<compile_context>
chip_gen: v7x
topology: tpu7x:2x2x1
jax: 0.10.0
libtpu: 0.0.40
codegen_flags: <defaults>
</compile_context>

<pallas_src>
import functools

import jax
import jax.numpy as jnp
from jax.experimental import pallas as pl
from jax.experimental.pallas import tpu as pltpu


# ----------------------------------------------------------------------------
# small numerics helpers (usable both inside the kernel and in the reference)
# ----------------------------------------------------------------------------
def _erf_approx(x):
    # Abramowitz & Stegun 7.1.26, |error| < 1.5e-7 (~fp32 eps); built only from
    # exp / mul / add / select so it is guaranteed to lower in Mosaic.
    a1, a2, a3, a4, a5 = (0.254829592, -0.284496736, 1.421413741,
                          -1.453152027, 1.061405429)
    pconst = 0.3275911
    z = jnp.abs(x)
    t = 1.0 / (1.0 + pconst * z)
    poly = ((((a5 * t + a4) * t + a3) * t + a2) * t + a1) * t
    y = 1.0 - poly * jnp.exp(-z * z)
    return jnp.where(x >= 0, y, -y)


def _gelu_exact(x):
    # PyTorch nn.GELU() default (erf-based, not the tanh approximation).
    return 0.5 * x * (1.0 + _erf_approx(x * 0.7071067811865476))


def _layernorm(v, g, b, eps=1e-5):
    mu = jnp.mean(v, axis=-1, keepdims=True)
    var = jnp.mean(jnp.square(v - mu), axis=-1, keepdims=True)
    return (v - mu) * jax.lax.rsqrt(var + eps) * g + b


# ----------------------------------------------------------------------------
# Pallas kernel: one group of G (batch, media) slabs per grid step
# ----------------------------------------------------------------------------
def _resampler_kernel(x_ref, media_ref, lat0_ref, wlin_ref,
                      nm_g_ref, nm_b_ref, nl_g_ref, nl_b_ref,
                      wq_ref, wkv_ref, wo_ref,
                      ff_g_ref, ff_b_ref, w1_ref, w2_ref,
                      fin_g_ref, fin_b_ref,
                      o_ref, attn_ref, *, num_layers, num_heads, dim_head):
    f32, bf16 = jnp.float32, jnp.bfloat16
    inner = num_heads * dim_head
    G, _, Dm = media_ref.shape                       # media block (G, 1, Dm)
    GN = x_ref.shape[1]                              # x block (1, G*N, Df)
    N = GN // G
    GL = lat0_ref.shape[0]                           # pre-tiled latents (G*L, Dm)
    L = GL // G
    S = N + L

    # slab grouping was done in the wrapper (free metadata reshape): merged rows.
    x_rows = x_ref[0]                                                          # (G*N, Df) bf16
    # per-slab media row repeated N times; f32, N multiple of 8 -> layout-free.
    media_rows = jnp.broadcast_to(media_ref[...], (G, N, Dm)).reshape(GN, Dm)  # (G*N, Dm)
    lat = lat0_ref[...]                                                        # (G*L, Dm) f32

    # ---- input projection (bf16 MXU operands, f32 accumulate) + media positional emb
    x = jnp.dot(x_rows, wlin_ref[...], preferred_element_type=f32) + media_rows

    # x-side LayerNorm statistics are layer-invariant: compute x_hat once, apply only
    # the per-layer affine inside the loop.
    mu = jnp.mean(x, axis=-1, keepdims=True)
    var = jnp.mean(jnp.square(x - mu), axis=-1, keepdims=True)
    x_hat = (x - mu) * jax.lax.rsqrt(var + 1e-5)                               # (G*N, Dm)

    # TODO(synk): for v7x / production num_layers, move the layer dimension onto an
    # "arbitrary" grid axis with per-layer weight BlockSpecs and carry lat/x_hat in
    # VMEM scratch (pl.when init/finalize), so only ~one layer of weights is resident.
    for l in range(num_layers):                      # static unroll (tiny num_layers)
        # ---- PerceiverAttention ----
        xm = x_hat * nm_g_ref[l] + nm_b_ref[l]                                 # (G*N, Dm) f32
        lt = _layernorm(lat, nl_g_ref[l], nl_b_ref[l])                         # (G*L, Dm) f32
        lt_b = lt.astype(bf16)

        # attention scale is pre-folded into wq in the wrapper.
        q = jnp.dot(lt_b, wq_ref[l], preferred_element_type=f32).astype(bf16)  # (G*L, HD)

        # single kv projection over the per-slab row-concatenated [xm_g; lt_g]
        # (f32 slices are 8-row aligned; one cast, one tall matmul).
        pieces = []
        for g in range(G):
            pieces.append(xm[g * N:(g + 1) * N, :])
            pieces.append(lt[g * L:(g + 1) * L, :])
        kv_in = jnp.concatenate(pieces, axis=0).astype(bf16)                   # (G*S, Dm)
        kv = jnp.dot(kv_in, wkv_ref[l],
                     preferred_element_type=f32).astype(bf16)                  # (G*S, 2HD)

        # per (slab, head): ONE score dot + ONE PV dot on contiguous row slices;
        # head outputs land in a lane-sliced VMEM scratch (no list concatenates).
        # TODO(synk): at production H*G switch these static loops to
        # lax.fori_loop(..., unroll=True) to bound vreg live ranges.
        for g in range(G):
            k_g = kv[g * S:(g + 1) * S, :inner]                                # (S, HD)
            v_g = kv[g * S:(g + 1) * S, inner:]                                # (S, HD)
            q_g = q[g * L:(g + 1) * L, :]                                      # (L, HD)
            for h in range(num_heads):
                sl = slice(h * dim_head, (h + 1) * dim_head)
                sim = jax.lax.dot_general(q_g[:, sl], k_g[:, sl],
                                          (((1,), (1,)), ((), ())),
                                          preferred_element_type=f32)          # (L, S)
                sim = sim - jnp.max(sim, axis=-1, keepdims=True)
                p = jnp.exp(sim)
                # TODO(synk): approx reciprocal (EUP) deviates slightly from the f32
                # reference; revisit tolerance at production N / dim_head.
                p = p * pl.reciprocal(jnp.sum(p, axis=-1, keepdims=True), approx=True)
                oh = jnp.dot(p.astype(bf16), v_g[:, sl],
                             preferred_element_type=f32)                       # (L, Dh)
                attn_ref[g * L:(g + 1) * L, h * dim_head:(h + 1) * dim_head] = oh

        # fused output projection: one (G*L, inner) @ (inner, Dm) matmul for all heads
        lat = lat + jnp.dot(attn_ref[...].astype(bf16), wo_ref[l],
                            preferred_element_type=f32)

        # ---- FeedForward ----
        y = _layernorm(lat, ff_g_ref[l], ff_b_ref[l])
        y = jnp.dot(y.astype(bf16), w1_ref[l], preferred_element_type=f32)     # (G*L, mult*Dm)
        y = _gelu_exact(y)
        lat = lat + jnp.dot(y.astype(bf16), w2_ref[l], preferred_element_type=f32)

    # ---- final LayerNorm ----
    # TODO(synk): lane-dense output packing ((G*L, Dm) -> (G*L*Dm/128, 128)) needs a
    # lane-merging relayout whose Mosaic lowering is not guaranteed at Dm=32; deferred.
    o_ref[0] = _layernorm(lat, fin_g_ref[...], fin_b_ref[...])                 # (G*L, Dm)


# ----------------------------------------------------------------------------
# chip-aware heuristics
# ----------------------------------------------------------------------------
def _tensorcores_per_chip():
    # v7x / v5p / v4 expose 2 TensorCores behind the megacore "parallel" axis;
    # v5e / v6e are single-TC, where extra grid steps are pure pipeline overhead.
    try:
        kind = jax.devices()[0].device_kind.lower()
    except Exception:
        return 1
    if ("v7" in kind) or ("v5p" in kind) or ("v4" in kind):
        return 2
    return 1


def _vmem_limit_bytes():
    # generation-aware: ~half the physical VMEM, leaving headroom for Mosaic internal
    # scratch (v7x has only 64 MiB physical; v5e/v6e have 128 MiB but small defaults).
    cap = 128 * 1024 * 1024
    try:
        cap = int(pltpu.get_tpu_info().vmem_capacity_bytes)
    except Exception:
        pass
    return int(min(100 * 1024 * 1024, max(32 * 1024 * 1024, cap // 2)))


def _pick_group_size(num_slabs, tc_per_chip, max_group=64):
    max_g = max(1, min(max_group, num_slabs))
    divisors = [g for g in range(max_g, 0, -1) if num_slabs % g == 0]
    if tc_per_chip > 1:
        # megacore: largest G that still leaves an even number of grid steps so the
        # "parallel" axis splits evenly across both TensorCores.
        for g in divisors:
            ng = num_slabs // g
            if ng >= 2 and ng % 2 == 0:
                return g
        for g in divisors:
            if num_slabs // g >= 2:
                return g
    # single TC: fewer grid steps is strictly better (taller matmuls, less per-step
    # overhead); num_groups == 1 is fine.
    return divisors[0]


# ----------------------------------------------------------------------------
# wrapper
# ----------------------------------------------------------------------------
def perceiver_resampler_pallas(x, params, cfg):
    if x.ndim == 3:                       # matches torch `x.unsqueeze(1) if x.ndim == 3`
        x = x[:, None]
    x = x.astype(jnp.float32)             # matches `x.float()`
    B, M, N, Df = x.shape
    Dm, L = cfg["dim_model"], cfg["num_latents"]
    H, Dh = cfg["num_heads"], cfg["dim_head"]
    BM = B * M
    G = _pick_group_size(BM, _tensorcores_per_chip())
    num_groups = BM // G

    bf16 = jnp.bfloat16
    # bf16 x halves the HBM->VMEM stream of the largest per-step input; slab grouping
    # is a free wrapper-side metadata reshape so the kernel never re-gathers slabs.
    x_grp = x.reshape(num_groups, G * N, Df).astype(bf16)
    media_flat = jnp.broadcast_to(params["media_pos"][None, :M],
                                  (B, M, 1, Dm)).reshape(BM, 1, Dm)
    lat0 = jnp.tile(params["latents"], (G, 1))                    # (G*L, Dm) f32

    weights = [
        params["w_lin"].astype(bf16),                   # matmul weights -> bf16 (MXU-native)
        params["nm_g"], params["nm_b"], params["nl_g"], params["nl_b"],
        (params["wq"] * (Dh ** -0.5)).astype(bf16),     # attention scale folded into wq
        params["wkv"].astype(bf16), params["wo"].astype(bf16),
        params["ff_g"], params["ff_b"],
        params["w1"].astype(bf16), params["w2"].astype(bf16),
        params["fin_g"], params["fin_b"],
    ]

    kernel = functools.partial(
        _resampler_kernel,
        num_layers=cfg["num_layers"], num_heads=H, dim_head=Dh)

    def wspec(a):
        # TODO(synk): once pipeline_mode=pl.Buffered(1) is verified for grid-invariant
        # operands, use it here to drop the redundant second weight buffer (v7x VMEM).
        nd = a.ndim
        return pl.BlockSpec(a.shape, lambda i, _n=nd: (0,) * _n)

    in_specs = ([pl.BlockSpec((1, G * N, Df), lambda i: (i, 0, 0)),
                 pl.BlockSpec((G, 1, Dm), lambda i: (i, 0, 0)),
                 wspec(lat0)]
                + [wspec(w) for w in weights])
    out_spec = pl.BlockSpec((1, G * L, Dm), lambda i: (i, 0, 0))

    out = pl.pallas_call(
        kernel,
        out_shape=jax.ShapeDtypeStruct((num_groups, G * L, Dm), jnp.float32),
        grid_spec=pltpu.PrefetchScalarGridSpec(
            num_scalar_prefetch=0,
            grid=(num_groups,),
            in_specs=in_specs,
            out_specs=out_spec,
            scratch_shapes=[pltpu.VMEM((G * L, H * Dh), jnp.float32)]),
        compiler_params=pltpu.CompilerParams(
            dimension_semantics=("parallel",),
            vmem_limit_bytes=_vmem_limit_bytes()),
    )(x_grp, media_flat, lat0, *weights)

    # row-major (num_groups, G, L, Dm) ordering == (B, M, L, Dm); pure metadata reshape.
    return out.reshape(B, M, L, Dm)


# ----------------------------------------------------------------------------
# pure-JAX reference (mirrors the PyTorch forward exactly, all-f32)
# ----------------------------------------------------------------------------
def perceiver_resampler_reference(x, p, cfg):
    if x.ndim == 3:
        x = x[:, None]
    x = x.astype(jnp.float32)
    B, M, N, _ = x.shape
    H, Dh, L = cfg["num_heads"], cfg["dim_head"], cfg["num_latents"]
    inner = H * Dh

    x = jnp.einsum("bmnf,fd->bmnd", x, p["w_lin"]) + p["media_pos"][None, :M]
    lat = jnp.broadcast_to(p["latents"], (B, M) + p["latents"].shape)

    for l in range(cfg["num_layers"]):
        xm = _layernorm(x, p["nm_g"][l], p["nm_b"][l])
        lt = _layernorm(lat, p["nl_g"][l], p["nl_b"][l])
        q = jnp.einsum("bmld,de->bmle", lt, p["wq"][l]) * (Dh ** -0.5)
        kvi = jnp.concatenate([xm, lt], axis=2)
        S = kvi.shape[2]
        kv = jnp.einsum("bmsd,de->bmse", kvi, p["wkv"][l])
        k, v = kv[..., :inner], kv[..., inner:]
        qh = q.reshape(B, M, L, H, Dh)
        kh = k.reshape(B, M, S, H, Dh)
        vh = v.reshape(B, M, S, H, Dh)
        sim = jnp.einsum("bmihd,bmjhd->bmhij", qh, kh)
        sim = sim - sim.max(-1, keepdims=True)
        attn = jax.nn.softmax(sim, axis=-1)
        o = jnp.einsum("bmhij,bmjhd->bmihd", attn, vh).reshape(B, M, L, inner)
        lat = lat + jnp.einsum("bmle,ed->bmld", o, p["wo"][l])
        y = _layernorm(lat, p["ff_g"][l], p["ff_b"][l])
        y = jax.nn.gelu(jnp.einsum("bmld,de->bmle", y, p["w1"][l]), approximate=False)
        lat = lat + jnp.einsum("bmle,ed->bmld", y, p["w2"][l])
    return _layernorm(lat, p["fin_g"], p["fin_b"])


# ----------------------------------------------------------------------------
# deterministic parameter construction + driver
# ----------------------------------------------------------------------------
def make_params(key, cfg):
    Df, Dm = cfg["dim_feats"], cfg["dim_model"]
    H, Dh = cfg["num_heads"], cfg["dim_head"]
    Lyr, L = cfg["num_layers"], cfg["num_latents"]
    Nm, mult = cfg["num_media"], cfg["ffwn_mult"]
    inner, ffi = H * Dh, Dm * mult

    ks = jax.random.split(key, 16)
    n = lambda k, s, sc=0.02: (sc * jax.random.normal(k, s)).astype(jnp.float32)
    return {
        # nn.Linear(dim_feats, dim_model, bias=False), stored pre-transposed [in, out]
        "w_lin":    n(ks[0], (Df, Dm)),
        "media_pos": jax.random.normal(ks[1], (Nm, 1, Dm), jnp.float32),
        "latents":   jax.random.normal(ks[2], (L, Dm), jnp.float32),
        # per-layer PerceiverAttention
        "nm_g": 1.0 + n(ks[3], (Lyr, 1, Dm), 0.1), "nm_b": n(ks[4], (Lyr, 1, Dm), 0.1),
        "nl_g": 1.0 + n(ks[5], (Lyr, 1, Dm), 0.1), "nl_b": n(ks[6], (Lyr, 1, Dm), 0.1),
        "wq":  n(ks[7], (Lyr, Dm, inner)),
        "wkv": n(ks[8], (Lyr, Dm, 2 * inner)),
        "wo":  n(ks[9], (Lyr, inner, Dm)),
        # per-layer FeedForward
        "ff_g": 1.0 + n(ks[10], (Lyr, 1, Dm), 0.1), "ff_b": n(ks[11], (Lyr, 1, Dm), 0.1),
        "w1": n(ks[12], (Lyr, Dm, ffi)),
        "w2": n(ks[13], (Lyr, ffi, Dm)),
        # final LayerNorm
        "fin_g": 1.0 + n(ks[14], (1, Dm), 0.1), "fin_b": n(ks[15], (1, Dm), 0.1),
    }


if __name__ == "__main__":
    cfg = dict(dim_feats=16, dim_model=32, dim_head=8, num_heads=4,
               num_layers=2, num_latents=8, num_media=2, ffwn_mult=4)

    key = jax.random.PRNGKey(0)
    kp, kx = jax.random.split(key)
    params = make_params(kp, cfg)

    # x: [B, M, N, dim_feats] (4-D path) — exercises the media dim, slab grouping
    # (G>1) and, on megacore chips, a multi-step parallel grid.
    x = jax.random.normal(kx, (2, 2, 8, cfg["dim_feats"]), jnp.float32)

    out = perceiver_resampler_pallas(x, params, cfg)
    out = jax.block_until_ready(out)

    ref = perceiver_resampler_reference(x, params, cfg)
    max_err = float(jnp.max(jnp.abs(out - ref)))
    assert out.shape == (2, 2, cfg["num_latents"], cfg["dim_model"]), out.shape
    # bf16 matmul operands (f32 accumulation) vs. the all-f32 reference
    assert max_err < 1e-2, f"mismatch vs reference: {max_err}"

    print("KERNEL_OK")
</pallas_src>

<mosaic_0001>
module attributes {stable_mosaic.version = 11 : i64} {
  func.func @_resampler_kernel(%arg0: i32, %arg1: memref<1x32x16xbf16, #tpu.memory_space<vmem>>, %arg2: memref<4x1x32xf32, #tpu.memory_space<vmem>>, %arg3: memref<32x32xf32, #tpu.memory_space<vmem>>, %arg4: memref<16x32xbf16, #tpu.memory_space<vmem>>, %arg5: memref<2x1x32xf32, #tpu.memory_space<vmem>>, %arg6: memref<2x1x32xf32, #tpu.memory_space<vmem>>, %arg7: memref<2x1x32xf32, #tpu.memory_space<vmem>>, %arg8: memref<2x1x32xf32, #tpu.memory_space<vmem>>, %arg9: memref<2x32x32xbf16, #tpu.memory_space<vmem>>, %arg10: memref<2x32x64xbf16, #tpu.memory_space<vmem>>, %arg11: memref<2x32x32xbf16, #tpu.memory_space<vmem>>, %arg12: memref<2x1x32xf32, #tpu.memory_space<vmem>>, %arg13: memref<2x1x32xf32, #tpu.memory_space<vmem>>, %arg14: memref<2x32x128xbf16, #tpu.memory_space<vmem>>, %arg15: memref<2x128x32xbf16, #tpu.memory_space<vmem>>, %arg16: memref<1x32xf32, #tpu.memory_space<vmem>>, %arg17: memref<1x32xf32, #tpu.memory_space<vmem>>, %arg18: memref<1x32x32xf32, #tpu.memory_space<vmem>>, %arg19: memref<32x32xf32, #tpu.memory_space<vmem>>) attributes {dimension_semantics = [#tpu.dimension_semantics<parallel>], iteration_bounds = array<i64: 1>, scalar_prefetch = 0 : i64, scratch_operands = 1 : i64, tpu.core_type = #tpu.core_type<tc>, window_params = [{transform_indices = @transform_0, window_bounds = array<i64: 1, 32, 16>}, {transform_indices = @transform_1, window_bounds = array<i64: 4, 1, 32>}, {pipeline_mode = #tpu.pipeline_mode<synchronous>, transform_indices = @transform_2, window_bounds = array<i64: 32, 32>}, {pipeline_mode = #tpu.pipeline_mode<synchronous>, transform_indices = @transform_3, window_bounds = array<i64: 16, 32>}, {pipeline_mode = #tpu.pipeline_mode<synchronous>, transform_indices = @transform_4, window_bounds = array<i64: 2, 1, 32>}, {pipeline_mode = #tpu.pipeline_mode<synchronous>, transform_indices = @transform_5, window_bounds = array<i64: 2, 1, 32>}, {pipeline_mode = #tpu.pipeline_mode<synchronous>, transform_indices = @transform_6, window_bounds = array<i64: 2, 1, 32>}, {pipeline_mode = #tpu.pipeline_mode<synchronous>, transform_indices = @transform_7, window_bounds = array<i64: 2, 1, 32>}, {pipeline_mode = #tpu.pipeline_mode<synchronous>, transform_indices = @transform_8, window_bounds = array<i64: 2, 32, 32>}, {pipeline_mode = #tpu.pipeline_mode<synchronous>, transform_indices = @transform_9, window_bounds = array<i64: 2, 32, 64>}, {pipeline_mode = #tpu.pipeline_mode<synchronous>, transform_indices = @transform_10, window_bounds = array<i64: 2, 32, 32>}, {pipeline_mode = #tpu.pipeline_mode<synchronous>, transform_indices = @transform_11, window_bounds = array<i64: 2, 1, 32>}, {pipeline_mode = #tpu.pipeline_mode<synchronous>, transform_indices = @transform_12, window_bounds = array<i64: 2, 1, 32>}, {pipeline_mode = #tpu.pipeline_mode<synchronous>, transform_indices = @transform_13, window_bounds = array<i64: 2, 32, 128>}, {pipeline_mode = #tpu.pipeline_mode<synchronous>, transform_indices = @transform_14, window_bounds = array<i64: 2, 128, 32>}, {pipeline_mode = #tpu.pipeline_mode<synchronous>, transform_indices = @transform_15, window_bounds = array<i64: 1, 32>}, {pipeline_mode = #tpu.pipeline_mode<synchronous>, transform_indices = @transform_16, window_bounds = array<i64: 1, 32>}, {transform_indices = @transform_17, window_bounds = array<i64: 1, 32, 32>}]} {
    %c0 = arith.constant 0 : index
    %c0_0 = arith.constant 0 : index
    %c0_1 = arith.constant 0 : index
    %0 = vector.load %arg1[%c0, %c0_0, %c0_1] : memref<1x32x16xbf16, #tpu.memory_space<vmem>>, vector<1x32x16xbf16>
    %1 = vector.shape_cast %0 : vector<1x32x16xbf16> to vector<32x16xbf16>
    %c0_2 = arith.constant 0 : index
    %c0_3 = arith.constant 0 : index
    %c0_4 = arith.constant 0 : index
    %2 = vector.load %arg2[%c0_2, %c0_3, %c0_4] : memref<4x1x32xf32, #tpu.memory_space<vmem>>, vector<4x1x32xf32>
    %3 = vector.shape_cast %2 : vector<4x1x32xf32> to vector<4x1x32xf32>
    %4 = vector.broadcast %3 : vector<4x1x32xf32> to vector<4x8x32xf32>
    %5 = vector.shape_cast %4 : vector<4x8x32xf32> to vector<32x32xf32>
    %c0_5 = arith.constant 0 : index
    %c0_6 = arith.constant 0 : index
    %6 = vector.load %arg3[%c0_5, %c0_6] : memref<32x32xf32, #tpu.memory_space<vmem>>, vector<32x32xf32>
    %c0_7 = arith.constant 0 : index
    %c0_8 = arith.constant 0 : index
    %7 = vector.load %arg4[%c0_7, %c0_8] : memref<16x32xbf16, #tpu.memory_space<vmem>>, vector<16x32xbf16>
    %cst = arith.constant dense<0.000000e+00> : vector<32x32xf32>
    %8 = tpu.matmul %1, %7, %cst {dimension_numbers = #tpu.dot_dimension_numbers<[1], [0], [0], [1], [0, 0, 1, 1], [], []>} : vector<32x16xbf16>, vector<16x32xbf16>, vector<32x32xf32> -> vector<32x32xf32>
    %9 = arith.addf %8, %5 : vector<32x32xf32>
    %cst_9 = arith.constant dense<0.000000e+00> : vector<32xf32>
    %10 = vector.multi_reduction <add>, %9, %cst_9 [1] : vector<32x32xf32> to vector<32xf32>
    %11 = vector.shape_cast %10 : vector<32xf32> to vector<32x1xf32>
    %cst_10 = arith.constant 3.200000e+01 : f32
    %12 = vector.broadcast %cst_10 : f32 to vector<32x1xf32>
    %13 = arith.divf %11, %12 : vector<32x1xf32>
    %14 = vector.broadcast %13 : vector<32x1xf32> to vector<32x32xf32>
    %15 = arith.subf %9, %14 : vector<32x32xf32>
    %16 = arith.mulf %15, %15 : vector<32x32xf32>
    %cst_11 = arith.constant dense<0.000000e+00> : vector<32xf32>
    %17 = vector.multi_reduction <add>, %16, %cst_11 [1] : vector<32x32xf32> to vector<32xf32>
    %18 = vector.shape_cast %17 : vector<32xf32> to vector<32x1xf32>
    %cst_12 = arith.constant 3.200000e+01 : f32
    %19 = vector.broadcast %cst_12 : f32 to vector<32x1xf32>
    %20 = arith.divf %18, %19 : vector<32x1xf32>
    %21 = vector.broadcast %13 : vector<32x1xf32> to vector<32x32xf32>
    %22 = arith.subf %9, %21 : vector<32x32xf32>
    %cst_13 = arith.constant 9.99999974E-6 : f32
    %23 = vector.broadcast %cst_13 : f32 to vector<32x1xf32>
    %24 = arith.addf %20, %23 : vector<32x1xf32>
    %25 = math.rsqrt %24 : vector<32x1xf32>
    %26 = vector.broadcast %25 : vector<32x1xf32> to vector<32x32xf32>
    %27 = arith.mulf %22, %26 : vector<32x32xf32>
    %c0_14 = arith.constant 0 : index
    %c0_15 = arith.constant 0 : index
    %c0_16 = arith.constant 0 : index
    %28 = vector.load %arg5[%c0_14, %c0_15, %c0_16] : memref<2x1x32xf32, #tpu.memory_space<vmem>>, vector<1x1x32xf32>
    %29 = vector.shape_cast %28 : vector<1x1x32xf32> to vector<1x32xf32>
    %30 = vector.broadcast %29 : vector<1x32xf32> to vector<32x32xf32>
    %31 = arith.mulf %27, %30 : vector<32x32xf32>
    %c0_17 = arith.constant 0 : index
    %c0_18 = arith.constant 0 : index
    %c0_19 = arith.constant 0 : index
    %32 = vector.load %arg6[%c0_17, %c0_18, %c0_19] : memref<2x1x32xf32, #tpu.memory_space<vmem>>, vector<1x1x32xf32>
    %33 = vector.shape_cast %32 : vector<1x1x32xf32> to vector<1x32xf32>
    %34 = vector.broadcast %33 : vector<1x32xf32> to vector<32x32xf32>
    %35 = arith.addf %31, %34 : vector<32x32xf32>
    %c0_20 = arith.constant 0 : index
    %c0_21 = arith.constant 0 : index
    %c0_22 = arith.constant 0 : index
    %36 = vector.load %arg7[%c0_20, %c0_21, %c0_22] : memref<2x1x32xf32, #tpu.memory_space<vmem>>, vector<1x1x32xf32>
    %37 = vector.shape_cast %36 : vector<1x1x32xf32> to vector<1x32xf32>
    %c0_23 = arith.constant 0 : index
    %c0_24 = arith.constant 0 : index
    %c0_25 = arith.constant 0 : index
    %38 = vector.load %arg8[%c0_23, %c0_24, %c0_25] : memref<2x1x32xf32, #tpu.memory_space<vmem>>, vector<1x1x32xf32>
    %39 = vector.shape_cast %38 : vector<1x1x32xf32> to vector<1x32xf32>
    %cst_26 = arith.constant dense<0.000000e+00> : vector<32xf32>
    %40 = vector.multi_reduction <add>, %6, %cst_26 [1] : vector<32x32xf32> to vector<32xf32>
    %41 = vector.shape_cast %40 : vector<32xf32> to vector<32x1xf32>
    %cst_27 = arith.constant 3.200000e+01 : f32
    %42 = vector.broadcast %cst_27 : f32 to vector<32x1xf32>
    %43 = arith.divf %41, %42 : vector<32x1xf32>
    %44 = vector.broadcast %43 : vector<32x1xf32> to vector<32x32xf32>
    %45 = arith.subf %6, %44 : vector<32x32xf32>
    %46 = arith.mulf %45, %45 : vector<32x32xf32>
    %cst_28 = arith.constant dense<0.000000e+00> : vector<32xf32>
    %47 = vector.multi_reduction <add>, %46, %cst_28 [1] : vector<32x32xf32> to vector<32xf32>
    %48 = vector.shape_cast %47 : vector<32xf32> to vector<32x1xf32>
    %cst_29 = arith.constant 3.200000e+01 : f32
    %49 = vector.broadcast %cst_29 : f32 to vector<32x1xf32>
    %50 = arith.divf %48, %49 : vector<32x1xf32>
    %51 = vector.broadcast %43 : vector<32x1xf32> to vector<32x32xf32>
    %52 = arith.subf %6, %51 : vector<32x32xf32>
    %cst_30 = arith.constant 9.99999974E-6 : f32
    %53 = vector.broadcast %cst_30 : f32 to vector<32x1xf32>
    %54 = arith.addf %50, %53 : vector<32x1xf32>
    %55 = math.rsqrt %54 : vector<32x1xf32>
    %56 = vector.broadcast %55 : vector<32x1xf32> to vector<32x32xf32>
    %57 = arith.mulf %52, %56 : vector<32x32xf32>
    %58 = vector.broadcast %37 : vector<1x32xf32> to vector<32x32xf32>
    %59 = arith.mulf %57, %58 : vector<32x32xf32>
    %60 = vector.broadcast %39 : vector<1x32xf32> to vector<32x32xf32>
    %61 = arith.addf %59, %60 : vector<32x32xf32>
    %62 = arith.truncf %61 : vector<32x32xf32> to vector<32x32xbf16>
    %c0_31 = arith.constant 0 : index
    %c0_32 = arith.constant 0 : index
    %c0_33 = arith.constant 0 : index
    %63 = vector.load %arg9[%c0_31, %c0_32, %c0_33] : memref<2x32x32xbf16, #tpu.memory_space<vmem>>, vector<1x32x32xbf16>
    %64 = vector.shape_cast %63 : vector<1x32x32xbf16> to vector<32x32xbf16>
    %cst_34 = arith.constant dense<0.000000e+00> : vector<32x32xf32>
    %65 = tpu.matmul %62, %64, %cst_34 {dimension_numbers = #tpu.dot_dimension_numbers<[1], [0], [0], [1], [0, 0, 1, 1], [], []>} : vector<32x32xbf16>, vector<32x32xbf16>, vector<32x32xf32> -> vector<32x32xf32>
    %66 = arith.truncf %65 : vector<32x32xf32> to vector<32x32xbf16>
    %67 = vector.extract_strided_slice %35 {offsets = [0, 0], sizes = [8, 32], strides = [1, 1]} : vector<32x32xf32> to vector<8x32xf32>
    %68 = vector.extract_strided_slice %61 {offsets = [0, 0], sizes = [8, 32], strides = [1, 1]} : vector<32x32xf32> to vector<8x32xf32>
    %69 = vector.extract_strided_slice %35 {offsets = [8, 0], sizes = [8, 32], strides = [1, 1]} : vector<32x32xf32> to vector<8x32xf32>
    %70 = vector.extract_strided_slice %61 {offsets = [8, 0], sizes = [8, 32], strides = [1, 1]} : vector<32x32xf32> to vector<8x32xf32>
    %71 = vector.extract_strided_slice %35 {offsets = [16, 0], sizes = [8, 32], strides = [1, 1]} : vector<32x32xf32> to vector<8x32xf32>
    %72 = vector.extract_strided_slice %61 {offsets = [16, 0], sizes = [8, 32], strides = [1, 1]} : vector<32x32xf32> to vector<8x32xf32>
    %73 = vector.extract_strided_slice %35 {offsets = [24, 0], sizes = [8, 32], strides = [1, 1]} : vector<32x32xf32> to vector<8x32xf32>
    %74 = vector.extract_strided_slice %61 {offsets = [24, 0], sizes = [8, 32], strides = [1, 1]} : vector<32x32xf32> to vector<8x32xf32>
    %75 = tpu.concatenate %67, %68, %69, %70, %71, %72, %73, %74 in 0 : vector<8x32xf32>, vector<8x32xf32>, vector<8x32xf32>, vector<8x32xf32>, vector<8x32xf32>, vector<8x32xf32>, vector<8x32xf32>, vector<8x32xf32> -> vector<64x32xf32>
    %76 = arith.truncf %75 : vector<64x32xf32> to vector<64x32xbf16>
    %c0_35 = arith.constant 0 : index
    %c0_36 = arith.constant 0 : index
    %c0_37 = arith.constant 0 : index
    %77 = vector.load %arg10[%c0_35, %c0_36, %c0_37] : memref<2x32x64xbf16, #tpu.memory_space<vmem>>, vector<1x32x64xbf16>
    %78 = vector.shape_cast %77 : vector<1x32x64xbf16> to vector<32x64xbf16>
    %cst_38 = arith.constant dense<0.000000e+00> : vector<64x64xf32>
    %79 = tpu.matmul %76, %78, %cst_38 {dimension_numbers = #tpu.dot_dimension_numbers<[1], [0], [0], [1], [0, 0, 1, 1], [], []>} : vector<64x32xbf16>, vector<32x64xbf16>, vector<64x64xf32> -> vector<64x64xf32>
    %80 = arith.truncf %79 : vector<64x64xf32> to vector<64x64xbf16>
    %81 = vector.extract_strided_slice %80 {offsets = [0, 0], sizes = [16, 32], strides = [1, 1]} : vector<64x64xbf16> to vector<16x32xbf16>
    %82 = vector.extract_strided_slice %80 {offsets = [0, 32], sizes = [16, 32], strides = [1, 1]} : vector<64x64xbf16> to vector<16x32xbf16>
    %83 = vector.extract_strided_slice %66 {offsets = [0, 0], sizes = [8, 32], strides = [1, 1]} : vector<32x32xbf16> to vector<8x32xbf16>
    %84 = vector.extract_strided_slice %83 {offsets = [0, 0], sizes = [8, 8], strides = [1, 1]} : vector<8x32xbf16> to vector<8x8xbf16>
    %85 = vector.extract_strided_slice %81 {offsets = [0, 0], sizes = [16, 8], strides = [1, 1]} : vector<16x32xbf16> to vector<16x8xbf16>
    %cst_39 = arith.constant dense<0.000000e+00> : vector<8x16xf32>
    %86 = tpu.matmul %84, %85, %cst_39 {dimension_numbers = #tpu.dot_dimension_numbers<[1], [1], [0], [0], [0, 0, 1, 0], [], []>} : vector<8x8xbf16>, vector<16x8xbf16>, vector<8x16xf32> -> vector<8x16xf32>
    %cst_40 = arith.constant dense<0xFF800000> : vector<8xf32>
    %87 = vector.multi_reduction <maximumf>, %86, %cst_40 [1] : vector<8x16xf32> to vector<8xf32>
    %88 = vector.shape_cast %87 : vector<8xf32> to vector<8x1xf32>
    %89 = vector.broadcast %88 : vector<8x1xf32> to vector<8x16xf32>
    %90 = arith.subf %86, %89 : vector<8x16xf32>
    %91 = math.exp %90 : vector<8x16xf32>
    %cst_41 = arith.constant dense<0.000000e+00> : vector<8xf32>
    %92 = vector.multi_reduction <add>, %91, %cst_41 [1] : vector<8x16xf32> to vector<8xf32>
    %93 = vector.shape_cast %92 : vector<8xf32> to vector<8x1xf32>
    %94 = tpu.reciprocal %93 {approx = true} : vector<8x1xf32> -> vector<8x1xf32>
    %95 = vector.broadcast %94 : vector<8x1xf32> to vector<8x16xf32>
    %96 = arith.mulf %91, %95 : vector<8x16xf32>
    %97 = arith.truncf %96 : vector<8x16xf32> to vector<8x16xbf16>
    %98 = vector.extract_strided_slice %82 {offsets = [0, 0], sizes = [16, 8], strides = [1, 1]} : vector<16x32xbf16> to vector<16x8xbf16>
    %cst_42 = arith.constant dense<0.000000e+00> : vector<8x8xf32>
    %99 = tpu.matmul %97, %98, %cst_42 {dimension_numbers = #tpu.dot_dimension_numbers<[1], [0], [0], [1], [0, 0, 1, 1], [], []>} : vector<8x16xbf16>, vector<16x8xbf16>, vector<8x8xf32> -> vector<8x8xf32>
    %c0_43 = arith.constant 0 : index
    %c0_44 = arith.constant 0 : index
    %100 = vector.load %arg19[%c0_43, %c0_44] : memref<32x32xf32, #tpu.memory_space<vmem>>, vector<8x8xf32>
    tpu.vector_store %arg19[%c0_43, %c0_44], %99 {strides = array<i32>} : memref<32x32xf32, #tpu.memory_space<vmem>>, vector<8x8xf32>,
    %101 = vector.extract_strided_slice %83 {offsets = [0, 8], sizes = [8, 8], strides = [1, 1]} : vector<8x32xbf16> to vector<8x8xbf16>
    %102 = vector.extract_strided_slice %81 {offsets = [0, 8], sizes = [16, 8], strides = [1, 1]} : vector<16x32xbf16> to vector<16x8xbf16>
    %cst_45 = arith.constant dense<0.000000e+00> : vector<8x16xf32>
    %103 = tpu.matmul %101, %102, %cst_45 {dimension_numbers = #tpu.dot_dimension_numbers<[1], [1], [0], [0], [0, 0, 1, 0], [], []>} : vector<8x8xbf16>, vector<16x8xbf16>, vector<8x16xf32> -> vector<8x16xf32>
    %cst_46 = arith.constant dense<0xFF800000> : vector<8xf32>
    %104 = vector.multi_reduction <maximumf>, %103, %cst_46 [1] : vector<8x16xf32> to vector<8xf32>
    %105 = vector.shape_cast %104 : vector<8xf32> to vector<8x1xf32>
    %106 = vector.broadcast %105 : vector<8x1xf32> to vector<8x16xf32>
    %107 = arith.subf %103, %106 : vector<8x16xf32>
    %108 = math.exp %107 : vector<8x16xf32>
    %cst_47 = arith.constant dense<0.000000e+00> : vector<8xf32>
    %109 = vector.multi_reduction <add>, %108, %cst_47 [1] : vector<8x16xf32> to vector<8xf32>
    %110 = vector.shape_cast %109 : vector<8xf32> to vector<8x1xf32>
    %111 = tpu.reciprocal %110 {approx = true} : vector<8x1xf32> -> vector<8x1xf32>
    %112 = vector.broadcast %111 : vector<8x1xf32> to vector<8x16xf32>
    %113 = arith.mulf %108, %112 : vector<8x16xf32>
    %114 = arith.truncf %113 : vector<8x16xf32> to vector<8x16xbf16>
    %115 = vector.extract_strided_slice %82 {offsets = [0, 8], sizes = [16, 8], strides = [1, 1]} : vector<16x32xbf16> to vector<16x8xbf16>
    %cst_48 = arith.constant dense<0.000000e+00> : vector<8x8xf32>
    %116 = tpu.matmul %114, %115, %cst_48 {dimension_numbers = #tpu.dot_dimension_numbers<[1], [0], [0], [1], [0, 0, 1, 1], [], []>} : vector<8x16xbf16>, vector<16x8xbf16>, vector<8x8xf32> -> vector<8x8xf32>
    %c0_49 = arith.constant 0 : index
    %c8 = arith.constant 8 : index
    %117 = vector.load %arg19[%c0_49, %c8] : memref<32x32xf32, #tpu.memory_space<vmem>>, vector<8x8xf32>
    tpu.vector_store %arg19[%c0_49, %c8], %116 {strides = array<i32>} : memref<32x32xf32, #tpu.memory_space<vmem>>, vector<8x8xf32>,
    %118 = vector.extract_strided_slice %83 {offsets = [0, 16], sizes = [8, 8], strides = [1, 1]} : vector<8x32xbf16> to vector<8x8xbf16>
    %119 = vector.extract_strided_slice %81 {offsets = [0, 16], sizes = [16, 8], strides = [1, 1]} : vector<16x32xbf16> to vector<16x8xbf16>
    %cst_50 = arith.constant dense<0.000000e+00> : vector<8x16xf32>
    %120 = tpu.matmul %118, %119, %cst_50 {dimension_numbers = #tpu.dot_dimension_numbers<[1], [1], [0], [0], [0, 0, 1, 0], [], []>} : vector<8x8xbf16>, vector<16x8xbf16>, vector<8x16xf32> -> vector<8x16xf32>
    %cst_51 = arith.constant dense<0xFF800000> : vector<8xf32>
    %121 = vector.multi_reduction <maximumf>, %120, %cst_51 [1] : vector<8x16xf32> to vector<8xf32>
    %122 = vector.shape_cast %121 : vector<8xf32> to vector<8x1xf32>
    %123 = vector.broadcast %122 : vector<8x1xf32> to vector<8x16xf32>
    %124 = arith.subf %120, %123 : vector<8x16xf32>
    %125 = math.exp %124 : vector<8x16xf32>
    %cst_52 = arith.constant dense<0.000000e+00> : vector<8xf32>
    %126 = vector.multi_reduction <add>, %125, %cst_52 [1] : vector<8x16xf32> to vector<8xf32>
    %127 = vector.shape_cast %126 : vector<8xf32> to vector<8x1xf32>
    %128 = tpu.reciprocal %127 {approx = true} : vector<8x1xf32> -> vector<8x1xf32>
    %129 = vector.broadcast %128 : vector<8x1xf32> to vector<8x16xf32>
    %130 = arith.mulf %125, %129 : vector<8x16xf32>
    %131 = arith.truncf %130 : vector<8x16xf32> to vector<8x16xbf16>
    %132 = vector.extract_strided_slice %82 {offsets = [0, 16], sizes = [16, 8], strides = [1, 1]} : vector<16x32xbf16> to vector<16x8xbf16>
    %cst_53 = arith.constant dense<0.000000e+00> : vector<8x8xf32>
    %133 = tpu.matmul %131, %132, %cst_53 {dimension_numbers = #tpu.dot_dimension_numbers<[1], [0], [0], [1], [0, 0, 1, 1], [], []>} : vector<8x16xbf16>, vector<16x8xbf16>, vector<8x8xf32> -> vector<8x8xf32>
    %c0_54 = arith.constant 0 : index
    %c16 = arith.constant 16 : index
    %134 = vector.load %arg19[%c0_54, %c16] : memref<32x32xf32, #tpu.memory_space<vmem>>, vector<8x8xf32>
    tpu.vector_store %arg19[%c0_54, %c16], %133 {strides = array<i32>} : memref<32x32xf32, #tpu.memory_space<vmem>>, vector<8x8xf32>,
    %135 = vector.extract_strided_slice %83 {offsets = [0, 24], sizes = [8, 8], strides = [1, 1]} : vector<8x32xbf16> to vector<8x8xbf16>
    %136 = vector.extract_strided_slice %81 {offsets = [0, 24], sizes = [16, 8], strides = [1, 1]} : vector<16x32xbf16> to vector<16x8xbf16>
    %cst_55 = arith.constant dense<0.000000e+00> : vector<8x16xf32>
    %137 = tpu.matmul %135, %136, %cst_55 {dimension_numbers = #tpu.dot_dimension_numbers<[1], [1], [0], [0], [0, 0, 1, 0], [], []>} : vector<8x8xbf16>, vector<16x8xbf16>, vector<8x16xf32> -> vector<8x16xf32>
    %cst_56 = arith.constant dense<0xFF800000> : vector<8xf32>
    %138 = vector.multi_reduction <maximumf>, %137, %cst_56 [1] : vector<8x16xf32> to vector<8xf32>
    %139 = vector.shape_cast %138 : vector<8xf32> to vector<8x1xf32>
    %140 = vector.broadcast %139 : vector<8x1xf32> to vector<8x16xf32>
    %141 = arith.subf %137, %140 : vector<8x16xf32>
    %142 = math.exp %141 : vector<8x16xf32>
    %cst_57 = arith.constant dense<0.000000e+00> : vector<8xf32>
    %143 = vector.multi_reduction <add>, %142, %cst_57 [1] : vector<8x16xf32> to vector<8xf32>
    %144 = vector.shape_cast %143 : vector<8xf32> to vector<8x1xf32>
    %145 = tpu.reciprocal %144 {approx = true} : vector<8x1xf32> -> vector<8x1xf32>
    %146 = vector.broadcast %145 : vector<8x1xf32> to vector<8x16xf32>
    %147 = arith.mulf %142, %146 : vector<8x16xf32>
    %148 = arith.truncf %147 : vector<8x16xf32> to vector<8x16xbf16>
    %149 = vector.extract_strided_slice %82 {offsets = [0, 24], sizes = [16, 8], strides = [1, 1]} : vector<16x32xbf16> to vector<16x8xbf16>
    %cst_58 = arith.constant dense<0.000000e+00> : vector<8x8xf32>
    %150 = tpu.matmul %148, %149, %cst_58 {dimension_numbers = #tpu.dot_dimension_numbers<[1], [0], [0], [1], [0, 0, 1, 1], [], []>} : vector<8x16xbf16>, vector<16x8xbf16>, vector<8x8xf32> -> vector<8x8xf32>
    %c0_59 = arith.constant 0 : index
    %c24 = arith.constant 24 : index
    %151 = vector.load %arg19[%c0_59, %c24] : memref<32x32xf32, #tpu.memory_space<vmem>>, vector<8x8xf32>
    tpu.vector_store %arg19[%c0_59, %c24], %150 {strides = array<i32>} : memref<32x32xf32, #tpu.memory_space<vmem>>, vector<8x8xf32>,
    %152 = vector.extract_strided_slice %80 {offsets = [16, 0], sizes = [16, 32], strides = [1, 1]} : vector<64x64xbf16> to vector<16x32xbf16>
    %153 = vector.extract_strided_slice %80 {offsets = [16, 32], sizes = [16, 32], strides = [1, 1]} : vector<64x64xbf16> to vector<16x32xbf16>
    %154 = vector.extract_strided_slice %66 {offsets = [8, 0], sizes = [8, 32], strides = [1, 1]} : vector<32x32xbf16> to vector<8x32xbf16>
    %155 = vector.extract_strided_slice %154 {offsets = [0, 0], sizes = [8, 8], strides = [1, 1]} : vector<8x32xbf16> to vector<8x8xbf16>
    %156 = vector.extract_strided_slice %152 {offsets = [0, 0], sizes = [16, 8], strides = [1, 1]} : vector<16x32xbf16> to vector<16x8xbf16>
    %cst_60 = arith.constant dense<0.000000e+00> : vector<8x16xf32>
    %157 = tpu.matmul %155, %156, %cst_60 {dimension_numbers = #tpu.dot_dimension_numbers<[1], [1], [0], [0], [0, 0, 1, 0], [], []>} : vector<8x8xbf16>, vector<16x8xbf16>, vector<8x16xf32> -> vector<8x16xf32>
    %cst_61 = arith.constant dense<0xFF800000> : vector<8xf32>
    %158 = vector.multi_reduction <maximumf>, %157, %cst_61 [1] : vector<8x16xf32> to vector<8xf32>
    %159 = vector.shape_cast %158 : vector<8xf32> to vector<8x1xf32>
    %160 = vector.broadcast %159 : vector<8x1xf32> to vector<8x16xf32>
    %161 = arith.subf %157, %160 : vector<8x16xf32>
    %162 = math.exp %161 : vector<8x16xf32>
    %cst_62 = arith.constant dense<0.000000e+00> : vector<8xf32>
    %163 = vector.multi_reduction <add>, %162, %cst_62 [1] : vector<8x16xf32> to vector<8xf32>
    %164 = vector.shape_cast %163 : vector<8xf32> to vector<8x1xf32>
    %165 = tpu.reciprocal %164 {approx = true} : vector<8x1xf32> -> vector<8x1xf32>
    %166 = vector.broadcast %165 : vector<8x1xf32> to vector<8x16xf32>
    %167 = arith.mulf %162, %166 : vector<8x16xf32>
    %168 = arith.truncf %167 : vector<8x16xf32> to vector<8x16xbf16>
    %169 = vector.extract_strided_slice %153 {offsets = [0, 0], sizes = [16, 8], strides = [1, 1]} : vector<16x32xbf16> to vector<16x8xbf16>
    %cst_63 = arith.constant dense<0.000000e+00> : vector<8x8xf32>
    %170 = tpu.matmul %168, %169, %cst_63 {dimension_numbers = #tpu.dot_dimension_numbers<[1], [0], [0], [1], [0, 0, 1, 1], [], []>} : vector<8x16xbf16>, vector<16x8xbf16>, vector<8x8xf32> -> vector<8x8xf32>
    %c8_64 = arith.constant 8 : index
    %c0_65 = arith.constant 0 : index
    %171 = vector.load %arg19[%c8_64, %c0_65] : memref<32x32xf32, #tpu.memory_space<vmem>>, vector<8x8xf32>
    tpu.vector_store %arg19[%c8_64, %c0_65], %170 {strides = array<i32>} : memref<32x32xf32, #tpu.memory_space<vmem>>, vector<8x8xf32>,
    %172 = vector.extract_strided_slice %154 {offsets = [0, 8], sizes = [8, 8], strides = [1, 1]} : vector<8x32xbf16> to vector<8x8xbf16>
    %173 = vector.extract_strided_slice %152 {offsets = [0, 8], sizes = [16, 8], strides = [1, 1]} : vector<16x32xbf16> to vector<16x8xbf16>
    %cst_66 = arith.constant dense<0.000000e+00> : vector<8x16xf32>
    %174 = tpu.matmul %172, %173, %cst_66 {dimension_numbers = #tpu.dot_dimension_numbers<[1], [1], [0], [0], [0, 0, 1, 0], [], []>} : vector<8x8xbf16>, vector<16x8xbf16>, vector<8x16xf32> -> vector<8x16xf32>
    %cst_67 = arith.constant dense<0xFF800000> : vector<8xf32>
    %175 = vector.multi_reduction <maximumf>, %174, %cst_67 [1] : vector<8x16xf32> to vector<8xf32>
    %176 = vector.shape_cast %175 : vector<8xf32> to vector<8x1xf32>
    %177 = vector.broadcast %176 : vector<8x1xf32> to vector<8x16xf32>
    %178 = arith.subf %174, %177 : vector<8x16xf32>
    %179 = math.exp %178 : vector<8x16xf32>
    %cst_68 = arith.constant dense<0.000000e+00> : vector<8xf32>
    %180 = vector.multi_reduction <add>, %179, %cst_68 [1] : vector<8x16xf32> to vector<8xf32>
    %181 = vector.shape_cast %180 : vector<8xf32> to vector<8x1xf32>
    %182 = tpu.reciprocal %181 {approx = true} : vector<8x1xf32> -> vector<8x1xf32>
    %183 = vector.broadcast %182 : vector<8x1xf32> to vector<8x16xf32>
    %184 = arith.mulf %179, %183 : vector<8x16xf32>
    %185 = arith.truncf %184 : vector<8x16xf32> to vector<8x16xbf16>
    %186 = vector.extract_strided_slice %153 {offsets = [0, 8], sizes = [16, 8], strides = [1, 1]} : vector<16x32xbf16> to vector<16x8xbf16>
    %cst_69 = arith.constant dense<0.000000e+00> : vector<8x8xf32>
    %187 = tpu.matmul %185, %186, %cst_69 {dimension_numbers = #tpu.dot_dimension_numbers<[1], [0], [0], [1], [0, 0, 1, 1], [], []>} : vector<8x16xbf16>, vector<16x8xbf16>, vector<8x8xf32> -> vector<8x8xf32>
    %c8_70 = arith.constant 8 : index
    %c8_71 = arith.constant 8 : index
    %188 = vector.load %arg19[%c8_70, %c8_71] : memref<32x32xf32, #tpu.memory_space<vmem>>, vector<8x8xf32>
    tpu.vector_store %arg19[%c8_70, %c8_71], %187 {strides = array<i32>} : memref<32x32xf32, #tpu.memory_space<vmem>>, vector<8x8xf32>,
    %189 = vector.extract_strided_slice %154 {offsets = [0, 16], sizes = [8, 8], strides = [1, 1]} : vector<8x32xbf16> to vector<8x8xbf16>
    %190 = vector.extract_strided_slice %152 {offsets = [0, 16], sizes = [16, 8], strides = [1, 1]} : vector<16x32xbf16> to vector<16x8xbf16>
    %cst_72 = arith.constant dense<0.000000e+00> : vector<8x16xf32>
    %191 = tpu.matmul %189, %190, %cst_72 {dimension_numbers = #tpu.dot_dimension_numbers<[1], [1], [0], [0], [0, 0, 1, 0], [], []>} : vector<8x8xbf16>, vector<16x8xbf16>, vector<8x16xf32> -> vector<8x16xf32>
    %cst_73 = arith.constant dense<0xFF800000> : vector<8xf32>
    %192 = vector.multi_reduction <maximumf>, %191, %cst_73 [1] : vector<8x16xf32> to vector<8xf32>
    %193 = vector.shape_cast %192 : vector<8xf32> to vector<8x1xf32>
    %194 = vector.broadcast %193 : vector<8x1xf32> to vector<8x16xf32>
    %195 = arith.subf %191, %194 : vector<8x16xf32>
    %196 = math.exp %195 : vector<8x16xf32>
    %cst_74 = arith.constant dense<0.000000e+00> : vector<8xf32>
    %197 = vector.multi_reduction <add>, %196, %cst_74 [1] : vector<8x16xf32> to vector<8xf32>
    %198 = vector.shape_cast %197 : vector<8xf32> to vector<8x1xf32>
    %199 = tpu.reciprocal %198 {approx = true} : vector<8x1xf32> -> vector<8x1xf32>
    %200 = vector.broadcast %199 : vector<8x1xf32> to vector<8x16xf32>
    %201 = arith.mulf %196, %200 : vector<8x16xf32>
    %202 = arith.truncf %201 : vector<8x16xf32> to vector<8x16xbf16>
    %203 = vector.extract_strided_slice %153 {offsets = [0, 16], sizes = [16, 8], strides = [1, 1]} : vector<16x32xbf16> to vector<16x8xbf16>
    %cst_75 = arith.constant dense<0.000000e+00> : vector<8x8xf32>
    %204 = tpu.matmul %202, %203, %cst_75 {dimension_numbers = #tpu.dot_dimension_numbers<[1], [0], [0], [1], [0, 0, 1, 1], [], []>} : vector<8x16xbf16>, vector<16x8xbf16>, vector<8x8xf32> -> vector<8x8xf32>
    %c8_76 = arith.constant 8 : index
    %c16_77 = arith.constant 16 : index
    %205 = vector.load %arg19[%c8_76, %c16_77] : memref<32x32xf32, #tpu.memory_space<vmem>>, vector<8x8xf32>
    tpu.vector_store %arg19[%c8_76, %c16_77], %204 {strides = array<i32>} : memref<32x32xf32, #tpu.memory_space<vmem>>, vector<8x8xf32>,
    %206 = vector.extract_strided_slice %154 {offsets = [0, 24], sizes = [8, 8], strides = [1, 1]} : vector<8x32xbf16> to vector<8x8xbf16>
    %207 = vector.extract_strided_slice %152 {offsets = [0, 24], sizes = [16, 8], strides = [1, 1]} : vector<16x32xbf16> to vector<16x8xbf16>
    %cst_78 = arith.constant dense<0.000000e+00> : vector<8x16xf32>
    %208 = tpu.matmul %206, %207, %cst_78 {dimension_numbers = #tpu.dot_dimension_numbers<[1], [1], [0], [0], [0, 0, 1, 0], [], []>} : vector<8x8xbf16>, vector<16x8xbf16>, vector<8x16xf32> -> vector<8x16xf32>
    %cst_79 = arith.constant dense<0xFF800000> : vector<8xf32>
    %209 = vector.multi_reduction <maximumf>, %208, %cst_79 [1] : vector<8x16xf32> to vector<8xf32>
    %210 = vector.shape_cast %209 : vector<8xf32> to vector<8x1xf32>
    %211 = vector.broadcast %210 : vector<8x1xf32> to vector<8x16xf32>
    %212 = arith.subf %208, %211 : vector<8x16xf32>
    %213 = math.exp %212 : vector<8x16xf32>
    %cst_80 = arith.constant dense<0.000000e+00> : vector<8xf32>
    %214 = vector.multi_reduction <add>, %213, %cst_80 [1] : vector<8x16xf32> to vector<8xf32>
    %215 = vector.shape_cast %214 : vector<8xf32> to vector<8x1xf32>
    %216 = tpu.reciprocal %215 {approx = true} : vector<8x1xf32> -> vector<8x1xf32>
    %217 = vector.broadcast %216 : vector<8x1xf32> to vector<8x16xf32>
    %218 = arith.mulf %213, %217 : vector<8x16xf32>
    %219 = arith.truncf %218 : vector<8x16xf32> to vector<8x16xbf16>
    %220 = vector.extract_strided_slice %153 {offsets = [0, 24], sizes = [16, 8], strides = [1, 1]} : vector<16x32xbf16> to vector<16x8xbf16>
    %cst_81 = arith.constant dense<0.000000e+00> : vector<8x8xf32>
    %221 = tpu.matmul %219, %220, %cst_81 {dimension_numbers = #tpu.dot_dimension_numbers<[1], [0], [0], [1], [0, 0, 1, 1], [], []>} : vector<8x16xbf16>, vector<16x8xbf16>, vector<8x8xf32> -> vector<8x8xf32>
    %c8_82 = arith.constant 8 : index
    %c24_83 = arith.constant 24 : index
    %222 = vector.load %arg19[%c8_82, %c24_83] : memref<32x32xf32, #tpu.memory_space<vmem>>, vector<8x8xf32>
    tpu.vector_store %arg19[%c8_82, %c24_83], %221 {strides = array<i32>} : memref<32x32xf32, #tpu.memory_space<vmem>>, vector<8x8xf32>,
    %223 = vector.extract_strided_slice %80 {offsets = [32, 0], sizes = [16, 32], strides = [1, 1]} : vector<64x64xbf16> to vector<16x32xbf16>
    %224 = vector.extract_strided_slice %80 {offsets = [32, 32], sizes = [16, 32], strides = [1, 1]} : vector<64x64xbf16> to vector<16x32xbf16>
    %225 = vector.extract_strided_slice %66 {offsets = [16, 0], sizes = [8, 32], strides = [1, 1]} : vector<32x32xbf16> to vector<8x32xbf16>
    %226 = vector.extract_strided_slice %225 {offsets = [0, 0], sizes = [8, 8], strides = [1, 1]} : vector<8x32xbf16> to vector<8x8xbf16>
    %227 = vector.extract_strided_slice %223 {offsets = [0, 0], sizes = [16, 8], strides = [1, 1]} : vector<16x32xbf16> to vector<16x8xbf16>
    %cst_84 = arith.constant dense<0.000000e+00> : vector<8x16xf32>
    %228 = tpu.matmul %226, %227, %cst_84 {dimension_numbers = #tpu.dot_dimension_numbers<[1], [1], [0], [0], [0, 0, 1, 0], [], []>} : vector<8x8xbf16>, vector<16x8xbf16>, vector<8x16xf32> -> vector<8x16xf32>
    %cst_85 = arith.constant dense<0xFF800000> : vector<8xf32>
    %229 = vector.multi_reduction <maximumf>, %228, %cst_85 [1] : vector<8x16xf32> to vector<8xf32>
    %230 = vector.shape_cast %229 : vector<8xf32> to vector<8x1xf32>
    %231 = vector.broadcast %230 : vector<8x1xf32> to vector<8x16xf32>
    %232 = arith.subf %228, %231 : vector<8x16xf32>
    %233 = math.exp %232 : vector<8x16xf32>
    %cst_86 = arith.constant dense<0.000000e+00> : vector<8xf32>
    %234 = vector.multi_reduction <add>, %233, %cst_86 [1] : vector<8x16xf32> to vector<8xf32>
    %235 = vector.shape_cast %234 : vector<8xf32> to vector<8x1xf32>
    %236 = tpu.reciprocal %235 {approx = true} : vector<8x1xf32> -> vector<8x1xf32>
    %237 = vector.broadcast %236 : vector<8x1xf32> to vector<8x16xf32>
    %238 = arith.mulf %233, %237 : vector<8x16xf32>
    %239 = arith.truncf %238 : vector<8x16xf32> to vector<8x16xbf16>
    %240 = vector.extract_strided_slice %224 {offsets = [0, 0], sizes = [16, 8], strides = [1, 1]} : vector<16x32xbf16> to vector<16x8xbf16>
    %cst_87 = arith.constant dense<0.000000e+00> : vector<8x8xf32>
    %241 = tpu.matmul %239, %240, %cst_87 {dimension_numbers = #tpu.dot_dimension_numbers<[1], [0], [0], [1], [0, 0, 1, 1], [], []>} : vector<8x16xbf16>, vector<16x8xbf16>, vector<8x8xf32> -> vector<8x8xf32>
    %c16_88 = arith.constant 16 : index
    %c0_89 = arith.constant 0 : index
    %242 = vector.load %arg19[%c16_88, %c0_89] : memref<32x32xf32, #tpu.memory_space<vmem>>, vector<8x8xf32>
    tpu.vector_store %arg19[%c16_88, %c0_89], %241 {strides = array<i32>} : memref<32x32xf32, #tpu.memory_space<vmem>>, vector<8x8xf32>,
    %243 = vector.extract_strided_slice %225 {offsets = [0, 8], sizes = [8, 8], strides = [1, 1]} : vector<8x32xbf16> to vector<8x8xbf16>
    %244 = vector.extract_strided_slice %223 {offsets = [0, 8], sizes = [16, 8], strides = [1, 1]} : vector<16x32xbf16> to vector<16x8xbf16>
    %cst_90 = arith.constant dense<0.000000e+00> : vector<8x16xf32>
    %245 = tpu.matmul %243, %244, %cst_90 {dimension_numbers = #tpu.dot_dimension_numbers<[1], [1], [0], [0], [0, 0, 1, 0], [], []>} : vector<8x8xbf16>, vector<16x8xbf16>, vector<8x16xf32> -> vector<8x16xf32>
    %cst_91 = arith.constant dense<0xFF800000> : vector<8xf32>
    %246 = vector.multi_reduction <maximumf>, %245, %cst_91 [1] : vector<8x16xf32> to vector<8xf32>
    %247 = vector.shape_cast %246 : vector<8xf32> to vector<8x1xf32>
    %248 = vector.broadcast %247 : vector<8x1xf32> to vector<8x16xf32>
    %249 = arith.subf %245, %248 : vector<8x16xf32>
    %250 = math.exp %249 : vector<8x16xf32>
    %cst_92 = arith.constant dense<0.000000e+00> : vector<8xf32>
    %251 = vector.multi_reduction <add>, %250, %cst_92 [1] : vector<8x16xf32> to vector<8xf32>
    %252 = vector.shape_cast %251 : vector<8xf32> to vector<8x1xf32>
    %253 = tpu.reciprocal %252 {approx = true} : vector<8x1xf32> -> vector<8x1xf32>
    %254 = vector.broadcast %253 : vector<8x1xf32> to vector<8x16xf32>
    %255 = arith.mulf %250, %254 : vector<8x16xf32>
    %256 = arith.truncf %255 : vector<8x16xf32> to vector<8x16xbf16>
    %257 = vector.extract_strided_slice %224 {offsets = [0, 8], sizes = [16, 8], strides = [1, 1]} : vector<16x32xbf16> to vector<16x8xbf16>
    %cst_93 = arith.constant dense<0.000000e+00> : vector<8x8xf32>
    %258 = tpu.matmul %256, %257, %cst_93 {dimension_numbers = #tpu.dot_dimension_numbers<[1], [0], [0], [1], [0, 0, 1, 1], [], []>} : vector<8x16xbf16>, vector<16x8xbf16>, vector<8x8xf32> -> vector<8x8xf32>
    %c16_94 = arith.constant 16 : index
    %c8_95 = arith.constant 8 : index
    %259 = vector.load %arg19[%c16_94, %c8_95] : memref<32x32xf32, #tpu.memory_space<vmem>>, vector<8x8xf32>
    tpu.vector_store %arg19[%c16_94, %c8_95], %258 {strides = array<i32>} : memref<32x32xf32, #tpu.memory_space<vmem>>, vector<8x8xf32>,
    %260 = vector.extract_strided_slice %225 {offsets = [0, 16], sizes = [8, 8], strides = [1, 1]} : vector<8x32xbf16> to vector<8x8xbf16>
    %261 = vector.extract_strided_slice %223 {offsets = [0, 16], sizes = [16, 8], strides = [1, 1]} : vector<16x32xbf16> to vector<16x8xbf16>
    %cst_96 = arith.constant dense<0.000000e+00> : vector<8x16xf32>
    %262 = tpu.matmul %260, %261, %cst_96 {dimension_numbers = #tpu.dot_dimension_numbers<[1], [1], [0], [0], [0, 0, 1, 0], [], []>} : vector<8x8xbf16>, vector<16x8xbf16>, vector<8x16xf32> -> vector<8x16xf32>
    %cst_97 = arith.constant dense<0xFF800000> : vector<8xf32>
    %263 = vector.multi_reduction <maximumf>, %262, %cst_97 [1] : vector<8x16xf32> to vector<8xf32>
    %264 = vector.shape_cast %263 : vector<8xf32> to vector<8x1xf32>
    %265 = vector.broadcast %264 : vector<8x1xf32> to vector<8x16xf32>
    %266 = arith.subf %262, %265 : vector<8x16xf32>
    %267 = math.exp %266 : vector<8x16xf32>
    %cst_98 = arith.constant dense<0.000000e+00> : vector<8xf32>
    %268 = vector.multi_reduction <add>, %267, %cst_98 [1] : vector<8x16xf32> to vector<8xf32>
    %269 = vector.shape_cast %268 : vector<8xf32> to vector<8x1xf32>
    %270 = tpu.reciprocal %269 {approx = true} : vector<8x1xf32> -> vector<8x1xf32>
    %271 = vector.broadcast %270 : vector<8x1xf32> to vector<8x16xf32>
    %272 = arith.mulf %267, %271 : vector<8x16xf32>
    %273 = arith.truncf %272 : vector<8x16xf32> to vector<8x16xbf16>
    %274 = vector.extract_strided_slice %224 {offsets = [0, 16], sizes = [16, 8], strides = [1, 1]} : vector<16x32xbf16> to vector<16x8xbf16>
    %cst_99 = arith.constant dense<0.000000e+00> : vector<8x8xf32>
    %275 = tpu.matmul %273, %274, %cst_99 {dimension_numbers = #tpu.dot_dimension_numbers<[1], [0], [0], [1], [0, 0, 1, 1], [], []>} : vector<8x16xbf16>, vector<16x8xbf16>, vector<8x8xf32> -> vector<8x8xf32>
    %c16_100 = arith.constant 16 : index
    %c16_101 = arith.constant 16 : index
    %276 = vector.load %arg19[%c16_100, %c16_101] : memref<32x32xf32, #tpu.memory_space<vmem>>, vector<8x8xf32>
    tpu.vector_store %arg19[%c16_100, %c16_101], %275 {strides = array<i32>} : memref<32x32xf32, #tpu.memory_space<vmem>>, vector<8x8xf32>,
    %277 = vector.extract_strided_slice %225 {offsets = [0, 24], sizes = [8, 8], strides = [1, 1]} : vector<8x32xbf16> to vector<8x8xbf16>
    %278 = vector.extract_strided_slice %223 {offsets = [0, 24], sizes = [16, 8], strides = [1, 1]} : vector<16x32xbf16> to vector<16x8xbf16>
    %cst_102 = arith.constant dense<0.000000e+00> : vector<8x16xf32>
    %279 = tpu.matmul %277, %278, %cst_102 {dimension_numbers = #tpu.dot_dimension_numbers<[1], [1], [0], [0], [0, 0, 1, 0], [], []>} : vector<8x8xbf16>, vector<16x8xbf16>, vector<8x16xf32> -> vector<8x16xf32>
    %cst_103 = arith.constant dense<0xFF800000> : vector<8xf32>
    %280 = vector.multi_reduction <maximumf>, %279, %cst_103 [1] : vector<8x16xf32> to vector<8xf32>
    %281 = vector.shape_cast %280 : vector<8xf32> to vector<8x1xf32>
    %282 = vector.broadcast %281 : vector<8x1xf32> to vector<8x16xf32>
    %283 = arith.subf %279, %282 : vector<8x16xf32>
    %284 = math.exp %283 : vector<8x16xf32>
    %cst_104 = arith.constant dense<0.000000e+00> : vector<8xf32>
    %285 = vector.multi_reduction <add>, %284, %cst_104 [1] : vector<8x16xf32> to vector<8xf32>
    %286 = vector.shape_cast %285 : vector<8xf32> to vector<8x1xf32>
    %287 = tpu.reciprocal %286 {approx = true} : vector<8x1xf32> -> vector<8x1xf32>
    %288 = vector.broadcast %287 : vector<8x1xf32> to vector<8x16xf32>
    %289 = arith.mulf %284, %288 : vector<8x16xf32>
    %290 = arith.truncf %289 : vector<8x16xf32> to vector<8x16xbf16>
    %291 = vector.extract_strided_slice %224 {offsets = [0, 24], sizes = [16, 8], strides = [1, 1]} : vector<16x32xbf16> to vector<16x8xbf16>
    %cst_105 = arith.constant dense<0.000000e+00> : vector<8x8xf32>
    %292 = tpu.matmul %290, %291, %cst_105 {dimension_numbers = #tpu.dot_dimension_numbers<[1], [0], [0], [1], [0, 0, 1, 1], [], []>} : vector<8x16xbf16>, vector<16x8xbf16>, vector<8x8xf32> -> vector<8x8xf32>
    %c16_106 = arith.constant 16 : index
    %c24_107 = arith.constant 24 : index
    %293 = vector.load %arg19[%c16_106, %c24_107] : memref<32x32xf32, #tpu.memory_space<vmem>>, vector<8x8xf32>
    tpu.vector_store %arg19[%c16_106, %c24_107], %292 {strides = array<i32>} : memref<32x32xf32, #tpu.memory_space<vmem>>, vector<8x8xf32>,
    %294 = vector.extract_strided_slice %80 {offsets = [48, 0], sizes = [16, 32], strides = [1, 1]} : vector<64x64xbf16> to vector<16x32xbf16>
    %295 = vector.extract_strided_slice %80 {offsets = [48, 32], sizes = [16, 32], strides = [1, 1]} : vector<64x64xbf16> to vector<16x32xbf16>
    %296 = vector.extract_strided_slice %66 {offsets = [24, 0], sizes = [8, 32], strides = [1, 1]} : vector<32x32xbf16> to vector<8x32xbf16>
    %297 = vector.extract_strided_slice %296 {offsets = [0, 0], sizes = [8, 8], strides = [1, 1]} : vector<8x32xbf16> to vector<8x8xbf16>
    %298 = vector.extract_strided_slice %294 {offsets = [0, 0], sizes = [16, 8], strides = [1, 1]} : vector<16x32xbf16> to vector<16x8xbf16>
    %cst_108 = arith.constant dense<0.000000e+00> : vector<8x16xf32>
    %299 = tpu.matmul %297, %298, %cst_108 {dimension_numbers = #tpu.dot_dimension_numbers<[1], [1], [0], [0], [0, 0, 1, 0], [], []>} : vector<8x8xbf16>, vector<16x8xbf16>, vector<8x16xf32> -> vector<8x16xf32>
    %cst_109 = arith.constant dense<0xFF800000> : vector<8xf32>
    %300 = vector.multi_reduction <maximumf>, %299, %cst_109 [1] : vector<8x16xf32> to vector<8xf32>
    %301 = vector.shape_cast %300 : vector<8xf32> to vector<8x1xf32>
    %302 = vector.broadcast %301 : vector<8x1xf32> to vector<8x16xf32>
    %303 = arith.subf %299, %302 : vector<8x16xf32>
    %304 = math.exp %303 : vector<8x16xf32>
    %cst_110 = arith.constant dense<0.000000e+00> : vector<8xf32>
    %305 = vector.multi_reduction <add>, %304, %cst_110 [1] : vector<8x16xf32> to vector<8xf32>
    %306 = vector.shape_cast %305 : vector<8xf32> to vector<8x1xf32>
    %307 = tpu.reciprocal %306 {approx = true} : vector<8x1xf32> -> vector<8x1xf32>
    %308 = vector.broadcast %307 : vector<8x1xf32> to vector<8x16xf32>
    %309 = arith.mulf %304, %308 : vector<8x16xf32>
    %310 = arith.truncf %309 : vector<8x16xf32> to vector<8x16xbf16>
    %311 = vector.extract_strided_slice %295 {offsets = [0, 0], sizes = [16, 8], strides = [1, 1]} : vector<16x32xbf16> to vector<16x8xbf16>
    %cst_111 = arith.constant dense<0.000000e+00> : vector<8x8xf32>
    %312 = tpu.matmul %310, %311, %cst_111 {dimension_numbers = #tpu.dot_dimension_numbers<[1], [0], [0], [1], [0, 0, 1, 1], [], []>} : vector<8x16xbf16>, vector<16x8xbf16>, vector<8x8xf32> -> vector<8x8xf32>
    %c24_112 = arith.constant 24 : index
    %c0_113 = arith.constant 0 : index
    %313 = vector.load %arg19[%c24_112, %c0_113] : memref<32x32xf32, #tpu.memory_space<vmem>>, vector<8x8xf32>
    tpu.vector_store %arg19[%c24_112, %c0_113], %312 {strides = array<i32>} : memref<32x32xf32, #tpu.memory_space<vmem>>, vector<8x8xf32>,
    %314 = vector.extract_strided_slice %296 {offsets = [0, 8], sizes = [8, 8], strides = [1, 1]} : vector<8x32xbf16> to vector<8x8xbf16>
    %315 = vector.extract_strided_slice %294 {offsets = [0, 8], sizes = [16, 8], strides = [1, 1]} : vector<16x32xbf16> to vector<16x8xbf16>
    %cst_114 = arith.constant dense<0.000000e+00> : vector<8x16xf32>
    %316 = tpu.matmul %314, %315, %cst_114 {dimension_numbers = #tpu.dot_dimension_numbers<[1], [1], [0], [0], [0, 0, 1, 0], [], []>} : vector<8x8xbf16>, vector<16x8xbf16>, vector<8x16xf32> -> vector<8x16xf32>
    %cst_115 = arith.constant dense<0xFF800000> : vector<8xf32>
    %317 = vector.multi_reduction <maximumf>, %316, %cst_115 [1] : vector<8x16xf32> to vector<8xf32>
    %318 = vector.shape_cast %317 : vector<8xf32> to vector<8x1xf32>
    %319 = vector.broadcast %318 : vector<8x1xf32> to vector<8x16xf32>
    %320 = arith.subf %316, %319 : vector<8x16xf32>
    %321 = math.exp %320 : vector<8x16xf32>
    %cst_116 = arith.constant dense<0.000000e+00> : vector<8xf32>
    %322 = vector.multi_reduction <add>, %321, %cst_116 [1] : vector<8x16xf32> to vector<8xf32>
    %323 = vector.shape_cast %322 : vector<8xf32> to vector<8x1xf32>
    %324 = tpu.reciprocal %323 {approx = true} : vector<8x1xf32> -> vector<8x1xf32>
    %325 = vector.broadcast %324 : vector<8x1xf32> to vector<8x16xf32>
    %326 = arith.mulf %321, %325 : vector<8x16xf32>
    %327 = arith.truncf %326 : vector<8x16xf32> to vector<8x16xbf16>
    %328 = vector.extract_strided_slice %295 {offsets = [0, 8], sizes = [16, 8], strides = [1, 1]} : vector<16x32xbf16> to vector<16x8xbf16>
    %cst_117 = arith.constant dense<0.000000e+00> : vector<8x8xf32>
    %329 = tpu.matmul %327, %328, %cst_117 {dimension_numbers = #tpu.dot_dimension_numbers<[1], [0], [0], [1], [0, 0, 1, 1], [], []>} : vector<8x16xbf16>, vector<16x8xbf16>, vector<8x8xf32> -> vector<8x8xf32>
    %c24_118 = arith.constant 24 : index
    %c8_119 = arith.constant 8 : index
    %330 = vector.load %arg19[%c24_118, %c8_119] : memref<32x32xf32, #tpu.memory_space<vmem>>, vector<8x8xf32>
    tpu.vector_store %arg19[%c24_118, %c8_119], %329 {strides = array<i32>} : memref<32x32xf32, #tpu.memory_space<vmem>>, vector<8x8xf32>,
    %331 = vector.extract_strided_slice %296 {offsets = [0, 16], sizes = [8, 8], strides = [1, 1]} : vector<8x32xbf16> to vector<8x8xbf16>
    %332 = vector.extract_strided_slice %294 {offsets = [0, 16], sizes = [16, 8], strides = [1, 1]} : vector<16x32xbf16> to vector<16x8xbf16>
    %cst_120 = arith.constant dense<0.000000e+00> : vector<8x16xf32>
    %333 = tpu.matmul %331, %332, %cst_120 {dimension_numbers = #tpu.dot_dimension_numbers<[1], [1], [0], [0], [0, 0, 1, 0], [], []>} : vector<8x8xbf16>, vector<16x8xbf16>, vector<8x16xf32> -> vector<8x16xf32>
    %cst_121 = arith.constant dense<0xFF800000> : vector<8xf32>
    %334 = vector.multi_reduction <maximumf>, %333, %cst_121 [1] : vector<8x16xf32> to vector<8xf32>
    %335 = vector.shape_cast %334 : vector<8xf32> to vector<8x1xf32>
    %336 = vector.broadcast %335 : vector<8x1xf32> to vector<8x16xf32>
    %337 = arith.subf %333, %336 : vector<8x16xf32>
    %338 = math.exp %337 : vector<8x16xf32>
    %cst_122 = arith.constant dense<0.000000e+00> : vector<8xf32>
    %339 = vector.multi_reduction <add>, %338, %cst_122 [1] : vector<8x16xf32> to vector<8xf32>
    %340 = vector.shape_cast %339 : vector<8xf32> to vector<8x1xf32>
    %341 = tpu.reciprocal %340 {approx = true} : vector<8x1xf32> -> vector<8x1xf32>
    %342 = vector.broadcast %341 : vector<8x1xf32> to vector<8x16xf32>
    %343 = arith.mulf %338, %342 : vector<8x16xf32>
    %344 = arith.truncf %343 : vector<8x16xf32> to vector<8x16xbf16>
    %345 = vector.extract_strided_slice %295 {offsets = [0, 16], sizes = [16, 8], strides = [1, 1]} : vector<16x32xbf16> to vector<16x8xbf16>
    %cst_123 = arith.constant dense<0.000000e+00> : vector<8x8xf32>
    %346 = tpu.matmul %344, %345, %cst_123 {dimension_numbers = #tpu.dot_dimension_numbers<[1], [0], [0], [1], [0, 0, 1, 1], [], []>} : vector<8x16xbf16>, vector<16x8xbf16>, vector<8x8xf32> -> vector<8x8xf32>
    %c24_124 = arith.constant 24 : index
    %c16_125 = arith.constant 16 : index
    %347 = vector.load %arg19[%c24_124, %c16_125] : memref<32x32xf32, #tpu.memory_space<vmem>>, vector<8x8xf32>
    tpu.vector_store %arg19[%c24_124, %c16_125], %346 {strides = array<i32>} : memref<32x32xf32, #tpu.memory_space<vmem>>, vector<8x8xf32>,
    %348 = vector.extract_strided_slice %296 {offsets = [0, 24], sizes = [8, 8], strides = [1, 1]} : vector<8x32xbf16> to vector<8x8xbf16>
    %349 = vector.extract_strided_slice %294 {offsets = [0, 24], sizes = [16, 8], strides = [1, 1]} : vector<16x32xbf16> to vector<16x8xbf16>
    %cst_126 = arith.constant dense<0.000000e+00> : vector<8x16xf32>
    %350 = tpu.matmul %348, %349, %cst_126 {dimension_numbers = #tpu.dot_dimension_numbers<[1], [1], [0], [0], [0, 0, 1, 0], [], []>} : vector<8x8xbf16>, vector<16x8xbf16>, vector<8x16xf32> -> vector<8x16xf32>
    %cst_127 = arith.constant dense<0xFF800000> : vector<8xf32>
    %351 = vector.multi_reduction <maximumf>, %350, %cst_127 [1] : vector<8x16xf32> to vector<8xf32>
    %352 = vector.shape_cast %351 : vector<8xf32> to vector<8x1xf32>
    %353 = vector.broadcast %352 : vector<8x1xf32> to vector<8x16xf32>
    %354 = arith.subf %350, %353 : vector<8x16xf32>
    %355 = math.exp %354 : vector<8x16xf32>
    %cst_128 = arith.constant dense<0.000000e+00> : vector<8xf32>
    %356 = vector.multi_reduction <add>, %355, %cst_128 [1] : vector<8x16xf32> to vector<8xf32>
    %357 = vector.shape_cast %356 : vector<8xf32> to vector<8x1xf32>
    %358 = tpu.reciprocal %357 {approx = true} : vector<8x1xf32> -> vector<8x1xf32>
    %359 = vector.broadcast %358 : vector<8x1xf32> to vector<8x16xf32>
    %360 = arith.mulf %355, %359 : vector<8x16xf32>
    %361 = arith.truncf %360 : vector<8x16xf32> to vector<8x16xbf16>
    %362 = vector.extract_strided_slice %295 {offsets = [0, 24], sizes = [16, 8], strides = [1, 1]} : vector<16x32xbf16> to vector<16x8xbf16>
    %cst_129 = arith.constant dense<0.000000e+00> : vector<8x8xf32>
    %363 = tpu.matmul %361, %362, %cst_129 {dimension_numbers = #tpu.dot_dimension_numbers<[1], [0], [0], [1], [0, 0, 1, 1], [], []>} : vector<8x16xbf16>, vector<16x8xbf16>, vector<8x8xf32> -> vector<8x8xf32>
    %c24_130 = arith.constant 24 : index
    %c24_131 = arith.constant 24 : index
    %364 = vector.load %arg19[%c24_130, %c24_131] : memref<32x32xf32, #tpu.memory_space<vmem>>, vector<8x8xf32>
    tpu.vector_store %arg19[%c24_130, %c24_131], %363 {strides = array<i32>} : memref<32x32xf32, #tpu.memory_space<vmem>>, vector<8x8xf32>,
    %c0_132 = arith.constant 0 : index
    %c0_133 = arith.constant 0 : index
    %365 = vector.load %arg19[%c0_132, %c0_133] : memref<32x32xf32, #tpu.memory_space<vmem>>, vector<32x32xf32>
    %366 = arith.truncf %365 : vector<32x32xf32> to vector<32x32xbf16>
    %c0_134 = arith.constant 0 : index
    %c0_135 = arith.constant 0 : index
    %c0_136 = arith.constant 0 : index
    %367 = vector.load %arg11[%c0_134, %c0_135, %c0_136] : memref<2x32x32xbf16, #tpu.memory_space<vmem>>, vector<1x32x32xbf16>
    %368 = vector.shape_cast %367 : vector<1x32x32xbf16> to vector<32x32xbf16>
    %cst_137 = arith.constant dense<0.000000e+00> : vector<32x32xf32>
    %369 = tpu.matmul %366, %368, %cst_137 {dimension_numbers = #tpu.dot_dimension_numbers<[1], [0], [0], [1], [0, 0, 1, 1], [], []>} : vector<32x32xbf16>, vector<32x32xbf16>, vector<32x32xf32> -> vector<32x32xf32>
    %370 = arith.addf %6, %369 : vector<32x32xf32>
    %c0_138 = arith.constant 0 : index
    %c0_139 = arith.constant 0 : index
    %c0_140 = arith.constant 0 : index
    %371 = vector.load %arg12[%c0_138, %c0_139, %c0_140] : memref<2x1x32xf32, #tpu.memory_space<vmem>>, vector<1x1x32xf32>
    %372 = vector.shape_cast %371 : vector<1x1x32xf32> to vector<1x32xf32>
    %c0_141 = arith.constant 0 : index
    %c0_142 = arith.constant 0 : index
    %c0_143 = arith.constant 0 : index
    %373 = vector.load %arg13[%c0_141, %c0_142, %c0_143] : memref<2x1x32xf32, #tpu.memory_space<vmem>>, vector<1x1x32xf32>
    %374 = vector.shape_cast %373 : vector<1x1x32xf32> to vector<1x32xf32>
    %cst_144 = arith.constant dense<0.000000e+00> : vector<32xf32>
    %375 = vector.multi_reduction <add>, %370, %cst_144 [1] : vector<32x32xf32> to vector<32xf32>
    %376 = vector.shape_cast %375 : vector<32xf32> to vector<32x1xf32>
    %cst_145 = arith.constant 3.200000e+01 : f32
    %377 = vector.broadcast %cst_145 : f32 to vector<32x1xf32>
    %378 = arith.divf %376, %377 : vector<32x1xf32>
    %379 = vector.broadcast %378 : vector<32x1xf32> to vector<32x32xf32>
    %380 = arith.subf %370, %379 : vector<32x32xf32>
    %381 = arith.mulf %380, %380 : vector<32x32xf32>
    %cst_146 = arith.constant dense<0.000000e+00> : vector<32xf32>
    %382 = vector.multi_reduction <add>, %381, %cst_146 [1] : vector<32x32xf32> to vector<32xf32>
    %383 = vector.shape_cast %382 : vector<32xf32> to vector<32x1xf32>
    %cst_147 = arith.constant 3.200000e+01 : f32
    %384 = vector.broadcast %cst_147 : f32 to vector<32x1xf32>
    %385 = arith.divf %383, %384 : vector<32x1xf32>
    %386 = vector.broadcast %378 : vector<32x1xf32> to vector<32x32xf32>
    %387 = arith.subf %370, %386 : vector<32x32xf32>
    %cst_148 = arith.constant 9.99999974E-6 : f32
    %388 = vector.broadcast %cst_148 : f32 to vector<32x1xf32>
    %389 = arith.addf %385, %388 : vector<32x1xf32>
    %390 = math.rsqrt %389 : vector<32x1xf32>
    %391 = vector.broadcast %390 : vector<32x1xf32> to vector<32x32xf32>
    %392 = arith.mulf %387, %391 : vector<32x32xf32>
    %393 = vector.broadcast %372 : vector<1x32xf32> to vector<32x32xf32>
    %394 = arith.mulf %392, %393 : vector<32x32xf32>
    %395 = vector.broadcast %374 : vector<1x32xf32> to vector<32x32xf32>
    %396 = arith.addf %394, %395 : vector<32x32xf32>
    %397 = arith.truncf %396 : vector<32x32xf32> to vector<32x32xbf16>
    %c0_149 = arith.constant 0 : index
    %c0_150 = arith.constant 0 : index
    %c0_151 = arith.constant 0 : index
    %398 = vector.load %arg14[%c0_149, %c0_150, %c0_151] : memref<2x32x128xbf16, #tpu.memory_space<vmem>>, vector<1x32x128xbf16>
    %399 = vector.shape_cast %398 : vector<1x32x128xbf16> to vector<32x128xbf16>
    %cst_152 = arith.constant dense<0.000000e+00> : vector<32x128xf32>
    %400 = tpu.matmul %397, %399, %cst_152 {dimension_numbers = #tpu.dot_dimension_numbers<[1], [0], [0], [1], [0, 0, 1, 1], [], []>} : vector<32x32xbf16>, vector<32x128xbf16>, vector<32x128xf32> -> vector<32x128xf32>
    %cst_153 = arith.constant 5.000000e-01 : f32
    %401 = vector.broadcast %cst_153 : f32 to vector<32x128xf32>
    %402 = arith.mulf %401, %400 : vector<32x128xf32>
    %cst_154 = arith.constant 0.707106769 : f32
    %403 = vector.broadcast %cst_154 : f32 to vector<32x128xf32>
    %404 = arith.mulf %400, %403 : vector<32x128xf32>
    %405 = math.absf %404 : vector<32x128xf32>
    %cst_155 = arith.constant 0.327591091 : f32
    %406 = vector.broadcast %cst_155 : f32 to vector<32x128xf32>
    %407 = arith.mulf %406, %405 : vector<32x128xf32>
    %cst_156 = arith.constant 1.000000e+00 : f32
    %408 = vector.broadcast %cst_156 : f32 to vector<32x128xf32>
    %409 = arith.addf %408, %407 : vector<32x128xf32>
    %cst_157 = arith.constant 1.000000e+00 : f32
    %410 = vector.broadcast %cst_157 : f32 to vector<32x128xf32>
    %411 = arith.divf %410, %409 : vector<32x128xf32>
    %cst_158 = arith.constant 1.06140542 : f32
    %412 = vector.broadcast %cst_158 : f32 to vector<32x128xf32>
    %413 = arith.mulf %412, %411 : vector<32x128xf32>
    %cst_159 = arith.constant -1.45315206 : f32
    %414 = vector.broadcast %cst_159 : f32 to vector<32x128xf32>
    %415 = arith.addf %413, %414 : vector<32x128xf32>
    %416 = arith.mulf %415, %411 : vector<32x128xf32>
    %cst_160 = arith.constant 1.42141378 : f32
    %417 = vector.broadcast %cst_160 : f32 to vector<32x128xf32>
    %418 = arith.addf %416, %417 : vector<32x128xf32>
    %419 = arith.mulf %418, %411 : vector<32x128xf32>
    %cst_161 = arith.constant -0.284496725 : f32
    %420 = vector.broadcast %cst_161 : f32 to vector<32x128xf32>
    %421 = arith.addf %419, %420 : vector<32x128xf32>
    %422 = arith.mulf %421, %411 : vector<32x128xf32>
    %cst_162 = arith.constant 0.254829586 : f32
    %423 = vector.broadcast %cst_162 : f32 to vector<32x128xf32>
    %424 = arith.addf %422, %423 : vector<32x128xf32>
    %425 = arith.mulf %424, %411 : vector<32x128xf32>
    %cst_163 = arith.constant 0.000000e+00 : f32
    %426 = vector.broadcast %cst_163 : f32 to vector<32x128xf32>
    %427 = arith.subf %426, %405 : vector<32x128xf32>
    %428 = arith.mulf %427, %405 : vector<32x128xf32>
    %429 = math.exp %428 : vector<32x128xf32>
    %430 = arith.mulf %425, %429 : vector<32x128xf32>
    %cst_164 = arith.constant 1.000000e+00 : f32
    %431 = vector.broadcast %cst_164 : f32 to vector<32x128xf32>
    %432 = arith.subf %431, %430 : vector<32x128xf32>
    %cst_165 = arith.constant 0.000000e+00 : f32
    %433 = vector.broadcast %cst_165 : f32 to vector<32x128xf32>
    %434 = arith.cmpf oge, %404, %433 : vector<32x128xf32>
    %cst_166 = arith.constant 0.000000e+00 : f32
    %435 = vector.broadcast %cst_166 : f32 to vector<32x128xf32>
    %436 = arith.subf %435, %432 : vector<32x128xf32>
    %437 = arith.select %434, %432, %436 : vector<32x128xi1>, vector<32x128xf32>
    %cst_167 = arith.constant 1.000000e+00 : f32
    %438 = vector.broadcast %cst_167 : f32 to vector<32x128xf32>
    %439 = arith.addf %438, %437 : vector<32x128xf32>
    %440 = arith.mulf %402, %439 : vector<32x128xf32>
    %441 = arith.truncf %440 : vector<32x128xf32> to vector<32x128xbf16>
    %c0_168 = arith.constant 0 : index
    %c0_169 = arith.constant 0 : index
    %c0_170 = arith.constant 0 : index
    %442 = vector.load %arg15[%c0_168, %c0_169, %c0_170] : memref<2x128x32xbf16, #tpu.memory_space<vmem>>, vector<1x128x32xbf16>
    %443 = vector.shape_cast %442 : vector<1x128x32xbf16> to vector<128x32xbf16>
    %cst_171 = arith.constant dense<0.000000e+00> : vector<32x32xf32>
    %444 = tpu.matmul %441, %443, %cst_171 {dimension_numbers = #tpu.dot_dimension_numbers<[1], [0], [0], [1], [0, 0, 1, 1], [], []>} : vector<32x128xbf16>, vector<128x32xbf16>, vector<32x32xf32> -> vector<32x32xf32>
    %445 = arith.addf %370, %444 : vector<32x32xf32>
    %c1 = arith.constant 1 : index
    %c0_172 = arith.constant 0 : index
    %c0_173 = arith.constant 0 : index
    %446 = vector.load %arg5[%c1, %c0_172, %c0_173] : memref<2x1x32xf32, #tpu.memory_space<vmem>>, vector<1x1x32xf32>
    %447 = vector.shape_cast %446 : vector<1x1x32xf32> to vector<1x32xf32>
    %448 = vector.broadcast %447 : vector<1x32xf32> to vector<32x32xf32>
    %449 = arith.mulf %27, %448 : vector<32x32xf32>
    %c1_174 = arith.constant 1 : index
    %c0_175 = arith.constant 0 : index
    %c0_176 = arith.constant 0 : index
    %450 = vector.load %arg6[%c1_174, %c0_175, %c0_176] : memref<2x1x32xf32, #tpu.memory_space<vmem>>, vector<1x1x32xf32>
    %451 = vector.shape_cast %450 : vector<1x1x32xf32> to vector<1x32xf32>
    %452 = vector.broadcast %451 : vector<1x32xf32> to vector<32x32xf32>
    %453 = arith.addf %449, %452 : vector<32x32xf32>
    %c1_177 = arith.constant 1 : index
    %c0_178 = arith.constant 0 : index
    %c0_179 = arith.constant 0 : index
    %454 = vector.load %arg7[%c1_177, %c0_178, %c0_179] : memref<2x1x32xf32, #tpu.memory_space<vmem>>, vector<1x1x32xf32>
    %455 = vector.shape_cast %454 : vector<1x1x32xf32> to vector<1x32xf32>
    %c1_180 = arith.constant 1 : index
    %c0_181 = arith.constant 0 : index
    %c0_182 = arith.constant 0 : index
    %456 = vector.load %arg8[%c1_180, %c0_181, %c0_182] : memref<2x1x32xf32, #tpu.memory_space<vmem>>, vector<1x1x32xf32>
    %457 = vector.shape_cast %456 : vector<1x1x32xf32> to vector<1x32xf32>
    %cst_183 = arith.constant dense<0.000000e+00> : vector<32xf32>
    %458 = vector.multi_reduction <add>, %445, %cst_183 [1] : vector<32x32xf32> to vector<32xf32>
    %459 = vector.shape_cast %458 : vector<32xf32> to vector<32x1xf32>
    %cst_184 = arith.constant 3.200000e+01 : f32
    %460 = vector.broadcast %cst_184 : f32 to vector<32x1xf32>
    %461 = arith.divf %459, %460 : vector<32x1xf32>
    %462 = vector.broadcast %461 : vector<32x1xf32> to vector<32x32xf32>
    %463 = arith.subf %445, %462 : vector<32x32xf32>
    %464 = arith.mulf %463, %463 : vector<32x32xf32>
    %cst_185 = arith.constant dense<0.000000e+00> : vector<32xf32>
    %465 = vector.multi_reduction <add>, %464, %cst_185 [1] : vector<32x32xf32> to vector<32xf32>
    %466 = vector.shape_cast %465 : vector<32xf32> to vector<32x1xf32>
    %cst_186 = arith.constant 3.200000e+01 : f32
    %467 = vector.broadcast %cst_186 : f32 to vector<32x1xf32>
    %468 = arith.divf %466, %467 : vector<32x1xf32>
    %469 = vector.broadcast %461 : vector<32x1xf32> to vector<32x32xf32>
    %470 = arith.subf %445, %469 : vector<32x32xf32>
    %cst_187 = arith.constant 9.99999974E-6 : f32
    %471 = vector.broadcast %cst_187 : f32 to vector<32x1xf32>
    %472 = arith.addf %468, %471 : vector<32x1xf32>
    %473 = math.rsqrt %472 : vector<32x1xf32>
    %474 = vector.broadcast %473 : vector<32x1xf32> to vector<32x32xf32>
    %475 = arith.mulf %470, %474 : vector<32x32xf32>
    %476 = vector.broadcast %455 : vector<1x32xf32> to vector<32x32xf32>
    %477 = arith.mulf %475, %476 : vector<32x32xf32>
    %478 = vector.broadcast %457 : vector<1x32xf32> to vector<32x32xf32>
    %479 = arith.addf %477, %478 : vector<32x32xf32>
    %480 = arith.truncf %479 : vector<32x32xf32> to vector<32x32xbf16>
    %c1_188 = arith.constant 1 : index
    %c0_189 = arith.constant 0 : index
    %c0_190 = arith.constant 0 : index
    %481 = vector.load %arg9[%c1_188, %c0_189, %c0_190] : memref<2x32x32xbf16, #tpu.memory_space<vmem>>, vector<1x32x32xbf16>
    %482 = vector.shape_cast %481 : vector<1x32x32xbf16> to vector<32x32xbf16>
    %cst_191 = arith.constant dense<0.000000e+00> : vector<32x32xf32>
    %483 = tpu.matmul %480, %482, %cst_191 {dimension_numbers = #tpu.dot_dimension_numbers<[1], [0], [0], [1], [0, 0, 1, 1], [], []>} : vector<32x32xbf16>, vector<32x32xbf16>, vector<32x32xf32> -> vector<32x32xf32>
    %484 = arith.truncf %483 : vector<32x32xf32> to vector<32x32xbf16>
    %485 = vector.extract_strided_slice %453 {offsets = [0, 0], sizes = [8, 32], strides = [1, 1]} : vector<32x32xf32> to vector<8x32xf32>
    %486 = vector.extract_strided_slice %479 {offsets = [0, 0], sizes = [8, 32], strides = [1, 1]} : vector<32x32xf32> to vector<8x32xf32>
    %487 = vector.extract_strided_slice %453 {offsets = [8, 0], sizes = [8, 32], strides = [1, 1]} : vector<32x32xf32> to vector<8x32xf32>
    %488 = vector.extract_strided_slice %479 {offsets = [8, 0], sizes = [8, 32], strides = [1, 1]} : vector<32x32xf32> to vector<8x32xf32>
    %489 = vector.extract_strided_slice %453 {offsets = [16, 0], sizes = [8, 32], strides = [1, 1]} : vector<32x32xf32> to vector<8x32xf32>
    %490 = vector.extract_strided_slice %479 {offsets = [16, 0], sizes = [8, 32], strides = [1, 1]} : vector<32x32xf32> to vector<8x32xf32>
    %491 = vector.extract_strided_slice %453 {offsets = [24, 0], sizes = [8, 32], strides = [1, 1]} : vector<32x32xf32> to vector<8x32xf32>
    %492 = vector.extract_strided_slice %479 {offsets = [24, 0], sizes = [8, 32], strides = [1, 1]} : vector<32x32xf32> to vector<8x32xf32>
    %493 = tpu.concatenate %485, %486, %487, %488, %489, %490, %491, %492 in 0 : vector<8x32xf32>, vector<8x32xf32>, vector<8x32xf32>, vector<8x32xf32>, vector<8x32xf32>, vector<8x32xf32>, vector<8x32xf32>, vector<8x32xf32> -> vector<64x32xf32>
    %494 = arith.truncf %493 : vector<64x32xf32> to vector<64x32xbf16>
    %c1_192 = arith.constant 1 : index
    %c0_193 = arith.constant 0 : index
    %c0_194 = arith.constant 0 : index
    %495 = vector.load %arg10[%c1_192, %c0_193, %c0_194] : memref<2x32x64xbf16, #tpu.memory_space<vmem>>, vector<1x32x64xbf16>
    %496 = vector.shape_cast %495 : vector<1x32x64xbf16> to vector<32x64xbf16>
    %cst_195 = arith.constant dense<0.000000e+00> : vector<64x64xf32>
    %497 = tpu.matmul %494, %496, %cst_195 {dimension_numbers = #tpu.dot_dimension_numbers<[1], [0], [0], [1], [0, 0, 1, 1], [], []>} : vector<64x32xbf16>, vector<32x64xbf16>, vector<64x64xf32> -> vector<64x64xf32>
    %498 = arith.truncf %497 : vector<64x64xf32> to vector<64x64xbf16>
    %499 = vector.extract_strided_slice %498 {offsets = [0, 0], sizes = [16, 32], strides = [1, 1]} : vector<64x64xbf16> to vector<16x32xbf16>
    %500 = vector.extract_strided_slice %498 {offsets = [0, 32], sizes = [16, 32], strides = [1, 1]} : vector<64x64xbf16> to vector<16x32xbf16>
    %501 = vector.extract_strided_slice %484 {offsets = [0, 0], sizes = [8, 32], strides = [1, 1]} : vector<32x32xbf16> to vector<8x32xbf16>
    %502 = vector.extract_strided_slice %501 {offsets = [0, 0], sizes = [8, 8], strides = [1, 1]} : vector<8x32xbf16> to vector<8x8xbf16>
    %503 = vector.extract_strided_slice %499 {offsets = [0, 0], sizes = [16, 8], strides = [1, 1]} : vector<16x32xbf16> to vector<16x8xbf16>
    %cst_196 = arith.constant dense<0.000000e+00> : vector<8x16xf32>
    %504 = tpu.matmul %502, %503, %cst_196 {dimension_numbers = #tpu.dot_dimension_numbers<[1], [1], [0], [0], [0, 0, 1, 0], [], []>} : vector<8x8xbf16>, vector<16x8xbf16>, vector<8x16xf32> -> vector<8x16xf32>
    %cst_197 = arith.constant dense<0xFF800000> : vector<8xf32>
    %505 = vector.multi_reduction <maximumf>, %504, %cst_197 [1] : vector<8x16xf32> to vector<8xf32>
    %506 = vector.shape_cast %505 : vector<8xf32> to vector<8x1xf32>
    %507 = vector.broadcast %506 : vector<8x1xf32> to vector<8x16xf32>
    %508 = arith.subf %504, %507 : vector<8x16xf32>
    %509 = math.exp %508 : vector<8x16xf32>
    %cst_198 = arith.constant dense<0.000000e+00> : vector<8xf32>
    %510 = vector.multi_reduction <add>, %509, %cst_198 [1] : vector<8x16xf32> to vector<8xf32>
    %511 = vector.shape_cast %510 : vector<8xf32> to vector<8x1xf32>
    %512 = tpu.reciprocal %511 {approx = true} : vector<8x1xf32> -> vector<8x1xf32>
    %513 = vector.broadcast %512 : vector<8x1xf32> to vector<8x16xf32>
    %514 = arith.mulf %509, %513 : vector<8x16xf32>
    %515 = arith.truncf %514 : vector<8x16xf32> to vector<8x16xbf16>
    %516 = vector.extract_strided_slice %500 {offsets = [0, 0], sizes = [16, 8], strides = [1, 1]} : vector<16x32xbf16> to vector<16x8xbf16>
    %cst_199 = arith.constant dense<0.000000e+00> : vector<8x8xf32>
    %517 = tpu.matmul %515, %516, %cst_199 {dimension_numbers = #tpu.dot_dimension_numbers<[1], [0], [0], [1], [0, 0, 1, 1], [], []>} : vector<8x16xbf16>, vector<16x8xbf16>, vector<8x8xf32> -> vector<8x8xf32>
    %c0_200 = arith.constant 0 : index
    %c0_201 = arith.constant 0 : index
    %518 = vector.load %arg19[%c0_200, %c0_201] : memref<32x32xf32, #tpu.memory_space<vmem>>, vector<8x8xf32>
    tpu.vector_store %arg19[%c0_200, %c0_201], %517 {strides = array<i32>} : memref<32x32xf32, #tpu.memory_space<vmem>>, vector<8x8xf32>,
    %519 = vector.extract_strided_slice %501 {offsets = [0, 8], sizes = [8, 8], strides = [1, 1]} : vector<8x32xbf16> to vector<8x8xbf16>
    %520 = vector.extract_strided_slice %499 {offsets = [0, 8], sizes = [16, 8], strides = [1, 1]} : vector<16x32xbf16> to vector<16x8xbf16>
    %cst_202 = arith.constant dense<0.000000e+00> : vector<8x16xf32>
    %521 = tpu.matmul %519, %520, %cst_202 {dimension_numbers = #tpu.dot_dimension_numbers<[1], [1], [0], [0], [0, 0, 1, 0], [], []>} : vector<8x8xbf16>, vector<16x8xbf16>, vector<8x16xf32> -> vector<8x16xf32>
    %cst_203 = arith.constant dense<0xFF800000> : vector<8xf32>
    %522 = vector.multi_reduction <maximumf>, %521, %cst_203 [1] : vector<8x16xf32> to vector<8xf32>
    %523 = vector.shape_cast %522 : vector<8xf32> to vector<8x1xf32>
    %524 = vector.broadcast %523 : vector<8x1xf32> to vector<8x16xf32>
    %525 = arith.subf %521, %524 : vector<8x16xf32>
    %526 = math.exp %525 : vector<8x16xf32>
    %cst_204 = arith.constant dense<0.000000e+00> : vector<8xf32>
    %527 = vector.multi_reduction <add>, %526, %cst_204 [1] : vector<8x16xf32> to vector<8xf32>
    %528 = vector.shape_cast %527 : vector<8xf32> to vector<8x1xf32>
    %529 = tpu.reciprocal %528 {approx = true} : vector<8x1xf32> -> vector<8x1xf32>
    %530 = vector.broadcast %529 : vector<8x1xf32> to vector<8x16xf32>
    %531 = arith.mulf %526, %530 : vector<8x16xf32>
    %532 = arith.truncf %531 : vector<8x16xf32> to vector<8x16xbf16>
    %533 = vector.extract_strided_slice %500 {offsets = [0, 8], sizes = [16, 8], strides = [1, 1]} : vector<16x32xbf16> to vector<16x8xbf16>
    %cst_205 = arith.constant dense<0.000000e+00> : vector<8x8xf32>
    %534 = tpu.matmul %532, %533, %cst_205 {dimension_numbers = #tpu.dot_dimension_numbers<[1], [0], [0], [1], [0, 0, 1, 1], [], []>} : vector<8x16xbf16>, vector<16x8xbf16>, vector<8x8xf32> -> vector<8x8xf32>
    %c0_206 = arith.constant 0 : index
    %c8_207 = arith.constant 8 : index
    %535 = vector.load %arg19[%c0_206, %c8_207] : memref<32x32xf32, #tpu.memory_space<vmem>>, vector<8x8xf32>
    tpu.vector_store %arg19[%c0_206, %c8_207], %534 {strides = array<i32>} : memref<32x32xf32, #tpu.memory_space<vmem>>, vector<8x8xf32>,
    %536 = vector.extract_strided_slice %501 {offsets = [0, 16], sizes = [8, 8], strides = [1, 1]} : vector<8x32xbf16> to vector<8x8xbf16>
    %537 = vector.extract_strided_slice %499 {offsets = [0, 16], sizes = [16, 8], strides = [1, 1]} : vector<16x32xbf16> to vector<16x8xbf16>
    %cst_208 = arith.constant dense<0.000000e+00> : vector<8x16xf32>
    %538 = tpu.matmul %536, %537, %cst_208 {dimension_numbers = #tpu.dot_dimension_numbers<[1], [1], [0], [0], [0, 0, 1, 0], [], []>} : vector<8x8xbf16>, vector<16x8xbf16>, vector<8x16xf32> -> vector<8x16xf32>
    %cst_209 = arith.constant dense<0xFF800000> : vector<8xf32>
    %539 = vector.multi_reduction <maximumf>, %538, %cst_209 [1] : vector<8x16xf32> to vector<8xf32>
    %540 = vector.shape_cast %539 : vector<8xf32> to vector<8x1xf32>
    %541 = vector.broadcast %540 : vector<8x1xf32> to vector<8x16xf32>
    %542 = arith.subf %538, %541 : vector<8x16xf32>
    %543 = math.exp %542 : vector<8x16xf32>
    %cst_210 = arith.constant dense<0.000000e+00> : vector<8xf32>
    %544 = vector.multi_reduction <add>, %543, %cst_210 [1] : vector<8x16xf32> to vector<8xf32>
    %545 = vector.shape_cast %544 : vector<8xf32> to vector<8x1xf32>
    %546 = tpu.reciprocal %545 {approx = true} : vector<8x1xf32> -> vector<8x1xf32>
    %547 = vector.broadcast %546 : vector<8x1xf32> to vector<8x16xf32>
    %548 = arith.mulf %543, %547 : vector<8x16xf32>
    %549 = arith.truncf %548 : vector<8x16xf32> to vector<8x16xbf16>
    %550 = vector.extract_strided_slice %500 {offsets = [0, 16], sizes = [16, 8], strides = [1, 1]} : vector<16x32xbf16> to vector<16x8xbf16>
    %cst_211 = arith.constant dense<0.000000e+00> : vector<8x8xf32>
    %551 = tpu.matmul %549, %550, %cst_211 {dimension_numbers = #tpu.dot_dimension_numbers<[1], [0], [0], [1], [0, 0, 1, 1], [], []>} : vector<8x16xbf16>, vector<16x8xbf16>, vector<8x8xf32> -> vector<8x8xf32>
    %c0_212 = arith.constant 0 : index
    %c16_213 = arith.constant 16 : index
    %552 = vector.load %arg19[%c0_212, %c16_213] : memref<32x32xf32, #tpu.memory_space<vmem>>, vector<8x8xf32>
    tpu.vector_store %arg19[%c0_212, %c16_213], %551 {strides = array<i32>} : memref<32x32xf32, #tpu.memory_space<vmem>>, vector<8x8xf32>,
    %553 = vector.extract_strided_slice %501 {offsets = [0, 24], sizes = [8, 8], strides = [1, 1]} : vector<8x32xbf16> to vector<8x8xbf16>
    %554 = vector.extract_strided_slice %499 {offsets = [0, 24], sizes = [16, 8], strides = [1, 1]} : vector<16x32xbf16> to vector<16x8xbf16>
    %cst_214 = arith.constant dense<0.000000e+00> : vector<8x16xf32>
    %555 = tpu.matmul %553, %554, %cst_214 {dimension_numbers = #tpu.dot_dimension_numbers<[1], [1], [0], [0], [0, 0, 1, 0], [], []>} : vector<8x8xbf16>, vector<16x8xbf16>, vector<8x16xf32> -> vector<8x16xf32>
    %cst_215 = arith.constant dense<0xFF800000> : vector<8xf32>
    %556 = vector.multi_reduction <maximumf>, %555, %cst_215 [1] : vector<8x16xf32> to vector<8xf32>
    %557 = vector.shape_cast %556 : vector<8xf32> to vector<8x1xf32>
    %558 = vector.broadcast %557 : vector<8x1xf32> to vector<8x16xf32>
    %559 = arith.subf %555, %558 : vector<8x16xf32>
    %560 = math.exp %559 : vector<8x16xf32>
    %cst_216 = arith.constant dense<0.000000e+00> : vector<8xf32>
    %561 = vector.multi_reduction <add>, %560, %cst_216 [1] : vector<8x16xf32> to vector<8xf32>
    %562 = vector.shape_cast %561 : vector<8xf32> to vector<8x1xf32>
    %563 = tpu.reciprocal %562 {approx = true} : vector<8x1xf32> -> vector<8x1xf32>
    %564 = vector.broadcast %563 : vector<8x1xf32> to vector<8x16xf32>
    %565 = arith.mulf %560, %564 : vector<8x16xf32>
    %566 = arith.truncf %565 : vector<8x16xf32> to vector<8x16xbf16>
    %567 = vector.extract_strided_slice %500 {offsets = [0, 24], sizes = [16, 8], strides = [1, 1]} : vector<16x32xbf16> to vector<16x8xbf16>
    %cst_217 = arith.constant dense<0.000000e+00> : vector<8x8xf32>
    %568 = tpu.matmul %566, %567, %cst_217 {dimension_numbers = #tpu.dot_dimension_numbers<[1], [0], [0], [1], [0, 0, 1, 1], [], []>} : vector<8x16xbf16>, vector<16x8xbf16>, vector<8x8xf32> -> vector<8x8xf32>
    %c0_218 = arith.constant 0 : index
    %c24_219 = arith.constant 24 : index
    %569 = vector.load %arg19[%c0_218, %c24_219] : memref<32x32xf32, #tpu.memory_space<vmem>>, vector<8x8xf32>
    tpu.vector_store %arg19[%c0_218, %c24_219], %568 {strides = array<i32>} : memref<32x32xf32, #tpu.memory_space<vmem>>, vector<8x8xf32>,
    %570 = vector.extract_strided_slice %498 {offsets = [16, 0], sizes = [16, 32], strides = [1, 1]} : vector<64x64xbf16> to vector<16x32xbf16>
    %571 = vector.extract_strided_slice %498 {offsets = [16, 32], sizes = [16, 32], strides = [1, 1]} : vector<64x64xbf16> to vector<16x32xbf16>
    %572 = vector.extract_strided_slice %484 {offsets = [8, 0], sizes = [8, 32], strides = [1, 1]} : vector<32x32xbf16> to vector<8x32xbf16>
    %573 = vector.extract_strided_slice %572 {offsets = [0, 0], sizes = [8, 8], strides = [1, 1]} : vector<8x32xbf16> to vector<8x8xbf16>
    %574 = vector.extract_strided_slice %570 {offsets = [0, 0], sizes = [16, 8], strides = [1, 1]} : vector<16x32xbf16> to vector<16x8xbf16>
    %cst_220 = arith.constant dense<0.000000e+00> : vector<8x16xf32>
    %575 = tpu.matmul %573, %574, %cst_220 {dimension_numbers = #tpu.dot_dimension_numbers<[1], [1], [0], [0], [0, 0, 1, 0], [], []>} : vector<8x8xbf16>, vector<16x8xbf16>, vector<8x16xf32> -> vector<8x16xf32>
    %cst_221 = arith.constant dense<0xFF800000> : vector<8xf32>
    %576 = vector.multi_reduction <maximumf>, %575, %cst_221 [1] : vector<8x16xf32> to vector<8xf32>
    %577 = vector.shape_cast %576 : vector<8xf32> to vector<8x1xf32>
    %578 = vector.broadcast %577 : vector<8x1xf32> to vector<8x16xf32>
    %579 = arith.subf %575, %578 : vector<8x16xf32>
    %580 = math.exp %579 : vector<8x16xf32>
    %cst_222 = arith.constant dense<0.000000e+00> : vector<8xf32>
    %581 = vector.multi_reduction <add>, %580, %cst_222 [1] : vector<8x16xf32> to vector<8xf32>
    %582 = vector.shape_cast %581 : vector<8xf32> to vector<8x1xf32>
    %583 = tpu.reciprocal %582 {approx = true} : vector<8x1xf32> -> vector<8x1xf32>
    %584 = vector.broadcast %583 : vector<8x1xf32> to vector<8x16xf32>
    %585 = arith.mulf %580, %584 : vector<8x16xf32>
    %586 = arith.truncf %585 : vector<8x16xf32> to vector<8x16xbf16>
    %587 = vector.extract_strided_slice %571 {offsets = [0, 0], sizes = [16, 8], strides = [1, 1]} : vector<16x32xbf16> to vector<16x8xbf16>
    %cst_223 = arith.constant dense<0.000000e+00> : vector<8x8xf32>
    %588 = tpu.matmul %586, %587, %cst_223 {dimension_numbers = #tpu.dot_dimension_numbers<[1], [0], [0], [1], [0, 0, 1, 1], [], []>} : vector<8x16xbf16>, vector<16x8xbf16>, vector<8x8xf32> -> vector<8x8xf32>
    %c8_224 = arith.constant 8 : index
    %c0_225 = arith.constant 0 : index
    %589 = vector.load %arg19[%c8_224, %c0_225] : memref<32x32xf32, #tpu.memory_space<vmem>>, vector<8x8xf32>
    tpu.vector_store %arg19[%c8_224, %c0_225], %588 {strides = array<i32>} : memref<32x32xf32, #tpu.memory_space<vmem>>, vector<8x8xf32>,
    %590 = vector.extract_strided_slice %572 {offsets = [0, 8], sizes = [8, 8], strides = [1, 1]} : vector<8x32xbf16> to vector<8x8xbf16>
    %591 = vector.extract_strided_slice %570 {offsets = [0, 8], sizes = [16, 8], strides = [1, 1]} : vector<16x32xbf16> to vector<16x8xbf16>
    %cst_226 = arith.constant dense<0.000000e+00> : vector<8x16xf32>
    %592 = tpu.matmul %590, %591, %cst_226 {dimension_numbers = #tpu.dot_dimension_numbers<[1], [1], [0], [0], [0, 0, 1, 0], [], []>} : vector<8x8xbf16>, vector<16x8xbf16>, vector<8x16xf32> -> vector<8x16xf32>
    %cst_227 = arith.constant dense<0xFF800000> : vector<8xf32>
    %593 = vector.multi_reduction <maximumf>, %592, %cst_227 [1] : vector<8x16xf32> to vector<8xf32>
    %594 = vector.shape_cast %593 : vector<8xf32> to vector<8x1xf32>
    %595 = vector.broadcast %594 : vector<8x1xf32> to vector<8x16xf32>
    %596 = arith.subf %592, %595 : vector<8x16xf32>
    %597 = math.exp %596 : vector<8x16xf32>
    %cst_228 = arith.constant dense<0.000000e+00> : vector<8xf32>
    %598 = vector.multi_reduction <add>, %597, %cst_228 [1] : vector<8x16xf32> to vector<8xf32>
    %599 = vector.shape_cast %598 : vector<8xf32> to vector<8x1xf32>
    %600 = tpu.reciprocal %599 {approx = true} : vector<8x1xf32> -> vector<8x1xf32>
    %601 = vector.broadcast %600 : vector<8x1xf32> to vector<8x16xf32>
    %602 = arith.mulf %597, %601 : vector<8x16xf32>
    %603 = arith.truncf %602 : vector<8x16xf32> to vector<8x16xbf16>
    %604 = vector.extract_strided_slice %571 {offsets = [0, 8], sizes = [16, 8], strides = [1, 1]} : vector<16x32xbf16> to vector<16x8xbf16>
    %cst_229 = arith.constant dense<0.000000e+00> : vector<8x8xf32>
    %605 = tpu.matmul %603, %604, %cst_229 {dimension_numbers = #tpu.dot_dimension_numbers<[1], [0], [0], [1], [0, 0, 1, 1], [], []>} : vector<8x16xbf16>, vector<16x8xbf16>, vector<8x8xf32> -> vector<8x8xf32>
    %c8_230 = arith.constant 8 : index
    %c8_231 = arith.constant 8 : index
    %606 = vector.load %arg19[%c8_230, %c8_231] : memref<32x32xf32, #tpu.memory_space<vmem>>, vector<8x8xf32>
    tpu.vector_store %arg19[%c8_230, %c8_231], %605 {strides = array<i32>} : memref<32x32xf32, #tpu.memory_space<vmem>>, vector<8x8xf32>,
    %607 = vector.extract_strided_slice %572 {offsets = [0, 16], sizes = [8, 8], strides = [1, 1]} : vector<8x32xbf16> to vector<8x8xbf16>
    %608 = vector.extract_strided_slice %570 {offsets = [0, 16], sizes = [16, 8], strides = [1, 1]} : vector<16x32xbf16> to vector<16x8xbf16>
    %cst_232 = arith.constant dense<0.000000e+00> : vector<8x16xf32>
    %609 = tpu.matmul %607, %608, %cst_232 {dimension_numbers = #tpu.dot_dimension_numbers<[1], [1], [0], [0], [0, 0, 1, 0], [], []>} : vector<8x8xbf16>, vector<16x8xbf16>, vector<8x16xf32> -> vector<8x16xf32>
    %cst_233 = arith.constant dense<0xFF800000> : vector<8xf32>
    %610 = vector.multi_reduction <maximumf>, %609, %cst_233 [1] : vector<8x16xf32> to vector<8xf32>
    %611 = vector.shape_cast %610 : vector<8xf32> to vector<8x1xf32>
    %612 = vector.broadcast %611 : vector<8x1xf32> to vector<8x16xf32>
    %613 = arith.subf %609, %612 : vector<8x16xf32>
    %614 = math.exp %613 : vector<8x16xf32>
    %cst_234 = arith.constant dense<0.000000e+00> : vector<8xf32>
    %615 = vector.multi_reduction <add>, %614, %cst_234 [1] : vector<8x16xf32> to vector<8xf32>
    %616 = vector.shape_cast %615 : vector<8xf32> to vector<8x1xf32>
    %617 = tpu.reciprocal %616 {approx = true} : vector<8x1xf32> -> vector<8x1xf32>
    %618 = vector.broadcast %617 : vector<8x1xf32> to vector<8x16xf32>
    %619 = arith.mulf %614, %618 : vector<8x16xf32>
    %620 = arith.truncf %619 : vector<8x16xf32> to vector<8x16xbf16>
    %621 = vector.extract_strided_slice %571 {offsets = [0, 16], sizes = [16, 8], strides = [1, 1]} : vector<16x32xbf16> to vector<16x8xbf16>
    %cst_235 = arith.constant dense<0.000000e+00> : vector<8x8xf32>
    %622 = tpu.matmul %620, %621, %cst_235 {dimension_numbers = #tpu.dot_dimension_numbers<[1], [0], [0], [1], [0, 0, 1, 1], [], []>} : vector<8x16xbf16>, vector<16x8xbf16>, vector<8x8xf32> -> vector<8x8xf32>
    %c8_236 = arith.constant 8 : index
    %c16_237 = arith.constant 16 : index
    %623 = vector.load %arg19[%c8_236, %c16_237] : memref<32x32xf32, #tpu.memory_space<vmem>>, vector<8x8xf32>
    tpu.vector_store %arg19[%c8_236, %c16_237], %622 {strides = array<i32>} : memref<32x32xf32, #tpu.memory_space<vmem>>, vector<8x8xf32>,
    %624 = vector.extract_strided_slice %572 {offsets = [0, 24], sizes = [8, 8], strides = [1, 1]} : vector<8x32xbf16> to vector<8x8xbf16>
    %625 = vector.extract_strided_slice %570 {offsets = [0, 24], sizes = [16, 8], strides = [1, 1]} : vector<16x32xbf16> to vector<16x8xbf16>
    %cst_238 = arith.constant dense<0.000000e+00> : vector<8x16xf32>
    %626 = tpu.matmul %624, %625, %cst_238 {dimension_numbers = #tpu.dot_dimension_numbers<[1], [1], [0], [0], [0, 0, 1, 0], [], []>} : vector<8x8xbf16>, vector<16x8xbf16>, vector<8x16xf32> -> vector<8x16xf32>
    %cst_239 = arith.constant dense<0xFF800000> : vector<8xf32>
    %627 = vector.multi_reduction <maximumf>, %626, %cst_239 [1] : vector<8x16xf32> to vector<8xf32>
    %628 = vector.shape_cast %627 : vector<8xf32> to vector<8x1xf32>
    %629 = vector.broadcast %628 : vector<8x1xf32> to vector<8x16xf32>
    %630 = arith.subf %626, %629 : vector<8x16xf32>
    %631 = math.exp %630 : vector<8x16xf32>
    %cst_240 = arith.constant dense<0.000000e+00> : vector<8xf32>
    %632 = vector.multi_reduction <add>, %631, %cst_240 [1] : vector<8x16xf32> to vector<8xf32>
    %633 = vector.shape_cast %632 : vector<8xf32> to vector<8x1xf32>
    %634 = tpu.reciprocal %633 {approx = true} : vector<8x1xf32> -> vector<8x1xf32>
    %635 = vector.broadcast %634 : vector<8x1xf32> to vector<8x16xf32>
    %636 = arith.mulf %631, %635 : vector<8x16xf32>
    %637 = arith.truncf %636 : vector<8x16xf32> to vector<8x16xbf16>
    %638 = vector.extract_strided_slice %571 {offsets = [0, 24], sizes = [16, 8], strides = [1, 1]} : vector<16x32xbf16> to vector<16x8xbf16>
    %cst_241 = arith.constant dense<0.000000e+00> : vector<8x8xf32>
    %639 = tpu.matmul %637, %638, %cst_241 {dimension_numbers = #tpu.dot_dimension_numbers<[1], [0], [0], [1], [0, 0, 1, 1], [], []>} : vector<8x16xbf16>, vector<16x8xbf16>, vector<8x8xf32> -> vector<8x8xf32>
    %c8_242 = arith.constant 8 : index
    %c24_243 = arith.constant 24 : index
    %640 = vector.load %arg19[%c8_242, %c24_243] : memref<32x32xf32, #tpu.memory_space<vmem>>, vector<8x8xf32>
    tpu.vector_store %arg19[%c8_242, %c24_243], %639 {strides = array<i32>} : memref<32x32xf32, #tpu.memory_space<vmem>>, vector<8x8xf32>,
    %641 = vector.extract_strided_slice %498 {offsets = [32, 0], sizes = [16, 32], strides = [1, 1]} : vector<64x64xbf16> to vector<16x32xbf16>
    %642 = vector.extract_strided_slice %498 {offsets = [32, 32], sizes = [16, 32], strides = [1, 1]} : vector<64x64xbf16> to vector<16x32xbf16>
    %643 = vector.extract_strided_slice %484 {offsets = [16, 0], sizes = [8, 32], strides = [1, 1]} : vector<32x32xbf16> to vector<8x32xbf16>
    %644 = vector.extract_strided_slice %643 {offsets = [0, 0], sizes = [8, 8], strides = [1, 1]} : vector<8x32xbf16> to vector<8x8xbf16>
    %645 = vector.extract_strided_slice %641 {offsets = [0, 0], sizes = [16, 8], strides = [1, 1]} : vector<16x32xbf16> to vector<16x8xbf16>
    %cst_244 = arith.constant dense<0.000000e+00> : vector<8x16xf32>
    %646 = tpu.matmul %644, %645, %cst_244 {dimension_numbers = #tpu.dot_dimension_numbers<[1], [1], [0], [0], [0, 0, 1, 0], [], []>} : vector<8x8xbf16>, vector<16x8xbf16>, vector<8x16xf32> -> vector<8x16xf32>
    %cst_245 = arith.constant dense<0xFF800000> : vector<8xf32>
    %647 = vector.multi_reduction <maximumf>, %646, %cst_245 [1] : vector<8x16xf32> to vector<8xf32>
    %648 = vector.shape_cast %647 : vector<8xf32> to vector<8x1xf32>
    %649 = vector.broadcast %648 : vector<8x1xf32> to vector<8x16xf32>
    %650 = arith.subf %646, %649 : vector<8x16xf32>
    %651 = math.exp %650 : vector<8x16xf32>
    %cst_246 = arith.constant dense<0.000000e+00> : vector<8xf32>
    %652 = vector.multi_reduction <add>, %651, %cst_246 [1] : vector<8x16xf32> to vector<8xf32>
    %653 = vector.shape_cast %652 : vector<8xf32> to vector<8x1xf32>
    %654 = tpu.reciprocal %653 {approx = true} : vector<8x1xf32> -> vector<8x1xf32>
    %655 = vector.broadcast %654 : vector<8x1xf32> to vector<8x16xf32>
    %656 = arith.mulf %651, %655 : vector<8x16xf32>
    %657 = arith.truncf %656 : vector<8x16xf32> to vector<8x16xbf16>
    %658 = vector.extract_strided_slice %642 {offsets = [0, 0], sizes = [16, 8], strides = [1, 1]} : vector<16x32xbf16> to vector<16x8xbf16>
    %cst_247 = arith.constant dense<0.000000e+00> : vector<8x8xf32>
    %659 = tpu.matmul %657, %658, %cst_247 {dimension_numbers = #tpu.dot_dimension_numbers<[1], [0], [0], [1], [0, 0, 1, 1], [], []>} : vector<8x16xbf16>, vector<16x8xbf16>, vector<8x8xf32> -> vector<8x8xf32>
    %c16_248 = arith.constant 16 : index
    %c0_249 = arith.constant 0 : index
    %660 = vector.load %arg19[%c16_248, %c0_249] : memref<32x32xf32, #tpu.memory_space<vmem>>, vector<8x8xf32>
    tpu.vector_store %arg19[%c16_248, %c0_249], %659 {strides = array<i32>} : memref<32x32xf32, #tpu.memory_space<vmem>>, vector<8x8xf32>,
    %661 = vector.extract_strided_slice %643 {offsets = [0, 8], sizes = [8, 8], strides = [1, 1]} : vector<8x32xbf16> to vector<8x8xbf16>
    %662 = vector.extract_strided_slice %641 {offsets = [0, 8], sizes = [16, 8], strides = [1, 1]} : vector<16x32xbf16> to vector<16x8xbf16>
    %cst_250 = arith.constant dense<0.000000e+00> : vector<8x16xf32>
    %663 = tpu.matmul %661, %662, %cst_250 {dimension_numbers = #tpu.dot_dimension_numbers<[1], [1], [0], [0], [0, 0, 1, 0], [], []>} : vector<8x8xbf16>, vector<16x8xbf16>, vector<8x16xf32> -> vector<8x16xf32>
    %cst_251 = arith.constant dense<0xFF800000> : vector<8xf32>
    %664 = vector.multi_reduction <maximumf>, %663, %cst_251 [1] : vector<8x16xf32> to vector<8xf32>
    %665 = vector.shape_cast %664 : vector<8xf32> to vector<8x1xf32>
    %666 = vector.broadcast %665 : vector<8x1xf32> to vector<8x16xf32>
    %667 = arith.subf %663, %666 : vector<8x16xf32>
    %668 = math.exp %667 : vector<8x16xf32>
    %cst_252 = arith.constant dense<0.000000e+00> : vector<8xf32>
    %669 = vector.multi_reduction <add>, %668, %cst_252 [1] : vector<8x16xf32> to vector<8xf32>
    %670 = vector.shape_cast %669 : vector<8xf32> to vector<8x1xf32>
    %671 = tpu.reciprocal %670 {approx = true} : vector<8x1xf32> -> vector<8x1xf32>
    %672 = vector.broadcast %671 : vector<8x1xf32> to vector<8x16xf32>
    %673 = arith.mulf %668, %672 : vector<8x16xf32>
    %674 = arith.truncf %673 : vector<8x16xf32> to vector<8x16xbf16>
    %675 = vector.extract_strided_slice %642 {offsets = [0, 8], sizes = [16, 8], strides = [1, 1]} : vector<16x32xbf16> to vector<16x8xbf16>
    %cst_253 = arith.constant dense<0.000000e+00> : vector<8x8xf32>
    %676 = tpu.matmul %674, %675, %cst_253 {dimension_numbers = #tpu.dot_dimension_numbers<[1], [0], [0], [1], [0, 0, 1, 1], [], []>} : vector<8x16xbf16>, vector<16x8xbf16>, vector<8x8xf32> -> vector<8x8xf32>
    %c16_254 = arith.constant 16 : index
    %c8_255 = arith.constant 8 : index
    %677 = vector.load %arg19[%c16_254, %c8_255] : memref<32x32xf32, #tpu.memory_space<vmem>>, vector<8x8xf32>
    tpu.vector_store %arg19[%c16_254, %c8_255], %676 {strides = array<i32>} : memref<32x32xf32, #tpu.memory_space<vmem>>, vector<8x8xf32>,
    %678 = vector.extract_strided_slice %643 {offsets = [0, 16], sizes = [8, 8], strides = [1, 1]} : vector<8x32xbf16> to vector<8x8xbf16>
    %679 = vector.extract_strided_slice %641 {offsets = [0, 16], sizes = [16, 8], strides = [1, 1]} : vector<16x32xbf16> to vector<16x8xbf16>
    %cst_256 = arith.constant dense<0.000000e+00> : vector<8x16xf32>
    %680 = tpu.matmul %678, %679, %cst_256 {dimension_numbers = #tpu.dot_dimension_numbers<[1], [1], [0], [0], [0, 0, 1, 0], [], []>} : vector<8x8xbf16>, vector<16x8xbf16>, vector<8x16xf32> -> vector<8x16xf32>
    %cst_257 = arith.constant dense<0xFF800000> : vector<8xf32>
    %681 = vector.multi_reduction <maximumf>, %680, %cst_257 [1] : vector<8x16xf32> to vector<8xf32>
    %682 = vector.shape_cast %681 : vector<8xf32> to vector<8x1xf32>
    %683 = vector.broadcast %682 : vector<8x1xf32> to vector<8x16xf32>
    %684 = arith.subf %680, %683 : vector<8x16xf32>
    %685 = math.exp %684 : vector<8x16xf32>
    %cst_258 = arith.constant dense<0.000000e+00> : vector<8xf32>
    %686 = vector.multi_reduction <add>, %685, %cst_258 [1] : vector<8x16xf32> to vector<8xf32>
    %687 = vector.shape_cast %686 : vector<8xf32> to vector<8x1xf32>
    %688 = tpu.reciprocal %687 {approx = true} : vector<8x1xf32> -> vector<8x1xf32>
    %689 = vector.broadcast %688 : vector<8x1xf32> to vector<8x16xf32>
    %690 = arith.mulf %685, %689 : vector<8x16xf32>
    %691 = arith.truncf %690 : vector<8x16xf32> to vector<8x16xbf16>
    %692 = vector.extract_strided_slice %642 {offsets = [0, 16], sizes = [16, 8], strides = [1, 1]} : vector<16x32xbf16> to vector<16x8xbf16>
    %cst_259 = arith.constant dense<0.000000e+00> : vector<8x8xf32>
    %693 = tpu.matmul %691, %692, %cst_259 {dimension_numbers = #tpu.dot_dimension_numbers<[1], [0], [0], [1], [0, 0, 1, 1], [], []>} : vector<8x16xbf16>, vector<16x8xbf16>, vector<8x8xf32> -> vector<8x8xf32>
    %c16_260 = arith.constant 16 : index
    %c16_261 = arith.constant 16 : index
    %694 = vector.load %arg19[%c16_260, %c16_261] : memref<32x32xf32, #tpu.memory_space<vmem>>, vector<8x8xf32>
    tpu.vector_store %arg19[%c16_260, %c16_261], %693 {strides = array<i32>} : memref<32x32xf32, #tpu.memory_space<vmem>>, vector<8x8xf32>,
    %695 = vector.extract_strided_slice %643 {offsets = [0, 24], sizes = [8, 8], strides = [1, 1]} : vector<8x32xbf16> to vector<8x8xbf16>
    %696 = vector.extract_strided_slice %641 {offsets = [0, 24], sizes = [16, 8], strides = [1, 1]} : vector<16x32xbf16> to vector<16x8xbf16>
    %cst_262 = arith.constant dense<0.000000e+00> : vector<8x16xf32>
    %697 = tpu.matmul %695, %696, %cst_262 {dimension_numbers = #tpu.dot_dimension_numbers<[1], [1], [0], [0], [0, 0, 1, 0], [], []>} : vector<8x8xbf16>, vector<16x8xbf16>, vector<8x16xf32> -> vector<8x16xf32>
    %cst_263 = arith.constant dense<0xFF800000> : vector<8xf32>
    %698 = vector.multi_reduction <maximumf>, %697, %cst_263 [1] : vector<8x16xf32> to vector<8xf32>
    %699 = vector.shape_cast %698 : vector<8xf32> to vector<8x1xf32>
    %700 = vector.broadcast %699 : vector<8x1xf32> to vector<8x16xf32>
    %701 = arith.subf %697, %700 : vector<8x16xf32>
    %702 = math.exp %701 : vector<8x16xf32>
    %cst_264 = arith.constant dense<0.000000e+00> : vector<8xf32>
    %703 = vector.multi_reduction <add>, %702, %cst_264 [1] : vector<8x16xf32> to vector<8xf32>
    %704 = vector.shape_cast %703 : vector<8xf32> to vector<8x1xf32>
    %705 = tpu.reciprocal %704 {approx = true} : vector<8x1xf32> -> vector<8x1xf32>
    %706 = vector.broadcast %705 : vector<8x1xf32> to vector<8x16xf32>
    %707 = arith.mulf %702, %706 : vector<8x16xf32>
    %708 = arith.truncf %707 : vector<8x16xf32> to vector<8x16xbf16>
    %709 = vector.extract_strided_slice %642 {offsets = [0, 24], sizes = [16, 8], strides = [1, 1]} : vector<16x32xbf16> to vector<16x8xbf16>
    %cst_265 = arith.constant dense<0.000000e+00> : vector<8x8xf32>
    %710 = tpu.matmul %708, %709, %cst_265 {dimension_numbers = #tpu.dot_dimension_numbers<[1], [0], [0], [1], [0, 0, 1, 1], [], []>} : vector<8x16xbf16>, vector<16x8xbf16>, vector<8x8xf32> -> vector<8x8xf32>
    %c16_266 = arith.constant 16 : index
    %c24_267 = arith.constant 24 : index
    %711 = vector.load %arg19[%c16_266, %c24_267] : memref<32x32xf32, #tpu.memory_space<vmem>>, vector<8x8xf32>
    tpu.vector_store %arg19[%c16_266, %c24_267], %710 {strides = array<i32>} : memref<32x32xf32, #tpu.memory_space<vmem>>, vector<8x8xf32>,
    %712 = vector.extract_strided_slice %498 {offsets = [48, 0], sizes = [16, 32], strides = [1, 1]} : vector<64x64xbf16> to vector<16x32xbf16>
    %713 = vector.extract_strided_slice %498 {offsets = [48, 32], sizes = [16, 32], strides = [1, 1]} : vector<64x64xbf16> to vector<16x32xbf16>
    %714 = vector.extract_strided_slice %484 {offsets = [24, 0], sizes = [8, 32], strides = [1, 1]} : vector<32x32xbf16> to vector<8x32xbf16>
    %715 = vector.extract_strided_slice %714 {offsets = [0, 0], sizes = [8, 8], strides = [1, 1]} : vector<8x32xbf16> to vector<8x8xbf16>
    %716 = vector.extract_strided_slice %712 {offsets = [0, 0], sizes = [16, 8], strides = [1, 1]} : vector<16x32xbf16> to vector<16x8xbf16>
    %cst_268 = arith.constant dense<0.000000e+00> : vector<8x16xf32>
    %717 = tpu.matmul %715, %716, %cst_268 {dimension_numbers = #tpu.dot_dimension_numbers<[1], [1], [0], [0], [0, 0, 1, 0], [], []>} : vector<8x8xbf16>, vector<16x8xbf16>, vector<8x16xf32> -> vector<8x16xf32>
    %cst_269 = arith.constant dense<0xFF800000> : vector<8xf32>
    %718 = vector.multi_reduction <maximumf>, %717, %cst_269 [1] : vector<8x16xf32> to vector<8xf32>
    %719 = vector.shape_cast %718 : vector<8xf32> to vector<8x1xf32>
    %720 = vector.broadcast %719 : vector<8x1xf32> to vector<8x16xf32>
    %721 = arith.subf %717, %720 : vector<8x16xf32>
    %722 = math.exp %721 : vector<8x16xf32>
    %cst_270 = arith.constant dense<0.000000e+00> : vector<8xf32>
    %723 = vector.multi_reduction <add>, %722, %cst_270 [1] : vector<8x16xf32> to vector<8xf32>
    %724 = vector.shape_cast %723 : vector<8xf32> to vector<8x1xf32>
    %725 = tpu.reciprocal %724 {approx = true} : vector<8x1xf32> -> vector<8x1xf32>
    %726 = vector.broadcast %725 : vector<8x1xf32> to vector<8x16xf32>
    %727 = arith.mulf %722, %726 : vector<8x16xf32>
    %728 = arith.truncf %727 : vector<8x16xf32> to vector<8x16xbf16>
    %729 = vector.extract_strided_slice %713 {offsets = [0, 0], sizes = [16, 8], strides = [1, 1]} : vector<16x32xbf16> to vector<16x8xbf16>
    %cst_271 = arith.constant dense<0.000000e+00> : vector<8x8xf32>
    %730 = tpu.matmul %728, %729, %cst_271 {dimension_numbers = #tpu.dot_dimension_numbers<[1], [0], [0], [1], [0, 0, 1, 1], [], []>} : vector<8x16xbf16>, vector<16x8xbf16>, vector<8x8xf32> -> vector<8x8xf32>
    %c24_272 = arith.constant 24 : index
    %c0_273 = arith.constant 0 : index
    %731 = vector.load %arg19[%c24_272, %c0_273] : memref<32x32xf32, #tpu.memory_space<vmem>>, vector<8x8xf32>
    tpu.vector_store %arg19[%c24_272, %c0_273], %730 {strides = array<i32>} : memref<32x32xf32, #tpu.memory_space<vmem>>, vector<8x8xf32>,
    %732 = vector.extract_strided_slice %714 {offsets = [0, 8], sizes = [8, 8], strides = [1, 1]} : vector<8x32xbf16> to vector<8x8xbf16>
    %733 = vector.extract_strided_slice %712 {offsets = [0, 8], sizes = [16, 8], strides = [1, 1]} : vector<16x32xbf16> to vector<16x8xbf16>
    %cst_274 = arith.constant dense<0.000000e+00> : vector<8x16xf32>
    %734 = tpu.matmul %732, %733, %cst_274 {dimension_numbers = #tpu.dot_dimension_numbers<[1], [1], [0], [0], [0, 0, 1, 0], [], []>} : vector<8x8xbf16>, vector<16x8xbf16>, vector<8x16xf32> -> vector<8x16xf32>
    %cst_275 = arith.constant dense<0xFF800000> : vector<8xf32>
    %735 = vector.multi_reduction <maximumf>, %734, %cst_275 [1] : vector<8x16xf32> to vector<8xf32>
    %736 = vector.shape_cast %735 : vector<8xf32> to vector<8x1xf32>
    %737 = vector.broadcast %736 : vector<8x1xf32> to vector<8x16xf32>
    %738 = arith.subf %734, %737 : vector<8x16xf32>
    %739 = math.exp %738 : vector<8x16xf32>
    %cst_276 = arith.constant dense<0.000000e+00> : vector<8xf32>
    %740 = vector.multi_reduction <add>, %739, %cst_276 [1] : vector<8x16xf32> to vector<8xf32>
    %741 = vector.shape_cast %740 : vector<8xf32> to vector<8x1xf32>
    %742 = tpu.reciprocal %741 {approx = true} : vector<8x1xf32> -> vector<8x1xf32>
    %743 = vector.broadcast %742 : vector<8x1xf32> to vector<8x16xf32>
    %744 = arith.mulf %739, %743 : vector<8x16xf32>
    %745 = arith.truncf %744 : vector<8x16xf32> to vector<8x16xbf16>
    %746 = vector.extract_strided_slice %713 {offsets = [0, 8], sizes = [16, 8], strides = [1, 1]} : vector<16x32xbf16> to vector<16x8xbf16>
    %cst_277 = arith.constant dense<0.000000e+00> : vector<8x8xf32>
    %747 = tpu.matmul %745, %746, %cst_277 {dimension_numbers = #tpu.dot_dimension_numbers<[1], [0], [0], [1], [0, 0, 1, 1], [], []>} : vector<8x16xbf16>, vector<16x8xbf16>, vector<8x8xf32> -> vector<8x8xf32>
    %c24_278 = arith.constant 24 : index
    %c8_279 = arith.constant 8 : index
    %748 = vector.load %arg19[%c24_278, %c8_279] : memref<32x32xf32, #tpu.memory_space<vmem>>, vector<8x8xf32>
    tpu.vector_store %arg19[%c24_278, %c8_279], %747 {strides = array<i32>} : memref<32x32xf32, #tpu.memory_space<vmem>>, vector<8x8xf32>,
    %749 = vector.extract_strided_slice %714 {offsets = [0, 16], sizes = [8, 8], strides = [1, 1]} : vector<8x32xbf16> to vector<8x8xbf16>
    %750 = vector.extract_strided_slice %712 {offsets = [0, 16], sizes = [16, 8], strides = [1, 1]} : vector<16x32xbf16> to vector<16x8xbf16>
    %cst_280 = arith.constant dense<0.000000e+00> : vector<8x16xf32>
    %751 = tpu.matmul %749, %750, %cst_280 {dimension_numbers = #tpu.dot_dimension_numbers<[1], [1], [0], [0], [0, 0, 1, 0], [], []>} : vector<8x8xbf16>, vector<16x8xbf16>, vector<8x16xf32> -> vector<8x16xf32>
    %cst_281 = arith.constant dense<0xFF800000> : vector<8xf32>
    %752 = vector.multi_reduction <maximumf>, %751, %cst_281 [1] : vector<8x16xf32> to vector<8xf32>
    %753 = vector.shape_cast %752 : vector<8xf32> to vector<8x1xf32>
    %754 = vector.broadcast %753 : vector<8x1xf32> to vector<8x16xf32>
    %755 = arith.subf %751, %754 : vector<8x16xf32>
    %756 = math.exp %755 : vector<8x16xf32>
    %cst_282 = arith.constant dense<0.000000e+00> : vector<8xf32>
    %757 = vector.multi_reduction <add>, %756, %cst_282 [1] : vector<8x16xf32> to vector<8xf32>
    %758 = vector.shape_cast %757 : vector<8xf32> to vector<8x1xf32>
    %759 = tpu.reciprocal %758 {approx = true} : vector<8x1xf32> -> vector<8x1xf32>
    %760 = vector.broadcast %759 : vector<8x1xf32> to vector<8x16xf32>
    %761 = arith.mulf %756, %760 : vector<8x16xf32>
    %762 = arith.truncf %761 : vector<8x16xf32> to vector<8x16xbf16>
    %763 = vector.extract_strided_slice %713 {offsets = [0, 16], sizes = [16, 8], strides = [1, 1]} : vector<16x32xbf16> to vector<16x8xbf16>
    %cst_283 = arith.constant dense<0.000000e+00> : vector<8x8xf32>
    %764 = tpu.matmul %762, %763, %cst_283 {dimension_numbers = #tpu.dot_dimension_numbers<[1], [0], [0], [1], [0, 0, 1, 1], [], []>} : vector<8x16xbf16>, vector<16x8xbf16>, vector<8x8xf32> -> vector<8x8xf32>
    %c24_284 = arith.constant 24 : index
    %c16_285 = arith.constant 16 : index
    %765 = vector.load %arg19[%c24_284, %c16_285] : memref<32x32xf32, #tpu.memory_space<vmem>>, vector<8x8xf32>
    tpu.vector_store %arg19[%c24_284, %c16_285], %764 {strides = array<i32>} : memref<32x32xf32, #tpu.memory_space<vmem>>, vector<8x8xf32>,
    %766 = vector.extract_strided_slice %714 {offsets = [0, 24], sizes = [8, 8], strides = [1, 1]} : vector<8x32xbf16> to vector<8x8xbf16>
    %767 = vector.extract_strided_slice %712 {offsets = [0, 24], sizes = [16, 8], strides = [1, 1]} : vector<16x32xbf16> to vector<16x8xbf16>
    %cst_286 = arith.constant dense<0.000000e+00> : vector<8x16xf32>
    %768 = tpu.matmul %766, %767, %cst_286 {dimension_numbers = #tpu.dot_dimension_numbers<[1], [1], [0], [0], [0, 0, 1, 0], [], []>} : vector<8x8xbf16>, vector<16x8xbf16>, vector<8x16xf32> -> vector<8x16xf32>
    %cst_287 = arith.constant dense<0xFF800000> : vector<8xf32>
    %769 = vector.multi_reduction <maximumf>, %768, %cst_287 [1] : vector<8x16xf32> to vector<8xf32>
    %770 = vector.shape_cast %769 : vector<8xf32> to vector<8x1xf32>
    %771 = vector.broadcast %770 : vector<8x1xf32> to vector<8x16xf32>
    %772 = arith.subf %768, %771 : vector<8x16xf32>
    %773 = math.exp %772 : vector<8x16xf32>
    %cst_288 = arith.constant dense<0.000000e+00> : vector<8xf32>
    %774 = vector.multi_reduction <add>, %773, %cst_288 [1] : vector<8x16xf32> to vector<8xf32>
    %775 = vector.shape_cast %774 : vector<8xf32> to vector<8x1xf32>
    %776 = tpu.reciprocal %775 {approx = true} : vector<8x1xf32> -> vector<8x1xf32>
    %777 = vector.broadcast %776 : vector<8x1xf32> to vector<8x16xf32>
    %778 = arith.mulf %773, %777 : vector<8x16xf32>
    %779 = arith.truncf %778 : vector<8x16xf32> to vector<8x16xbf16>
    %780 = vector.extract_strided_slice %713 {offsets = [0, 24], sizes = [16, 8], strides = [1, 1]} : vector<16x32xbf16> to vector<16x8xbf16>
    %cst_289 = arith.constant dense<0.000000e+00> : vector<8x8xf32>
    %781 = tpu.matmul %779, %780, %cst_289 {dimension_numbers = #tpu.dot_dimension_numbers<[1], [0], [0], [1], [0, 0, 1, 1], [], []>} : vector<8x16xbf16>, vector<16x8xbf16>, vector<8x8xf32> -> vector<8x8xf32>
    %c24_290 = arith.constant 24 : index
    %c24_291 = arith.constant 24 : index
    %782 = vector.load %arg19[%c24_290, %c24_291] : memref<32x32xf32, #tpu.memory_space<vmem>>, vector<8x8xf32>
    tpu.vector_store %arg19[%c24_290, %c24_291], %781 {strides = array<i32>} : memref<32x32xf32, #tpu.memory_space<vmem>>, vector<8x8xf32>,
    %c0_292 = arith.constant 0 : index
    %c0_293 = arith.constant 0 : index
    %783 = vector.load %arg19[%c0_292, %c0_293] : memref<32x32xf32, #tpu.memory_space<vmem>>, vector<32x32xf32>
    %784 = arith.truncf %783 : vector<32x32xf32> to vector<32x32xbf16>
    %c1_294 = arith.constant 1 : index
    %c0_295 = arith.constant 0 : index
    %c0_296 = arith.constant 0 : index
    %785 = vector.load %arg11[%c1_294, %c0_295, %c0_296] : memref<2x32x32xbf16, #tpu.memory_space<vmem>>, vector<1x32x32xbf16>
    %786 = vector.shape_cast %785 : vector<1x32x32xbf16> to vector<32x32xbf16>
    %cst_297 = arith.constant dense<0.000000e+00> : vector<32x32xf32>
    %787 = tpu.matmul %784, %786, %cst_297 {dimension_numbers = #tpu.dot_dimension_numbers<[1], [0], [0], [1], [0, 0, 1, 1], [], []>} : vector<32x32xbf16>, vector<32x32xbf16>, vector<32x32xf32> -> vector<32x32xf32>
    %788 = arith.addf %445, %787 : vector<32x32xf32>
    %c1_298 = arith.constant 1 : index
    %c0_299 = arith.constant 0 : index
    %c0_300 = arith.constant 0 : index
    %789 = vector.load %arg12[%c1_298, %c0_299, %c0_300] : memref<2x1x32xf32, #tpu.memory_space<vmem>>, vector<1x1x32xf32>
    %790 = vector.shape_cast %789 : vector<1x1x32xf32> to vector<1x32xf32>
    %c1_301 = arith.constant 1 : index
    %c0_302 = arith.constant 0 : index
    %c0_303 = arith.constant 0 : index
    %791 = vector.load %arg13[%c1_301, %c0_302, %c0_303] : memref<2x1x32xf32, #tpu.memory_space<vmem>>, vector<1x1x32xf32>
    %792 = vector.shape_cast %791 : vector<1x1x32xf32> to vector<1x32xf32>
    %cst_304 = arith.constant dense<0.000000e+00> : vector<32xf32>
    %793 = vector.multi_reduction <add>, %788, %cst_304 [1] : vector<32x32xf32> to vector<32xf32>
    %794 = vector.shape_cast %793 : vector<32xf32> to vector<32x1xf32>
    %cst_305 = arith.constant 3.200000e+01 : f32
    %795 = vector.broadcast %cst_305 : f32 to vector<32x1xf32>
    %796 = arith.divf %794, %795 : vector<32x1xf32>
    %797 = vector.broadcast %796 : vector<32x1xf32> to vector<32x32xf32>
    %798 = arith.subf %788, %797 : vector<32x32xf32>
    %799 = arith.mulf %798, %798 : vector<32x32xf32>
    %cst_306 = arith.constant dense<0.000000e+00> : vector<32xf32>
    %800 = vector.multi_reduction <add>, %799, %cst_306 [1] : vector<32x32xf32> to vector<32xf32>
    %801 = vector.shape_cast %800 : vector<32xf32> to vector<32x1xf32>
    %cst_307 = arith.constant 3.200000e+01 : f32
    %802 = vector.broadcast %cst_307 : f32 to vector<32x1xf32>
    %803 = arith.divf %801, %802 : vector<32x1xf32>
    %804 = vector.broadcast %796 : vector<32x1xf32> to vector<32x32xf32>
    %805 = arith.subf %788, %804 : vector<32x32xf32>
    %cst_308 = arith.constant 9.99999974E-6 : f32
    %806 = vector.broadcast %cst_308 : f32 to vector<32x1xf32>
    %807 = arith.addf %803, %806 : vector<32x1xf32>
    %808 = math.rsqrt %807 : vector<32x1xf32>
    %809 = vector.broadcast %808 : vector<32x1xf32> to vector<32x32xf32>
    %810 = arith.mulf %805, %809 : vector<32x32xf32>
    %811 = vector.broadcast %790 : vector<1x32xf32> to vector<32x32xf32>
    %812 = arith.mulf %810, %811 : vector<32x32xf32>
    %813 = vector.broadcast %792 : vector<1x32xf32> to vector<32x32xf32>
    %814 = arith.addf %812, %813 : vector<32x32xf32>
    %815 = arith.truncf %814 : vector<32x32xf32> to vector<32x32xbf16>
    %c1_309 = arith.constant 1 : index
    %c0_310 = arith.constant 0 : index
    %c0_311 = arith.constant 0 : index
    %816 = vector.load %arg14[%c1_309, %c0_310, %c0_311] : memref<2x32x128xbf16, #tpu.memory_space<vmem>>, vector<1x32x128xbf16>
    %817 = vector.shape_cast %816 : vector<1x32x128xbf16> to vector<32x128xbf16>
    %cst_312 = arith.constant dense<0.000000e+00> : vector<32x128xf32>
    %818 = tpu.matmul %815, %817, %cst_312 {dimension_numbers = #tpu.dot_dimension_numbers<[1], [0], [0], [1], [0, 0, 1, 1], [], []>} : vector<32x32xbf16>, vector<32x128xbf16>, vector<32x128xf32> -> vector<32x128xf32>
    %cst_313 = arith.constant 5.000000e-01 : f32
    %819 = vector.broadcast %cst_313 : f32 to vector<32x128xf32>
    %820 = arith.mulf %819, %818 : vector<32x128xf32>
    %cst_314 = arith.constant 0.707106769 : f32
    %821 = vector.broadcast %cst_314 : f32 to vector<32x128xf32>
    %822 = arith.mulf %818, %821 : vector<32x128xf32>
    %823 = math.absf %822 : vector<32x128xf32>
    %cst_315 = arith.constant 0.327591091 : f32
    %824 = vector.broadcast %cst_315 : f32 to vector<32x128xf32>
    %825 = arith.mulf %824, %823 : vector<32x128xf32>
    %cst_316 = arith.constant 1.000000e+00 : f32
    %826 = vector.broadcast %cst_316 : f32 to vector<32x128xf32>
    %827 = arith.addf %826, %825 : vector<32x128xf32>
    %cst_317 = arith.constant 1.000000e+00 : f32
    %828 = vector.broadcast %cst_317 : f32 to vector<32x128xf32>
    %829 = arith.divf %828, %827 : vector<32x128xf32>
    %cst_318 = arith.constant 1.06140542 : f32
    %830 = vector.broadcast %cst_318 : f32 to vector<32x128xf32>
    %831 = arith.mulf %830, %829 : vector<32x128xf32>
    %cst_319 = arith.constant -1.45315206 : f32
    %832 = vector.broadcast %cst_319 : f32 to vector<32x128xf32>
    %833 = arith.addf %831, %832 : vector<32x128xf32>
    %834 = arith.mulf %833, %829 : vector<32x128xf32>
    %cst_320 = arith.constant 1.42141378 : f32
    %835 = vector.broadcast %cst_320 : f32 to vector<32x128xf32>
    %836 = arith.addf %834, %835 : vector<32x128xf32>
    %837 = arith.mulf %836, %829 : vector<32x128xf32>
    %cst_321 = arith.constant -0.284496725 : f32
    %838 = vector.broadcast %cst_321 : f32 to vector<32x128xf32>
    %839 = arith.addf %837, %838 : vector<32x128xf32>
    %840 = arith.mulf %839, %829 : vector<32x128xf32>
    %cst_322 = arith.constant 0.254829586 : f32
    %841 = vector.broadcast %cst_322 : f32 to vector<32x128xf32>
    %842 = arith.addf %840, %841 : vector<32x128xf32>
    %843 = arith.mulf %842, %829 : vector<32x128xf32>
    %cst_323 = arith.constant 0.000000e+00 : f32
    %844 = vector.broadcast %cst_323 : f32 to vector<32x128xf32>
    %845 = arith.subf %844, %823 : vector<32x128xf32>
    %846 = arith.mulf %845, %823 : vector<32x128xf32>
    %847 = math.exp %846 : vector<32x128xf32>
    %848 = arith.mulf %843, %847 : vector<32x128xf32>
    %cst_324 = arith.constant 1.000000e+00 : f32
    %849 = vector.broadcast %cst_324 : f32 to vector<32x128xf32>
    %850 = arith.subf %849, %848 : vector<32x128xf32>
    %cst_325 = arith.constant 0.000000e+00 : f32
    %851 = vector.broadcast %cst_325 : f32 to vector<32x128xf32>
    %852 = arith.cmpf oge, %822, %851 : vector<32x128xf32>
    %cst_326 = arith.constant 0.000000e+00 : f32
    %853 = vector.broadcast %cst_326 : f32 to vector<32x128xf32>
    %854 = arith.subf %853, %850 : vector<32x128xf32>
    %855 = arith.select %852, %850, %854 : vector<32x128xi1>, vector<32x128xf32>
    %cst_327 = arith.constant 1.000000e+00 : f32
    %856 = vector.broadcast %cst_327 : f32 to vector<32x128xf32>
    %857 = arith.addf %856, %855 : vector<32x128xf32>
    %858 = arith.mulf %820, %857 : vector<32x128xf32>
    %859 = arith.truncf %858 : vector<32x128xf32> to vector<32x128xbf16>
    %c1_328 = arith.constant 1 : index
    %c0_329 = arith.constant 0 : index
    %c0_330 = arith.constant 0 : index
    %860 = vector.load %arg15[%c1_328, %c0_329, %c0_330] : memref<2x128x32xbf16, #tpu.memory_space<vmem>>, vector<1x128x32xbf16>
    %861 = vector.shape_cast %860 : vector<1x128x32xbf16> to vector<128x32xbf16>
    %cst_331 = arith.constant dense<0.000000e+00> : vector<32x32xf32>
    %862 = tpu.matmul %859, %861, %cst_331 {dimension_numbers = #tpu.dot_dimension_numbers<[1], [0], [0], [1], [0, 0, 1, 1], [], []>} : vector<32x128xbf16>, vector<128x32xbf16>, vector<32x32xf32> -> vector<32x32xf32>
    %863 = arith.addf %788, %862 : vector<32x32xf32>
    %c0_332 = arith.constant 0 : index
    %c0_333 = arith.constant 0 : index
    %864 = vector.load %arg16[%c0_332, %c0_333] : memref<1x32xf32, #tpu.memory_space<vmem>>, vector<1x32xf32>
    %c0_334 = arith.constant 0 : index
    %c0_335 = arith.constant 0 : index
    %865 = vector.load %arg17[%c0_334, %c0_335] : memref<1x32xf32, #tpu.memory_space<vmem>>, vector<1x32xf32>
    %cst_336 = arith.constant dense<0.000000e+00> : vector<32xf32>
    %866 = vector.multi_reduction <add>, %863, %cst_336 [1] : vector<32x32xf32> to vector<32xf32>
    %867 = vector.shape_cast %866 : vector<32xf32> to vector<32x1xf32>
    %cst_337 = arith.constant 3.200000e+01 : f32
    %868 = vector.broadcast %cst_337 : f32 to vector<32x1xf32>
    %869 = arith.divf %867, %868 : vector<32x1xf32>
    %870 = vector.broadcast %869 : vector<32x1xf32> to vector<32x32xf32>
    %871 = arith.subf %863, %870 : vector<32x32xf32>
    %872 = arith.mulf %871, %871 : vector<32x32xf32>
    %cst_338 = arith.constant dense<0.000000e+00> : vector<32xf32>
    %873 = vector.multi_reduction <add>, %872, %cst_338 [1] : vector<32x32xf32> to vector<32xf32>
    %874 = vector.shape_cast %873 : vector<32xf32> to vector<32x1xf32>
    %cst_339 = arith.constant 3.200000e+01 : f32
    %875 = vector.broadcast %cst_339 : f32 to vector<32x1xf32>
    %876 = arith.divf %874, %875 : vector<32x1xf32>
    %877 = vector.broadcast %869 : vector<32x1xf32> to vector<32x32xf32>
    %878 = arith.subf %863, %877 : vector<32x32xf32>
    %cst_340 = arith.constant 9.99999974E-6 : f32
    %879 = vector.broadcast %cst_340 : f32 to vector<32x1xf32>
    %880 = arith.addf %876, %879 : vector<32x1xf32>
    %881 = math.rsqrt %880 : vector<32x1xf32>
    %882 = vector.broadcast %881 : vector<32x1xf32> to vector<32x32xf32>
    %883 = arith.mulf %878, %882 : vector<32x32xf32>
    %884 = vector.broadcast %864 : vector<1x32xf32> to vector<32x32xf32>
    %885 = arith.mulf %883, %884 : vector<32x32xf32>
    %886 = vector.broadcast %865 : vector<1x32xf32> to vector<32x32xf32>
    %887 = arith.addf %885, %886 : vector<32x32xf32>
    %c0_341 = arith.constant 0 : index
    %c0_342 = arith.constant 0 : index
    %c0_343 = arith.constant 0 : index
    %888 = vector.load %arg18[%c0_341, %c0_342, %c0_343] : memref<1x32x32xf32, #tpu.memory_space<vmem>>, vector<1x32x32xf32>
    %889 = vector.shape_cast %888 : vector<1x32x32xf32> to vector<32x32xf32>
    %890 = vector.shape_cast %887 : vector<32x32xf32> to vector<1x32x32xf32>
    tpu.vector_store %arg18[%c0_341, %c0_342, %c0_343], %890 {strides = array<i32>} : memref<1x32x32xf32, #tpu.memory_space<vmem>>, vector<1x32x32xf32>,
    return
  }
  func.func @transform_0(%arg0: i32) -> (i32, i32, i32) {
    %c0_i32 = arith.constant 0 : i32
    %c0_i32_0 = arith.constant 0 : i32
    %c0_i32_1 = arith.constant 0 : i32
    return %arg0, %c0_i32, %c0_i32_0 : i32, i32, i32
  }
  func.func @transform_1(%arg0: i32) -> (i32, i32, i32) {
    %c0_i32 = arith.constant 0 : i32
    %c0_i32_0 = arith.constant 0 : i32
    %c0_i32_1 = arith.constant 0 : i32
    return %arg0, %c0_i32, %c0_i32_0 : i32, i32, i32
  }
  func.func @transform_2(%arg0: i32) -> (i32, i32) {
    %c0_i32 = arith.constant 0 : i32
    %c0_i32_0 = arith.constant 0 : i32
    %c0_i32_1 = arith.constant 0 : i32
    return %c0_i32, %c0_i32_0 : i32, i32
  }
  func.func @transform_3(%arg0: i32) -> (i32, i32) {
    %c0_i32 = arith.constant 0 : i32
    %c0_i32_0 = arith.constant 0 : i32
    %c0_i32_1 = arith.constant 0 : i32
    return %c0_i32, %c0_i32_0 : i32, i32
  }
  func.func @transform_4(%arg0: i32) -> (i32, i32, i32) {
    %c0_i32 = arith.constant 0 : i32
    %c0_i32_0 = arith.constant 0 : i32
    %c0_i32_1 = arith.constant 0 : i32
    %c0_i32_2 = arith.constant 0 : i32
    return %c0_i32, %c0_i32_0, %c0_i32_1 : i32, i32, i32
  }
  func.func @transform_5(%arg0: i32) -> (i32, i32, i32) {
    %c0_i32 = arith.constant 0 : i32
    %c0_i32_0 = arith.constant 0 : i32
    %c0_i32_1 = arith.constant 0 : i32
    %c0_i32_2 = arith.constant 0 : i32
    return %c0_i32, %c0_i32_0, %c0_i32_1 : i32, i32, i32
  }
  func.func @transform_6(%arg0: i32) -> (i32, i32, i32) {
    %c0_i32 = arith.constant 0 : i32
    %c0_i32_0 = arith.constant 0 : i32
    %c0_i32_1 = arith.constant 0 : i32
    %c0_i32_2 = arith.constant 0 : i32
    return %c0_i32, %c0_i32_0, %c0_i32_1 : i32, i32, i32
  }
  func.func @transform_7(%arg0: i32) -> (i32, i32, i32) {
    %c0_i32 = arith.constant 0 : i32
    %c0_i32_0 = arith.constant 0 : i32
    %c0_i32_1 = arith.constant 0 : i32
    %c0_i32_2 = arith.constant 0 : i32
    return %c0_i32, %c0_i32_0, %c0_i32_1 : i32, i32, i32
  }
  func.func @transform_8(%arg0: i32) -> (i32, i32, i32) {
    %c0_i32 = arith.constant 0 : i32
    %c0_i32_0 = arith.constant 0 : i32
    %c0_i32_1 = arith.constant 0 : i32
    %c0_i32_2 = arith.constant 0 : i32
    return %c0_i32, %c0_i32_0, %c0_i32_1 : i32, i32, i32
  }
  func.func @transform_9(%arg0: i32) -> (i32, i32, i32) {
    %c0_i32 = arith.constant 0 : i32
    %c0_i32_0 = arith.constant 0 : i32
    %c0_i32_1 = arith.constant 0 : i32
    %c0_i32_2 = arith.constant 0 : i32
    return %c0_i32, %c0_i32_0, %c0_i32_1 : i32, i32, i32
  }
  func.func @transform_10(%arg0: i32) -> (i32, i32, i32) {
    %c0_i32 = arith.constant 0 : i32
    %c0_i32_0 = arith.constant 0 : i32
    %c0_i32_1 = arith.constant 0 : i32
    %c0_i32_2 = arith.constant 0 : i32
    return %c0_i32, %c0_i32_0, %c0_i32_1 : i32, i32, i32
  }
  func.func @transform_11(%arg0: i32) -> (i32, i32, i32) {
    %c0_i32 = arith.constant 0 : i32
    %c0_i32_0 = arith.constant 0 : i32
    %c0_i32_1 = arith.constant 0 : i32
    %c0_i32_2 = arith.constant 0 : i32
    return %c0_i32, %c0_i32_0, %c0_i32_1 : i32, i32, i32
  }
  func.func @transform_12(%arg0: i32) -> (i32, i32, i32) {
    %c0_i32 = arith.constant 0 : i32
    %c0_i32_0 = arith.constant 0 : i32
    %c0_i32_1 = arith.constant 0 : i32
    %c0_i32_2 = arith.constant 0 : i32
    return %c0_i32, %c0_i32_0, %c0_i32_1 : i32, i32, i32
  }
  func.func @transform_13(%arg0: i32) -> (i32, i32, i32) {
    %c0_i32 = arith.constant 0 : i32
    %c0_i32_0 = arith.constant 0 : i32
    %c0_i32_1 = arith.constant 0 : i32
    %c0_i32_2 = arith.constant 0 : i32
    return %c0_i32, %c0_i32_0, %c0_i32_1 : i32, i32, i32
  }
  func.func @transform_14(%arg0: i32) -> (i32, i32, i32) {
    %c0_i32 = arith.constant 0 : i32
    %c0_i32_0 = arith.constant 0 : i32
    %c0_i32_1 = arith.constant 0 : i32
    %c0_i32_2 = arith.constant 0 : i32
    return %c0_i32, %c0_i32_0, %c0_i32_1 : i32, i32, i32
  }
  func.func @transform_15(%arg0: i32) -> (i32, i32) {
    %c0_i32 = arith.constant 0 : i32
    %c0_i32_0 = arith.constant 0 : i32
    %c0_i32_1 = arith.constant 0 : i32
    return %c0_i32, %c0_i32_0 : i32, i32
  }
  func.func @transform_16(%arg0: i32) -> (i32, i32) {
    %c0_i32 = arith.constant 0 : i32
    %c0_i32_0 = arith.constant 0 : i32
    %c0_i32_1 = arith.constant 0 : i32
    return %c0_i32, %c0_i32_0 : i32, i32
  }
  func.func @transform_17(%arg0: i32) -> (i32, i32, i32) {
    %c0_i32 = arith.constant 0 : i32
    %c0_i32_0 = arith.constant 0 : i32
    %c0_i32_1 = arith.constant 0 : i32
    return %arg0, %c0_i32, %c0_i32_0 : i32, i32, i32
  }
}

</mosaic_0001>

<bundles_post_ra>
// kernel: tpu_custom_call.1
= control target key start
LH: loop header
LB: loop body
LE: loop exit
PB: predicated region body
PF: predicated region fallthrough
CT: control target
= control target key end

     0   :  { %s8618_s0 = inlined_call_operand.hbm [shape: bf16[1,32,16], index: 0, kind: input, shape index: {}]   ;;  %s8619_s1 = inlined_call_operand.hbm [shape: f32[4,1,32], index: 1, kind: input, shape index: {}]   ;;  %s8620_s2 = inlined_call_operand.hbm [shape: f32[32,32], index: 2, kind: input, shape index: {}]   ;;  %s8621_s3 = inlined_call_operand.hbm [shape: bf16[16,32], index: 3, kind: input, shape index: {}]   ;;  %s8622_s4 = inlined_call_operand.hbm [shape: f32[2,1,32], index: 4, kind: input, shape index: {}]   ;;  %s8623_s5 = inlined_call_operand.hbm [shape: f32[2,1,32], index: 5, kind: input, shape index: {}]   ;;  %s8624_s6 = inlined_call_operand.hbm [shape: f32[2,1,32], index: 6, kind: input, shape index: {}]   ;;  %s8625_s7 = inlined_call_operand.hbm [shape: f32[2,1,32], index: 7, kind: input, shape index: {}]   ;;  %s8626_s8 = inlined_call_operand.hbm [shape: bf16[2,32,32], index: 8, kind: input, shape index: {}]   ;;  %s8627_s9 = inlined_call_operand.hbm [shape: bf16[2,32,64], index: 9, kind: input, shape index: {}]   ;;  %s8628_s10 = inlined_call_operand.hbm [shape: bf16[2,32,32], index: 10, kind: input, shape index: {}]   ;;  %s8629_s11 = inlined_call_operand.hbm [shape: f32[2,1,32], index: 11, kind: input, shape index: {}]   ;;  %s8630_s12 = inlined_call_operand.hbm [shape: f32[2,1,32], index: 12, kind: input, shape index: {}]   ;;  %s8631_s13 = inlined_call_operand.hbm [shape: bf16[2,32,128], index: 13, kind: input, shape index: {}]   ;;  %s8632_s14 = inlined_call_operand.hbm [shape: bf16[2,128,32], index: 14, kind: input, shape index: {}]   ;;  %s8633_s15 = inlined_call_operand.hbm [shape: f32[1,32], index: 15, kind: input, shape index: {}]   ;;  %s8634_s16 = inlined_call_operand.hbm [shape: f32[1,32], index: 16, kind: input, shape index: {}]   ;;  %s8635_s17 = inlined_call_operand.hbm [shape: f32[1,32,32], index: 17, kind: output, shape index: {}]  }
   0x1   :  { %8640 = sst [smem:[#allocation41_spill]] %s8618_s0 }
   0x2   :  { %8641 = sst [smem:[#allocation42_spill]] %s8619_s1 }
   0x3   :  { %8642 = sst [smem:[#allocation43_spill]] %s8634_s16 }
   0x4   :  { %8643 = sst [smem:[#allocation44_spill]] %s8635_s17 }
   0x5   :  { %22 = vsyncpa [#allocation4], 0 }
   0x6   :  { %23 = vsyncpa [#allocation7], 0 }
   0x7   :  { %24 = vsyncpa [#allocation10], 0 }
   0x8   :  { %25 = vsyncpa [#allocation13], 0 }
   0x9   :  { %26 = vsyncpa [#allocation16], 0 }
   0xa   :  { %27 = vsyncpa [#allocation19], 0 }
   0xb   :  { %28 = vsyncpa [#allocation22], 0 }
   0xc   :  { %29 = vsyncpa [#allocation25], 0 }
   0xd   :  { %30 = vsyncpa [#allocation28], 0 }
   0xe   :  { %31 = vsyncpa [#allocation5], 0  ;;  %s7113_s24 = smov [#allocation6]   ;;  %s8644_s28 = sld [smem:[#allocation42_spill]] }
   0xf   :  { %s49_s25 = sshll.u32 %s7113_s24, 4  ;;  %s50_s25 = int_to_ptr.vmem [resolvable:$true] %s49_s25 }
  0x14   :  { %s6697_s29 = scalar_lea.hbm %s8644_s28, 64 }
  0x15   :  { %p6698_p0 = scmp.ne.s32.totalorder %s8644_s28, %s6697_s29  ;;  %p6701_p1 = scmp.lt.u32.totalorder %s6697_s29, %s8644_s28 }
  0x17   :  { %p6703_p2 = pnand %p6701_p1, %p6698_p0 }
  0x19   :  { %6706 = shalt.err (!%p6703_p2)
}
  0x1a   :  { %s6707_s1 = scalar_lea.vmem %s50_s25, 64  ;;  %p6712_p4 = scmp.lt.s32.totalorder %s50_s25, %s50_s25 }
  0x1b   :  { %p6708_p3 = scmp.ne.s32.totalorder %s50_s25, %s6707_s1  ;;  %p6713_p5 = scmp.lt.s32.totalorder %s6707_s1, %s6707_s1 }
  0x1d   :  { %p6714_p6 = por %p6713_p5, %p6712_p4 }
  0x1f   :  { %p6715_p7 = pnand %p6714_p6, %p6708_p3 }
  0x21   :  { %6718 = shalt.err (!%p6715_p7)
}
  0x22   :  { %s7114_s20 = smov 16   ;;  %s7115_s21 = smov 1  }
  0x23   :  { %55 = dma.hbm_to_vmem [thread:$0]  %s8644_s28, 64, %s50_s25, [#allocation7], %s7114_s20, %s7114_s20, %s7115_s21  }
  0x24   :  { %s7116_s24 = smov [#allocation9]   ;;  %s7117_s27 = smov [#allocation12]  }
  0x25   :  { %s73_s26 = sshll.u32 %s7116_s24, 4  ;;  %s97_s29 = sshll.u32 %s7117_s27, 4  ;;  %s74_s26 = int_to_ptr.vmem [resolvable:$true] %s73_s26  ;;  %s98_s29 = int_to_ptr.vmem [resolvable:$true] %s97_s29 }
  0x26   :  { %s6719_s18 = scalar_lea.hbm %s8621_s3, 128 }
  0x27   :  { %p6720_p8 = scmp.ne.s32.totalorder %s8621_s3, %s6719_s18  ;;  %p6723_p9 = scmp.lt.u32.totalorder %s6719_s18, %s8621_s3 }
  0x29   :  { %p6725_p10 = pnand %p6723_p9, %p6720_p8 }
  0x2b   :  { %6728 = shalt.err (!%p6725_p10)
}
  0x2c   :  { %s6729_s25 = scalar_lea.vmem %s74_s26, 128  ;;  %p6734_p12 = scmp.lt.s32.totalorder %s74_s26, %s74_s26 }
  0x2d   :  { %p6730_p11 = scmp.ne.s32.totalorder %s74_s26, %s6729_s25  ;;  %p6735_p13 = scmp.lt.s32.totalorder %s6729_s25, %s6729_s25 }
  0x2f   :  { %p6736_p0 = por %p6735_p13, %p6734_p12 }
  0x31   :  { %p6737_p1 = pnand %p6736_p0, %p6730_p11 }
  0x33   :  { %6740 = shalt.err (!%p6737_p1)
}
  0x34   :  { %s7118_s28 = smov 64   ;;  %s7119_s22 = smov 4  }
  0x35   :  { %79 = dma.hbm_to_vmem [thread:$0]  %s8621_s3, 128, %s74_s26, [#allocation10], %s7118_s28, %s7118_s28, %s7119_s22  }
  0x36   :  { %s6741_s27 = scalar_lea.hbm %s8623_s5, 32 }
  0x37   :  { %p6742_p2 = scmp.ne.s32.totalorder %s8623_s5, %s6741_s27  ;;  %p6745_p3 = scmp.lt.u32.totalorder %s6741_s27, %s8623_s5 }
  0x39   :  { %p6747_p4 = pnand %p6745_p3, %p6742_p2 }
  0x3b   :  { %6750 = shalt.err (!%p6747_p4)
}
  0x3c   :  { %s6751_s1 = scalar_lea.vmem %s98_s29, 32  ;;  %p6756_p6 = scmp.lt.s32.totalorder %s98_s29, %s98_s29 }
  0x3d   :  { %p6752_p5 = scmp.ne.s32.totalorder %s98_s29, %s6751_s1  ;;  %p6757_p7 = scmp.lt.s32.totalorder %s6751_s1, %s6751_s1 }
  0x3f   :  { %p6758_p8 = por %p6757_p7, %p6756_p6 }
  0x41   :  { %p6759_p9 = pnand %p6758_p8, %p6752_p5 }
  0x43   :  { %6762 = shalt.err (!%p6759_p9)
}
  0x44   :  { %103 = dma.hbm_to_vmem [thread:$0]  %s8623_s5, 32, %s98_s29, [#allocation13], %s7114_s20, %s7114_s20, %s7115_s21  }
  0x45   :  { %s7120_s25 = smov [#allocation15]   ;;  %s7121_s24 = smov [#allocation18]  }
  0x46   :  { %s121_s23 = sshll.u32 %s7120_s25, 4  ;;  %s145_s16 = sshll.u32 %s7121_s24, 4  ;;  %s122_s23 = int_to_ptr.vmem [resolvable:$true] %s121_s23  ;;  %s146_s16 = int_to_ptr.vmem [resolvable:$true] %s145_s16 }
  0x47   :  { %s6763_s0 = scalar_lea.hbm %s8625_s7, 32 }
  0x48   :  { %p6764_p10 = scmp.ne.s32.totalorder %s8625_s7, %s6763_s0  ;;  %p6767_p11 = scmp.lt.u32.totalorder %s6763_s0, %s8625_s7 }
  0x4a   :  { %p6769_p12 = pnand %p6767_p11, %p6764_p10 }
  0x4c   :  { %6772 = shalt.err (!%p6769_p12)
}
  0x4d   :  { %s6773_s5 = scalar_lea.vmem %s122_s23, 32  ;;  %p6778_p0 = scmp.lt.s32.totalorder %s122_s23, %s122_s23 }
  0x4e   :  { %p6774_p13 = scmp.ne.s32.totalorder %s122_s23, %s6773_s5  ;;  %p6779_p1 = scmp.lt.s32.totalorder %s6773_s5, %s6773_s5 }
  0x50   :  { %p6780_p2 = por %p6779_p1, %p6778_p0 }
  0x52   :  { %p6781_p3 = pnand %p6780_p2, %p6774_p13 }
  0x54   :  { %6784 = shalt.err (!%p6781_p3)
}
  0x55   :  { %127 = dma.hbm_to_vmem [thread:$0]  %s8625_s7, 32, %s122_s23, [#allocation16], %s7114_s20, %s7114_s20, %s7115_s21  }
  0x56   :  { %s6785_s24 = scalar_lea.hbm %s8627_s9, 512 }
  0x57   :  { %p6786_p4 = scmp.ne.s32.totalorder %s8627_s9, %s6785_s24  ;;  %p6789_p5 = scmp.lt.u32.totalorder %s6785_s24, %s8627_s9 }
  0x59   :  { %p6791_p6 = pnand %p6789_p5, %p6786_p4 }
  0x5b   :  { %6794 = shalt.err (!%p6791_p6)
}
  0x5c   :  { %s6795_s18 = scalar_lea.vmem %s146_s16, 512  ;;  %p6800_p8 = scmp.lt.s32.totalorder %s146_s16, %s146_s16 }
  0x5d   :  { %p6796_p7 = scmp.ne.s32.totalorder %s146_s16, %s6795_s18  ;;  %p6801_p9 = scmp.lt.s32.totalorder %s6795_s18, %s6795_s18 }
  0x5f   :  { %p6802_p10 = por %p6801_p9, %p6800_p8 }
  0x61   :  { %p6803_p11 = pnand %p6802_p10, %p6796_p7 }
  0x63   :  { %6806 = shalt.err (!%p6803_p11)
}
  0x64   :  { %151 = dma.hbm_to_vmem [thread:$0]  %s8627_s9, 512, %s146_s16, [#allocation19], %s7118_s28, %s7118_s28, %s7119_s22  }
  0x65   :  { %s7122_s19 = smov [#allocation21]   ;;  %s7123_s5 = smov [#allocation24]  }
  0x66   :  { %s169_s1 = sshll.u32 %s7122_s19, 4  ;;  %s193_s29 = sshll.u32 %s7123_s5, 4  ;;  %s170_s1 = int_to_ptr.vmem [resolvable:$true] %s169_s1  ;;  %s194_s29 = int_to_ptr.vmem [resolvable:$true] %s193_s29 }
  0x67   :  { %s6807_s25 = scalar_lea.hbm %s8629_s11, 32 }
  0x68   :  { %p6808_p12 = scmp.ne.s32.totalorder %s8629_s11, %s6807_s25  ;;  %p6811_p13 = scmp.lt.u32.totalorder %s6807_s25, %s8629_s11 }
  0x6a   :  { %p6813_p0 = pnand %p6811_p13, %p6808_p12 }
  0x6c   :  { %6816 = shalt.err (!%p6813_p0)
}
  0x6d   :  { %s6817_s9 = scalar_lea.vmem %s170_s1, 32  ;;  %p6822_p2 = scmp.lt.s32.totalorder %s170_s1, %s170_s1 }
  0x6e   :  { %p6818_p1 = scmp.ne.s32.totalorder %s170_s1, %s6817_s9  ;;  %p6823_p3 = scmp.lt.s32.totalorder %s6817_s9, %s6817_s9 }
  0x70   :  { %p6824_p4 = por %p6823_p3, %p6822_p2 }
  0x72   :  { %p6825_p5 = pnand %p6824_p4, %p6818_p1 }
  0x74   :  { %6828 = shalt.err (!%p6825_p5)
}
  0x75   :  { %175 = dma.hbm_to_vmem [thread:$0]  %s8629_s11, 32, %s170_s1, [#allocation22], %s7114_s20, %s7114_s20, %s7115_s21  }
  0x76   :  { %s6829_s23 = scalar_lea.hbm %s8631_s13, 512 }
  0x77   :  { %p6830_p6 = scmp.ne.s32.totalorder %s8631_s13, %s6829_s23  ;;  %p6833_p7 = scmp.lt.u32.totalorder %s6829_s23, %s8631_s13 }
  0x79   :  { %p6835_p8 = pnand %p6833_p7, %p6830_p6 }
  0x7b   :  { %6838 = shalt.err (!%p6835_p8)
}
  0x7c   :  { %s6839_s25 = scalar_lea.vmem %s194_s29, 512  ;;  %p6844_p10 = scmp.lt.s32.totalorder %s194_s29, %s194_s29 }
  0x7d   :  { %p6840_p9 = scmp.ne.s32.totalorder %s194_s29, %s6839_s25  ;;  %p6845_p11 = scmp.lt.s32.totalorder %s6839_s25, %s6839_s25 }
  0x7f   :  { %p6846_p12 = por %p6845_p11, %p6844_p10 }
  0x81   :  { %p6847_p13 = pnand %p6846_p12, %p6840_p9 }
  0x83   :  { %6850 = shalt.err (!%p6847_p13)
}
  0x84   :  { %199 = dma.hbm_to_vmem [thread:$0]  %s8631_s13, 512, %s194_s29, [#allocation25], %s7118_s28, %s7118_s28, %s7119_s22  }
  0x85   :  { %s7124_s24 = smov [#allocation27]   ;;  %s7125_s27 = smov [#allocation3]  }
  0x86   :  { %s218_s17 = sshll.u32 %s7124_s24, 4  ;;  %s37_s0 = sshll.u32 %s7125_s27, 4  ;;  %s219_s17 = int_to_ptr.vmem [resolvable:$true] %s218_s17  ;;  %s38_s0 = int_to_ptr.vmem [resolvable:$true] %s37_s0 }
  0x87   :  { %s6851_s30 = scalar_lea.hbm %s8633_s15, 16 }
  0x88   :  { %p6852_p0 = scmp.ne.s32.totalorder %s8633_s15, %s6851_s30  ;;  %p6855_p1 = scmp.lt.u32.totalorder %s6851_s30, %s8633_s15 }
  0x8a   :  { %p6857_p2 = pnand %p6855_p1, %p6852_p0 }
  0x8c   :  { %6860 = shalt.err (!%p6857_p2)
}
  0x8d   :  { %s6861_s13 = scalar_lea.vmem %s219_s17, 16  ;;  %s6865_s29 = scalar_lea.vmem %s219_s17, 32 }
  0x8e   :  { %p6862_p3 = scmp.ne.s32.totalorder %s219_s17, %s6861_s13  ;;  %p6866_p4 = scmp.lt.s32.totalorder %s219_s17, %s219_s17 }
  0x8f   :  { %p6867_p5 = scmp.lt.s32.totalorder %s6865_s29, %s6861_s13 }
  0x91   :  { %p6868_p6 = por %p6867_p5, %p6866_p4 }
  0x93   :  { %p6869_p7 = pnand %p6868_p6, %p6862_p3 }
  0x95   :  { %6872 = shalt.err (!%p6869_p7)
}
  0x96   :  { %221 = dma.hbm_to_vmem [thread:$0]  %s8633_s15, 16, %s219_s17, [#allocation28]  }
  0x97   :  { %s8645_s11 = sld [smem:[#allocation41_spill]] }
  0x9d   :  { %s6873_s1 = scalar_lea.hbm %s8645_s11, 256 }
  0x9e   :  { %p6874_p8 = scmp.ne.s32.totalorder %s8645_s11, %s6873_s1  ;;  %p6877_p9 = scmp.lt.u32.totalorder %s6873_s1, %s8645_s11 }
  0xa0   :  { %p6879_p10 = pnand %p6877_p9, %p6874_p8 }
  0xa2   :  { %6882 = shalt.err (!%p6879_p10)
}
  0xa3   :  { %s6883_s30 = scalar_lea.vmem %s38_s0, 256  ;;  %p6888_p12 = scmp.lt.s32.totalorder %s38_s0, %s38_s0 }
  0xa4   :  { %p6884_p11 = scmp.ne.s32.totalorder %s38_s0, %s6883_s30  ;;  %p6889_p13 = scmp.lt.s32.totalorder %s6883_s30, %s6883_s30 }
  0xa6   :  { %p6890_p0 = por %p6889_p13, %p6888_p12 }
  0xa8   :  { %p6891_p1 = pnand %p6890_p0, %p6884_p11 }
  0xaa   :  { %6894 = shalt.err (!%p6891_p1)
}
  0xab   :  { %43 = dma.hbm_to_vmem [thread:$0]  %s8645_s11, 256, %s38_s0, [#allocation4], %s7118_s28, %s7118_s28, %s7119_s22  }
  0xac   :  { %s7126_s18 = smov [#allocation8]   ;;  %s6895_s13 = scalar_lea.hbm %s8620_s2, 512 }
  0xad   :  { %s61_s7 = sshll.u32 %s7126_s18, 4  ;;  %p6896_p2 = scmp.ne.s32.totalorder %s8620_s2, %s6895_s13  ;;  %s62_s7 = int_to_ptr.vmem [resolvable:$true] %s61_s7 }
  0xae   :  { %p6899_p3 = scmp.lt.u32.totalorder %s6895_s13, %s8620_s2 }
  0xb0   :  { %p6901_p4 = pnand %p6899_p3, %p6896_p2 }
  0xb2   :  { %6904 = shalt.err (!%p6901_p4)
}
  0xb3   :  { %s6905_s25 = scalar_lea.vmem %s62_s7, 512  ;;  %p6910_p6 = scmp.lt.s32.totalorder %s62_s7, %s62_s7 }
  0xb4   :  { %p6906_p5 = scmp.ne.s32.totalorder %s62_s7, %s6905_s25  ;;  %p6911_p7 = scmp.lt.s32.totalorder %s6905_s25, %s6905_s25 }
  0xb6   :  { %p6912_p8 = por %p6911_p7, %p6910_p6 }
  0xb8   :  { %p6913_p9 = pnand %p6912_p8, %p6906_p5 }
  0xba   :  { %6916 = shalt.err (!%p6913_p9)
}
  0xbb   :  { %s7127_s0 = smov 128   ;;  %s7128_s11 = smov 8  }
  0xbc   :  { %67 = dma.hbm_to_vmem [thread:$0]  %s8620_s2, 512, %s62_s7, [#allocation7], %s7127_s0, %s7127_s0, %s7128_s11  }
  0xbd   :  { %s7129_s27 = smov [#allocation11]   ;;  %s7130_s16 = smov [#allocation14]  }
  0xbe   :  { %s85_s9 = sshll.u32 %s7129_s27, 4  ;;  %s109_s30 = sshll.u32 %s7130_s16, 4  ;;  %s86_s9 = int_to_ptr.vmem [resolvable:$true] %s85_s9  ;;  %s7384_s30 = int_to_ptr.vmem [resolvable:$true] %s109_s30 }
  0xbf   :  { %s6917_s18 = scalar_lea.hbm %s8622_s4, 32 }
  0xc0   :  { %p6918_p10 = scmp.ne.s32.totalorder %s8622_s4, %s6917_s18  ;;  %p6921_p11 = scmp.lt.u32.totalorder %s6917_s18, %s8622_s4 }
  0xc2   :  { %p6923_p12 = pnand %p6921_p11, %p6918_p10 }
  0xc4   :  { %6926 = shalt.err (!%p6923_p12)
}
  0xc5   :  { %s6927_s2 = scalar_lea.vmem %s86_s9, 32  ;;  %p6932_p0 = scmp.lt.s32.totalorder %s86_s9, %s86_s9 }
  0xc6   :  { %p6928_p13 = scmp.ne.s32.totalorder %s86_s9, %s6927_s2  ;;  %p6933_p1 = scmp.lt.s32.totalorder %s6927_s2, %s6927_s2 }
  0xc8   :  { %p6934_p2 = por %p6933_p1, %p6932_p0 }
  0xca   :  { %p6935_p3 = pnand %p6934_p2, %p6928_p13 }
  0xcc   :  { %6938 = shalt.err (!%p6935_p3)
}
  0xcd   :  { %91 = dma.hbm_to_vmem [thread:$0]  %s8622_s4, 32, %s86_s9, [#allocation10], %s7114_s20, %s7114_s20, %s7115_s21  }
  0xce   :  { %s6939_s25 = scalar_lea.hbm %s8624_s6, 32 }
  0xcf   :  { %p6940_p4 = scmp.ne.s32.totalorder %s8624_s6, %s6939_s25  ;;  %p6943_p5 = scmp.lt.u32.totalorder %s6939_s25, %s8624_s6 }
  0xd1   :  { %p6945_p6 = pnand %p6943_p5, %p6940_p4 }
  0xd3   :  { %6948 = shalt.err (!%p6945_p6)
}
  0xd4   :  { %s6949_s15 = scalar_lea.vmem %s7384_s30, 32  ;;  %p6954_p8 = scmp.lt.s32.totalorder %s7384_s30, %s7384_s30 }
  0xd5   :  { %p6950_p7 = scmp.ne.s32.totalorder %s7384_s30, %s6949_s15  ;;  %p6955_p9 = scmp.lt.s32.totalorder %s6949_s15, %s6949_s15 }
  0xd7   :  { %p6956_p10 = por %p6955_p9, %p6954_p8 }
  0xd9   :  { %p6957_p11 = pnand %p6956_p10, %p6950_p7 }
  0xdb   :  { %6960 = shalt.err (!%p6957_p11)
}
  0xdc   :  { %115 = dma.hbm_to_vmem [thread:$0]  %s8624_s6, 32, %s7384_s30, [#allocation13], %s7114_s20, %s7114_s20, %s7115_s21  }
  0xdd   :  { %s7131_s17 = smov [#allocation17]   ;;  %s7132_s23 = smov [#allocation20]  }
  0xde   :  { %s133_s18 = sshll.u32 %s7131_s17, 4  ;;  %s157_s19 = sshll.u32 %s7132_s23, 4  ;;  %s134_s18 = int_to_ptr.vmem [resolvable:$true] %s133_s18  ;;  %s7421_s19 = int_to_ptr.vmem [resolvable:$true] %s157_s19 }
  0xdf   :  { %s6961_s2 = scalar_lea.hbm %s8626_s8, 512 }
  0xe0   :  { %p6962_p12 = scmp.ne.s32.totalorder %s8626_s8, %s6961_s2  ;;  %p6965_p13 = scmp.lt.u32.totalorder %s6961_s2, %s8626_s8 }
  0xe2   :  { %p6967_p0 = pnand %p6965_p13, %p6962_p12 }
  0xe4   :  { %6970 = shalt.err (!%p6967_p0)
}
  0xe5   :  { %s6971_s6 = scalar_lea.vmem %s134_s18, 512  ;;  %p6976_p2 = scmp.lt.s32.totalorder %s134_s18, %s134_s18 }
  0xe6   :  { %p6972_p1 = scmp.ne.s32.totalorder %s134_s18, %s6971_s6  ;;  %p6977_p3 = scmp.lt.s32.totalorder %s6971_s6, %s6971_s6 }
  0xe8   :  { %p6978_p4 = por %p6977_p3, %p6976_p2 }
  0xea   :  { %p6979_p5 = pnand %p6978_p4, %p6972_p1 }
  0xec   :  { %6982 = shalt.err (!%p6979_p5)
}
  0xed   :  { %139 = dma.hbm_to_vmem [thread:$0]  %s8626_s8, 512, %s134_s18, [#allocation16], %s7118_s28, %s7118_s28, %s7119_s22  }
  0xee   :  { %s6983_s27 = scalar_lea.hbm %s8628_s10, 512 }
  0xef   :  { %p6984_p6 = scmp.ne.s32.totalorder %s8628_s10, %s6983_s27  ;;  %p6987_p7 = scmp.lt.u32.totalorder %s6983_s27, %s8628_s10 }
  0xf1   :  { %p6989_p8 = pnand %p6987_p7, %p6984_p6 }
  0xf3   :  { %6992 = shalt.err (!%p6989_p8)
}
  0xf4   :  { %s6993_s17 = scalar_lea.vmem %s7421_s19, 512  ;;  %p6998_p10 = scmp.lt.s32.totalorder %s7421_s19, %s7421_s19 }
  0xf5   :  { %p6994_p9 = scmp.ne.s32.totalorder %s7421_s19, %s6993_s17  ;;  %p6999_p11 = scmp.lt.s32.totalorder %s6993_s17, %s6993_s17 }
  0xf7   :  { %p7000_p12 = por %p6999_p11, %p6998_p10 }
  0xf9   :  { %p7001_p13 = pnand %p7000_p12, %p6994_p9 }
  0xfb   :  { %7004 = shalt.err (!%p7001_p13)
}
  0xfc   :  { %163 = dma.hbm_to_vmem [thread:$0]  %s8628_s10, 512, %s7421_s19, [#allocation19], %s7118_s28, %s7118_s28, %s7119_s22  }
  0xfd   :  { %s7133_s23 = smov [#allocation23]   ;;  %s7134_s29 = smov [#allocation26]  }
  0xfe   :  { %s181_s13 = sshll.u32 %s7133_s23, 4  ;;  %s205_s2 = sshll.u32 %s7134_s29, 4  ;;  %s182_s13 = int_to_ptr.vmem [resolvable:$true] %s181_s13  ;;  %s7458_s2 = int_to_ptr.vmem [resolvable:$true] %s205_s2 }
  0xff   :  { %s7005_s3 = scalar_lea.hbm %s8630_s12, 32 }
 0x100   :  { %p7006_p0 = scmp.ne.s32.totalorder %s8630_s12, %s7005_s3  ;;  %p7009_p1 = scmp.lt.u32.totalorder %s7005_s3, %s8630_s12 }
 0x102   :  { %p7011_p2 = pnand %p7009_p1, %p7006_p0 }
 0x104   :  { %7014 = shalt.err (!%p7011_p2)
}
 0x105   :  { %s7015_s10 = scalar_lea.vmem %s182_s13, 32  ;;  %p7020_p4 = scmp.lt.s32.totalorder %s182_s13, %s182_s13 }
 0x106   :  { %p7016_p3 = scmp.ne.s32.totalorder %s182_s13, %s7015_s10  ;;  %p7021_p5 = scmp.lt.s32.totalorder %s7015_s10, %s7015_s10 }
 0x108   :  { %p7022_p6 = por %p7021_p5, %p7020_p4 }
 0x10a   :  { %p7023_p7 = pnand %p7022_p6, %p7016_p3 }
 0x10c   :  { %7026 = shalt.err (!%p7023_p7)
}
 0x10d   :  { %187 = dma.hbm_to_vmem [thread:$0]  %s8630_s12, 32, %s182_s13, [#allocation22], %s7114_s20, %s7114_s20, %s7115_s21  }
 0x10e   :  { %s7027_s16 = scalar_lea.hbm %s8632_s14, 2048 }
 0x10f   :  { %p7028_p8 = scmp.ne.s32.totalorder %s8632_s14, %s7027_s16  ;;  %p7031_p9 = scmp.lt.u32.totalorder %s7027_s16, %s8632_s14 }
 0x111   :  { %p7033_p10 = pnand %p7031_p9, %p7028_p8 }
 0x113   :  { %7036 = shalt.err (!%p7033_p10)
}
 0x114   :  { %s7037_s8 = scalar_lea.vmem %s7458_s2, 2048  ;;  %p7042_p12 = scmp.lt.s32.totalorder %s7458_s2, %s7458_s2 }
 0x115   :  { %p7038_p11 = scmp.ne.s32.totalorder %s7458_s2, %s7037_s8  ;;  %p7043_p13 = scmp.lt.s32.totalorder %s7037_s8, %s7037_s8 }
 0x117   :  { %p7044_p0 = por %p7043_p13, %p7042_p12 }
 0x119   :  { %p7045_p1 = pnand %p7044_p0, %p7038_p11 }
 0x11b   :  { %7048 = shalt.err (!%p7045_p1)
}
 0x11c   :  { %211 = dma.hbm_to_vmem [thread:$0]  %s8632_s14, 2048, %s7458_s2, [#allocation25], %s7118_s28, %s7118_s28, %s7119_s22  }
 0x11d   :  { %s7135_s18 = smov [#allocation29]   ;;  %s8646_s7 = sld [smem:[#allocation43_spill]] }
 0x11e   :  { %s228_s23 = sshll.u32 %s7135_s18, 4  ;;  %s229_s23 = int_to_ptr.vmem [resolvable:$true] %s228_s23 }
 0x123   :  { %s7049_s5 = scalar_lea.hbm %s8646_s7, 16 }
 0x124   :  { %p7050_p2 = scmp.ne.s32.totalorder %s8646_s7, %s7049_s5  ;;  %p7053_p3 = scmp.lt.u32.totalorder %s7049_s5, %s8646_s7 }
 0x126   :  { %p7055_p4 = pnand %p7053_p3, %p7050_p2 }
 0x128   :  { %7058 = shalt.err (!%p7055_p4)
}
 0x129   :  { %s7059_s25 = scalar_lea.vmem %s229_s23, 16  ;;  %s7063_s14 = scalar_lea.vmem %s229_s23, 32 }
 0x12a   :  { %p7060_p5 = scmp.ne.s32.totalorder %s229_s23, %s7059_s25  ;;  %p7064_p6 = scmp.lt.s32.totalorder %s229_s23, %s229_s23 }
 0x12b   :  { %p7065_p7 = scmp.lt.s32.totalorder %s7063_s14, %s7059_s25 }
 0x12d   :  { %p7066_p8 = por %p7065_p7, %p7064_p6 }
 0x12f   :  { %p7067_p9 = pnand %p7066_p8, %p7060_p5 }
 0x131   :  { %7070 = shalt.err (!%p7067_p9)
}
 0x132   :  { %231 = dma.hbm_to_vmem [thread:$0]  %s8646_s7, 16, %s229_s23, [#allocation28]  }
 0x133   :  { %7093 = dma.done.wait [#allocation4], 256  }
 0x134   :  { %7094 = vsyncadd [#allocation4], 4294967040 }
 0x135   :  { %7095 = dma.done.wait [#allocation7], 576  }
 0x136   :  { %7096 = vsyncadd [#allocation7], 4294966720 }
 0x137   :  { %7097 = dma.done.wait [#allocation10], 160  }
 0x138   :  { %7098 = vsyncadd [#allocation10], 4294967136 }
 0x139   :  { %7099 = dma.done.wait [#allocation13], 64  }
 0x13a   :  { %7100 = vsyncadd [#allocation13], 4294967232 }
 0x13b   :  { %7101 = dma.done.wait [#allocation16], 544  }
 0x13c   :  { %7102 = vsyncadd [#allocation16], 4294966752 }
 0x13d   :  { %7103 = dma.done.wait [#allocation19], 1024  }
 0x13e   :  { %7104 = vsyncadd [#allocation19], 4294966272 }
 0x13f   :  { %7105 = dma.done.wait [#allocation22], 64  }
 0x140   :  { %7106 = vsyncadd [#allocation22], 4294967232 }
 0x141   :  { %7107 = dma.done.wait [#allocation25], 2560  }
 0x142   :  { %7108 = vsyncadd [#allocation25], 4294964736 }
 0x143   :  { %7109 = dma.done.wait [#allocation28], 32  }
 0x144   :  { %7110 = vsyncadd [#allocation28], 4294967264  ;;  %v6450_v0 = vld [vmem:[#allocation9] sm:$0xff]   ;;  %vm338_vm0 = vcmask 130048   ;;  %v6451_v1 = vld [vmem:[#allocation3] sm:$0xff]   ;;  %vm394_vm1 = vcmask 261120  }
 0x145   :  { %5914 = vmatprep.subr.bf16.mxu0 %v6450_v0  ;;  %v6452_v2 = vld [vmem:[#allocation3 + $0x8] sm:$0xff]   ;;  %5916 = vmatprep.mubr.msk.bf16.mxu0 %vm338_vm0, %v6451_v1  ;;  %v5588_v3 = vld [vmem:[#allocation6] ss:$0 sm:$0xff]  ;;  %v5589_v6 = vld [vmem:[#allocation6 + $0x1] ss:$0 sm:$0xff]  ;;  %vm7137_vm2 = vmmov 0  }
 0x146   :  { %5915 = vmatpush3.bf16.msra.mxu0 %v6450_v0  ;;  %v316_v10 = vld [vmem:[#allocation8] sm:$0xff]  ;;  %v317_v13 = vld [vmem:[#allocation8 + $0x8] sm:$0xff]  ;;  %v318_v16 = vld [vmem:[#allocation8 + $0x10] sm:$0xff]  ;;  %vm720_vm3 = vcmask 64512   ;;  %s7138_s2 = smov 120   ;;  %s7139_s10 = smov 104  }
 0x147   :  { %v472_v15 = vsel %vm394_vm1, %v316_v10, 0.0  ;;  %v475_v17 = vsel %vm394_vm1, %v317_v13, 0.0  ;;  %v5590_v18 = vld [vmem:[#allocation6 + $0x2] ss:$0 sm:$0xff]  ;;  %v478_v20 = vsel %vm394_vm1, %v318_v16, 0.0  ;;  %s7140_s19 = smov 112  }
 0x148   :  { %v319_v19 = vld [vmem:[#allocation8 + $0x18] sm:$0xff]  ;;  %s7141_s1 = smov 88   ;;  %s7142_s24 = smov 96   ;;  %vm940_vm4 = vcmask 130112   ;;  %vm1054_vm5 = vcmask 195712   ;;  %vm1168_vm6 = vcmask 261312  }
 0x149   :  { %5917 = vmatmul.mubr.msk.bf16.vlgmr.msra.gmra.mrb[0].mxu0 %vm338_vm0, %v6452_v2  ;;  %v5591_v21 = vld [vmem:[#allocation6 + $0x3] ss:$0 sm:$0xff]  ;;  %v481_v23 = vsel %vm394_vm1, %v319_v19, 0.0  ;;  %s7143_s27 = smov 80   ;;  %s7144_s16 = smov 72  }
 0x14a   :  { %s7145_s15 = smov 24  }
 0x21c   :  { %v5918_v4 = vpop.f32.mrb[0].mxu0 }
 0x21d   :  { %v379_v5 = vpop.f32.mrb[1].mxu0  ;;  %v388_v22 = vadd.f32 %v5918_v4, %v5590_v18  ;;  %v6454_v4 = vld [vmem:[#allocation17] sm:$0xff]  }
 0x21e   :  { %v380_v7 = vadd.f32 %v5588_v3, %v379_v5  ;;  %v5919_v8 = vpop.f32.mrb[2].mxu0  ;;  %v6453_v3 = vld [vmem:[#allocation18] sm:$0xff]   ;;  %v6455_v5 = vld [vmem:[#allocation18 + $0x8] sm:$0xff]   ;;  %5920 = vmatprep.subr.bf16.mxu1 %v6454_v4 }
 0x21f   :  { %v382_v9 = vpop.f32.mrb[3].mxu0  ;;  %v391_v24 = vadd.f32 %v5919_v8, %v5591_v21  ;;  %v401_v25 = vsel %vm394_vm1, %v388_v22, 0.0  ;;  %5928 = vmatprep.subr.bf16.mxu0 %v6453_v3  ;;  %5921 = vmatpush3.bf16.msra.mxu1 %v6454_v4 }
 0x220   :  { %v383_v11 = vadd.f32 %v5589_v6, %v382_v9  ;;  %v395_v12 = vsel %vm394_vm1, %v380_v7, 0.0  ;;  %5929 = vmatpush3.bf16.msra.mxu0 %v6453_v3  ;;  %v6456_v6 = vld [vmem:[#allocation17 + $0x8] sm:$0xff]  }
 0x221   :  { %396 = vadd.xlane.f32.xlu0 %v395_v12  ;;  %v404_v26 = vsel %vm394_vm1, %v391_v24, 0.0  ;;  %5930 = vmatprep.subr.bf16.mxu0 %v6455_v5 }
 0x222   :  { %v398_v14 = vsel %vm394_vm1, %v383_v11, 0.0  ;;  %5922 = vmatprep.subr.bf16.mxu1 %v6456_v6 }
 0x223   :  { %399 = vadd.xlane.f32.xlu1 %v398_v14  ;;  %5923 = vmatpush3.bf16.msra.mxu1 %v6456_v6 }
 0x224   :  { %5931 = vmatpush3.bf16.msra.mxu0 %v6455_v5 }
 0x225   :  { %473 = vadd.xlane.f32.xlu0 %v472_v15 }
 0x227   :  { %476 = vadd.xlane.f32.xlu1 %v475_v17 }
 0x229   :  { %479 = vadd.xlane.f32.xlu0 %v478_v20 }
 0x22b   :  { %482 = vadd.xlane.f32.xlu1 %v481_v23 }
 0x22d   :  { %402 = vadd.xlane.f32.xlu0 %v401_v25 }
 0x22f   :  { %405 = vadd.xlane.f32.xlu1 %v404_v26 }
 0x2ae   :  { %v397_v27 = vpop.xlane.xlu0 %396 }
 0x2af   :  { %v408_v28 = vmul.f32 0.03125, %v397_v27 }
 0x2b0   :  { %v400_v29 = vpop.xlane.xlu1 %399 }
 0x2b1   :  { %v7517_v30 = vsub.f32 %v380_v7, %v408_v28  ;;  %v409_v31 = vmul.f32 0.03125, %v400_v29 }
 0x2b2   :  { %v474_v32 = vpop.xlane.xlu0 %473 }
 0x2b3   :  { %v7519_v33 = vsub.f32 %v383_v11, %v409_v31  ;;  %v484_v34 = vmul.f32 0.03125, %v474_v32  ;;  %v416_v35 = vmul.f32 %v7517_v30, %v7517_v30 }
 0x2b4   :  { %v477_v36 = vpop.xlane.xlu1 %476 }
 0x2b5   :  { %v7523_v37 = vsub.f32 %v316_v10, %v484_v34  ;;  %v485_v38 = vmul.f32 0.03125, %v477_v36  ;;  %v420_v39 = vsel %vm394_vm1, %v416_v35, 0.0  ;;  %v417_v40 = vmul.f32 %v7519_v33, %v7519_v33  ;;  %v5597_v34 = vld [vmem:[#allocation11] ss:$0 sm:$0xff] }
 0x2b6   :  { %421 = vadd.xlane.f32.xlu0 %v420_v39  ;;  %v480_v41 = vpop.xlane.xlu0 %479 }
 0x2b7   :  { %v7528_v42 = vsub.f32 %v317_v13, %v485_v38  ;;  %v486_v43 = vmul.f32 0.03125, %v480_v41  ;;  %v492_v44 = vmul.f32 %v7523_v37, %v7523_v37  ;;  %v423_v46 = vsel %vm394_vm1, %v417_v40, 0.0  ;;  %v5599_v38 = vld [vmem:[#allocation14] ss:$0 sm:$0xff] }
 0x2b8   :  { %v483_v45 = vpop.xlane.xlu1 %482 }
 0x2b9   :  { %v7533_v47 = vsub.f32 %v318_v16, %v486_v43  ;;  %v487_v48 = vmul.f32 0.03125, %v483_v45  ;;  %v496_v49 = vsel %vm394_vm1, %v492_v44, 0.0  ;;  %v493_v50 = vmul.f32 %v7528_v42, %v7528_v42  ;;  %v5598_v43 = vld [vmem:[#allocation12] ss:$0 sm:$0xff]  ;;  %v5600_v44 = vld [vmem:[#allocation15] ss:$0 sm:$0xff] }
 0x2ba   :  { %424 = vadd.xlane.f32.xlu0 %v423_v46  ;;  %497 = vadd.xlane.f32.xlu1 %v496_v49  ;;  %v403_v51 = vpop.xlane.xlu0 %402 }
 0x2bb   :  { %v7538_v52 = vsub.f32 %v319_v19, %v487_v48  ;;  %v410_v53 = vmul.f32 0.03125, %v403_v51  ;;  %v499_v54 = vsel %vm394_vm1, %v493_v50, 0.0  ;;  %v494_v55 = vmul.f32 %v7533_v47, %v7533_v47 }
 0x2bc   :  { %v406_v56 = vpop.xlane.xlu1 %405 }
 0x2bd   :  { %v7543_v57 = vsub.f32 %v388_v22, %v410_v53  ;;  %v411_v58 = vmul.f32 0.03125, %v406_v56  ;;  %v502_v59 = vsel %vm394_vm1, %v494_v55, 0.0  ;;  %v495_v60 = vmul.f32 %v7538_v52, %v7538_v52 }
 0x2be   :  { %500 = vadd.xlane.f32.xlu1 %v499_v54  ;;  %503 = vadd.xlane.f32.xlu0 %v502_v59 }
 0x2bf   :  { %v7548_v61 = vsub.f32 %v391_v24, %v411_v58  ;;  %v505_v62 = vsel %vm394_vm1, %v495_v60, 0.0  ;;  %v418_v63 = vmul.f32 %v7543_v57, %v7543_v57 }
 0x2c1   :  { %v426_v0 = vsel %vm394_vm1, %v418_v63, 0.0  ;;  %v419_v1 = vmul.f32 %v7548_v61, %v7548_v61 }
 0x2c2   :  { %506 = vadd.xlane.f32.xlu1 %v505_v62  ;;  %427 = vadd.xlane.f32.xlu0 %v426_v0 }
 0x2c3   :  { %v429_v2 = vsel %vm394_vm1, %v419_v1, 0.0 }
 0x2c6   :  { %430 = vadd.xlane.f32.xlu1 %v429_v2 }
 0x343   :  { %v422_v7 = vpop.xlane.xlu0 %421 }
 0x344   :  { %v432_v8 = vmul.f32 0.03125, %v422_v7 }
 0x346   :  { %v436_v9 = vadd.f32 1e-05, %v432_v8 }
 0x347   :  { %v498_v10 = vpop.xlane.xlu1 %497  ;;  %v425_v11 = vpop.xlane.xlu0 %424 }
 0x348   :  { %6485 = vrsqrt.f32 %v436_v9  ;;  %v508_v12 = vmul.f32 0.03125, %v498_v10  ;;  %v433_v13 = vmul.f32 0.03125, %v425_v11  ;;  %v7136_v10 = vmov 0.0  }
 0x349   :  { %5940 = vmatprep.subr.bf16.mxu1 %v7136_v10  ;;  %5952 = vmatprep.subr.bf16.mxu0 %v7136_v10 }
 0x34a   :  { %v512_v14 = vadd.f32 1e-05, %v508_v12  ;;  %v437_v15 = vadd.f32 1e-05, %v433_v13 }
 0x34b   :  { %v501_v16 = vpop.xlane.xlu1 %500  ;;  %v504_v17 = vpop.xlane.xlu0 %503 }
 0x34c   :  { %6487 = vrsqrt.f32 %v512_v14  ;;  %v509_v18 = vmul.f32 0.03125, %v501_v16  ;;  %v510_v19 = vmul.f32 0.03125, %v504_v17 }
 0x34d   :  { %6489 = vrsqrt.f32 %v437_v15 }
 0x34e   :  { %v513_v20 = vadd.f32 1e-05, %v509_v18  ;;  %v514_v21 = vadd.f32 1e-05, %v510_v19 }
 0x34f   :  { %v507_v22 = vpop.xlane.xlu1 %506  ;;  %v428_v23 = vpop.xlane.xlu0 %427 }
 0x350   :  { %6491 = vrsqrt.f32 %v513_v20  ;;  %v511_v24 = vmul.f32 0.03125, %v507_v22  ;;  %v434_v25 = vmul.f32 0.03125, %v428_v23 }
 0x351   :  { %6493 = vrsqrt.f32 %v514_v21 }
 0x352   :  { %v6486_v26 = vpop.eup %6485  ;;  %v515_v27 = vadd.f32 1e-05, %v511_v24  ;;  %v438_v28 = vadd.f32 1e-05, %v434_v25 }
 0x353   :  { %v431_v29 = vpop.xlane.xlu1 %430  ;;  %v7558_v31 = vmul.f32 %v6486_v26, %v7517_v30 }
 0x354   :  { %6495 = vrsqrt.f32 %v515_v27  ;;  %v435_v32 = vmul.f32 0.03125, %v431_v29 }
 0x355   :  { %6497 = vrsqrt.f32 %v438_v28  ;;  %v455_v40 = vmul.f32 %v5597_v34, %v7558_v31 }
 0x356   :  { %v6488_v35 = vpop.eup %6487  ;;  %v439_v36 = vadd.f32 1e-05, %v435_v32 }
 0x357   :  { %v6490_v39 = vpop.eup %6489  ;;  %v520_v41 = vmul.f32 %v6488_v35, %v7523_v37  ;;  %v466_v49 = vadd.f32 %v5598_v43, %v455_v40 }
 0x358   :  { %6499 = vrsqrt.f32 %v439_v36  ;;  %v7563_v45 = vmul.f32 %v6490_v39, %v7519_v33 }
 0x359   :  { %v530_v30 = vmul.f32 %v5599_v38, %v520_v41 }
 0x35a   :  { %v6492_v46 = vpop.eup %6491  ;;  %v456_v51 = vmul.f32 %v5597_v34, %v7563_v45 }
 0x35b   :  { %v6494_v48 = vpop.eup %6493  ;;  %v540_v50 = vadd.f32 %v5600_v44, %v530_v30  ;;  %v521_v53 = vmul.f32 %v6492_v46, %v7528_v42 }
 0x35c   :  { %v522_v54 = vmul.f32 %v6494_v48, %v7533_v47  ;;  %v467_v59 = vadd.f32 %v5598_v43, %v456_v51 }
 0x35d   :  { %v619_v55 = vpack.c.bf16 %v540_v50, %v466_v49  ;;  %v531_v56 = vmul.f32 %v5599_v38, %v521_v53 }
 0x35e   :  { %v6496_v37 = vpop.eup %6495  ;;  %v532_v62 = vmul.f32 %v5599_v38, %v522_v54 }
 0x35f   :  { %v6498_v58 = vpop.eup %6497  ;;  %5932 = vmatprep.mubr.msk.bf16.mxu0 %vm394_vm1, %v619_v55  ;;  %v541_v33 = vadd.f32 %v5600_v44, %v531_v56  ;;  %v523_v60 = vmul.f32 %v6496_v37, %v7538_v52 }
 0x360   :  { %v7571_v63 = vmul.f32 %v6498_v58, %v7543_v57  ;;  %v542_v3 = vadd.f32 %v5600_v44, %v532_v62 }
 0x361   :  { %v544_v0 = vpack.c.bf16 %v541_v33, %v540_v50  ;;  %v620_v1 = vpack.c.bf16 %v541_v33, %v467_v59  ;;  %v533_v2 = vmul.f32 %v5599_v38, %v523_v60 }
 0x362   :  { %v6500_v42 = vpop.eup %6499  ;;  %v457_v47 = vmul.f32 %v5597_v34, %v7571_v63 }
 0x363   :  { %5924 = vmatprep.mubr.msk.bf16.mxu1 %vm394_vm1, %v544_v0  ;;  %5933 = vmatmul.mubr.msk.bf16.vlgmr.msra.gmra.mrb[4].mxu0 %vm394_vm1, %v620_v1  ;;  %v543_v4 = vadd.f32 %v5600_v44, %v533_v2  ;;  %v7577_v5 = vmul.f32 %v6500_v42, %v7548_v61 }
 0x364   :  { %v468_v52 = vadd.f32 %v5598_v43, %v457_v47 }
 0x365   :  { %v545_v6 = vpack.c.bf16 %v543_v4, %v542_v3  ;;  %v458_v57 = vmul.f32 %v5597_v34, %v7577_v5 }
 0x366   :  { %v621_v7 = vpack.c.bf16 %v542_v3, %v468_v52 }
 0x367   :  { %5925 = vmatmul.mubr.msk.bf16.vlgmr.msra.gmra.mrb[0].mxu1 %vm394_vm1, %v545_v6  ;;  %v469_v8 = vadd.f32 %v5598_v43, %v458_v57 }
 0x368   :  { %5936 = vmatprep.mubr.msk.bf16.mxu0 %vm394_vm1, %v621_v7  ;;  %5942 = vmatprep.mubr.msk.bf16.mxu1 %vm7137_vm2, %v7136_v10 }
 0x369   :  { %v622_v9 = vpack.c.bf16 %v543_v4, %v469_v8 }
 0x36b   :  { %5937 = vmatmul.mubr.msk.bf16.gmra.mrb[8].mxu0 %vm394_vm1, %v622_v9 }
 0x36c   :  { %5954 = vmatprep.mubr.msk.bf16.mxu0 %vm7137_vm2, %v7136_v10 }
 0x436   :  { %v5934_v61 = vpop.f32.mrb[4].mxu0 }
 0x437   :  { %v685_v11 = vpop.f32.mrb[5].mxu0 }
 0x438   :  { %v5935_v12 = vpop.f32.mrb[6].mxu0 }
 0x439   :  { %v7589_v13 = vpack.c.bf16 %v5935_v12, %v5934_v61  ;;  %v688_v14 = vpop.f32.mrb[7].mxu0 }
 0x43a   :  { %v7591_v15 = vpack.c.bf16 %v688_v14, %v685_v11  ;;  %v5926_v16 = vpop.f32.mrb[0].mxu1 }
 0x43b   :  { %v602_v17 = vpop.f32.mrb[1].mxu1  ;;  %v1175_v30 = vsel %vm720_vm3, %v7589_v13, 0 }
 0x43c   :  { %830 = vrot.lane.b32.xlu0 %v7591_v15, %s7138_s2  ;;  %v5927_v18 = vpop.f32.mrb[2].mxu1  ;;  %v725_v19 = vsel %vm720_vm3, %v7591_v15, 0 }
 0x43d   :  { %v7597_v20 = vpack.c.bf16 %v5927_v18, %v5926_v16  ;;  %v605_v21 = vpop.f32.mrb[3].mxu1  ;;  %5941 = vmatpush3.bf16.xpose.msra.mxu1 %v725_v19 }
 0x43e   :  { %v617_v22 = vpack.c.bf16 %v605_v21, %v602_v17  ;;  %v5938_v23 = vpop.f32.mrb[8].mxu0  ;;  %5946 = vmatprep.subr.bf16.mxu1 %v7136_v10 }
 0x43f   :  { %v701_v24 = vpop.f32.mrb[9].mxu0  ;;  %v7642_v32 = vrot.slane %v7597_v20, 4 }
 0x440   :  { %1058 = vrot.lane.b32.xlu0 %v7591_v15, %s7139_s10  ;;  %828 = vrot.lane.b32.xlu1 %v617_v22, %s7138_s2  ;;  %v5939_v25 = vpop.f32.mrb[10].mxu0  ;;  %v1170_v29 = vrot.slane %v617_v22, 4 }
 0x441   :  { %v7603_v26 = vpack.c.bf16 %v5939_v25, %v5938_v23  ;;  %v704_v27 = vpop.f32.mrb[11].mxu0 }
 0x442   :  { %v7605_v28 = vpack.c.bf16 %v704_v27, %v701_v24 }
 0x443   :  { %v2067_v47 = vsel %vm720_vm3, %v7603_v26, 0 }
 0x444   :  { %1279 = vrot.lane.b32.xlu0 %v7589_v13, %s7138_s2  ;;  %944 = vrot.lane.b32.xlu1 %v7591_v15, %s7140_s19  ;;  %v1620_v37 = vsel %vm720_vm3, %v7605_v28, 0 }
 0x445   :  { %5943 = vmatmul.mubr.msk.bf16.vlgmr.msra.gmra.mrb[4].mxu1 %vm720_vm3, %v617_v22 }
 0x446   :  { %5948 = vmatprep.mubr.msk.bf16.mxu1 %vm7137_vm2, %v7136_v10 }
 0x448   :  { %1392 = vrot.lane.b32.xlu0 %v7589_v13, %s7140_s19  ;;  %942 = vrot.lane.b32.xlu1 %v617_v22, %s7140_s19 }
 0x44c   :  { %1505 = vrot.lane.b32.xlu0 %v7589_v13, %s7139_s10  ;;  %1056 = vrot.lane.b32.xlu1 %v617_v22, %s7139_s10 }
 0x450   :  { %1277 = vrot.lane.b32.xlu1 %v1170_v29, %s7138_s2  ;;  %1725 = vrot.lane.b32.xlu0 %v7605_v28, %s7138_s2 }
 0x454   :  { %1390 = vrot.lane.b32.xlu1 %v1170_v29, %s7140_s19  ;;  %1838 = vrot.lane.b32.xlu0 %v7605_v28, %s7140_s19 }
 0x458   :  { %1503 = vrot.lane.b32.xlu1 %v1170_v29, %s7139_s10  ;;  %1951 = vrot.lane.b32.xlu0 %v7605_v28, %s7139_s10 }
 0x45c   :  { %1723 = vrot.lane.b32.xlu1 %v7597_v20, %s7138_s2  ;;  %2171 = vrot.lane.b32.xlu0 %v7603_v26, %s7138_s2 }
 0x460   :  { %1836 = vrot.lane.b32.xlu1 %v7597_v20, %s7140_s19  ;;  %2284 = vrot.lane.b32.xlu0 %v7603_v26, %s7140_s19 }
 0x464   :  { %1949 = vrot.lane.b32.xlu1 %v7597_v20, %s7139_s10  ;;  %2397 = vrot.lane.b32.xlu0 %v7603_v26, %s7139_s10 }
 0x468   :  { %2169 = vrot.lane.b32.xlu1 %v7642_v32, %s7138_s2 }
 0x46c   :  { %2282 = vrot.lane.b32.xlu1 %v7642_v32, %s7140_s19 }
 0x470   :  { %2395 = vrot.lane.b32.xlu1 %v7642_v32, %s7139_s10 }
 0x4ae   :  { %v831_v34 = vpop.permute.xlu0 %830 }
 0x4af   :  { %v836_v35 = vsel %vm720_vm3, %v831_v34, 0 }
 0x4b0   :  { %5953 = vmatpush3.bf16.xpose.msra.mxu0 %v836_v35 }
 0x4b1   :  { %5964 = vmatprep.subr.bf16.mxu0 %v7136_v10 }
 0x4b2   :  { %v829_v36 = vpop.permute.xlu1 %828  ;;  %v1059_v40 = vpop.permute.xlu0 %1058 }
 0x4b3   :  { %v1064_v43 = vsel %vm720_vm3, %v1059_v40, 0 }
 0x4b6   :  { %v945_v38 = vpop.permute.xlu1 %944  ;;  %v1280_v46 = vpop.permute.xlu0 %1279 }
 0x4b7   :  { %v950_v39 = vsel %vm720_vm3, %v945_v38, 0  ;;  %5955 = vmatmul.mubr.msk.bf16.vlgmr.msra.gmra.mrb[12].mxu0 %vm720_vm3, %v829_v36  ;;  %v1285_v48 = vsel %vm720_vm3, %v1280_v46, 0 }
 0x4b8   :  { %5965 = vmatpush3.bf16.xpose.msra.mxu0 %v950_v39  ;;  %5966 = vmatprep.mubr.msk.bf16.mxu0 %vm7137_vm2, %v7136_v10 }
 0x4b9   :  { %5976 = vmatprep.subr.bf16.mxu0 %v7136_v10 }
 0x4ba   :  { %v943_v41 = vpop.permute.xlu1 %942  ;;  %v1393_v49 = vpop.permute.xlu0 %1392 }
 0x4bb   :  { %v1398_v51 = vsel %vm720_vm3, %v1393_v49, 0 }
 0x4be   :  { %v1057_v44 = vpop.permute.xlu1 %1056  ;;  %v1506_v53 = vpop.permute.xlu0 %1505 }
 0x4bf   :  { %5967 = vmatmul.mubr.msk.bf16.vlgmr.msra.gmra.mrb[16].mxu0 %vm720_vm3, %v943_v41  ;;  %v1511_v55 = vsel %vm720_vm3, %v1506_v53, 0 }
 0x4c0   :  { %5977 = vmatpush3.bf16.xpose.msra.mxu0 %v1064_v43  ;;  %5978 = vmatprep.mubr.msk.bf16.mxu0 %vm7137_vm2, %v7136_v10 }
 0x4c1   :  { %5988 = vmatprep.subr.bf16.mxu0 %v7136_v10 }
 0x4c2   :  { %v1278_v50 = vpop.permute.xlu1 %1277  ;;  %v1726_v58 = vpop.permute.xlu0 %1725 }
 0x4c3   :  { %v1731_v59 = vsel %vm720_vm3, %v1726_v58, 0 }
 0x4c6   :  { %v1391_v54 = vpop.permute.xlu1 %1390  ;;  %v1839_v33 = vpop.permute.xlu0 %1838 }
 0x4c7   :  { %5979 = vmatmul.mubr.msk.bf16.vlgmr.msra.gmra.mrb[20].mxu0 %vm720_vm3, %v1057_v44  ;;  %v1844_v62 = vsel %vm720_vm3, %v1839_v33, 0 }
 0x4c8   :  { %5989 = vmatpush3.bf16.xpose.msra.mxu0 %v1175_v30  ;;  %5990 = vmatprep.mubr.msk.bf16.mxu0 %vm7137_vm2, %v7136_v10 }
 0x4c9   :  { %6000 = vmatprep.subr.bf16.mxu0 %v7136_v10 }
 0x4ca   :  { %v1504_v56 = vpop.permute.xlu1 %1503  ;;  %v1952_v0 = vpop.permute.xlu0 %1951 }
 0x4cb   :  { %v1957_v2 = vsel %vm720_vm3, %v1952_v0, 0 }
 0x4ce   :  { %v1724_v60 = vpop.permute.xlu1 %1723  ;;  %v2172_v3 = vpop.permute.xlu0 %2171 }
 0x4cf   :  { %5991 = vmatmul.mubr.msk.bf16.vlgmr.msra.gmra.mrb[24].mxu0 %vm720_vm3, %v1170_v29  ;;  %v2177_v4 = vsel %vm720_vm3, %v2172_v3, 0 }
 0x4d0   :  { %6001 = vmatpush3.bf16.xpose.msra.mxu0 %v1285_v48  ;;  %6002 = vmatprep.mubr.msk.bf16.mxu0 %vm7137_vm2, %v7136_v10 }
 0x4d1   :  { %6012 = vmatprep.subr.bf16.mxu0 %v7136_v10 }
 0x4d2   :  { %v1837_v1 = vpop.permute.xlu1 %1836  ;;  %v2285_v52 = vpop.permute.xlu0 %2284 }
 0x4d3   :  { %v2290_v57 = vsel %vm720_vm3, %v2285_v52, 0 }
 0x4d6   :  { %v1950_v42 = vpop.permute.xlu1 %1949  ;;  %v2398_v12 = vpop.permute.xlu0 %2397 }
 0x4d7   :  { %6003 = vmatmul.mubr.msk.bf16.vlgmr.msra.gmra.mrb[28].mxu0 %vm720_vm3, %v1278_v50  ;;  %v2403_v16 = vsel %vm720_vm3, %v2398_v12, 0 }
 0x4d8   :  { %6013 = vmatpush3.bf16.xpose.msra.mxu0 %v1398_v51  ;;  %6014 = vmatprep.mubr.msk.bf16.mxu0 %vm7137_vm2, %v7136_v10 }
 0x4d9   :  { %6024 = vmatprep.subr.bf16.mxu0 %v7136_v10 }
 0x4da   :  { %v2170_v6 = vpop.permute.xlu1 %2169 }
 0x4de   :  { %v2283_v14 = vpop.permute.xlu1 %2282 }
 0x4df   :  { %6015 = vmatmul.mubr.msk.bf16.vlgmr.msra.gmra.mrb[32].mxu0 %vm720_vm3, %v1391_v54 }
 0x4e0   :  { %6025 = vmatpush3.bf16.xpose.msra.mxu0 %v1511_v55  ;;  %6026 = vmatprep.mubr.msk.bf16.mxu0 %vm7137_vm2, %v7136_v10 }
 0x4e1   :  { %6036 = vmatprep.subr.bf16.mxu0 %v7136_v10 }
 0x4e2   :  { %v2396_v17 = vpop.permute.xlu1 %2395 }
 0x4e7   :  { %6027 = vmatmul.mubr.msk.bf16.vlgmr.msra.gmra.mrb[36].mxu0 %vm720_vm3, %v1504_v56 }
 0x4e8   :  { %6037 = vmatpush3.bf16.xpose.msra.mxu0 %v1620_v37  ;;  %6038 = vmatprep.mubr.msk.bf16.mxu0 %vm7137_vm2, %v7136_v10 }
 0x4e9   :  { %6048 = vmatprep.subr.bf16.mxu0 %v7136_v10 }
 0x4ef   :  { %6039 = vmatmul.mubr.msk.bf16.vlgmr.msra.gmra.mrb[40].mxu0 %vm720_vm3, %v7597_v20 }
 0x4f0   :  { %6049 = vmatpush3.bf16.xpose.msra.mxu0 %v1731_v59  ;;  %6050 = vmatprep.mubr.msk.bf16.mxu0 %vm7137_vm2, %v7136_v10 }
 0x4f1   :  { %6060 = vmatprep.subr.bf16.mxu0 %v7136_v10 }
 0x4f7   :  { %6051 = vmatmul.mubr.msk.bf16.vlgmr.msra.gmra.mrb[44].mxu0 %vm720_vm3, %v1724_v60 }
 0x4f8   :  { %6061 = vmatpush3.bf16.xpose.msra.mxu0 %v1844_v62  ;;  %6062 = vmatprep.mubr.msk.bf16.mxu0 %vm7137_vm2, %v7136_v10 }
 0x4f9   :  { %6072 = vmatprep.subr.bf16.mxu0 %v7136_v10 }
 0x4ff   :  { %6063 = vmatmul.mubr.msk.bf16.vlgmr.msra.gmra.mrb[48].mxu0 %vm720_vm3, %v1837_v1 }
 0x500   :  { %6073 = vmatpush3.bf16.xpose.msra.mxu0 %v1957_v2  ;;  %6074 = vmatprep.mubr.msk.bf16.mxu0 %vm7137_vm2, %v7136_v10 }
 0x501   :  { %6084 = vmatprep.subr.bf16.mxu0 %v7136_v10 }
 0x507   :  { %6075 = vmatmul.mubr.msk.bf16.vlgmr.msra.gmra.mrb[52].mxu0 %vm720_vm3, %v1950_v42 }
 0x508   :  { %6085 = vmatpush3.bf16.xpose.msra.mxu0 %v2067_v47  ;;  %6086 = vmatprep.mubr.msk.bf16.mxu0 %vm7137_vm2, %v7136_v10 }
 0x509   :  { %6096 = vmatprep.subr.bf16.mxu0 %v7136_v10 }
 0x50f   :  { %6087 = vmatmul.mubr.msk.bf16.vlgmr.msra.gmra.mrb[56].mxu0 %vm720_vm3, %v7642_v32 }
 0x510   :  { %6097 = vmatpush3.bf16.xpose.msra.mxu0 %v2177_v4  ;;  %6098 = vmatprep.mubr.msk.bf16.mxu0 %vm7137_vm2, %v7136_v10 }
 0x511   :  { %6108 = vmatprep.subr.bf16.mxu0 %v7136_v10 }
 0x517   :  { %6099 = vmatmul.mubr.msk.bf16.vlgmr.msra.gmra.mrb[60].mxu0 %vm720_vm3, %v2170_v6 }
 0x518   :  { %v761_v7 = vpop.f32.mrb[4].mxu1  ;;  %6109 = vmatpush3.bf16.xpose.msra.mxu0 %v2290_v57  ;;  %6110 = vmatprep.mubr.msk.bf16.mxu0 %vm7137_vm2, %v7136_v10 }
 0x519   :  { %v5944_v8 = vpop.f32.mrb[5].mxu1  ;;  %v767_v9 = vsel %vm338_vm0, %v761_v7, -inf  ;;  %6120 = vmatprep.subr.bf16.mxu0 %v7136_v10 }
 0x51a   :  { %v764_v61 = vpop.f32.mrb[6].mxu1  ;;  %768 = vmax.xlane.f32.xlu0 %v767_v9 }
 0x51b   :  { %v5945_v11 = vpop.f32.mrb[7].mxu1 }
 0x51f   :  { %6111 = vmatmul.mubr.msk.bf16.vlgmr.msra.gmra.mrb[64].mxu0 %vm720_vm3, %v2283_v14 }
 0x520   :  { %6121 = vmatpush3.bf16.xpose.msra.mxu0 %v2403_v16  ;;  %6122 = vmatprep.mubr.msk.bf16.mxu0 %vm7137_vm2, %v7136_v10 }
 0x527   :  { %6123 = vmatmul.mubr.msk.bf16.vlgmr.msra.gmra.mrb[68].mxu0 %vm720_vm3, %v2396_v17 }
 0x58a   :  { %v7728_v18 = vpop.f32.mrb[12].mxu0 }
 0x58b   :  { %v5956_v19 = vpop.f32.mrb[13].mxu0  ;;  %v878_v20 = vsel %vm338_vm0, %v7728_v18, -inf }
 0x58c   :  { %879 = vmax.xlane.f32.xlu1 %v878_v20  ;;  %v875_v21 = vpop.f32.mrb[14].mxu0 }
 0x58d   :  { %v5957_v22 = vpop.f32.mrb[15].mxu0 }
 0x592   :  { %v7732_v23 = vpop.f32.mrb[16].mxu0 }
 0x593   :  { %v5968_v24 = vpop.f32.mrb[17].mxu0  ;;  %v992_v25 = vsel %vm338_vm0, %v7732_v23, -inf }
 0x594   :  { %993 = vmax.xlane.f32.xlu0 %v992_v25  ;;  %v989_v27 = vpop.f32.mrb[18].mxu0 }
 0x595   :  { %v5969_v29 = vpop.f32.mrb[19].mxu0 }
 0x59a   :  { %v7736_v32 = vpop.f32.mrb[20].mxu0 }
 0x59b   :  { %v5980_v34 = vpop.f32.mrb[21].mxu0  ;;  %v1106_v35 = vsel %vm338_vm0, %v7736_v32, -inf }
 0x59c   :  { %1107 = vmax.xlane.f32.xlu0 %v1106_v35  ;;  %v1103_v36 = vpop.f32.mrb[22].mxu0 }
 0x59d   :  { %v5981_v38 = vpop.f32.mrb[23].mxu0 }
 0x5a2   :  { %v7740_v39 = vpop.f32.mrb[24].mxu0 }
 0x5a3   :  { %v5992_v40 = vpop.f32.mrb[25].mxu0  ;;  %v1217_v41 = vsel %vm338_vm0, %v7740_v39, -inf }
 0x5a4   :  { %1218 = vmax.xlane.f32.xlu0 %v1217_v41  ;;  %v1214_v43 = vpop.f32.mrb[26].mxu0 }
 0x5a5   :  { %v5993_v44 = vpop.f32.mrb[27].mxu0 }
 0x5a7   :  { %v769_v30 = vpop.xlane.xlu0 %768 }
 0x5a8   :  { %v770_v46 = vsub.f32 %v761_v7, %v769_v30 }
 0x5aa   :  { %v771_v48 = vmul.f32 1.442695, %v770_v46  ;;  %v7744_v49 = vpop.f32.mrb[28].mxu0 }
 0x5ab   :  { %v6004_v50 = vpop.f32.mrb[29].mxu0  ;;  %v1327_v51 = vsel %vm338_vm0, %v7744_v49, -inf }
 0x5ac   :  { %6501 = vpow2.f32 %v771_v48  ;;  %1328 = vmax.xlane.f32.xlu1 %v1327_v51  ;;  %v1324_v53 = vpop.f32.mrb[30].mxu0 }
 0x5ad   :  { %v6005_v54 = vpop.f32.mrb[31].mxu0 }
 0x5b2   :  { %v7748_v55 = vpop.f32.mrb[32].mxu0 }
 0x5b3   :  { %v6016_v56 = vpop.f32.mrb[33].mxu0  ;;  %v1440_v37 = vsel %vm338_vm0, %v7748_v55, -inf }
 0x5b4   :  { %1441 = vmax.xlane.f32.xlu0 %v1440_v37  ;;  %v1437_v58 = vpop.f32.mrb[34].mxu0 }
 0x5b5   :  { %v6017_v59 = vpop.f32.mrb[35].mxu0 }
 0x5b6   :  { %v7752_v33 = vpop.eup %6501 }
 0x5b7   :  { %v773_v60 = vsel %vm338_vm0, %v7752_v33, 0.0 }
 0x5b8   :  { %774 = vadd.xlane.f32.xlu1 %v773_v60 }
 0x5ba   :  { %v7756_v62 = vpop.f32.mrb[36].mxu0 }
 0x5bb   :  { %v6028_v0 = vpop.f32.mrb[37].mxu0  ;;  %v1553_v1 = vsel %vm338_vm0, %v7756_v62, -inf }
 0x5bc   :  { %v1550_v2 = vpop.f32.mrb[38].mxu0  ;;  %1554 = vmax.xlane.f32.xlu1 %v1553_v1 }
 0x5bd   :  { %v6029_v42 = vpop.f32.mrb[39].mxu0 }
 0x5c2   :  { %v7760_v47 = vpop.f32.mrb[40].mxu0 }
 0x5c3   :  { %v6040_v3 = vpop.f32.mrb[41].mxu0  ;;  %v1662_v4 = vsel %vm338_vm0, %v7760_v47, -inf }
 0x5c4   :  { %1663 = vmax.xlane.f32.xlu0 %v1662_v4  ;;  %v1659_v52 = vpop.f32.mrb[42].mxu0 }
 0x5c5   :  { %v6041_v6 = vpop.f32.mrb[43].mxu0 }
 0x5ca   :  { %v7764_v57 = vpop.f32.mrb[44].mxu0 }
 0x5cb   :  { %v6052_v7 = vpop.f32.mrb[45].mxu0  ;;  %v1773_v8 = vsel %vm338_vm0, %v7764_v57, -inf }
 0x5cc   :  { %v1770_v9 = vpop.f32.mrb[46].mxu0  ;;  %1774 = vmax.xlane.f32.xlu1 %v1773_v8 }
 0x5cd   :  { %v6053_v61 = vpop.f32.mrb[47].mxu0 }
 0x5d2   :  { %v7768_v11 = vpop.f32.mrb[48].mxu0 }
 0x5d3   :  { %v6064_v12 = vpop.f32.mrb[49].mxu0  ;;  %v1886_v44 = vsel %vm338_vm0, %v7768_v11, -inf }
 0x5d4   :  { %v1883_v14 = vpop.f32.mrb[50].mxu0 }
 0x5d5   :  { %v6065_v16 = vpop.f32.mrb[51].mxu0 }
 0x5da   :  { %890 = vrot.lane.b32.xlu0 %v7591_v15, %s7141_s1  ;;  %v7772_v17 = vpop.f32.mrb[52].mxu0 }
 0x5db   :  { %v6076_v19 = vpop.f32.mrb[53].mxu0  ;;  %v1999_v50 = vsel %vm338_vm0, %v7772_v17, -inf }
 0x5dc   :  { %v1996_v20 = vpop.f32.mrb[54].mxu0 }
 0x5dd   :  { %v6077_v21 = vpop.f32.mrb[55].mxu0  ;;  %780 = vrot.lane.b32.xlu1 %v7591_v15, %s7142_s24 }
 0x5e2   :  { %v7776_v22 = vpop.f32.mrb[56].mxu0 }
 0x5e3   :  { %v6088_v24 = vpop.f32.mrb[57].mxu0  ;;  %v2109_v53 = vsel %vm338_vm0, %v7776_v22, -inf }
 0x5e4   :  { %v2106_v25 = vpop.f32.mrb[58].mxu0 }
 0x5e5   :  { %v6089_v27 = vpop.f32.mrb[59].mxu0 }
 0x5ea   :  { %v7778_v29 = vpop.f32.mrb[60].mxu0 }
 0x5eb   :  { %v6100_v34 = vpop.f32.mrb[61].mxu0  ;;  %v2219_v54 = vsel %vm338_vm0, %v7778_v29, -inf }
 0x5ec   :  { %v2216_v35 = vpop.f32.mrb[62].mxu0 }
 0x5ed   :  { %v6101_v36 = vpop.f32.mrb[63].mxu0 }
 0x5f2   :  { %v7780_v38 = vpop.f32.mrb[64].mxu0 }
 0x5f3   :  { %v6112_v40 = vpop.f32.mrb[65].mxu0  ;;  %v2332_v56 = vsel %vm338_vm0, %v7780_v38, -inf }
 0x5f4   :  { %v2329_v41 = vpop.f32.mrb[66].mxu0 }
 0x5f5   :  { %v6113_v43 = vpop.f32.mrb[67].mxu0 }
 0x5f9   :  { %1887 = vmax.xlane.f32.xlu0 %v1886_v44 }
 0x5fa   :  { %v7784_v30 = vpop.f32.mrb[68].mxu0 }
 0x5fb   :  { %v6124_v46 = vpop.f32.mrb[69].mxu0  ;;  %v2445_v37 = vsel %vm338_vm0, %v7784_v30, -inf }
 0x5fc   :  { %v2442_v48 = vpop.f32.mrb[70].mxu0 }
 0x5fd   :  { %2000 = vmax.xlane.f32.xlu0 %v1999_v50  ;;  %v6125_v51 = vpop.f32.mrb[71].mxu0 }
 0x601   :  { %2110 = vmax.xlane.f32.xlu0 %v2109_v53 }
 0x605   :  { %2220 = vmax.xlane.f32.xlu0 %v2219_v54 }
 0x609   :  { %2333 = vmax.xlane.f32.xlu0 %v2332_v56 }
 0x60d   :  { %2446 = vmax.xlane.f32.xlu0 %v2445_v37 }
 0x619   :  { %v880_v58 = vpop.xlane.xlu1 %879 }
 0x61a   :  { %v881_v59 = vsub.f32 %v7728_v18, %v880_v58 }
 0x61c   :  { %v882_v60 = vmul.f32 1.442695, %v881_v59 }
 0x61e   :  { %6503 = vpow2.f32 %v882_v60 }
 0x621   :  { %v994_v0 = vpop.xlane.xlu0 %993 }
 0x622   :  { %v995_v1 = vsub.f32 %v7732_v23, %v994_v0 }
 0x624   :  { %v996_v2 = vmul.f32 1.442695, %v995_v1 }
 0x626   :  { %6505 = vpow2.f32 %v996_v2 }
 0x628   :  { %v7798_v42 = vpop.eup %6503 }
 0x629   :  { %v1108_v3 = vpop.xlane.xlu0 %1107  ;;  %v884_v4 = vsel %vm338_vm0, %v7798_v42, 0.0 }
 0x62a   :  { %v1109_v52 = vsub.f32 %v7736_v32, %v1108_v3  ;;  %885 = vadd.xlane.f32.xlu1 %v884_v4 }
 0x62c   :  { %v1110_v6 = vmul.f32 1.442695, %v1109_v52 }
 0x62e   :  { %6507 = vpow2.f32 %v1110_v6 }
 0x630   :  { %v7803_v7 = vpop.eup %6505 }
 0x631   :  { %v1219_v18 = vpop.xlane.xlu0 %1218  ;;  %v998_v8 = vsel %vm338_vm0, %v7803_v7, 0.0 }
 0x632   :  { %v1220_v23 = vsub.f32 %v7740_v39, %v1219_v18  ;;  %999 = vadd.xlane.f32.xlu1 %v998_v8 }
 0x634   :  { %v1221_v9 = vmul.f32 1.442695, %v1220_v23 }
 0x636   :  { %6509 = vpow2.f32 %v1221_v9 }
 0x638   :  { %v7808_v61 = vpop.eup %6507 }
 0x639   :  { %v1329_v12 = vpop.xlane.xlu1 %1328  ;;  %v1112_v32 = vsel %vm338_vm0, %v7808_v61, 0.0 }
 0x63a   :  { %v1330_v14 = vsub.f32 %v7744_v49, %v1329_v12  ;;  %1113 = vadd.xlane.f32.xlu1 %v1112_v32 }
 0x63c   :  { %v1331_v16 = vmul.f32 1.442695, %v1330_v14 }
 0x63e   :  { %6511 = vpow2.f32 %v1331_v16 }
 0x640   :  { %v7813_v19 = vpop.eup %6509 }
 0x641   :  { %v1223_v20 = vsel %vm338_vm0, %v7813_v19, 0.0  ;;  %v1442_v27 = vpop.xlane.xlu0 %1441 }
 0x642   :  { %1224 = vadd.xlane.f32.xlu0 %v1223_v20  ;;  %v1443_v43 = vsub.f32 %v7748_v55, %v1442_v27 }
 0x645   :  { %v775_v24 = vpop.xlane.xlu1 %774 }
 0x646   :  { %6513 = vrcp.f32 %v775_v24 }
 0x648   :  { %v7817_v39 = vpop.eup %6511 }
 0x649   :  { %v1333_v21 = vsel %vm338_vm0, %v7817_v39, 0.0  ;;  %v1555_v25 = vpop.xlane.xlu1 %1554 }
 0x64a   :  { %1334 = vadd.xlane.f32.xlu1 %v1333_v21 }
 0x650   :  { %v6514_v49 = vpop.eup %6513 }
 0x651   :  { %v1664_v35 = vpop.xlane.xlu0 %1663  ;;  %v777_v36 = vmul.f32 %v6514_v49, %v7752_v33  ;;  %v1556_v33 = vsub.f32 %v7756_v62, %v1555_v25 }
 0x652   :  { %v1665_v46 = vsub.f32 %v7760_v47, %v1664_v35 }
 0x653   :  { %v778_v41 = vpack.c.bf16 %v777_v36, %v777_v36  ;;  %v1557_v55 = vmul.f32 1.442695, %v1556_v33 }
 0x654   :  { %v1666_v48 = vmul.f32 1.442695, %v1665_v46 }
 0x655   :  { %v891_v44 = vpop.permute.xlu0 %890 }
 0x658   :  { %1004 = vrot.lane.b32.xlu0 %v7591_v15, %s7143_s27 }
 0x659   :  { %v1775_v34 = vpop.xlane.xlu1 %1774 }
 0x65a   :  { %v1776_v50 = vsub.f32 %v7764_v57, %v1775_v34 }
 0x65b   :  { %1118 = vrot.lane.b32.xlu1 %v7591_v15, %s7144_s16  ;;  %v1444_v15 = vmul.f32 1.442695, %v1443_v43 }
 0x65c   :  { %v1777_v51 = vmul.f32 1.442695, %v1776_v50 }
 0x65d   :  { %v781_v40 = vpop.permute.xlu1 %780  ;;  %6515 = vpow2.f32 %v1444_v15 }
 0x65e   :  { %5947 = vmatpush3.bf16.msra.mxu1 %v781_v40  ;;  %6517 = vpow2.f32 %v1557_v55 }
 0x65f   :  { %1230 = vrot.lane.b32.xlu1 %v7589_v13, %s7142_s24  ;;  %5958 = vmatprep.subr.bf16.mxu1 %v7136_v10  ;;  %6519 = vpow2.f32 %v1666_v48 }
 0x660   :  { %6521 = vpow2.f32 %v1777_v51 }
 0x661   :  { %5949 = vmatmul.mubr.msk.bf16.vlgmr.msra.gmra.mrb[8].mxu1 %vm338_vm0, %v778_v41 }
 0x662   :  { %5959 = vmatpush3.bf16.msra.mxu1 %v891_v44  ;;  %5960 = vmatprep.mubr.msk.bf16.mxu1 %vm7137_vm2, %v7136_v10 }
 0x663   :  { %1339 = vrot.lane.b32.xlu1 %v7589_v13, %s7141_s1  ;;  %5970 = vmatprep.subr.bf16.mxu1 %v7136_v10 }
 0x667   :  { %1452 = vrot.lane.b32.xlu1 %v7589_v13, %s7143_s27  ;;  %v7845_v62 = vpop.eup %6515 }
 0x668   :  { %v1446_v47 = vsel %vm338_vm0, %v7845_v62, 0.0  ;;  %v7851_v53 = vpop.eup %6517 }
 0x669   :  { %v7857_v57 = vpop.eup %6519 }
 0x66a   :  { %v1668_v54 = vsel %vm338_vm0, %v7857_v57, 0.0  ;;  %v7863_v56 = vpop.eup %6521 }
 0x66b   :  { %1565 = vrot.lane.b32.xlu1 %v7589_v13, %s7144_s16  ;;  %v1559_v13 = vsel %vm338_vm0, %v7851_v53, 0.0  ;;  %v1779_v37 = vsel %vm338_vm0, %v7863_v56, 0.0 }
 0x66f   :  { %1675 = vrot.lane.b32.xlu1 %v7605_v28, %s7142_s24 }
 0x673   :  { %1785 = vrot.lane.b32.xlu1 %v7605_v28, %s7141_s1 }
 0x677   :  { %1898 = vrot.lane.b32.xlu1 %v7605_v28, %s7143_s27  ;;  %1447 = vadd.xlane.f32.xlu0 %v1446_v47 }
 0x67b   :  { %2011 = vrot.lane.b32.xlu1 %v7605_v28, %s7144_s16  ;;  %1560 = vadd.xlane.f32.xlu0 %v1559_v13 }
 0x67f   :  { %2122 = vrot.lane.b32.xlu1 %v7603_v26, %s7142_s24  ;;  %1669 = vadd.xlane.f32.xlu0 %v1668_v54 }
 0x683   :  { %2344 = vrot.lane.b32.xlu1 %v7603_v26, %s7143_s27  ;;  %1780 = vadd.xlane.f32.xlu0 %v1779_v37 }
 0x686   :  { %v1888_v58 = vpop.xlane.xlu0 %1887 }
 0x687   :  { %v1889_v28 = vsub.f32 %v7768_v11, %v1888_v58  ;;  %2457 = vrot.lane.b32.xlu1 %v7603_v26, %s7144_s16 }
 0x689   :  { %v1890_v59 = vmul.f32 1.442695, %v1889_v28 }
 0x68a   :  { %v2001_v60 = vpop.xlane.xlu0 %2000 }
 0x68b   :  { %6523 = vpow2.f32 %v1890_v59  ;;  %v2002_v0 = vsub.f32 %v7772_v17, %v2001_v60 }
 0x68d   :  { %v2003_v1 = vmul.f32 1.442695, %v2002_v0 }
 0x68e   :  { %v2111_v2 = vpop.xlane.xlu0 %2110 }
 0x68f   :  { %6525 = vpow2.f32 %v2003_v1  ;;  %v2112_v3 = vsub.f32 %v7776_v22, %v2111_v2 }
 0x691   :  { %v2113_v4 = vmul.f32 1.442695, %v2112_v3 }
 0x692   :  { %v2221_v52 = vpop.xlane.xlu0 %2220 }
 0x693   :  { %6527 = vpow2.f32 %v2113_v4  ;;  %v2222_v6 = vsub.f32 %v7778_v29, %v2221_v52 }
 0x695   :  { %v7877_v18 = vpop.eup %6523  ;;  %v2223_v11 = vmul.f32 1.442695, %v2222_v6 }
 0x696   :  { %v2334_v8 = vpop.xlane.xlu0 %2333  ;;  %v1892_v23 = vsel %vm338_vm0, %v7877_v18, 0.0 }
 0x697   :  { %6529 = vpow2.f32 %v2223_v11  ;;  %v2335_v17 = vsub.f32 %v7780_v38, %v2334_v8  ;;  %1893 = vadd.xlane.f32.xlu0 %v1892_v23 }
 0x699   :  { %v7882_v9 = vpop.eup %6525  ;;  %v2336_v12 = vmul.f32 1.442695, %v2335_v17 }
 0x69a   :  { %v2447_v22 = vpop.xlane.xlu0 %2446  ;;  %v2005_v32 = vsel %vm338_vm0, %v7882_v9, 0.0 }
 0x69b   :  { %6531 = vpow2.f32 %v2336_v12  ;;  %v2448_v29 = vsub.f32 %v7784_v30, %v2447_v22  ;;  %2006 = vadd.xlane.f32.xlu0 %v2005_v32 }
 0x69d   :  { %v7887_v14 = vpop.eup %6527  ;;  %v2449_v16 = vmul.f32 1.442695, %v2448_v29 }
 0x69e   :  { %v2115_v20 = vsel %vm338_vm0, %v7887_v14, 0.0 }
 0x69f   :  { %6533 = vpow2.f32 %v2449_v16  ;;  %2116 = vadd.xlane.f32.xlu0 %v2115_v20 }
 0x6a1   :  { %v7891_v38 = vpop.eup %6529 }
 0x6a2   :  { %v2225_v21 = vsel %vm338_vm0, %v7891_v38, 0.0 }
 0x6a3   :  { %2226 = vadd.xlane.f32.xlu0 %v2225_v21 }
 0x6a5   :  { %v7895_v24 = vpop.eup %6531 }
 0x6a6   :  { %v2338_v30 = vsel %vm338_vm0, %v7895_v24, 0.0 }
 0x6a7   :  { %2339 = vadd.xlane.f32.xlu0 %v2338_v30 }
 0x6a9   :  { %v7899_v25 = vpop.eup %6533 }
 0x6aa   :  { %v2451_v27 = vsel %vm338_vm0, %v7899_v25, 0.0 }
 0x6ab   :  { %2452 = vadd.xlane.f32.xlu0 %v2451_v27 }
 0x6b7   :  { %v886_v49 = vpop.xlane.xlu1 %885 }
 0x6b8   :  { %6535 = vrcp.f32 %v886_v49 }
 0x6bf   :  { %v1000_v34 = vpop.xlane.xlu1 %999 }
 0x6c0   :  { %6537 = vrcp.f32 %v1000_v34 }
 0x6c1   :  { %2231 = vrot.lane.b32.xlu0 %v7603_v26, %s7141_s1 }
 0x6c2   :  { %v6536_v35 = vpop.eup %6535 }
 0x6c3   :  { %v888_v36 = vmul.f32 %v6536_v35, %v7798_v42 }
 0x6c5   :  { %v889_v40 = vpack.c.bf16 %v888_v36, %v888_v36 }
 0x6c7   :  { %5961 = vmatmul.mubr.msk.bf16.vlgmr.msra.gmra.mrb[12].mxu1 %vm338_vm0, %v889_v40  ;;  %v1114_v41 = vpop.xlane.xlu1 %1113 }
 0x6c8   :  { %5972 = vmatprep.mubr.msk.bf16.mxu1 %vm7137_vm2, %v7136_v10  ;;  %6539 = vrcp.f32 %v1114_v41 }
 0x6ca   :  { %v6538_v43 = vpop.eup %6537 }
 0x6cb   :  { %v1002_v15 = vmul.f32 %v6538_v43, %v7803_v7 }
 0x6cd   :  { %v1003_v26 = vpack.c.bf16 %v1002_v15, %v1002_v15 }
 0x6cf   :  { %v1225_v44 = vpop.xlane.xlu0 %1224 }
 0x6d0   :  { %6541 = vrcp.f32 %v1225_v44 }
 0x6d2   :  { %v6540_v42 = vpop.eup %6539 }
 0x6d3   :  { %v1005_v33 = vpop.permute.xlu0 %1004  ;;  %v1116_v46 = vmul.f32 %v6540_v42, %v7808_v61 }
 0x6d4   :  { %5971 = vmatpush3.bf16.msra.mxu1 %v1005_v33 }
 0x6d5   :  { %5982 = vmatprep.subr.bf16.mxu1 %v7136_v10  ;;  %v1117_v50 = vpack.c.bf16 %v1116_v46, %v1116_v46 }
 0x6d7   :  { %v1335_v55 = vpop.xlane.xlu1 %1334  ;;  %5973 = vmatmul.mubr.msk.bf16.vlgmr.msra.gmra.mrb[16].mxu1 %vm338_vm0, %v1003_v26 }
 0x6d8   :  { %5984 = vmatprep.mubr.msk.bf16.mxu1 %vm7137_vm2, %v7136_v10  ;;  %6543 = vrcp.f32 %v1335_v55 }
 0x6da   :  { %v6542_v7 = vpop.eup %6541 }
 0x6db   :  { %v1119_v48 = vpop.permute.xlu1 %1118  ;;  %v1227_v47 = vmul.f32 %v6542_v7, %v7813_v19 }
 0x6dc   :  { %5983 = vmatpush3.bf16.msra.mxu1 %v1119_v48 }
 0x6dd   :  { %5994 = vmatprep.subr.bf16.mxu1 %v7136_v10  ;;  %v1228_v13 = vpack.c.bf16 %v1227_v47, %v1227_v47 }
 0x6df   :  { %v1231_v51 = vpop.permute.xlu1 %1230  ;;  %5985 = vmatmul.mubr.msk.bf16.vlgmr.msra.gmra.mrb[20].mxu1 %vm338_vm0, %v1117_v50 }
 0x6e0   :  { %5995 = vmatpush3.bf16.msra.mxu1 %v1231_v51  ;;  %5996 = vmatprep.mubr.msk.bf16.mxu1 %vm7137_vm2, %v7136_v10 }
 0x6e1   :  { %6006 = vmatprep.subr.bf16.mxu1 %v7136_v10 }
 0x6e2   :  { %v6544_v61 = vpop.eup %6543 }
 0x6e3   :  { %v1340_v54 = vpop.permute.xlu1 %1339  ;;  %v1337_v37 = vmul.f32 %v6544_v61, %v7817_v39 }
 0x6e5   :  { %v1338_v58 = vpack.c.bf16 %v1337_v37, %v1337_v37 }
 0x6e7   :  { %5997 = vmatmul.mubr.msk.bf16.vlgmr.msra.gmra.mrb[24].mxu1 %vm338_vm0, %v1228_v13  ;;  %v1453_v28 = vpop.permute.xlu1 %1452 }
 0x6e8   :  { %6007 = vmatpush3.bf16.msra.mxu1 %v1340_v54  ;;  %6008 = vmatprep.mubr.msk.bf16.mxu1 %vm7137_vm2, %v7136_v10 }
 0x6e9   :  { %6018 = vmatprep.subr.bf16.mxu1 %v7136_v10 }
 0x6eb   :  { %v1566_v3 = vpop.permute.xlu1 %1565 }
 0x6ef   :  { %6009 = vmatmul.mubr.msk.bf16.vlgmr.msra.gmra.mrb[28].mxu1 %vm338_vm0, %v1338_v58  ;;  %v1676_v8 = vpop.permute.xlu1 %1675 }
 0x6f0   :  { %6019 = vmatpush3.bf16.msra.mxu1 %v1453_v28  ;;  %6020 = vmatprep.mubr.msk.bf16.mxu1 %vm7137_vm2, %v7136_v10 }
 0x6f1   :  { %6030 = vmatprep.subr.bf16.mxu1 %v7136_v10 }
 0x6f3   :  { %v1786_v12 = vpop.permute.xlu1 %1785 }
 0x6f7   :  { %v1899_v16 = vpop.permute.xlu1 %1898 }
 0x6fb   :  { %v2012_v49 = vpop.permute.xlu1 %2011 }
 0x6ff   :  { %v2123_v15 = vpop.permute.xlu1 %2122 }
 0x703   :  { %v2345_v7 = vpop.permute.xlu1 %2344 }
 0x704   :  { %v1448_v19 = vpop.xlane.xlu0 %1447 }
 0x705   :  { %6545 = vrcp.f32 %v1448_v19 }
 0x707   :  { %v2458_v13 = vpop.permute.xlu1 %2457 }
 0x708   :  { %v1561_v59 = vpop.xlane.xlu0 %1560 }
 0x709   :  { %6547 = vrcp.f32 %v1561_v59 }
 0x70c   :  { %v1670_v60 = vpop.xlane.xlu0 %1669 }
 0x70d   :  { %6549 = vrcp.f32 %v1670_v60 }
 0x70f   :  { %v6546_v0 = vpop.eup %6545 }
 0x710   :  { %v1450_v1 = vmul.f32 %v6546_v0, %v7845_v62  ;;  %v1781_v4 = vpop.xlane.xlu0 %1780 }
 0x711   :  { %6551 = vrcp.f32 %v1781_v4 }
 0x712   :  { %v1451_v39 = vpack.c.bf16 %v1450_v1, %v1450_v1 }
 0x713   :  { %v6548_v2 = vpop.eup %6547 }
 0x714   :  { %6021 = vmatmul.mubr.msk.bf16.vlgmr.msra.gmra.mrb[32].mxu1 %vm338_vm0, %v1451_v39  ;;  %v1563_v52 = vmul.f32 %v6548_v2, %v7851_v53 }
 0x715   :  { %6031 = vmatpush3.bf16.msra.mxu1 %v1566_v3  ;;  %6032 = vmatprep.mubr.msk.bf16.mxu1 %vm7137_vm2, %v7136_v10 }
 0x716   :  { %6042 = vmatprep.subr.bf16.mxu1 %v7136_v10  ;;  %v1564_v6 = vpack.c.bf16 %v1563_v52, %v1563_v52 }
 0x717   :  { %v6550_v11 = vpop.eup %6549 }
 0x718   :  { %v1672_v62 = vmul.f32 %v6550_v11, %v7857_v57 }
 0x71a   :  { %v1673_v23 = vpack.c.bf16 %v1672_v62, %v1672_v62 }
 0x71b   :  { %v6552_v17 = vpop.eup %6551 }
 0x71c   :  { %6033 = vmatmul.mubr.msk.bf16.vlgmr.msra.gmra.mrb[36].mxu1 %vm338_vm0, %v1564_v6  ;;  %v1783_v22 = vmul.f32 %v6552_v17, %v7863_v56 }
 0x71d   :  { %6043 = vmatpush3.bf16.msra.mxu1 %v1676_v8  ;;  %6044 = vmatprep.mubr.msk.bf16.mxu1 %vm7137_vm2, %v7136_v10 }
 0x71e   :  { %6054 = vmatprep.subr.bf16.mxu1 %v7136_v10  ;;  %v1784_v29 = vpack.c.bf16 %v1783_v22, %v1783_v22 }
 0x724   :  { %6045 = vmatmul.mubr.msk.bf16.vlgmr.msra.gmra.mrb[40].mxu1 %vm338_vm0, %v1673_v23  ;;  %v1894_v53 = vpop.xlane.xlu0 %1893 }
 0x725   :  { %6055 = vmatpush3.bf16.msra.mxu1 %v1786_v12  ;;  %6553 = vrcp.f32 %v1894_v53  ;;  %6056 = vmatprep.mubr.msk.bf16.mxu1 %vm7137_vm2, %v7136_v10 }
 0x726   :  { %6066 = vmatprep.subr.bf16.mxu1 %v7136_v10 }
 0x728   :  { %v2007_v32 = vpop.xlane.xlu0 %2006 }
 0x729   :  { %6555 = vrcp.f32 %v2007_v32 }
 0x72c   :  { %6057 = vmatmul.mubr.msk.bf16.vlgmr.msra.gmra.mrb[44].mxu1 %vm338_vm0, %v1784_v29  ;;  %v2117_v57 = vpop.xlane.xlu0 %2116 }
 0x72d   :  { %6067 = vmatpush3.bf16.msra.mxu1 %v1899_v16  ;;  %6068 = vmatprep.mubr.msk.bf16.mxu1 %vm7137_vm2, %v7136_v10  ;;  %6557 = vrcp.f32 %v2117_v57 }
 0x72e   :  { %6078 = vmatprep.subr.bf16.mxu1 %v7136_v10 }
 0x72f   :  { %v6554_v20 = vpop.eup %6553 }
 0x730   :  { %v1896_v21 = vmul.f32 %v6554_v20, %v7877_v18  ;;  %v2227_v30 = vpop.xlane.xlu0 %2226 }
 0x731   :  { %6559 = vrcp.f32 %v2227_v30 }
 0x732   :  { %v1897_v27 = vpack.c.bf16 %v1896_v21, %v1896_v21 }
 0x733   :  { %v6556_v56 = vpop.eup %6555 }
 0x734   :  { %v820_v34 = vpop.f32.mrb[8].mxu1  ;;  %6069 = vmatmul.mubr.msk.bf16.vlgmr.msra.gmra.mrb[48].mxu1 %vm338_vm0, %v1897_v27  ;;  %v2009_v18 = vmul.f32 %v6556_v56, %v7882_v9  ;;  %v2340_v41 = vpop.xlane.xlu0 %2339 }
 0x735   :  { %826 = vst.msk [vmem:[#allocation2] sm:$0xff] %vm720_vm3, %v820_v34  ;;  %6079 = vmatpush3.bf16.msra.mxu1 %v2012_v49  ;;  %v5950_v35 = vpop.f32.mrb[9].mxu1  ;;  %6080 = vmatprep.mubr.msk.bf16.mxu1 %vm7137_vm2, %v7136_v10  ;;  %6561 = vrcp.f32 %v2340_v41 }
 0x736   :  { %v823_v36 = vpop.f32.mrb[10].mxu1  ;;  %6090 = vmatprep.subr.bf16.mxu1 %v7136_v10  ;;  %v2010_v43 = vpack.c.bf16 %v2009_v18, %v2009_v18 }
 0x737   :  { %v5951_v40 = vpop.f32.mrb[11].mxu1  ;;  %v6558_v44 = vpop.eup %6557 }
 0x738   :  { %v2453_v33 = vpop.xlane.xlu0 %2452  ;;  %v2119_v26 = vmul.f32 %v6558_v44, %v7887_v14 }
 0x739   :  { %6563 = vrcp.f32 %v2453_v33 }
 0x73a   :  { %v2120_v42 = vpack.c.bf16 %v2119_v26, %v2119_v26 }
 0x73b   :  { %v6560_v9 = vpop.eup %6559 }
 0x73c   :  { %6081 = vmatmul.mubr.msk.bf16.vlgmr.msra.gmra.mrb[52].mxu1 %vm338_vm0, %v2010_v43  ;;  %v2232_v55 = vpop.permute.xlu0 %2231  ;;  %v2229_v46 = vmul.f32 %v6560_v9, %v7891_v38 }
 0x73d   :  { %6091 = vmatpush3.bf16.msra.mxu1 %v2123_v15  ;;  %6092 = vmatprep.mubr.msk.bf16.mxu1 %vm7137_vm2, %v7136_v10 }
 0x73e   :  { %6102 = vmatprep.subr.bf16.mxu1 %v7136_v10  ;;  %v2230_v48 = vpack.c.bf16 %v2229_v46, %v2229_v46 }
 0x73f   :  { %v6562_v50 = vpop.eup %6561 }
 0x740   :  { %v2342_v14 = vmul.f32 %v6562_v50, %v7895_v24 }
 0x742   :  { %v2343_v51 = vpack.c.bf16 %v2342_v14, %v2342_v14 }
 0x743   :  { %v6564_v47 = vpop.eup %6563 }
 0x744   :  { %6093 = vmatmul.mubr.msk.bf16.vlgmr.msra.gmra.mrb[56].mxu1 %vm338_vm0, %v2120_v42  ;;  %v2455_v38 = vmul.f32 %v6564_v47, %v7899_v25  ;;  %v6458_v47 = vld [vmem:[#allocation20 + $0x8] sm:$0xff]  }
 0x745   :  { %6103 = vmatpush3.bf16.msra.mxu1 %v2232_v55  ;;  %6104 = vmatprep.mubr.msk.bf16.mxu1 %vm7137_vm2, %v7136_v10 }
 0x746   :  { %6114 = vmatprep.subr.bf16.mxu1 %v7136_v10  ;;  %v2456_v61 = vpack.c.bf16 %v2455_v38, %v2455_v38 }
 0x74c   :  { %6105 = vmatmul.mubr.msk.bf16.vlgmr.msra.gmra.mrb[60].mxu1 %vm338_vm0, %v2230_v48 }
 0x74d   :  { %6115 = vmatpush3.bf16.msra.mxu1 %v2345_v7  ;;  %6116 = vmatprep.mubr.msk.bf16.mxu1 %vm7137_vm2, %v7136_v10 }
 0x74e   :  { %6126 = vmatprep.subr.bf16.mxu1 %v7136_v10 }
 0x754   :  { %6117 = vmatmul.mubr.msk.bf16.vlgmr.msra.gmra.mrb[64].mxu1 %vm338_vm0, %v2343_v51  ;;  %v6457_v51 = vld [vmem:[#allocation20] sm:$0xff]  }
 0x755   :  { %6127 = vmatpush3.bf16.msra.mxu1 %v2458_v13  ;;  %6128 = vmatprep.mubr.msk.bf16.mxu1 %vm7137_vm2, %v7136_v10 }
 0x756   :  { %6132 = vmatprep.subr.bf16.mxu0 %v6457_v51 }
 0x757   :  { %6133 = vmatpush3.bf16.msra.mxu0 %v6457_v51 }
 0x758   :  { %6134 = vmatprep.subr.bf16.mxu0 %v6458_v47 }
 0x75b   :  { %6135 = vmatpush3.bf16.msra.mxu0 %v6458_v47 }
 0x75c   :  { %6129 = vmatmul.mubr.msk.bf16.vlgmr.msra.gmra.mrb[68].mxu1 %vm338_vm0, %v2456_v61 }
 0x79a   :  { %v930_v54 = vpop.f32.mrb[12].mxu1 }
 0x79b   :  { %937 = vrot.lane.b32.xlu1 %v930_v54, %s7128_s11  ;;  %v5962_v37 = vpop.f32.mrb[13].mxu1 }
 0x79c   :  { %v933_v58 = vpop.f32.mrb[14].mxu1 }
 0x79d   :  { %v5963_v24 = vpop.f32.mrb[15].mxu1 }
 0x7aa   :  { %v1044_v28 = vpop.f32.mrb[16].mxu1 }
 0x7ab   :  { %1051 = vrot.lane.b32.xlu1 %v1044_v28, %s7114_s20  ;;  %v5974_v19 = vpop.f32.mrb[17].mxu1 }
 0x7ac   :  { %v1047_v59 = vpop.f32.mrb[18].mxu1 }
 0x7ad   :  { %v5975_v60 = vpop.f32.mrb[19].mxu1 }
 0x7b2   :  { %v1158_v0 = vpop.f32.mrb[20].mxu1 }
 0x7b3   :  { %1165 = vrot.lane.b32.xlu0 %v1158_v0, %s7145_s15  ;;  %v5986_v25 = vpop.f32.mrb[21].mxu1 }
 0x7b4   :  { %v1161_v1 = vpop.f32.mrb[22].mxu1 }
 0x7b5   :  { %v5987_v39 = vpop.f32.mrb[23].mxu1 }
 0x7ba   :  { %v1270_v2 = vpop.f32.mrb[24].mxu1 }
 0x7bb   :  { %1276 = vst.msk [vmem:[#allocation2 + $0x8] sm:$0xff] %vm720_vm3, %v1270_v2  ;;  %v5998_v3 = vpop.f32.mrb[25].mxu1 }
 0x7bc   :  { %v1273_v4 = vpop.f32.mrb[26].mxu1 }
 0x7bd   :  { %v5999_v52 = vpop.f32.mrb[27].mxu1 }
 0x7c2   :  { %v1379_v6 = vpop.f32.mrb[28].mxu1 }
 0x7c3   :  { %1386 = vrot.lane.b32.xlu1 %v1379_v6, %s7128_s11  ;;  %v6010_v11 = vpop.f32.mrb[29].mxu1 }
 0x7c4   :  { %v1382_v8 = vpop.f32.mrb[30].mxu1 }
 0x7c5   :  { %v6011_v62 = vpop.f32.mrb[31].mxu1 }
 0x7e7   :  { %v1492_v23 = vpop.f32.mrb[32].mxu1 }
 0x7e8   :  { %1499 = vrot.lane.b32.xlu1 %v1492_v23, %s7114_s20  ;;  %v6022_v17 = vpop.f32.mrb[33].mxu1 }
 0x7e9   :  { %v1495_v12 = vpop.f32.mrb[34].mxu1 }
 0x7ea   :  { %v6023_v53 = vpop.f32.mrb[35].mxu1 }
 0x7eb   :  { %v6693_v53 = vld [vmem:[#allocation8] sm:$0xff] }
 0x7ef   :  { %v1605_v22 = vpop.f32.mrb[36].mxu1 }
 0x7f0   :  { %1612 = vrot.lane.b32.xlu1 %v1605_v22, %s7145_s15  ;;  %v6034_v32 = vpop.f32.mrb[37].mxu1 }
 0x7f1   :  { %v1608_v29 = vpop.f32.mrb[38].mxu1 }
 0x7f2   :  { %v6035_v16 = vpop.f32.mrb[39].mxu1 }
 0x7f3   :  { %v6694_v16 = vld [vmem:[#allocation8 + $0x10] sm:$0xff] }
 0x7f7   :  { %v1715_v57 = vpop.f32.mrb[40].mxu1 }
 0x7f8   :  { %1721 = vst.msk [vmem:[#allocation2 + $0x10] sm:$0xff] %vm720_vm3, %v1715_v57  ;;  %v6046_v20 = vpop.f32.mrb[41].mxu1 }
 0x7f9   :  { %v1718_v21 = vpop.f32.mrb[42].mxu1  ;;  %v6695_v20 = vld [vmem:[#allocation8 + $0x8] sm:$0xff] }
 0x7fa   :  { %v6047_v30 = vpop.f32.mrb[43].mxu1 }
 0x7ff   :  { %v1825_v27 = vpop.f32.mrb[44].mxu1 }
 0x800   :  { %1832 = vrot.lane.b32.xlu0 %v1825_v27, %s7128_s11  ;;  %v6058_v56 = vpop.f32.mrb[45].mxu1 }
 0x801   :  { %v1828_v49 = vpop.f32.mrb[46].mxu1  ;;  %v6696_v56 = vld [vmem:[#allocation8 + $0x18] sm:$0xff] }
 0x802   :  { %v6059_v34 = vpop.f32.mrb[47].mxu1 }
 0x807   :  { %v1938_v35 = vpop.f32.mrb[48].mxu1 }
 0x808   :  { %1945 = vrot.lane.b32.xlu0 %v1938_v35, %s7114_s20  ;;  %v6070_v36 = vpop.f32.mrb[49].mxu1 }
 0x809   :  { %v1941_v18 = vpop.f32.mrb[50].mxu1 }
 0x80a   :  { %v6071_v40 = vpop.f32.mrb[51].mxu1 }
 0x80d   :  { %v938_v41 = vpop.permute.xlu1 %937 }
 0x80e   :  { %941 = vst.msk [vmem:[#allocation2] sm:$0xff] %vm940_vm4, %v938_v41 }
 0x80f   :  { %v2051_v43 = vpop.f32.mrb[52].mxu1 }
 0x810   :  { %2058 = vrot.lane.b32.xlu0 %v2051_v43, %s7145_s15  ;;  %v6082_v44 = vpop.f32.mrb[53].mxu1 }
 0x811   :  { %v2054_v15 = vpop.f32.mrb[54].mxu1 }
 0x812   :  { %v6083_v33 = vpop.f32.mrb[55].mxu1 }
 0x817   :  { %v2162_v26 = vpop.f32.mrb[56].mxu1 }
 0x818   :  { %2168 = vst.msk [vmem:[#allocation2 + $0x18] sm:$0xff] %vm720_vm3, %v2162_v26  ;;  %v6094_v42 = vpop.f32.mrb[57].mxu1 }
 0x819   :  { %v2165_v9 = vpop.f32.mrb[58].mxu1 }
 0x81a   :  { %v6095_v55 = vpop.f32.mrb[59].mxu1 }
 0x81d   :  { %v1052_v46 = vpop.permute.xlu1 %1051 }
 0x81e   :  { %1055 = vst.msk [vmem:[#allocation2] sm:$0xff] %vm1054_vm5, %v1052_v46 }
 0x81f   :  { %v2271_v48 = vpop.f32.mrb[60].mxu1 }
 0x820   :  { %2278 = vrot.lane.b32.xlu1 %v2271_v48, %s7128_s11  ;;  %v6106_v50 = vpop.f32.mrb[61].mxu1 }
 0x821   :  { %v2274_v7 = vpop.f32.mrb[62].mxu1 }
 0x822   :  { %v6107_v14 = vpop.f32.mrb[63].mxu1 }
 0x825   :  { %v1166_v13 = vpop.permute.xlu0 %1165 }
 0x826   :  { %1169 = vst.msk [vmem:[#allocation2] sm:$0xff] %vm1168_vm6, %v1166_v13 }
 0x827   :  { %v2384_v38 = vpop.f32.mrb[64].mxu1 }
 0x828   :  { %2391 = vrot.lane.b32.xlu1 %v2384_v38, %s7114_s20  ;;  %v6118_v61 = vpop.f32.mrb[65].mxu1  ;;  %v6459_v38 = vld [vmem:[#allocation24] sm:$0xff]  }
 0x829   :  { %v2387_v54 = vpop.f32.mrb[66].mxu1  ;;  %6140 = vmatprep.subr.bf16.mxu1 %v6459_v38  ;;  %v6460_v61 = vld [vmem:[#allocation24 + $0x8] sm:$0xff]  }
 0x82a   :  { %v6119_v37 = vpop.f32.mrb[67].mxu1  ;;  %6141 = vmatpush3.bf16.msra.mxu1 %v6459_v38 }
 0x82b   :  { %6142 = vmatprep.subr.bf16.mxu1 %v6460_v61 }
 0x82d   :  { %v2508_v25 = vld [vmem:[#allocation2] sm:$0xff] }
 0x82e   :  { %6143 = vmatpush3.bf16.msra.mxu1 %v6460_v61 }
 0x82f   :  { %v2497_v58 = vpop.f32.mrb[68].mxu1 }
 0x830   :  { %2504 = vrot.lane.b32.xlu1 %v2497_v58, %s7145_s15  ;;  %v6130_v24 = vpop.f32.mrb[69].mxu1 }
 0x831   :  { %v2500_v28 = vpop.f32.mrb[70].mxu1 }
 0x832   :  { %v6131_v19 = vpop.f32.mrb[71].mxu1 }
 0x835   :  { %v1387_v59 = vpop.permute.xlu1 %1386 }
 0x836   :  { %1389 = vst.msk [vmem:[#allocation2 + $0x8] sm:$0xff] %vm940_vm4, %v1387_v59 }
 0x85a   :  { %v1500_v60 = vpop.permute.xlu1 %1499 }
 0x85b   :  { %1502 = vst.msk [vmem:[#allocation2 + $0x8] sm:$0xff] %vm1054_vm5, %v1500_v60 }
 0x862   :  { %v1613_v0 = vpop.permute.xlu1 %1612 }
 0x863   :  { %1615 = vst.msk [vmem:[#allocation2 + $0x8] sm:$0xff] %vm1168_vm6, %v1613_v0 }
 0x86a   :  { %v2509_v1 = vld [vmem:[#allocation2 + $0x8] sm:$0xff] }
 0x86b   :  { %v2512_v39 = vpack.c.bf16 %v2509_v1, %v2508_v25 }
 0x86d   :  { %6136 = vmatprep.mubr.msk.bf16.mxu0 %vm394_vm1, %v2512_v39 }
 0x872   :  { %v1833_v2 = vpop.permute.xlu0 %1832 }
 0x873   :  { %1835 = vst.msk [vmem:[#allocation2 + $0x10] sm:$0xff] %vm940_vm4, %v1833_v2 }
 0x87a   :  { %v1946_v3 = vpop.permute.xlu0 %1945 }
 0x87b   :  { %1948 = vst.msk [vmem:[#allocation2 + $0x10] sm:$0xff] %vm1054_vm5, %v1946_v3  ;;  %v5647_v3 = vld [vmem:[#allocation21] ss:$0 sm:$0xff] }
 0x882   :  { %v2059_v4 = vpop.permute.xlu0 %2058 }
 0x883   :  { %2061 = vst.msk [vmem:[#allocation2 + $0x10] sm:$0xff] %vm1168_vm6, %v2059_v4 }
 0x88a   :  { %v2510_v8 = vld [vmem:[#allocation2 + $0x10] sm:$0xff] }
 0x892   :  { %v2279_v52 = vpop.permute.xlu1 %2278 }
 0x893   :  { %2281 = vst.msk [vmem:[#allocation2 + $0x18] sm:$0xff] %vm940_vm4, %v2279_v52 }
 0x89a   :  { %v2392_v6 = vpop.permute.xlu1 %2391 }
 0x89b   :  { %2394 = vst.msk [vmem:[#allocation2 + $0x18] sm:$0xff] %vm1054_vm5, %v2392_v6 }
 0x8a2   :  { %v2505_v11 = vpop.permute.xlu1 %2504 }
 0x8a3   :  { %2507 = vst.msk [vmem:[#allocation2 + $0x18] sm:$0xff] %vm1168_vm6, %v2505_v11 }
 0x8aa   :  { %v2511_v62 = vld [vmem:[#allocation2 + $0x18] sm:$0xff] }
 0x8ab   :  { %v2513_v23 = vpack.c.bf16 %v2511_v62, %v2510_v8  ;;  %v5648_v62 = vld [vmem:[#allocation23] ss:$0 sm:$0xff] }
 0x8ad   :  { %6137 = vmatmul.mubr.msk.bf16.vlgmr.msra.gmra.mrb[72].mxu0 %vm394_vm1, %v2513_v23 }
 0x980   :  { %v6138_v17 = vpop.f32.mrb[72].mxu0 }
 0x981   :  { %v2570_v12 = vpop.f32.mrb[73].mxu0  ;;  %v8008_v57 = vadd.f32 %v6694_v16, %v6138_v17 }
 0x982   :  { %v8006_v22 = vadd.f32 %v6693_v53, %v2570_v12  ;;  %v6139_v32 = vpop.f32.mrb[74].mxu0 }
 0x983   :  { %v2573_v29 = vpop.f32.mrb[75].mxu0  ;;  %v8016_v49 = vadd.f32 %v6696_v56, %v6139_v32  ;;  %v2597_v34 = vsel %vm394_vm1, %v8008_v57, 0.0 }
 0x984   :  { %v8010_v21 = vadd.f32 %v6695_v20, %v2573_v29  ;;  %v2591_v30 = vsel %vm394_vm1, %v8006_v22, 0.0 }
 0x985   :  { %2592 = vadd.xlane.f32.xlu0 %v2591_v30  ;;  %v2600_v35 = vsel %vm394_vm1, %v8016_v49, 0.0 }
 0x986   :  { %v2594_v27 = vsel %vm394_vm1, %v8010_v21, 0.0 }
 0x987   :  { %2595 = vadd.xlane.f32.xlu1 %v2594_v27 }
 0x989   :  { %2598 = vadd.xlane.f32.xlu0 %v2597_v34 }
 0x98d   :  { %2601 = vadd.xlane.f32.xlu0 %v2600_v35  ;;  %v6461_v35 = vld [vmem:[#allocation26] sm:$0xff]  }
 0x98e   :  { %6148 = vmatprep.subr.bf16.mxu0 %v6461_v35 }
 0x98f   :  { %6149 = vmatpush3.bf16.msra.mxu0 %v6461_v35 }
 0xa12   :  { %v2593_v36 = vpop.xlane.xlu0 %2592 }
 0xa13   :  { %v2603_v18 = vmul.f32 0.03125, %v2593_v36  ;;  %v6462_v36 = vld [vmem:[#allocation26 + $0x8] sm:$0xff]  }
 0xa14   :  { %v2596_v40 = vpop.xlane.xlu1 %2595  ;;  %6150 = vmatprep.subr.bf16.mxu0 %v6462_v36 }
 0xa15   :  { %v2607_v41 = vsub.f32 %v8006_v22, %v2603_v18  ;;  %v2604_v43 = vmul.f32 0.03125, %v2596_v40  ;;  %6151 = vmatpush3.bf16.msra.mxu0 %v6462_v36  ;;  %v6463_v18 = vld [vmem:[#allocation26 + $0x10] sm:$0xff]   ;;  %v6464_v40 = vld [vmem:[#allocation26 + $0x18] sm:$0xff]  }
 0xa16   :  { %v2599_v44 = vpop.xlane.xlu0 %2598  ;;  %6152 = vmatprep.subr.bf16.mxu0 %v6463_v18 }
 0xa17   :  { %v2608_v15 = vsub.f32 %v8010_v21, %v2604_v43  ;;  %v2605_v33 = vmul.f32 0.03125, %v2599_v44  ;;  %v2611_v26 = vmul.f32 %v2607_v41, %v2607_v41  ;;  %v6466_v43 = vld [vmem:[#allocation26 + $0x28] sm:$0xff]   ;;  %v6467_v44 = vld [vmem:[#allocation26 + $0x30] sm:$0xff]  }
 0xa19   :  { %v2609_v42 = vsub.f32 %v8008_v57, %v2605_v33  ;;  %v2615_v9 = vsel %vm394_vm1, %v2611_v26, 0.0  ;;  %v2612_v55 = vmul.f32 %v2608_v15, %v2608_v15  ;;  %6153 = vmatpush3.bf16.msra.mxu0 %v6463_v18 }
 0xa1a   :  { %2616 = vadd.xlane.f32.xlu0 %v2615_v9  ;;  %v2602_v46 = vpop.xlane.xlu0 %2601  ;;  %6154 = vmatprep.subr.bf16.mxu0 %v6464_v40 }
 0xa1b   :  { %v2606_v48 = vmul.f32 0.03125, %v2602_v46  ;;  %v2618_v50 = vsel %vm394_vm1, %v2612_v55, 0.0  ;;  %v2613_v7 = vmul.f32 %v2609_v42, %v2609_v42 }
 0xa1c   :  { %2619 = vadd.xlane.f32.xlu1 %v2618_v50 }
 0xa1d   :  { %v2610_v14 = vsub.f32 %v8016_v49, %v2606_v48  ;;  %v2621_v51 = vsel %vm394_vm1, %v2613_v7, 0.0  ;;  %6155 = vmatpush3.bf16.msra.mxu0 %v6464_v40 }
 0xa1e   :  { %2622 = vadd.xlane.f32.xlu0 %v2621_v51 }
 0xa1f   :  { %v2614_v47 = vmul.f32 %v2610_v14, %v2610_v14 }
 0xa21   :  { %v2624_v13 = vsel %vm394_vm1, %v2614_v47, 0.0 }
 0xa22   :  { %2625 = vadd.xlane.f32.xlu1 %v2624_v13 }
 0xaa7   :  { %v2617_v54 = vpop.xlane.xlu0 %2616 }
 0xaa8   :  { %v2627_v37 = vmul.f32 0.03125, %v2617_v54 }
 0xaa9   :  { %v2620_v58 = vpop.xlane.xlu1 %2619 }
 0xaaa   :  { %v2631_v24 = vadd.f32 1e-05, %v2627_v37  ;;  %v2628_v28 = vmul.f32 0.03125, %v2620_v58 }
 0xaab   :  { %v2623_v19 = vpop.xlane.xlu0 %2622 }
 0xaac   :  { %6565 = vrsqrt.f32 %v2631_v24  ;;  %v2632_v59 = vadd.f32 1e-05, %v2628_v28  ;;  %v2629_v60 = vmul.f32 0.03125, %v2623_v19 }
 0xaae   :  { %6567 = vrsqrt.f32 %v2632_v59  ;;  %v2633_v0 = vadd.f32 1e-05, %v2629_v60 }
 0xaaf   :  { %v2626_v25 = vpop.xlane.xlu1 %2625 }
 0xab0   :  { %6569 = vrsqrt.f32 %v2633_v0  ;;  %v2630_v1 = vmul.f32 0.03125, %v2626_v25 }
 0xab2   :  { %v2634_v39 = vadd.f32 1e-05, %v2630_v1 }
 0xab4   :  { %6571 = vrsqrt.f32 %v2634_v39 }
 0xab6   :  { %v6566_v2 = vpop.eup %6565 }
 0xab7   :  { %v2639_v4 = vmul.f32 %v6566_v2, %v2607_v41  ;;  %v6465_v41 = vld [vmem:[#allocation26 + $0x20] sm:$0xff]  }
 0xab8   :  { %v6568_v52 = vpop.eup %6567  ;;  %6156 = vmatprep.subr.bf16.mxu0 %v6465_v41 }
 0xab9   :  { %v2640_v6 = vmul.f32 %v6568_v52, %v2608_v15  ;;  %v2649_v11 = vmul.f32 %v5647_v3, %v2639_v4  ;;  %6157 = vmatpush3.bf16.msra.mxu0 %v6465_v41  ;;  %v6468_v15 = vld [vmem:[#allocation26 + $0x38] sm:$0xff]  }
 0xaba   :  { %v6570_v8 = vpop.eup %6569  ;;  %6158 = vmatprep.subr.bf16.mxu0 %v6466_v43 }
 0xabb   :  { %v2641_v23 = vmul.f32 %v6570_v8, %v2609_v42  ;;  %v2650_v17 = vmul.f32 %v5647_v3, %v2640_v6  ;;  %v2659_v12 = vadd.f32 %v5648_v62, %v2649_v11 }
 0xabd   :  { %v2660_v53 = vadd.f32 %v5648_v62, %v2650_v17  ;;  %v2651_v20 = vmul.f32 %v5647_v3, %v2641_v23  ;;  %6159 = vmatpush3.bf16.msra.mxu0 %v6466_v43 }
 0xabe   :  { %v6572_v32 = vpop.eup %6571  ;;  %6160 = vmatprep.subr.bf16.mxu0 %v6467_v44 }
 0xabf   :  { %v2642_v29 = vmul.f32 %v6572_v32, %v2610_v14  ;;  %v2663_v16 = vpack.c.bf16 %v2660_v53, %v2659_v12  ;;  %v2661_v27 = vadd.f32 %v5648_v62, %v2651_v20 }
 0xac1   :  { %6144 = vmatprep.mubr.msk.bf16.mxu1 %vm394_vm1, %v2663_v16  ;;  %v2652_v30 = vmul.f32 %v5647_v3, %v2642_v29  ;;  %6161 = vmatpush3.bf16.msra.mxu0 %v6467_v44 }
 0xac2   :  { %6162 = vmatprep.subr.bf16.mxu0 %v6468_v15 }
 0xac3   :  { %v2662_v56 = vadd.f32 %v5648_v62, %v2652_v30 }
 0xac5   :  { %v2664_v34 = vpack.c.bf16 %v2662_v56, %v2661_v27  ;;  %6163 = vmatpush3.bf16.msra.mxu0 %v6468_v15 }
 0xac7   :  { %6145 = vmatmul.mubr.msk.bf16.vlgmr.msra.gmra.mrb[72].mxu1 %vm394_vm1, %v2664_v34 }
 0xb9a   :  { %v8032_v33 = vpop.f32.mrb[72].mxu1 }
 0xb9b   :  { %v8035_v26 = vmul.f32 0.70710677, %v8032_v33  ;;  %v8037_v42 = vpop.f32.mrb[73].mxu1 }
 0xb9c   :  { %v8040_v9 = vmul.f32 0.70710677, %v8037_v42  ;;  %v8042_v55 = vpop.f32.mrb[74].mxu1 }
 0xb9d   :  { %v2746_v46 = vand.u32 2147483647, %v8035_v26  ;;  %v8046_v48 = vmul.f32 0.70710677, %v8042_v55  ;;  %v8049_v7 = vpop.f32.mrb[75].mxu1  ;;  %vm2826_vm7 = vcmp.ge.f32.partialorder %v8035_v26, 0.0 }
 0xb9e   :  { %v2744_v50 = vand.u32 2147483647, %v8040_v9  ;;  %v8053_v13 = vmul.f32 0.70710677, %v8049_v7  ;;  %vm2824_vm8 = vcmp.ge.f32.partialorder %v8040_v9, 0.0 }
 0xb9f   :  { %v2750_v14 = vmul.f32 0.3275911, %v2746_v46  ;;  %v2747_v51 = vand.u32 2147483647, %v8046_v48  ;;  %v2802_v19 = vsub.f32 0.0, %v2746_v46  ;;  %vm2827_vm9 = vcmp.ge.f32.partialorder %v8046_v48, 0.0 }
 0xba0   :  { %v2748_v47 = vmul.f32 0.3275911, %v2744_v50  ;;  %v2745_v37 = vand.u32 2147483647, %v8053_v13  ;;  %v2800_v59 = vsub.f32 0.0, %v2744_v50  ;;  %vm2825_vm10 = vcmp.ge.f32.partialorder %v8053_v13, 0.0 }
 0xba1   :  { %v2754_v38 = vadd.f32 1.0, %v2750_v14  ;;  %v2751_v61 = vmul.f32 0.3275911, %v2747_v51  ;;  %v2806_v0 = vmul.f32 %v2802_v19, %v2746_v46  ;;  %v2803_v25 = vsub.f32 0.0, %v2747_v51 }
 0xba2   :  { %v2752_v54 = vadd.f32 1.0, %v2748_v47  ;;  %v2749_v24 = vmul.f32 0.3275911, %v2745_v37  ;;  %v2804_v2 = vmul.f32 %v2800_v59, %v2744_v50  ;;  %v2801_v4 = vsub.f32 0.0, %v2745_v37 }
 0xba3   :  { %6573 = vrcp.f32 %v2754_v38  ;;  %v2755_v58 = vadd.f32 1.0, %v2751_v61  ;;  %v2812_v11 = vmul.f32 1.442695, %v2806_v0  ;;  %v2807_v62 = vmul.f32 %v2803_v25, %v2747_v51 }
 0xba4   :  { %6575 = vrcp.f32 %v2752_v54  ;;  %v2753_v28 = vadd.f32 1.0, %v2749_v24  ;;  %v2808_v17 = vmul.f32 1.442695, %v2804_v2  ;;  %v2805_v29 = vmul.f32 %v2801_v4, %v2745_v37 }
 0xba5   :  { %6577 = vrcp.f32 %v2755_v58  ;;  %v2814_v56 = vmul.f32 1.442695, %v2807_v62 }
 0xba6   :  { %6579 = vrcp.f32 %v2753_v28  ;;  %v2810_v40 = vmul.f32 1.442695, %v2805_v29 }
 0xba7   :  { %6581 = vpow2.f32 %v2812_v11 }
 0xba8   :  { %6583 = vpow2.f32 %v2808_v17 }
 0xba9   :  { %6585 = vpow2.f32 %v2814_v56 }
 0xbaa   :  { %6587 = vpow2.f32 %v2810_v40 }
 0xbad   :  { %v6574_v60 = vpop.eup %6573 }
 0xbae   :  { %v6576_v1 = vpop.eup %6575  ;;  %v2766_v39 = vmul.f32 1.0614054, %v6574_v60 }
 0xbaf   :  { %v2764_v3 = vmul.f32 1.0614054, %v6576_v1  ;;  %v6578_v6 = vpop.eup %6577 }
 0xbb0   :  { %v2770_v52 = vadd.f32 -1.4531521, %v2766_v39  ;;  %v2767_v12 = vmul.f32 1.0614054, %v6578_v6  ;;  %v6580_v53 = vpop.eup %6579 }
 0xbb1   :  { %v2768_v8 = vadd.f32 -1.4531521, %v2764_v3  ;;  %v2765_v30 = vmul.f32 1.0614054, %v6580_v53  ;;  %v6582_v28 = vpop.eup %6581 }
 0xbb2   :  { %v2774_v23 = vmul.f32 %v6574_v60, %v2770_v52  ;;  %v2771_v20 = vadd.f32 -1.4531521, %v2767_v12  ;;  %v6584_v59 = vpop.eup %6583 }
 0xbb3   :  { %v2772_v32 = vmul.f32 %v6576_v1, %v2768_v8  ;;  %v2769_v36 = vadd.f32 -1.4531521, %v2765_v30  ;;  %v6586_v11 = vpop.eup %6585 }
 0xbb4   :  { %v2778_v16 = vadd.f32 1.4214138, %v2774_v23  ;;  %v2775_v35 = vmul.f32 %v6578_v6, %v2771_v20  ;;  %v6588_v12 = vpop.eup %6587 }
 0xbb5   :  { %v2776_v27 = vadd.f32 1.4214138, %v2772_v32  ;;  %v2773_v44 = vmul.f32 %v6580_v53, %v2769_v36  ;;  %v2736_v36 = vmul.f32 0.5, %v8037_v42 }
 0xbb6   :  { %v2782_v34 = vmul.f32 %v6574_v60, %v2778_v16  ;;  %v2779_v43 = vadd.f32 1.4214138, %v2775_v35  ;;  %v2739_v35 = vmul.f32 0.5, %v8042_v55 }
 0xbb7   :  { %v2780_v18 = vmul.f32 %v6576_v1, %v2776_v27  ;;  %v2777_v14 = vadd.f32 1.4214138, %v2773_v44 }
 0xbb8   :  { %v2786_v41 = vadd.f32 -0.28449672, %v2782_v34  ;;  %v2783_v50 = vmul.f32 %v6578_v6, %v2779_v43 }
 0xbb9   :  { %v2784_v15 = vadd.f32 -0.28449672, %v2780_v18  ;;  %v2781_v61 = vmul.f32 %v6580_v53, %v2777_v14 }
 0xbba   :  { %v2790_v46 = vmul.f32 %v6574_v60, %v2786_v41  ;;  %v2787_v38 = vadd.f32 -0.28449672, %v2783_v50  ;;  %v2737_v41 = vmul.f32 0.5, %v8049_v7 }
 0xbbb   :  { %v2788_v51 = vmul.f32 %v6576_v1, %v2784_v15  ;;  %v2785_v24 = vadd.f32 -0.28449672, %v2781_v61 }
 0xbbc   :  { %v2794_v47 = vadd.f32 0.2548296, %v2790_v46  ;;  %v2791_v58 = vmul.f32 %v6578_v6, %v2787_v38 }
 0xbbd   :  { %v2792_v54 = vadd.f32 0.2548296, %v2788_v51  ;;  %v2789_v39 = vmul.f32 %v6580_v53, %v2785_v24 }
 0xbbe   :  { %v2798_v37 = vmul.f32 %v6574_v60, %v2794_v47  ;;  %v2795_v25 = vadd.f32 0.2548296, %v2791_v58 }
 0xbbf   :  { %v2796_v19 = vmul.f32 %v6576_v1, %v2792_v54  ;;  %v2793_v52 = vadd.f32 0.2548296, %v2789_v39 }
 0xbc0   :  { %v2818_v0 = vmul.f32 %v6582_v28, %v2798_v37  ;;  %v2799_v4 = vmul.f32 %v6578_v6, %v2795_v25  ;;  %v2738_v6 = vmul.f32 0.5, %v8032_v33 }
 0xbc1   :  { %v2816_v2 = vmul.f32 %v6584_v59, %v2796_v19  ;;  %v2797_v17 = vmul.f32 %v6580_v53, %v2793_v52 }
 0xbc2   :  { %v2822_v3 = vsub.f32 1.0, %v2818_v0  ;;  %v2819_v23 = vmul.f32 %v6586_v11, %v2799_v4 }
 0xbc3   :  { %v2820_v8 = vsub.f32 1.0, %v2816_v2  ;;  %v2817_v1 = vmul.f32 %v6588_v12, %v2797_v17  ;;  %v6470_v17 = vld [vmem:[#allocation17 + $0x10] sm:$0xff]   ;;  %v6471_v12 = vld [vmem:[#allocation18 + $0x18] sm:$0xff]  }
 0xbc4   :  { %v2830_v62 = vsub.f32 0.0, %v2822_v3  ;;  %v2823_v29 = vsub.f32 1.0, %v2819_v23  ;;  %v6469_v23 = vld [vmem:[#allocation18 + $0x10] sm:$0xff]   ;;  %6168 = vmatprep.subr.bf16.mxu1 %v6470_v17 }
 0xbc5   :  { %v2828_v60 = vsub.f32 0.0, %v2820_v8  ;;  %v2821_v30 = vsub.f32 1.0, %v2817_v1  ;;  %6176 = vmatprep.subr.bf16.mxu0 %v6469_v23  ;;  %6169 = vmatpush3.bf16.msra.mxu1 %v6470_v17 }
 0xbc6   :  { %v2834_v32 = vsel %vm2826_vm7, %v2822_v3, %v2830_v62  ;;  %v2831_v20 = vsub.f32 0.0, %v2823_v29 }
 0xbc7   :  { %v2832_v16 = vsel %vm2824_vm8, %v2820_v8, %v2828_v60  ;;  %v2838_v27 = vadd.f32 1.0, %v2834_v32  ;;  %v2829_v34 = vsub.f32 0.0, %v2821_v30  ;;  %v6472_v60 = vld [vmem:[#allocation17 + $0x18] sm:$0xff]  }
 0xbc8   :  { %v2835_v56 = vsel %vm2827_vm9, %v2823_v29, %v2831_v20  ;;  %v2836_v53 = vadd.f32 1.0, %v2832_v16  ;;  %6170 = vmatprep.subr.bf16.mxu1 %v6472_v60 }
 0xbc9   :  { %v2839_v26 = vadd.f32 1.0, %v2835_v56  ;;  %v2833_v18 = vsel %vm2825_vm10, %v2821_v30, %v2829_v34  ;;  %v2842_v9 = vmul.f32 %v2838_v27, %v2738_v6  ;;  %6171 = vmatpush3.bf16.msra.mxu1 %v6472_v60 }
 0xbca   :  { %v2837_v43 = vadd.f32 1.0, %v2833_v18  ;;  %v2840_v44 = vmul.f32 %v2836_v53, %v2736_v36  ;;  %6188 = vmatprep.subr.bf16.mxu1 %v7136_v10  ;;  %v5663_v18 = vld [vmem:[#allocation14 + $0x1] ss:$0 sm:$0xff] }
 0xbcb   :  { %v2843_v40 = vmul.f32 %v2839_v26, %v2739_v35  ;;  %v5661_v26 = vld [vmem:[#allocation11 + $0x1] ss:$0 sm:$0xff] }
 0xbcc   :  { %v2841_v15 = vmul.f32 %v2837_v43, %v2737_v41  ;;  %v2972_v43 = vmul.f32 %v5661_v26, %v7563_v45 }
 0xbcd   :  { %v2845_v48 = vpack.c.bf16 %v2843_v40, %v2842_v9  ;;  %v2971_v9 = vmul.f32 %v5661_v26, %v7558_v31 }
 0xbce   :  { %v2844_v33 = vpack.c.bf16 %v2841_v15, %v2840_v44  ;;  %v5662_v44 = vld [vmem:[#allocation12 + $0x1] ss:$0 sm:$0xff] }
 0xbd0   :  { %6164 = vmatprep.mubr.bf16.mxu0 %v2844_v33 }
 0xbd1   :  { %6165 = vmatmul.mubr.bf16.vlgmr.msra.gmra.mrb[76].mxu0 %v2845_v48  ;;  %v5664_v48 = vld [vmem:[#allocation15 + $0x1] ss:$0 sm:$0xff] }
 0xbd2   :  { %6177 = vmatpush3.bf16.msra.mxu0 %v6469_v23 }
 0xbd3   :  { %6178 = vmatprep.subr.bf16.mxu0 %v6471_v12 }
 0xbd6   :  { %6179 = vmatpush3.bf16.msra.mxu0 %v6471_v12 }
 0xbd7   :  { %6194 = vmatprep.subr.bf16.mxu0 %v7136_v10 }
 0xca4   :  { %v6166_v46 = vpop.f32.mrb[76].mxu0 }
 0xca5   :  { %v2944_v50 = vpop.f32.mrb[77].mxu0  ;;  %v8068_v42 = vadd.f32 %v6166_v46, %v8008_v57 }
 0xca6   :  { %v8065_v55 = vadd.f32 %v2944_v50, %v8006_v22  ;;  %v6167_v13 = vpop.f32.mrb[78].mxu0  ;;  %v2973_v50 = vmul.f32 %v5661_v26, %v7571_v63 }
 0xca7   :  { %v2947_v14 = vpop.f32.mrb[79].mxu0  ;;  %v8076_v47 = vadd.f32 %v6167_v13, %v8016_v49  ;;  %v2997_v22 = vsel %vm394_vm1, %v8068_v42, 0.0  ;;  %v2983_v13 = vadd.f32 %v5662_v44, %v2971_v9 }
 0xca8   :  { %v8071_v51 = vadd.f32 %v2947_v14, %v8010_v21  ;;  %v2991_v7 = vsel %vm394_vm1, %v8065_v55, 0.0 }
 0xca9   :  { %2992 = vadd.xlane.f32.xlu0 %v2991_v7  ;;  %v3000_v57 = vsel %vm394_vm1, %v8076_v47, 0.0 }
 0xcaa   :  { %v2994_v38 = vsel %vm394_vm1, %v8071_v51, 0.0 }
 0xcab   :  { %2995 = vadd.xlane.f32.xlu1 %v2994_v38 }
 0xcad   :  { %2998 = vadd.xlane.f32.xlu0 %v2997_v22 }
 0xcaf   :  { %3001 = vadd.xlane.f32.xlu1 %v3000_v57  ;;  %v2984_v57 = vadd.f32 %v5662_v44, %v2972_v43 }
 0xd36   :  { %v2993_v21 = vpop.xlane.xlu0 %2992 }
 0xd37   :  { %v3003_v61 = vmul.f32 0.03125, %v2993_v21 }
 0xd38   :  { %v2996_v54 = vpop.xlane.xlu1 %2995 }
 0xd39   :  { %v3007_v37 = vsub.f32 %v8065_v55, %v3003_v61  ;;  %v3004_v58 = vmul.f32 0.03125, %v2996_v54 }
 0xd3a   :  { %v2999_v49 = vpop.xlane.xlu0 %2998 }
 0xd3b   :  { %v3008_v24 = vsub.f32 %v8071_v51, %v3004_v58  ;;  %v3005_v28 = vmul.f32 0.03125, %v2999_v49  ;;  %v3011_v19 = vmul.f32 %v3007_v37, %v3007_v37 }
 0xd3c   :  { %v3002_v59 = vpop.xlane.xlu1 %3001 }
 0xd3d   :  { %v3009_v0 = vsub.f32 %v8068_v42, %v3005_v28  ;;  %v3006_v25 = vmul.f32 0.03125, %v3002_v59  ;;  %v3015_v39 = vsel %vm394_vm1, %v3011_v19, 0.0  ;;  %v3012_v2 = vmul.f32 %v3008_v24, %v3008_v24 }
 0xd3e   :  { %3016 = vadd.xlane.f32.xlu0 %v3015_v39  ;;  %v2974_v19 = vmul.f32 %v5661_v26, %v7577_v5 }
 0xd3f   :  { %v3010_v3 = vsub.f32 %v8076_v47, %v3006_v25  ;;  %v3018_v4 = vsel %vm394_vm1, %v3012_v2, 0.0  ;;  %v3013_v52 = vmul.f32 %v3009_v0, %v3009_v0 }
 0xd40   :  { %3019 = vadd.xlane.f32.xlu1 %v3018_v4 }
 0xd41   :  { %v3021_v11 = vsel %vm394_vm1, %v3013_v52, 0.0  ;;  %v3014_v8 = vmul.f32 %v3010_v3, %v3010_v3 }
 0xd42   :  { %3022 = vadd.xlane.f32.xlu0 %v3021_v11 }
 0xd43   :  { %v3024_v62 = vsel %vm394_vm1, %v3014_v8, 0.0 }
 0xd44   :  { %3025 = vadd.xlane.f32.xlu1 %v3024_v62 }
 0xdcb   :  { %v3017_v32 = vpop.xlane.xlu0 %3016 }
 0xdcc   :  { %v3027_v29 = vmul.f32 0.03125, %v3017_v32 }
 0xdcd   :  { %v3020_v1 = vpop.xlane.xlu1 %3019 }
 0xdce   :  { %v3031_v16 = vadd.f32 1e-05, %v3027_v29  ;;  %v3028_v20 = vmul.f32 0.03125, %v3020_v1 }
 0xdcf   :  { %v3023_v30 = vpop.xlane.xlu0 %3022 }
 0xdd0   :  { %6589 = vrsqrt.f32 %v3031_v16  ;;  %v3032_v27 = vadd.f32 1e-05, %v3028_v20  ;;  %v3029_v6 = vmul.f32 0.03125, %v3023_v30 }
 0xdd1   :  { %v3026_v56 = vpop.xlane.xlu1 %3025 }
 0xdd2   :  { %6591 = vrsqrt.f32 %v3032_v27  ;;  %v3033_v34 = vadd.f32 1e-05, %v3029_v6  ;;  %v3030_v53 = vmul.f32 0.03125, %v3026_v56 }
 0xdd4   :  { %6593 = vrsqrt.f32 %v3033_v34  ;;  %v3034_v35 = vadd.f32 1e-05, %v3030_v53 }
 0xdd6   :  { %6595 = vrsqrt.f32 %v3034_v35 }
 0xdda   :  { %v6590_v36 = vpop.eup %6589 }
 0xddb   :  { %v3039_v40 = vmul.f32 %v6590_v36, %v3007_v37  ;;  %v2985_v37 = vadd.f32 %v5662_v44, %v2973_v50 }
 0xddc   :  { %v6592_v41 = vpop.eup %6591 }
 0xddd   :  { %v3049_v15 = vmul.f32 %v5663_v18, %v3039_v40  ;;  %v3040_v33 = vmul.f32 %v6592_v41, %v3008_v24 }
 0xdde   :  { %v6594_v46 = vpop.eup %6593 }
 0xddf   :  { %v3059_v14 = vadd.f32 %v5664_v48, %v3049_v15  ;;  %v3050_v7 = vmul.f32 %v5663_v18, %v3040_v33  ;;  %v3041_v38 = vmul.f32 %v6594_v46, %v3009_v0  ;;  %v2986_v0 = vadd.f32 %v5662_v44, %v2974_v19 }
 0xde0   :  { %v6596_v22 = vpop.eup %6595 }
 0xde1   :  { %v3042_v21 = vmul.f32 %v6596_v22, %v3010_v3  ;;  %v3139_v61 = vpack.c.bf16 %v3059_v14, %v2983_v13  ;;  %v3060_v31 = vadd.f32 %v5664_v48, %v3050_v7  ;;  %v3051_v54 = vmul.f32 %v5663_v18, %v3041_v38 }
 0xde3   :  { %6180 = vmatprep.mubr.msk.bf16.mxu0 %vm394_vm1, %v3139_v61  ;;  %v3063_v45 = vpack.c.bf16 %v3060_v31, %v3059_v14  ;;  %v3140_v58 = vpack.c.bf16 %v3060_v31, %v2984_v57  ;;  %v3052_v49 = vmul.f32 %v5663_v18, %v3042_v21  ;;  %v3061_v24 = vadd.f32 %v5664_v48, %v3051_v54 }
 0xde5   :  { %6172 = vmatprep.mubr.msk.bf16.mxu1 %vm394_vm1, %v3063_v45  ;;  %6181 = vmatmul.mubr.msk.bf16.vlgmr.msra.gmra.mrb[80].mxu0 %vm394_vm1, %v3140_v58  ;;  %v3062_v63 = vadd.f32 %v5664_v48, %v3052_v49  ;;  %v3141_v28 = vpack.c.bf16 %v3061_v24, %v2985_v37 }
 0xde7   :  { %v3064_v59 = vpack.c.bf16 %v3062_v63, %v3061_v24  ;;  %6184 = vmatprep.mubr.msk.bf16.mxu0 %vm394_vm1, %v3141_v28  ;;  %v3142_v25 = vpack.c.bf16 %v3062_v63, %v2986_v0 }
 0xde9   :  { %6173 = vmatmul.mubr.msk.bf16.vlgmr.msra.gmra.mrb[76].mxu1 %vm394_vm1, %v3064_v59 }
 0xdea   :  { %6190 = vmatprep.mubr.msk.bf16.mxu1 %vm7137_vm2, %v7136_v10 }
 0xded   :  { %6185 = vmatmul.mubr.msk.bf16.gmra.mrb[84].mxu0 %vm394_vm1, %v3142_v25 }
 0xdee   :  { %6196 = vmatprep.mubr.msk.bf16.mxu0 %vm7137_vm2, %v7136_v10 }
 0xeb8   :  { %v6182_v39 = vpop.f32.mrb[80].mxu0 }
 0xeb9   :  { %v3206_v2 = vpop.f32.mrb[81].mxu0 }
 0xeba   :  { %v6183_v3 = vpop.f32.mrb[82].mxu0 }
 0xebb   :  { %v8108_v4 = vpack.c.bf16 %v6183_v3, %v6182_v39  ;;  %v3209_v5 = vpop.f32.mrb[83].mxu0 }
 0xebc   :  { %v8110_v52 = vpack.c.bf16 %v3209_v5, %v3206_v2  ;;  %v6174_v11 = vpop.f32.mrb[76].mxu1 }
 0xebd   :  { %v3122_v8 = vpop.f32.mrb[77].mxu1  ;;  %v3692_v41 = vsel %vm720_vm3, %v8108_v4, 0 }
 0xebe   :  { %3350 = vrot.lane.b32.xlu0 %v8110_v52, %s7138_s2  ;;  %v6175_v62 = vpop.f32.mrb[78].mxu1  ;;  %v3245_v23 = vsel %vm720_vm3, %v8110_v52, 0 }
 0xebf   :  { %v8116_v17 = vpack.c.bf16 %v6175_v62, %v6174_v11  ;;  %v3125_v12 = vpop.f32.mrb[79].mxu1  ;;  %6189 = vmatpush3.bf16.xpose.msra.mxu1 %v3245_v23 }
 0xec0   :  { %v3137_v60 = vpack.c.bf16 %v3125_v12, %v3122_v8  ;;  %v6186_v32 = vpop.f32.mrb[84].mxu0  ;;  %6200 = vmatprep.subr.bf16.mxu1 %v7136_v10 }
 0xec1   :  { %v3222_v29 = vpop.f32.mrb[85].mxu0  ;;  %v8161_v6 = vrot.slane %v8116_v17, 4 }
 0xec2   :  { %3576 = vrot.lane.b32.xlu0 %v8110_v52, %s7139_s10  ;;  %v6187_v1 = vpop.f32.mrb[86].mxu0  ;;  %3348 = vrot.lane.b32.xlu1 %v3137_v60, %s7138_s2  ;;  %v3687_v27 = vrot.slane %v3137_v60, 4 }
 0xec3   :  { %v8122_v16 = vpack.c.bf16 %v6187_v1, %v6186_v32  ;;  %v3225_v20 = vpop.f32.mrb[87].mxu0 }
 0xec4   :  { %v8124_v30 = vpack.c.bf16 %v3225_v20, %v3222_v29 }
 0xec5   :  { %v4584_v58 = vsel %vm720_vm3, %v8122_v16, 0 }
 0xec6   :  { %3796 = vrot.lane.b32.xlu0 %v8108_v4, %s7138_s2  ;;  %3463 = vrot.lane.b32.xlu1 %v8110_v52, %s7140_s19  ;;  %v4137_v7 = vsel %vm720_vm3, %v8124_v30, 0 }
 0xec7   :  { %6191 = vmatmul.mubr.msk.bf16.vlgmr.msra.gmra.mrb[80].mxu1 %vm720_vm3, %v3137_v60 }
 0xec8   :  { %6202 = vmatprep.mubr.msk.bf16.mxu1 %vm7137_vm2, %v7136_v10 }
 0xeca   :  { %3909 = vrot.lane.b32.xlu0 %v8108_v4, %s7140_s19  ;;  %3461 = vrot.lane.b32.xlu1 %v3137_v60, %s7140_s19 }
 0xece   :  { %4022 = vrot.lane.b32.xlu0 %v8108_v4, %s7139_s10  ;;  %3574 = vrot.lane.b32.xlu1 %v3137_v60, %s7139_s10 }
 0xed2   :  { %4242 = vrot.lane.b32.xlu0 %v8124_v30, %s7138_s2  ;;  %3794 = vrot.lane.b32.xlu1 %v3687_v27, %s7138_s2 }
 0xed6   :  { %4355 = vrot.lane.b32.xlu0 %v8124_v30, %s7140_s19  ;;  %3907 = vrot.lane.b32.xlu1 %v3687_v27, %s7140_s19 }
 0xeda   :  { %4468 = vrot.lane.b32.xlu0 %v8124_v30, %s7139_s10  ;;  %4020 = vrot.lane.b32.xlu1 %v3687_v27, %s7139_s10 }
 0xede   :  { %4688 = vrot.lane.b32.xlu0 %v8122_v16, %s7138_s2  ;;  %4240 = vrot.lane.b32.xlu1 %v8116_v17, %s7138_s2 }
 0xee2   :  { %4801 = vrot.lane.b32.xlu0 %v8122_v16, %s7140_s19  ;;  %4353 = vrot.lane.b32.xlu1 %v8116_v17, %s7140_s19 }
 0xee6   :  { %4914 = vrot.lane.b32.xlu0 %v8122_v16, %s7139_s10  ;;  %4466 = vrot.lane.b32.xlu1 %v8116_v17, %s7139_s10 }
 0xeea   :  { %4686 = vrot.lane.b32.xlu1 %v8161_v6, %s7138_s2 }
 0xeee   :  { %4799 = vrot.lane.b32.xlu1 %v8161_v6, %s7140_s19 }
 0xef2   :  { %4912 = vrot.lane.b32.xlu1 %v8161_v6, %s7139_s10 }
 0xf30   :  { %v3351_v56 = vpop.permute.xlu0 %3350 }
 0xf31   :  { %v3356_v34 = vsel %vm720_vm3, %v3351_v56, 0 }
 0xf32   :  { %6201 = vmatpush3.bf16.xpose.msra.mxu1 %v3356_v34 }
 0xf33   :  { %6212 = vmatprep.subr.bf16.mxu1 %v7136_v10 }
 0xf34   :  { %v3349_v53 = vpop.permute.xlu1 %3348  ;;  %v3577_v36 = vpop.permute.xlu0 %3576 }
 0xf35   :  { %v3582_v9 = vsel %vm720_vm3, %v3577_v36, 0 }
 0xf38   :  { %v3464_v35 = vpop.permute.xlu1 %3463  ;;  %v3797_v43 = vpop.permute.xlu0 %3796 }
 0xf39   :  { %v3469_v26 = vsel %vm720_vm3, %v3464_v35, 0  ;;  %6203 = vmatmul.mubr.msk.bf16.vlgmr.msra.gmra.mrb[84].mxu1 %vm720_vm3, %v3349_v53  ;;  %v3802_v44 = vsel %vm720_vm3, %v3797_v43, 0 }
 0xf3a   :  { %6213 = vmatpush3.bf16.xpose.msra.mxu1 %v3469_v26  ;;  %6214 = vmatprep.mubr.msk.bf16.mxu1 %vm7137_vm2, %v7136_v10 }
 0xf3b   :  { %6224 = vmatprep.subr.bf16.mxu1 %v7136_v10 }
 0xf3c   :  { %v3462_v18 = vpop.permute.xlu1 %3461  ;;  %v3910_v48 = vpop.permute.xlu0 %3909 }
 0xf3d   :  { %v3915_v33 = vsel %vm720_vm3, %v3910_v48, 0 }
 0xf40   :  { %v3575_v40 = vpop.permute.xlu1 %3574  ;;  %v4023_v46 = vpop.permute.xlu0 %4022 }
 0xf41   :  { %6215 = vmatmul.mubr.msk.bf16.vlgmr.msra.gmra.mrb[88].mxu1 %vm720_vm3, %v3462_v18  ;;  %v4028_v13 = vsel %vm720_vm3, %v4023_v46, 0 }
 0xf42   :  { %6225 = vmatpush3.bf16.xpose.msra.mxu1 %v3582_v9  ;;  %6226 = vmatprep.mubr.msk.bf16.mxu1 %vm7137_vm2, %v7136_v10 }
 0xf43   :  { %6236 = vmatprep.subr.bf16.mxu1 %v7136_v10 }
 0xf44   :  { %v3795_v15 = vpop.permute.xlu1 %3794  ;;  %v4243_v38 = vpop.permute.xlu0 %4242 }
 0xf45   :  { %v4248_v22 = vsel %vm720_vm3, %v4243_v38, 0 }
 0xf48   :  { %v3908_v50 = vpop.permute.xlu1 %3907  ;;  %v4356_v57 = vpop.permute.xlu0 %4355 }
 0xf49   :  { %6227 = vmatmul.mubr.msk.bf16.vlgmr.msra.gmra.mrb[92].mxu1 %vm720_vm3, %v3575_v40  ;;  %v4361_v61 = vsel %vm720_vm3, %v4356_v57, 0 }
 0xf4a   :  { %6237 = vmatpush3.bf16.xpose.msra.mxu1 %v3692_v41  ;;  %6238 = vmatprep.mubr.msk.bf16.mxu1 %vm7137_vm2, %v7136_v10 }
 0xf4b   :  { %6248 = vmatprep.subr.bf16.mxu1 %v7136_v10 }
 0xf4c   :  { %v4021_v14 = vpop.permute.xlu1 %4020  ;;  %v4469_v31 = vpop.permute.xlu0 %4468 }
 0xf4d   :  { %v4474_v37 = vsel %vm720_vm3, %v4469_v31, 0 }
 0xf50   :  { %v4241_v21 = vpop.permute.xlu1 %4240  ;;  %v4689_v49 = vpop.permute.xlu0 %4688 }
 0xf51   :  { %6239 = vmatmul.mubr.msk.bf16.vlgmr.msra.gmra.mrb[96].mxu1 %vm720_vm3, %v3687_v27  ;;  %v4694_v24 = vsel %vm720_vm3, %v4689_v49, 0 }
 0xf52   :  { %6249 = vmatpush3.bf16.xpose.msra.mxu1 %v3802_v44  ;;  %6250 = vmatprep.mubr.msk.bf16.mxu1 %vm7137_vm2, %v7136_v10 }
 0xf53   :  { %6260 = vmatprep.subr.bf16.mxu1 %v7136_v10 }
 0xf54   :  { %v4354_v54 = vpop.permute.xlu1 %4353  ;;  %v4802_v63 = vpop.permute.xlu0 %4801 }
 0xf55   :  { %v4807_v19 = vsel %vm720_vm3, %v4802_v63, 0 }
 0xf58   :  { %v4467_v45 = vpop.permute.xlu1 %4466  ;;  %v4915_v3 = vpop.permute.xlu0 %4914 }
 0xf59   :  { %6251 = vmatmul.mubr.msk.bf16.vlgmr.msra.gmra.mrb[100].mxu1 %vm720_vm3, %v3795_v15  ;;  %v4920_v11 = vsel %vm720_vm3, %v4915_v3, 0 }
 0xf5a   :  { %6261 = vmatpush3.bf16.xpose.msra.mxu1 %v3915_v33  ;;  %6262 = vmatprep.mubr.msk.bf16.mxu1 %vm7137_vm2, %v7136_v10 }
 0xf5b   :  { %6272 = vmatprep.subr.bf16.mxu1 %v7136_v10 }
 0xf5c   :  { %v4687_v28 = vpop.permute.xlu1 %4686 }
 0xf60   :  { %v4800_v5 = vpop.permute.xlu1 %4799 }
 0xf61   :  { %6263 = vmatmul.mubr.msk.bf16.vlgmr.msra.gmra.mrb[104].mxu1 %vm720_vm3, %v3908_v50 }
 0xf62   :  { %6273 = vmatpush3.bf16.xpose.msra.mxu1 %v4028_v13  ;;  %6274 = vmatprep.mubr.msk.bf16.mxu1 %vm7137_vm2, %v7136_v10 }
 0xf63   :  { %6284 = vmatprep.subr.bf16.mxu1 %v7136_v10 }
 0xf64   :  { %v4913_v8 = vpop.permute.xlu1 %4912 }
 0xf69   :  { %6275 = vmatmul.mubr.msk.bf16.vlgmr.msra.gmra.mrb[108].mxu1 %vm720_vm3, %v4021_v14 }
 0xf6a   :  { %6285 = vmatpush3.bf16.xpose.msra.mxu1 %v4137_v7  ;;  %6286 = vmatprep.mubr.msk.bf16.mxu1 %vm7137_vm2, %v7136_v10 }
 0xf6b   :  { %6296 = vmatprep.subr.bf16.mxu1 %v7136_v10 }
 0xf71   :  { %6287 = vmatmul.mubr.msk.bf16.vlgmr.msra.gmra.mrb[112].mxu1 %vm720_vm3, %v8116_v17 }
 0xf72   :  { %6297 = vmatpush3.bf16.xpose.msra.mxu1 %v4248_v22  ;;  %6298 = vmatprep.mubr.msk.bf16.mxu1 %vm7137_vm2, %v7136_v10 }
 0xf73   :  { %6308 = vmatprep.subr.bf16.mxu1 %v7136_v10 }
 0xf79   :  { %6299 = vmatmul.mubr.msk.bf16.vlgmr.msra.gmra.mrb[116].mxu1 %vm720_vm3, %v4241_v21 }
 0xf7a   :  { %6309 = vmatpush3.bf16.xpose.msra.mxu1 %v4361_v61  ;;  %6310 = vmatprep.mubr.msk.bf16.mxu1 %vm7137_vm2, %v7136_v10 }
 0xf7b   :  { %6320 = vmatprep.subr.bf16.mxu1 %v7136_v10 }
 0xf81   :  { %6311 = vmatmul.mubr.msk.bf16.vlgmr.msra.gmra.mrb[120].mxu1 %vm720_vm3, %v4354_v54 }
 0xf82   :  { %6321 = vmatpush3.bf16.xpose.msra.mxu1 %v4474_v37  ;;  %6322 = vmatprep.mubr.msk.bf16.mxu1 %vm7137_vm2, %v7136_v10 }
 0xf83   :  { %6332 = vmatprep.subr.bf16.mxu1 %v7136_v10 }
 0xf89   :  { %6323 = vmatmul.mubr.msk.bf16.vlgmr.msra.gmra.mrb[124].mxu1 %vm720_vm3, %v4467_v45 }
 0xf8a   :  { %6333 = vmatpush3.bf16.xpose.msra.mxu1 %v4584_v58  ;;  %6334 = vmatprep.mubr.msk.bf16.mxu1 %vm7137_vm2, %v7136_v10 }
 0xf8b   :  { %6344 = vmatprep.subr.bf16.mxu1 %v7136_v10 }
 0xf91   :  { %6335 = vmatmul.mubr.msk.bf16.vlgmr.msra.gmra.mrb[128].mxu1 %vm720_vm3, %v8161_v6 }
 0xf92   :  { %6345 = vmatpush3.bf16.xpose.msra.mxu1 %v4694_v24  ;;  %6346 = vmatprep.mubr.msk.bf16.mxu1 %vm7137_vm2, %v7136_v10 }
 0xf93   :  { %6356 = vmatprep.subr.bf16.mxu1 %v7136_v10 }
 0xf99   :  { %6347 = vmatmul.mubr.msk.bf16.vlgmr.msra.gmra.mrb[132].mxu1 %vm720_vm3, %v4687_v28 }
 0xf9a   :  { %v3281_v59 = vpop.f32.mrb[80].mxu1  ;;  %6357 = vmatpush3.bf16.xpose.msra.mxu1 %v4807_v19  ;;  %6358 = vmatprep.mubr.msk.bf16.mxu1 %vm7137_vm2, %v7136_v10 }
 0xf9b   :  { %v6192_v0 = vpop.f32.mrb[81].mxu1  ;;  %v3287_v25 = vsel %vm338_vm0, %v3281_v59, -inf  ;;  %6368 = vmatprep.subr.bf16.mxu1 %v7136_v10 }
 0xf9c   :  { %3288 = vmax.xlane.f32.xlu0 %v3287_v25  ;;  %v3284_v39 = vpop.f32.mrb[82].mxu1 }
 0xf9d   :  { %v6193_v2 = vpop.f32.mrb[83].mxu1 }
 0xfa1   :  { %6359 = vmatmul.mubr.msk.bf16.vlgmr.msra.gmra.mrb[136].mxu1 %vm720_vm3, %v4800_v5 }
 0xfa2   :  { %6369 = vmatpush3.bf16.xpose.msra.mxu1 %v4920_v11  ;;  %6370 = vmatprep.mubr.msk.bf16.mxu1 %vm7137_vm2, %v7136_v10 }
 0xfa9   :  { %6371 = vmatmul.mubr.msk.bf16.vlgmr.msra.gmra.mrb[140].mxu1 %vm720_vm3, %v4913_v8 }
0x100c   :  { %v8247_v62 = vpop.f32.mrb[84].mxu1 }
0x100d   :  { %v6204_v23 = vpop.f32.mrb[85].mxu1  ;;  %v3398_v17 = vsel %vm338_vm0, %v8247_v62, -inf }
0x100e   :  { %3399 = vmax.xlane.f32.xlu1 %v3398_v17  ;;  %v3395_v12 = vpop.f32.mrb[86].mxu1 }
0x100f   :  { %v6205_v60 = vpop.f32.mrb[87].mxu1 }
0x1014   :  { %v8251_v32 = vpop.f32.mrb[88].mxu1 }
0x1015   :  { %v6216_v29 = vpop.f32.mrb[89].mxu1  ;;  %v3511_v1 = vsel %vm338_vm0, %v8251_v32, -inf }
0x1016   :  { %3512 = vmax.xlane.f32.xlu0 %v3511_v1  ;;  %v3508_v20 = vpop.f32.mrb[90].mxu1 }
0x1017   :  { %v6217_v27 = vpop.f32.mrb[91].mxu1 }
0x101c   :  { %v8255_v6 = vpop.f32.mrb[92].mxu1 }
0x101d   :  { %v6228_v56 = vpop.f32.mrb[93].mxu1  ;;  %v3624_v34 = vsel %vm338_vm0, %v8255_v6, -inf }
0x101e   :  { %3625 = vmax.xlane.f32.xlu0 %v3624_v34  ;;  %v3621_v53 = vpop.f32.mrb[94].mxu1 }
0x101f   :  { %v6229_v35 = vpop.f32.mrb[95].mxu1 }
0x1024   :  { %v8259_v26 = vpop.f32.mrb[96].mxu1 }
0x1025   :  { %v6240_v36 = vpop.f32.mrb[97].mxu1  ;;  %v3734_v18 = vsel %vm338_vm0, %v8259_v26, -inf }
0x1026   :  { %3735 = vmax.xlane.f32.xlu0 %v3734_v18  ;;  %v3731_v9 = vpop.f32.mrb[98].mxu1 }
0x1027   :  { %v6241_v40 = vpop.f32.mrb[99].mxu1 }
0x1029   :  { %v3289_v41 = vpop.xlane.xlu0 %3288 }
0x102a   :  { %v3290_v43 = vsub.f32 %v3281_v59, %v3289_v41 }
0x102c   :  { %v3291_v44 = vmul.f32 1.442695, %v3290_v43  ;;  %v8263_v48 = vpop.f32.mrb[100].mxu1 }
0x102d   :  { %v6252_v15 = vpop.f32.mrb[101].mxu1  ;;  %v3844_v33 = vsel %vm338_vm0, %v8263_v48, -inf }
0x102e   :  { %6597 = vpow2.f32 %v3291_v44  ;;  %3845 = vmax.xlane.f32.xlu1 %v3844_v33  ;;  %v3841_v46 = vpop.f32.mrb[102].mxu1 }
0x102f   :  { %v6253_v50 = vpop.f32.mrb[103].mxu1 }
0x1034   :  { %v8267_v13 = vpop.f32.mrb[104].mxu1 }
0x1035   :  { %v6264_v14 = vpop.f32.mrb[105].mxu1  ;;  %v3957_v7 = vsel %vm338_vm0, %v8267_v13, -inf }
0x1036   :  { %3958 = vmax.xlane.f32.xlu0 %v3957_v7  ;;  %v3954_v38 = vpop.f32.mrb[106].mxu1 }
0x1037   :  { %v6265_v22 = vpop.f32.mrb[107].mxu1 }
0x1038   :  { %v8271_v57 = vpop.eup %6597 }
0x1039   :  { %v3293_v21 = vsel %vm338_vm0, %v8271_v57, 0.0 }
0x103a   :  { %3294 = vadd.xlane.f32.xlu1 %v3293_v21 }
0x103c   :  { %v8275_v61 = vpop.f32.mrb[108].mxu1 }
0x103d   :  { %v6276_v31 = vpop.f32.mrb[109].mxu1  ;;  %v4070_v54 = vsel %vm338_vm0, %v8275_v61, -inf }
0x103e   :  { %4071 = vmax.xlane.f32.xlu1 %v4070_v54  ;;  %v4067_v37 = vpop.f32.mrb[110].mxu1 }
0x103f   :  { %v6277_v45 = vpop.f32.mrb[111].mxu1 }
0x1044   :  { %v8279_v58 = vpop.f32.mrb[112].mxu1 }
0x1045   :  { %v6288_v49 = vpop.f32.mrb[113].mxu1  ;;  %v4179_v24 = vsel %vm338_vm0, %v8279_v58, -inf }
0x1046   :  { %4180 = vmax.xlane.f32.xlu0 %v4179_v24  ;;  %v4176_v63 = vpop.f32.mrb[114].mxu1 }
0x1047   :  { %v6289_v28 = vpop.f32.mrb[115].mxu1 }
0x104c   :  { %v8283_v19 = vpop.f32.mrb[116].mxu1 }
0x104d   :  { %v6300_v59 = vpop.f32.mrb[117].mxu1  ;;  %v4290_v0 = vsel %vm338_vm0, %v8283_v19, -inf }
0x104e   :  { %4291 = vmax.xlane.f32.xlu1 %v4290_v0  ;;  %v4287_v25 = vpop.f32.mrb[118].mxu1 }
0x104f   :  { %v6301_v39 = vpop.f32.mrb[119].mxu1 }
0x1054   :  { %v8287_v2 = vpop.f32.mrb[120].mxu1 }
0x1055   :  { %v6312_v3 = vpop.f32.mrb[121].mxu1  ;;  %v4403_v40 = vsel %vm338_vm0, %v8287_v2, -inf }
0x1056   :  { %v4400_v5 = vpop.f32.mrb[122].mxu1 }
0x1057   :  { %v6313_v11 = vpop.f32.mrb[123].mxu1 }
0x105c   :  { %3410 = vrot.lane.b32.xlu0 %v8110_v52, %s7141_s1  ;;  %v8291_v8 = vpop.f32.mrb[124].mxu1 }
0x105d   :  { %v6324_v23 = vpop.f32.mrb[125].mxu1  ;;  %v4516_v15 = vsel %vm338_vm0, %v8291_v8, -inf }
0x105e   :  { %v4513_v17 = vpop.f32.mrb[126].mxu1 }
0x105f   :  { %3300 = vrot.lane.b32.xlu1 %v8110_v52, %s7142_s24  ;;  %v6325_v12 = vpop.f32.mrb[127].mxu1 }
0x1064   :  { %v8295_v60 = vpop.f32.mrb[128].mxu1 }
0x1065   :  { %v6336_v29 = vpop.f32.mrb[129].mxu1  ;;  %v4626_v46 = vsel %vm338_vm0, %v8295_v60, -inf }
0x1066   :  { %v4623_v1 = vpop.f32.mrb[130].mxu1 }
0x1067   :  { %v6337_v20 = vpop.f32.mrb[131].mxu1 }
0x106c   :  { %v8297_v27 = vpop.f32.mrb[132].mxu1 }
0x106d   :  { %v6348_v56 = vpop.f32.mrb[133].mxu1  ;;  %v4736_v50 = vsel %vm338_vm0, %v8297_v27, -inf }
0x106e   :  { %v4733_v34 = vpop.f32.mrb[134].mxu1 }
0x106f   :  { %v6349_v53 = vpop.f32.mrb[135].mxu1 }
0x1074   :  { %v8299_v35 = vpop.f32.mrb[136].mxu1 }
0x1075   :  { %v6360_v36 = vpop.f32.mrb[137].mxu1  ;;  %v4849_v14 = vsel %vm338_vm0, %v8299_v35, -inf }
0x1076   :  { %v4846_v18 = vpop.f32.mrb[138].mxu1 }
0x1077   :  { %v6361_v9 = vpop.f32.mrb[139].mxu1 }
0x107b   :  { %4404 = vmax.xlane.f32.xlu0 %v4403_v40 }
0x107c   :  { %v8303_v41 = vpop.f32.mrb[140].mxu1 }
0x107d   :  { %v6372_v43 = vpop.f32.mrb[141].mxu1  ;;  %v4962_v7 = vsel %vm338_vm0, %v8303_v41, -inf }
0x107e   :  { %v4959_v44 = vpop.f32.mrb[142].mxu1 }
0x107f   :  { %4517 = vmax.xlane.f32.xlu0 %v4516_v15  ;;  %v6373_v33 = vpop.f32.mrb[143].mxu1 }
0x1083   :  { %4627 = vmax.xlane.f32.xlu0 %v4626_v46 }
0x1087   :  { %4737 = vmax.xlane.f32.xlu0 %v4736_v50 }
0x108b   :  { %4850 = vmax.xlane.f32.xlu0 %v4849_v14 }
0x108f   :  { %4963 = vmax.xlane.f32.xlu0 %v4962_v7 }
0x109b   :  { %v3400_v38 = vpop.xlane.xlu1 %3399 }
0x109c   :  { %v3401_v22 = vsub.f32 %v8247_v62, %v3400_v38 }
0x109e   :  { %v3402_v21 = vmul.f32 1.442695, %v3401_v22 }
0x10a0   :  { %6599 = vpow2.f32 %v3402_v21 }
0x10a3   :  { %v3513_v31 = vpop.xlane.xlu0 %3512 }
0x10a4   :  { %v3514_v54 = vsub.f32 %v8251_v32, %v3513_v31 }
0x10a6   :  { %v3515_v37 = vmul.f32 1.442695, %v3514_v54 }
0x10a8   :  { %6601 = vpow2.f32 %v3515_v37 }
0x10aa   :  { %v8317_v45 = vpop.eup %6599 }
0x10ab   :  { %v3626_v49 = vpop.xlane.xlu0 %3625  ;;  %v3404_v24 = vsel %vm338_vm0, %v8317_v45, 0.0 }
0x10ac   :  { %v3627_v63 = vsub.f32 %v8255_v6, %v3626_v49  ;;  %3405 = vadd.xlane.f32.xlu1 %v3404_v24 }
0x10ae   :  { %v3628_v28 = vmul.f32 1.442695, %v3627_v63 }
0x10b0   :  { %6603 = vpow2.f32 %v3628_v28 }
0x10b2   :  { %v8322_v59 = vpop.eup %6601 }
0x10b3   :  { %v3736_v62 = vpop.xlane.xlu0 %3735  ;;  %v3517_v0 = vsel %vm338_vm0, %v8322_v59, 0.0 }
0x10b4   :  { %v3737_v32 = vsub.f32 %v8259_v26, %v3736_v62  ;;  %3518 = vadd.xlane.f32.xlu1 %v3517_v0 }
0x10b6   :  { %v3738_v25 = vmul.f32 1.442695, %v3737_v32 }
0x10b8   :  { %6605 = vpow2.f32 %v3738_v25 }
0x10ba   :  { %v8327_v39 = vpop.eup %6603 }
0x10bb   :  { %v3846_v3 = vpop.xlane.xlu1 %3845  ;;  %v3630_v6 = vsel %vm338_vm0, %v8327_v39, 0.0 }
0x10bc   :  { %v3847_v5 = vsub.f32 %v8263_v48, %v3846_v3  ;;  %3631 = vadd.xlane.f32.xlu1 %v3630_v6 }
0x10be   :  { %v3848_v11 = vmul.f32 1.442695, %v3847_v5 }
0x10c0   :  { %6607 = vpow2.f32 %v3848_v11 }
0x10c2   :  { %v8332_v23 = vpop.eup %6605 }
0x10c3   :  { %v3740_v17 = vsel %vm338_vm0, %v8332_v23, 0.0  ;;  %v3959_v20 = vpop.xlane.xlu0 %3958 }
0x10c4   :  { %3741 = vadd.xlane.f32.xlu0 %v3740_v17  ;;  %v3960_v9 = vsub.f32 %v8267_v13, %v3959_v20 }
0x10c7   :  { %v3295_v29 = vpop.xlane.xlu1 %3294 }
0x10c8   :  { %6609 = vrcp.f32 %v3295_v29 }
0x10ca   :  { %v8336_v26 = vpop.eup %6607 }
0x10cb   :  { %v3850_v12 = vsel %vm338_vm0, %v8336_v26, 0.0  ;;  %v4072_v1 = vpop.xlane.xlu1 %4071 }
0x10cc   :  { %3851 = vadd.xlane.f32.xlu1 %v3850_v12 }
0x10d2   :  { %v6610_v48 = vpop.eup %6609 }
0x10d3   :  { %v3297_v34 = vmul.f32 %v6610_v48, %v8271_v57  ;;  %v4181_v53 = vpop.xlane.xlu0 %4180  ;;  %v4073_v57 = vsub.f32 %v8275_v61, %v4072_v1 }
0x10d4   :  { %v4182_v43 = vsub.f32 %v8279_v58, %v4181_v53 }
0x10d5   :  { %v3298_v18 = vpack.c.bf16 %v3297_v34, %v3297_v34  ;;  %v4074_v13 = vmul.f32 1.442695, %v4073_v57 }
0x10d6   :  { %v4183_v44 = vmul.f32 1.442695, %v4182_v43 }
0x10d7   :  { %v3411_v40 = vpop.permute.xlu0 %3410 }
0x10da   :  { %3523 = vrot.lane.b32.xlu0 %v8110_v52, %s7143_s27 }
0x10db   :  { %v4292_v56 = vpop.xlane.xlu1 %4291 }
0x10dc   :  { %v4293_v15 = vsub.f32 %v8283_v19, %v4292_v56 }
0x10dd   :  { %3636 = vrot.lane.b32.xlu1 %v8110_v52, %s7144_s16  ;;  %v3961_v52 = vmul.f32 1.442695, %v3960_v9 }
0x10de   :  { %v4294_v33 = vmul.f32 1.442695, %v4293_v15 }
0x10df   :  { %v3301_v36 = vpop.permute.xlu1 %3300  ;;  %6611 = vpow2.f32 %v3961_v52 }
0x10e0   :  { %6195 = vmatpush3.bf16.msra.mxu0 %v3301_v36  ;;  %6613 = vpow2.f32 %v4074_v13 }
0x10e1   :  { %3747 = vrot.lane.b32.xlu1 %v8108_v4, %s7142_s24  ;;  %6206 = vmatprep.subr.bf16.mxu0 %v7136_v10  ;;  %6615 = vpow2.f32 %v4183_v44 }
0x10e2   :  { %6617 = vpow2.f32 %v4294_v33 }
0x10e3   :  { %6197 = vmatmul.mubr.msk.bf16.vlgmr.msra.gmra.mrb[88].mxu0 %vm338_vm0, %v3298_v18 }
0x10e4   :  { %6207 = vmatpush3.bf16.msra.mxu0 %v3411_v40  ;;  %6208 = vmatprep.mubr.msk.bf16.mxu0 %vm7137_vm2, %v7136_v10 }
0x10e5   :  { %3856 = vrot.lane.b32.xlu1 %v8108_v4, %s7141_s1  ;;  %6218 = vmatprep.subr.bf16.mxu0 %v7136_v10 }
0x10e9   :  { %3969 = vrot.lane.b32.xlu1 %v8108_v4, %s7143_s27  ;;  %v8364_v61 = vpop.eup %6611 }
0x10ea   :  { %v3963_v58 = vsel %vm338_vm0, %v8364_v61, 0.0  ;;  %v8370_v46 = vpop.eup %6613 }
0x10eb   :  { %v8376_v19 = vpop.eup %6615 }
0x10ec   :  { %v4185_v50 = vsel %vm338_vm0, %v8376_v19, 0.0  ;;  %v8382_v14 = vpop.eup %6617 }
0x10ed   :  { %4082 = vrot.lane.b32.xlu1 %v8108_v4, %s7144_s16  ;;  %v4076_v4 = vsel %vm338_vm0, %v8370_v46, 0.0  ;;  %v4296_v7 = vsel %vm338_vm0, %v8382_v14, 0.0 }
0x10f1   :  { %4192 = vrot.lane.b32.xlu1 %v8124_v30, %s7142_s24 }
0x10f5   :  { %4302 = vrot.lane.b32.xlu1 %v8124_v30, %s7141_s1 }
0x10f9   :  { %4415 = vrot.lane.b32.xlu1 %v8124_v30, %s7143_s27  ;;  %3964 = vadd.xlane.f32.xlu0 %v3963_v58 }
0x10fd   :  { %4528 = vrot.lane.b32.xlu1 %v8124_v30, %s7144_s16  ;;  %4077 = vadd.xlane.f32.xlu0 %v4076_v4 }
0x1101   :  { %4639 = vrot.lane.b32.xlu1 %v8122_v16, %s7142_s24  ;;  %4186 = vadd.xlane.f32.xlu0 %v4185_v50 }
0x1105   :  { %4861 = vrot.lane.b32.xlu1 %v8122_v16, %s7143_s27  ;;  %4297 = vadd.xlane.f32.xlu0 %v4296_v7 }
0x1108   :  { %v4405_v38 = vpop.xlane.xlu0 %4404 }
0x1109   :  { %v4406_v30 = vsub.f32 %v8287_v2, %v4405_v38  ;;  %4974 = vrot.lane.b32.xlu1 %v8122_v16, %s7144_s16 }
0x110b   :  { %v4407_v22 = vmul.f32 1.442695, %v4406_v30 }
0x110c   :  { %v4518_v21 = vpop.xlane.xlu0 %4517 }
0x110d   :  { %6619 = vpow2.f32 %v4407_v22  ;;  %v4519_v31 = vsub.f32 %v8291_v8, %v4518_v21 }
0x110f   :  { %v4520_v54 = vmul.f32 1.442695, %v4519_v31 }
0x1110   :  { %v4628_v37 = vpop.xlane.xlu0 %4627 }
0x1111   :  { %6621 = vpow2.f32 %v4520_v54  ;;  %v4629_v49 = vsub.f32 %v8295_v60, %v4628_v37 }
0x1113   :  { %v4630_v24 = vmul.f32 1.442695, %v4629_v49 }
0x1114   :  { %v4738_v63 = vpop.xlane.xlu0 %4737 }
0x1115   :  { %6623 = vpow2.f32 %v4630_v24  ;;  %v4739_v28 = vsub.f32 %v8297_v27, %v4738_v63 }
0x1117   :  { %v8396_v62 = vpop.eup %6619  ;;  %v4740_v2 = vmul.f32 1.442695, %v4739_v28 }
0x1118   :  { %v4851_v0 = vpop.xlane.xlu0 %4850  ;;  %v4409_v32 = vsel %vm338_vm0, %v8396_v62, 0.0 }
0x1119   :  { %6625 = vpow2.f32 %v4740_v2  ;;  %v4852_v8 = vsub.f32 %v8299_v35, %v4851_v0  ;;  %4410 = vadd.xlane.f32.xlu0 %v4409_v32 }
0x111b   :  { %v8401_v25 = vpop.eup %6621  ;;  %v4853_v3 = vmul.f32 1.442695, %v4852_v8 }
0x111c   :  { %v4964_v60 = vpop.xlane.xlu0 %4963  ;;  %v4522_v6 = vsel %vm338_vm0, %v8401_v25, 0.0 }
0x111d   :  { %6627 = vpow2.f32 %v4853_v3  ;;  %v4965_v27 = vsub.f32 %v8303_v41, %v4964_v60  ;;  %4523 = vadd.xlane.f32.xlu0 %v4522_v6 }
0x111f   :  { %v8406_v5 = vpop.eup %6623  ;;  %v4966_v11 = vmul.f32 1.442695, %v4965_v27 }
0x1120   :  { %v4632_v17 = vsel %vm338_vm0, %v8406_v5, 0.0 }
0x1121   :  { %6629 = vpow2.f32 %v4966_v11  ;;  %4633 = vadd.xlane.f32.xlu0 %v4632_v17 }
0x1123   :  { %v8410_v35 = vpop.eup %6625 }
0x1124   :  { %v4742_v12 = vsel %vm338_vm0, %v8410_v35, 0.0 }
0x1125   :  { %4743 = vadd.xlane.f32.xlu0 %v4742_v12 }
0x1127   :  { %v8414_v29 = vpop.eup %6627 }
0x1128   :  { %v4855_v41 = vsel %vm338_vm0, %v8414_v29, 0.0 }
0x1129   :  { %4856 = vadd.xlane.f32.xlu0 %v4855_v41 }
0x112b   :  { %v8418_v1 = vpop.eup %6629 }
0x112c   :  { %v4968_v20 = vsel %vm338_vm0, %v8418_v1, 0.0 }
0x112d   :  { %4969 = vadd.xlane.f32.xlu0 %v4968_v20 }
0x1139   :  { %v3406_v48 = vpop.xlane.xlu1 %3405 }
0x113a   :  { %6631 = vrcp.f32 %v3406_v48 }
0x1141   :  { %v3519_v56 = vpop.xlane.xlu1 %3518 }
0x1142   :  { %6633 = vrcp.f32 %v3519_v56 }
0x1143   :  { %4748 = vrot.lane.b32.xlu0 %v8122_v16, %s7141_s1 }
0x1144   :  { %v6632_v34 = vpop.eup %6631 }
0x1145   :  { %v3408_v53 = vmul.f32 %v6632_v34, %v8317_v45 }
0x1147   :  { %v3409_v36 = vpack.c.bf16 %v3408_v53, %v3408_v53 }
0x1149   :  { %6209 = vmatmul.mubr.msk.bf16.vlgmr.msra.gmra.mrb[92].mxu0 %vm338_vm0, %v3409_v36  ;;  %v3632_v18 = vpop.xlane.xlu1 %3631 }
0x114a   :  { %6220 = vmatprep.mubr.msk.bf16.mxu0 %vm7137_vm2, %v7136_v10  ;;  %6635 = vrcp.f32 %v3632_v18 }
0x114c   :  { %v6634_v9 = vpop.eup %6633 }
0x114d   :  { %v3521_v52 = vmul.f32 %v6634_v9, %v8322_v59 }
0x114f   :  { %v3522_v16 = vpack.c.bf16 %v3521_v52, %v3521_v52 }
0x1151   :  { %v3742_v40 = vpop.xlane.xlu0 %3741 }
0x1152   :  { %6637 = vrcp.f32 %v3742_v40 }
0x1154   :  { %v6636_v45 = vpop.eup %6635 }
0x1155   :  { %v3524_v57 = vpop.permute.xlu0 %3523  ;;  %v3634_v43 = vmul.f32 %v6636_v45, %v8327_v39 }
0x1156   :  { %6219 = vmatpush3.bf16.msra.mxu0 %v3524_v57 }
0x1157   :  { %6230 = vmatprep.subr.bf16.mxu0 %v7136_v10  ;;  %v3635_v15 = vpack.c.bf16 %v3634_v43, %v3634_v43 }
0x1159   :  { %v3852_v13 = vpop.xlane.xlu1 %3851  ;;  %6221 = vmatmul.mubr.msk.bf16.vlgmr.msra.gmra.mrb[96].mxu0 %vm338_vm0, %v3522_v16 }
0x115a   :  { %6232 = vmatprep.mubr.msk.bf16.mxu0 %vm7137_vm2, %v7136_v10  ;;  %6639 = vrcp.f32 %v3852_v13 }
0x115c   :  { %v6638_v59 = vpop.eup %6637 }
0x115d   :  { %v3637_v44 = vpop.permute.xlu1 %3636  ;;  %v3744_v58 = vmul.f32 %v6638_v59, %v8332_v23 }
0x115e   :  { %6231 = vmatpush3.bf16.msra.mxu0 %v3637_v44 }
0x115f   :  { %6242 = vmatprep.subr.bf16.mxu0 %v7136_v10  ;;  %v3745_v4 = vpack.c.bf16 %v3744_v58, %v3744_v58 }
0x1161   :  { %v3748_v33 = vpop.permute.xlu1 %3747  ;;  %6233 = vmatmul.mubr.msk.bf16.vlgmr.msra.gmra.mrb[100].mxu0 %vm338_vm0, %v3635_v15 }
0x1162   :  { %6243 = vmatpush3.bf16.msra.mxu0 %v3748_v33  ;;  %6244 = vmatprep.mubr.msk.bf16.mxu0 %vm7137_vm2, %v7136_v10 }
0x1163   :  { %6254 = vmatprep.subr.bf16.mxu0 %v7136_v10 }
0x1164   :  { %v6640_v39 = vpop.eup %6639 }
0x1165   :  { %v3857_v50 = vpop.permute.xlu1 %3856  ;;  %v3854_v7 = vmul.f32 %v6640_v39, %v8336_v26 }
0x1167   :  { %v3855_v38 = vpack.c.bf16 %v3854_v7, %v3854_v7 }
0x1169   :  { %6245 = vmatmul.mubr.msk.bf16.vlgmr.msra.gmra.mrb[104].mxu0 %vm338_vm0, %v3745_v4  ;;  %v3970_v30 = vpop.permute.xlu1 %3969 }
0x116a   :  { %6255 = vmatpush3.bf16.msra.mxu0 %v3857_v50  ;;  %6256 = vmatprep.mubr.msk.bf16.mxu0 %vm7137_vm2, %v7136_v10 }
0x116b   :  { %6266 = vmatprep.subr.bf16.mxu0 %v7136_v10 }
0x116d   :  { %v4083_v49 = vpop.permute.xlu1 %4082 }
0x1171   :  { %6257 = vmatmul.mubr.msk.bf16.vlgmr.msra.gmra.mrb[108].mxu0 %vm338_vm0, %v3855_v38  ;;  %v4193_v0 = vpop.permute.xlu1 %4192 }
0x1172   :  { %6267 = vmatpush3.bf16.msra.mxu0 %v3970_v30  ;;  %6268 = vmatprep.mubr.msk.bf16.mxu0 %vm7137_vm2, %v7136_v10 }
0x1173   :  { %6278 = vmatprep.subr.bf16.mxu0 %v7136_v10 }
0x1186   :  { %v3965_v23 = vpop.xlane.xlu0 %3964 }
0x1187   :  { %6641 = vrcp.f32 %v3965_v23 }
0x118a   :  { %v4078_v22 = vpop.xlane.xlu0 %4077 }
0x118b   :  { %6643 = vrcp.f32 %v4078_v22 }
0x118e   :  { %v4187_v21 = vpop.xlane.xlu0 %4186 }
0x118f   :  { %6645 = vrcp.f32 %v4187_v21 }
0x1191   :  { %v6642_v31 = vpop.eup %6641 }
0x1192   :  { %v3967_v26 = vmul.f32 %v6642_v31, %v8364_v61  ;;  %v4298_v63 = vpop.xlane.xlu0 %4297 }
0x1193   :  { %6647 = vrcp.f32 %v4298_v63 }
0x1194   :  { %v3968_v54 = vpack.c.bf16 %v3967_v26, %v3967_v26 }
0x1195   :  { %v6644_v37 = vpop.eup %6643 }
0x1196   :  { %6269 = vmatmul.mubr.msk.bf16.vlgmr.msra.gmra.mrb[112].mxu0 %vm338_vm0, %v3968_v54  ;;  %v4080_v24 = vmul.f32 %v6644_v37, %v8370_v46  ;;  %v4303_v46 = vpop.permute.xlu1 %4302 }
0x1197   :  { %6279 = vmatpush3.bf16.msra.mxu0 %v4083_v49  ;;  %6280 = vmatprep.mubr.msk.bf16.mxu0 %vm7137_vm2, %v7136_v10 }
0x1198   :  { %6290 = vmatprep.subr.bf16.mxu0 %v7136_v10  ;;  %v4081_v28 = vpack.c.bf16 %v4080_v24, %v4080_v24 }
0x1199   :  { %v6646_v2 = vpop.eup %6645 }
0x119a   :  { %v4189_v61 = vmul.f32 %v6646_v2, %v8376_v19  ;;  %v4416_v27 = vpop.permute.xlu1 %4415 }
0x119c   :  { %v4190_v32 = vpack.c.bf16 %v4189_v61, %v4189_v61 }
0x119d   :  { %v6648_v8 = vpop.eup %6647 }
0x119e   :  { %6281 = vmatmul.mubr.msk.bf16.vlgmr.msra.gmra.mrb[116].mxu0 %vm338_vm0, %v4081_v28  ;;  %v4300_v60 = vmul.f32 %v6648_v8, %v8382_v14  ;;  %v4529_v48 = vpop.permute.xlu1 %4528 }
0x119f   :  { %6291 = vmatpush3.bf16.msra.mxu0 %v4193_v0  ;;  %6292 = vmatprep.mubr.msk.bf16.mxu0 %vm7137_vm2, %v7136_v10 }
0x11a0   :  { %6302 = vmatprep.subr.bf16.mxu0 %v7136_v10  ;;  %v4301_v19 = vpack.c.bf16 %v4300_v60, %v4300_v60 }
0x11a2   :  { %v4640_v52 = vpop.permute.xlu1 %4639 }
0x11a6   :  { %6293 = vmatmul.mubr.msk.bf16.vlgmr.msra.gmra.mrb[120].mxu0 %vm338_vm0, %v4190_v32  ;;  %v4411_v3 = vpop.xlane.xlu0 %4410  ;;  %v4862_v15 = vpop.permute.xlu1 %4861 }
0x11a7   :  { %6303 = vmatpush3.bf16.msra.mxu0 %v4303_v46  ;;  %6649 = vrcp.f32 %v4411_v3  ;;  %6304 = vmatprep.mubr.msk.bf16.mxu0 %vm7137_vm2, %v7136_v10 }
0x11a8   :  { %6314 = vmatprep.subr.bf16.mxu0 %v7136_v10 }
0x11aa   :  { %v4524_v6 = vpop.xlane.xlu0 %4523  ;;  %v4975_v4 = vpop.permute.xlu1 %4974 }
0x11ab   :  { %6651 = vrcp.f32 %v4524_v6 }
0x11ae   :  { %6305 = vmatmul.mubr.msk.bf16.vlgmr.msra.gmra.mrb[124].mxu0 %vm338_vm0, %v4301_v19  ;;  %v4634_v11 = vpop.xlane.xlu0 %4633 }
0x11af   :  { %6315 = vmatpush3.bf16.msra.mxu0 %v4416_v27  ;;  %6316 = vmatprep.mubr.msk.bf16.mxu0 %vm7137_vm2, %v7136_v10  ;;  %6653 = vrcp.f32 %v4634_v11 }
0x11b0   :  { %6326 = vmatprep.subr.bf16.mxu0 %v7136_v10 }
0x11b1   :  { %v6650_v17 = vpop.eup %6649 }
0x11b2   :  { %v4413_v12 = vmul.f32 %v6650_v17, %v8396_v62  ;;  %v4744_v14 = vpop.xlane.xlu0 %4743 }
0x11b3   :  { %6655 = vrcp.f32 %v4744_v14 }
0x11b4   :  { %v4414_v41 = vpack.c.bf16 %v4413_v12, %v4413_v12 }
0x11b5   :  { %v6652_v20 = vpop.eup %6651 }
0x11b6   :  { %v3340_v56 = vpop.f32.mrb[88].mxu0  ;;  %6317 = vmatmul.mubr.msk.bf16.vlgmr.msra.gmra.mrb[128].mxu0 %vm338_vm0, %v4414_v41  ;;  %v4526_v53 = vmul.f32 %v6652_v20, %v8401_v25  ;;  %v4857_v18 = vpop.xlane.xlu0 %4856 }
0x11b7   :  { %3346 = vst.msk [vmem:[#allocation2] sm:$0xff] %vm720_vm3, %v3340_v56  ;;  %6327 = vmatpush3.bf16.msra.mxu0 %v4529_v48  ;;  %v6198_v34 = vpop.f32.mrb[89].mxu0  ;;  %6328 = vmatprep.mubr.msk.bf16.mxu0 %vm7137_vm2, %v7136_v10  ;;  %6657 = vrcp.f32 %v4857_v18 }
0x11b8   :  { %v3343_v36 = vpop.f32.mrb[90].mxu0  ;;  %6338 = vmatprep.subr.bf16.mxu0 %v7136_v10  ;;  %v4527_v9 = vpack.c.bf16 %v4526_v53, %v4526_v53 }
0x11b9   :  { %v6199_v62 = vpop.f32.mrb[91].mxu0  ;;  %v6654_v40 = vpop.eup %6653 }
0x11ba   :  { %v4636_v57 = vmul.f32 %v6654_v40, %v8406_v5  ;;  %v4970_v16 = vpop.xlane.xlu0 %4969 }
0x11bb   :  { %6659 = vrcp.f32 %v4970_v16 }
0x11bc   :  { %v4637_v25 = vpack.c.bf16 %v4636_v57, %v4636_v57 }
0x11bd   :  { %v6656_v45 = vpop.eup %6655 }
0x11be   :  { %6329 = vmatmul.mubr.msk.bf16.vlgmr.msra.gmra.mrb[132].mxu0 %vm338_vm0, %v4527_v9  ;;  %v4749_v13 = vpop.permute.xlu0 %4748  ;;  %v4746_v43 = vmul.f32 %v6656_v45, %v8410_v35 }
0x11bf   :  { %6339 = vmatpush3.bf16.msra.mxu0 %v4640_v52  ;;  %6340 = vmatprep.mubr.msk.bf16.mxu0 %vm7137_vm2, %v7136_v10 }
0x11c0   :  { %6350 = vmatprep.subr.bf16.mxu0 %v7136_v10  ;;  %v4747_v44 = vpack.c.bf16 %v4746_v43, %v4746_v43 }
0x11c1   :  { %v6658_v5 = vpop.eup %6657 }
0x11c2   :  { %v4859_v59 = vmul.f32 %v6658_v5, %v8414_v29 }
0x11c4   :  { %v4860_v33 = vpack.c.bf16 %v4859_v59, %v4859_v59  ;;  %v6473_v59 = vld [vmem:[#allocation20 + $0x10] sm:$0xff]  }
0x11c5   :  { %v6660_v58 = vpop.eup %6659  ;;  %6380 = vmatprep.subr.bf16.mxu1 %v6473_v59 }
0x11c6   :  { %6341 = vmatmul.mubr.msk.bf16.vlgmr.msra.gmra.mrb[136].mxu0 %vm338_vm0, %v4637_v25  ;;  %v4972_v35 = vmul.f32 %v6660_v58, %v8418_v1  ;;  %6381 = vmatpush3.bf16.msra.mxu1 %v6473_v59 }
0x11c7   :  { %6351 = vmatpush3.bf16.msra.mxu0 %v4749_v13  ;;  %6352 = vmatprep.mubr.msk.bf16.mxu0 %vm7137_vm2, %v7136_v10 }
0x11c8   :  { %6362 = vmatprep.subr.bf16.mxu0 %v7136_v10  ;;  %v4973_v39 = vpack.c.bf16 %v4972_v35, %v4972_v35 }
0x11ce   :  { %6353 = vmatmul.mubr.msk.bf16.vlgmr.msra.gmra.mrb[140].mxu0 %vm338_vm0, %v4747_v44 }
0x11cf   :  { %6363 = vmatpush3.bf16.msra.mxu0 %v4862_v15  ;;  %6364 = vmatprep.mubr.msk.bf16.mxu0 %vm7137_vm2, %v7136_v10 }
0x11d0   :  { %6374 = vmatprep.subr.bf16.mxu0 %v7136_v10 }
0x11d6   :  { %6365 = vmatmul.mubr.msk.bf16.vlgmr.msra.gmra.mrb[144].mxu0 %vm338_vm0, %v4860_v33  ;;  %v6474_v33 = vld [vmem:[#allocation20 + $0x18] sm:$0xff]  }
0x11d7   :  { %6375 = vmatpush3.bf16.msra.mxu0 %v4975_v4  ;;  %6376 = vmatprep.mubr.msk.bf16.mxu0 %vm7137_vm2, %v7136_v10 }
0x11d8   :  { %6382 = vmatprep.subr.bf16.mxu1 %v6474_v33 }
0x11d9   :  { %6383 = vmatpush3.bf16.msra.mxu1 %v6474_v33 }
0x11de   :  { %6377 = vmatmul.mubr.msk.bf16.vlgmr.msra.gmra.mrb[148].mxu0 %vm338_vm0, %v4973_v39 }
0x121c   :  { %v3450_v50 = vpop.f32.mrb[92].mxu0 }
0x121d   :  { %3457 = vrot.lane.b32.xlu1 %v3450_v50, %s7128_s11  ;;  %v6210_v29 = vpop.f32.mrb[93].mxu0 }
0x121e   :  { %v3453_v7 = vpop.f32.mrb[94].mxu0 }
0x121f   :  { %v6211_v38 = vpop.f32.mrb[95].mxu0 }
0x122c   :  { %v3563_v30 = vpop.f32.mrb[96].mxu0 }
0x122d   :  { %3570 = vrot.lane.b32.xlu1 %v3563_v30, %s7114_s20  ;;  %v6222_v23 = vpop.f32.mrb[97].mxu0 }
0x122e   :  { %v3566_v22 = vpop.f32.mrb[98].mxu0 }
0x122f   :  { %v6223_v21 = vpop.f32.mrb[99].mxu0 }
0x1234   :  { %v3676_v31 = vpop.f32.mrb[100].mxu0 }
0x1235   :  { %3683 = vrot.lane.b32.xlu0 %v3676_v31, %s7145_s15  ;;  %v6234_v10 = vpop.f32.mrb[101].mxu0 }
0x1236   :  { %v3679_v1 = vpop.f32.mrb[102].mxu0 }
0x1237   :  { %v6235_v26 = vpop.f32.mrb[103].mxu0 }
0x123c   :  { %v3787_v54 = vpop.f32.mrb[104].mxu0 }
0x123d   :  { %3793 = vst.msk [vmem:[#allocation2 + $0x8] sm:$0xff] %vm720_vm3, %v3787_v54  ;;  %v6246_v37 = vpop.f32.mrb[105].mxu0 }
0x123e   :  { %v3790_v49 = vpop.f32.mrb[106].mxu0 }
0x123f   :  { %v6247_v24 = vpop.f32.mrb[107].mxu0 }
0x1244   :  { %v3896_v63 = vpop.f32.mrb[108].mxu0 }
0x1245   :  { %3903 = vrot.lane.b32.xlu1 %v3896_v63, %s7128_s11  ;;  %v6258_v28 = vpop.f32.mrb[109].mxu0 }
0x1246   :  { %v3899_v2 = vpop.f32.mrb[110].mxu0 }
0x1247   :  { %v6259_v0 = vpop.f32.mrb[111].mxu0 }
0x1269   :  { %v4009_v61 = vpop.f32.mrb[112].mxu0 }
0x126a   :  { %4016 = vrot.lane.b32.xlu1 %v4009_v61, %s7114_s20  ;;  %v6270_v32 = vpop.f32.mrb[113].mxu0 }
0x126b   :  { %v4012_v8 = vpop.f32.mrb[114].mxu0 }
0x126c   :  { %v6271_v46 = vpop.f32.mrb[115].mxu0 }
0x1271   :  { %v4122_v3 = vpop.f32.mrb[116].mxu0 }
0x1272   :  { %4129 = vrot.lane.b32.xlu1 %v4122_v3, %s7145_s15  ;;  %v6282_v60 = vpop.f32.mrb[117].mxu0 }
0x1273   :  { %v4125_v6 = vpop.f32.mrb[118].mxu0 }
0x1274   :  { %v6283_v19 = vpop.f32.mrb[119].mxu0 }
0x1279   :  { %v4232_v27 = vpop.f32.mrb[120].mxu0 }
0x127a   :  { %4238 = vst.msk [vmem:[#allocation2 + $0x10] sm:$0xff] %vm720_vm3, %v4232_v27  ;;  %v6294_v11 = vpop.f32.mrb[121].mxu0 }
0x127b   :  { %v4235_v17 = vpop.f32.mrb[122].mxu0 }
0x127c   :  { %v6295_v12 = vpop.f32.mrb[123].mxu0 }
0x1281   :  { %v4342_v14 = vpop.f32.mrb[124].mxu0 }
0x1282   :  { %4349 = vrot.lane.b32.xlu0 %v4342_v14, %s7128_s11  ;;  %v6306_v41 = vpop.f32.mrb[125].mxu0 }
0x1283   :  { %v4345_v20 = vpop.f32.mrb[126].mxu0 }
0x1284   :  { %v6307_v48 = vpop.f32.mrb[127].mxu0 }
0x1289   :  { %v4455_v56 = vpop.f32.mrb[128].mxu0 }
0x128a   :  { %4462 = vrot.lane.b32.xlu0 %v4455_v56, %s7114_s20  ;;  %v6318_v34 = vpop.f32.mrb[129].mxu0 }
0x128b   :  { %v4458_v53 = vpop.f32.mrb[130].mxu0 }
0x128c   :  { %v6319_v36 = vpop.f32.mrb[131].mxu0 }
0x128f   :  { %v3458_v62 = vpop.permute.xlu1 %3457 }
0x1290   :  { %3460 = vst.msk [vmem:[#allocation2] sm:$0xff] %vm940_vm4, %v3458_v62 }
0x1291   :  { %v4568_v18 = vpop.f32.mrb[132].mxu0 }
0x1292   :  { %4575 = vrot.lane.b32.xlu0 %v4568_v18, %s7145_s15  ;;  %v6330_v9 = vpop.f32.mrb[133].mxu0 }
0x1293   :  { %v4571_v40 = vpop.f32.mrb[134].mxu0 }
0x1294   :  { %v6331_v52 = vpop.f32.mrb[135].mxu0 }
0x1299   :  { %v4679_v57 = vpop.f32.mrb[136].mxu0 }
0x129a   :  { %4685 = vst.msk [vmem:[#allocation2 + $0x18] sm:$0xff] %vm720_vm3, %v4679_v57  ;;  %v6342_v16 = vpop.f32.mrb[137].mxu0 }
0x129b   :  { %v4682_v25 = vpop.f32.mrb[138].mxu0 }
0x129c   :  { %v6343_v45 = vpop.f32.mrb[139].mxu0 }
0x129d   :  { %v6475_v45 = vld [vmem:[#allocation24 + $0x10] sm:$0xff]  }
0x129e   :  { %6388 = vmatprep.subr.bf16.mxu0 %v6475_v45 }
0x129f   :  { %v3571_v13 = vpop.permute.xlu1 %3570  ;;  %6389 = vmatpush3.bf16.msra.mxu0 %v6475_v45 }
0x12a0   :  { %3573 = vst.msk [vmem:[#allocation2] sm:$0xff] %vm1054_vm5, %v3571_v13  ;;  %v6476_v13 = vld [vmem:[#allocation24 + $0x18] sm:$0xff]  }
0x12a1   :  { %v4788_v43 = vpop.f32.mrb[140].mxu0  ;;  %6390 = vmatprep.subr.bf16.mxu0 %v6476_v13 }
0x12a2   :  { %4795 = vrot.lane.b32.xlu1 %v4788_v43, %s7128_s11  ;;  %v6354_v44 = vpop.f32.mrb[141].mxu0 }
0x12a3   :  { %v4791_v5 = vpop.f32.mrb[142].mxu0  ;;  %6391 = vmatpush3.bf16.msra.mxu0 %v6476_v13 }
0x12a4   :  { %v6355_v15 = vpop.f32.mrb[143].mxu0 }
0x12a7   :  { %v3684_v58 = vpop.permute.xlu0 %3683 }
0x12a8   :  { %3686 = vst.msk [vmem:[#allocation2] sm:$0xff] %vm1168_vm6, %v3684_v58 }
0x12a9   :  { %v4901_v4 = vpop.f32.mrb[144].mxu0 }
0x12aa   :  { %4908 = vrot.lane.b32.xlu1 %v4901_v4, %s7114_s20  ;;  %v6366_v35 = vpop.f32.mrb[145].mxu0  ;;  %s7146_s20 = smov [#allocation30]  }
0x12ab   :  { %v4904_v39 = vpop.f32.mrb[146].mxu0  ;;  %s5568_s4 = sshll.u32 %s7146_s20, 4  ;;  %s5569_s4 = int_to_ptr.vmem [resolvable:$true] %s5568_s4 }
0x12ac   :  { %v6367_v50 = vpop.f32.mrb[147].mxu0  ;;  %s7071_s9 = scalar_lea.vmem %s5569_s4, 512  ;;  %p7076_p11 = scmp.lt.s32.totalorder %s5569_s4, %s5569_s4 }
0x12ad   :  { %p7072_p10 = scmp.ne.s32.totalorder %s5569_s4, %s7071_s9  ;;  %p7077_p12 = scmp.lt.s32.totalorder %s7071_s9, %s7071_s9 }
0x12af   :  { %v5025_v31 = vld [vmem:[#allocation2] sm:$0xff]  ;;  %p7078_p13 = por %p7077_p12, %p7076_p11 }
0x12b1   :  { %v5014_v29 = vpop.f32.mrb[148].mxu0  ;;  %p7079_p0 = pnand %p7078_p13, %p7072_p10 }
0x12b2   :  { %5021 = vrot.lane.b32.xlu1 %v5014_v29, %s7145_s15  ;;  %v6378_v7 = vpop.f32.mrb[149].mxu0 }
0x12b3   :  { %v5017_v38 = vpop.f32.mrb[150].mxu0 }
0x12b4   :  { %v6379_v30 = vpop.f32.mrb[151].mxu0  ;;  %v5711_v38 = vld [vmem:[#allocation21 + $0x1] ss:$0 sm:$0xff] }
0x12b7   :  { %v3904_v23 = vpop.permute.xlu1 %3903 }
0x12b8   :  { %3906 = vst.msk [vmem:[#allocation2 + $0x8] sm:$0xff] %vm940_vm4, %v3904_v23 }
0x12dc   :  { %v4017_v22 = vpop.permute.xlu1 %4016 }
0x12dd   :  { %4019 = vst.msk [vmem:[#allocation2 + $0x8] sm:$0xff] %vm1054_vm5, %v4017_v22 }
0x12e4   :  { %v4130_v21 = vpop.permute.xlu1 %4129 }
0x12e5   :  { %4132 = vst.msk [vmem:[#allocation2 + $0x8] sm:$0xff] %vm1168_vm6, %v4130_v21 }
0x12ec   :  { %v5026_v10 = vld [vmem:[#allocation2 + $0x8] sm:$0xff] }
0x12ed   :  { %v5029_v1 = vpack.c.bf16 %v5026_v10, %v5025_v31  ;;  %v5712_v10 = vld [vmem:[#allocation23 + $0x1] ss:$0 sm:$0xff] }
0x12ef   :  { %6384 = vmatprep.mubr.msk.bf16.mxu1 %vm394_vm1, %v5029_v1 }
0x12f4   :  { %v4350_v26 = vpop.permute.xlu0 %4349 }
0x12f5   :  { %4352 = vst.msk [vmem:[#allocation2 + $0x10] sm:$0xff] %vm940_vm4, %v4350_v26 }
0x12fc   :  { %v4463_v54 = vpop.permute.xlu0 %4462 }
0x12fd   :  { %4465 = vst.msk [vmem:[#allocation2 + $0x10] sm:$0xff] %vm1054_vm5, %v4463_v54 }
0x1304   :  { %v4576_v37 = vpop.permute.xlu0 %4575 }
0x1305   :  { %4578 = vst.msk [vmem:[#allocation2 + $0x10] sm:$0xff] %vm1168_vm6, %v4576_v37 }
0x130c   :  { %v5027_v28 = vld [vmem:[#allocation2 + $0x10] sm:$0xff] }
0x1314   :  { %v4796_v49 = vpop.permute.xlu1 %4795 }
0x1315   :  { %4798 = vst.msk [vmem:[#allocation2 + $0x18] sm:$0xff] %vm940_vm4, %v4796_v49 }
0x131c   :  { %v4909_v24 = vpop.permute.xlu1 %4908 }
0x131d   :  { %4911 = vst.msk [vmem:[#allocation2 + $0x18] sm:$0xff] %vm1054_vm5, %v4909_v24 }
0x1324   :  { %v5022_v63 = vpop.permute.xlu1 %5021 }
0x1325   :  { %5024 = vst.msk [vmem:[#allocation2 + $0x18] sm:$0xff] %vm1168_vm6, %v5022_v63 }
0x132c   :  { %v5028_v2 = vld [vmem:[#allocation2 + $0x18] sm:$0xff] }
0x132d   :  { %v5030_v0 = vpack.c.bf16 %v5028_v2, %v5027_v28 }
0x132f   :  { %6385 = vmatmul.mubr.msk.bf16.vlgmr.msra.gmra.mrb[144].mxu1 %vm394_vm1, %v5030_v0 }
0x1402   :  { %v6386_v61 = vpop.f32.mrb[144].mxu1 }
0x1403   :  { %v5088_v32 = vpop.f32.mrb[145].mxu1  ;;  %v8529_v60 = vadd.f32 %v6386_v61, %v8068_v42 }
0x1404   :  { %v8526_v8 = vadd.f32 %v5088_v32, %v8065_v55  ;;  %v6387_v46 = vpop.f32.mrb[146].mxu1 }
0x1405   :  { %v5091_v3 = vpop.f32.mrb[147].mxu1  ;;  %v8539_v11 = vadd.f32 %v6387_v46, %v8076_v47  ;;  %v5117_v55 = vsel %vm394_vm1, %v8529_v60, 0.0  ;;  %v6477_v46 = vld [vmem:[#allocation26 + $0x40] sm:$0xff]  }
0x1406   :  { %v8532_v6 = vadd.f32 %v5091_v3, %v8071_v51  ;;  %v5111_v19 = vsel %vm394_vm1, %v8526_v8, 0.0  ;;  %6396 = vmatprep.subr.bf16.mxu1 %v6477_v46  ;;  %v6478_v3 = vld [vmem:[#allocation26 + $0x48] sm:$0xff]  }
0x1407   :  { %5112 = vadd.xlane.f32.xlu0 %v5111_v19  ;;  %v5120_v42 = vsel %vm394_vm1, %v8539_v11, 0.0  ;;  %6397 = vmatpush3.bf16.msra.mxu1 %v6477_v46  ;;  %v6479_v19 = vld [vmem:[#allocation26 + $0x50] sm:$0xff]  }
0x1408   :  { %v5114_v27 = vsel %vm394_vm1, %v8532_v6, 0.0  ;;  %6398 = vmatprep.subr.bf16.mxu1 %v6478_v3 }
0x1409   :  { %5115 = vadd.xlane.f32.xlu1 %v5114_v27  ;;  %v6480_v27 = vld [vmem:[#allocation26 + $0x58] sm:$0xff]  }
0x140b   :  { %5118 = vadd.xlane.f32.xlu0 %v5117_v55  ;;  %6399 = vmatpush3.bf16.msra.mxu1 %v6478_v3  ;;  %v6481_v55 = vld [vmem:[#allocation26 + $0x60] sm:$0xff]  }
0x140c   :  { %6400 = vmatprep.subr.bf16.mxu1 %v6479_v19 }
0x140f   :  { %5121 = vadd.xlane.f32.xlu0 %v5120_v42  ;;  %6401 = vmatpush3.bf16.msra.mxu1 %v6479_v19  ;;  %v6482_v42 = vld [vmem:[#allocation26 + $0x68] sm:$0xff]  }
0x1410   :  { %6402 = vmatprep.subr.bf16.mxu1 %v6480_v27 }
0x1413   :  { %6403 = vmatpush3.bf16.msra.mxu1 %v6480_v27 }
0x1414   :  { %6404 = vmatprep.subr.bf16.mxu1 %v6481_v55 }
0x1417   :  { %6405 = vmatpush3.bf16.msra.mxu1 %v6481_v55 }
0x1418   :  { %6406 = vmatprep.subr.bf16.mxu1 %v6482_v42 }
0x141b   :  { %6407 = vmatpush3.bf16.msra.mxu1 %v6482_v42 }
0x1494   :  { %v5113_v51 = vpop.xlane.xlu0 %5112 }
0x1495   :  { %v5123_v17 = vmul.f32 0.03125, %v5113_v51  ;;  %v6483_v51 = vld [vmem:[#allocation26 + $0x70] sm:$0xff]  }
0x1496   :  { %v5116_v12 = vpop.xlane.xlu1 %5115  ;;  %6408 = vmatprep.subr.bf16.mxu1 %v6483_v51 }
0x1497   :  { %v5127_v14 = vsub.f32 %v8526_v8, %v5123_v17  ;;  %v5124_v41 = vmul.f32 0.03125, %v5116_v12  ;;  %6409 = vmatpush3.bf16.msra.mxu1 %v6483_v51  ;;  %v6484_v17 = vld [vmem:[#allocation26 + $0x78] sm:$0xff]  }
0x1498   :  { %v5119_v20 = vpop.xlane.xlu0 %5118  ;;  %6410 = vmatprep.subr.bf16.mxu1 %v6484_v17 }
0x1499   :  { %v5128_v48 = vsub.f32 %v8532_v6, %v5124_v41  ;;  %v5125_v56 = vmul.f32 0.03125, %v5119_v20  ;;  %v5131_v47 = vmul.f32 %v5127_v14, %v5127_v14 }
0x149b   :  { %v5129_v34 = vsub.f32 %v8529_v60, %v5125_v56  ;;  %v5135_v53 = vsel %vm394_vm1, %v5131_v47, 0.0  ;;  %v5132_v36 = vmul.f32 %v5128_v48, %v5128_v48  ;;  %6411 = vmatpush3.bf16.msra.mxu1 %v6484_v17 }
0x149c   :  { %5136 = vadd.xlane.f32.xlu0 %v5135_v53  ;;  %v5122_v62 = vpop.xlane.xlu0 %5121 }
0x149d   :  { %v5126_v18 = vmul.f32 0.03125, %v5122_v62  ;;  %v5138_v9 = vsel %vm394_vm1, %v5132_v36, 0.0  ;;  %v5133_v40 = vmul.f32 %v5129_v34, %v5129_v34 }
0x149e   :  { %5139 = vadd.xlane.f32.xlu1 %v5138_v9 }
0x149f   :  { %v5130_v52 = vsub.f32 %v8539_v11, %v5126_v18  ;;  %v5141_v57 = vsel %vm394_vm1, %v5133_v40, 0.0 }
0x14a0   :  { %5142 = vadd.xlane.f32.xlu0 %v5141_v57 }
0x14a1   :  { %v5134_v16 = vmul.f32 %v5130_v52, %v5130_v52 }
0x14a3   :  { %v5144_v25 = vsel %vm394_vm1, %v5134_v16, 0.0 }
0x14a4   :  { %5145 = vadd.xlane.f32.xlu1 %v5144_v25 }
0x1529   :  { %v5137_v43 = vpop.xlane.xlu0 %5136 }
0x152a   :  { %v5147_v44 = vmul.f32 0.03125, %v5137_v43 }
0x152b   :  { %v5140_v5 = vpop.xlane.xlu1 %5139 }
0x152c   :  { %v5151_v15 = vadd.f32 1e-05, %v5147_v44  ;;  %v5148_v59 = vmul.f32 0.03125, %v5140_v5 }
0x152d   :  { %v5143_v33 = vpop.xlane.xlu0 %5142 }
0x152e   :  { %6661 = vrsqrt.f32 %v5151_v15  ;;  %v5152_v58 = vadd.f32 1e-05, %v5148_v59  ;;  %v5149_v4 = vmul.f32 0.03125, %v5143_v33 }
0x1530   :  { %6663 = vrsqrt.f32 %v5152_v58  ;;  %v5153_v35 = vadd.f32 1e-05, %v5149_v4 }
0x1531   :  { %v5146_v39 = vpop.xlane.xlu1 %5145 }
0x1532   :  { %6665 = vrsqrt.f32 %v5153_v35  ;;  %v5150_v50 = vmul.f32 0.03125, %v5146_v39 }
0x1534   :  { %v5154_v29 = vadd.f32 1e-05, %v5150_v50 }
0x1536   :  { %6667 = vrsqrt.f32 %v5154_v29 }
0x1538   :  { %v6662_v7 = vpop.eup %6661 }
0x1539   :  { %v5159_v30 = vmul.f32 %v6662_v7, %v5127_v14 }
0x153a   :  { %v6664_v23 = vpop.eup %6663 }
0x153b   :  { %v5160_v22 = vmul.f32 %v6664_v23, %v5128_v48  ;;  %v5169_v21 = vmul.f32 %v5711_v38, %v5159_v30 }
0x153c   :  { %v6666_v31 = vpop.eup %6665 }
0x153d   :  { %v5161_v1 = vmul.f32 %v6666_v31, %v5129_v34  ;;  %v5170_v26 = vmul.f32 %v5711_v38, %v5160_v22  ;;  %v5179_v54 = vadd.f32 %v5712_v10, %v5169_v21 }
0x153f   :  { %v5180_v37 = vadd.f32 %v5712_v10, %v5170_v26  ;;  %v5171_v24 = vmul.f32 %v5711_v38, %v5161_v1 }
0x1540   :  { %v6668_v49 = vpop.eup %6667 }
0x1541   :  { %v5162_v63 = vmul.f32 %v6668_v49, %v5130_v52  ;;  %v5183_v28 = vpack.c.bf16 %v5180_v37, %v5179_v54  ;;  %v5181_v0 = vadd.f32 %v5712_v10, %v5171_v24 }
0x1543   :  { %v5172_v2 = vmul.f32 %v5711_v38, %v5162_v63  ;;  %6392 = vmatprep.mubr.msk.bf16.mxu0 %vm394_vm1, %v5183_v28 }
0x1545   :  { %v5182_v61 = vadd.f32 %v5712_v10, %v5172_v2 }
0x1547   :  { %v5184_v32 = vpack.c.bf16 %v5182_v61, %v5181_v0 }
0x1549   :  { %6393 = vmatmul.mubr.msk.bf16.vlgmr.msra.gmra.mrb[152].mxu0 %vm394_vm1, %v5184_v32 }
0x161c   :  { %v8555_v12 = vpop.f32.mrb[152].mxu0 }
0x161d   :  { %v8558_v14 = vmul.f32 0.70710677, %v8555_v12  ;;  %v8560_v41 = vpop.f32.mrb[153].mxu0 }
0x161e   :  { %v8563_v20 = vmul.f32 0.70710677, %v8560_v41  ;;  %v8565_v48 = vpop.f32.mrb[154].mxu0 }
0x161f   :  { %v5267_v56 = vand.u32 2147483647, %v8558_v14  ;;  %v8569_v47 = vmul.f32 0.70710677, %v8565_v48  ;;  %v8572_v53 = vpop.f32.mrb[155].mxu0  ;;  %vm5347_vm11 = vcmp.ge.f32.partialorder %v8558_v14, 0.0 }
0x1620   :  { %v5265_v34 = vand.u32 2147483647, %v8563_v20  ;;  %v8576_v9 = vmul.f32 0.70710677, %v8572_v53  ;;  %vm5345_vm12 = vcmp.ge.f32.partialorder %v8563_v20, 0.0 }
0x1621   :  { %v5271_v36 = vmul.f32 0.3275911, %v5267_v56  ;;  %v5268_v62 = vand.u32 2147483647, %v8569_v47  ;;  %v5323_v43 = vsub.f32 0.0, %v5267_v56  ;;  %vm5348_vm13 = vcmp.ge.f32.partialorder %v8569_v47, 0.0 }
0x1622   :  { %v5269_v18 = vmul.f32 0.3275911, %v5265_v34  ;;  %v5266_v16 = vand.u32 2147483647, %v8576_v9  ;;  %v5321_v44 = vsub.f32 0.0, %v5265_v34  ;;  %vm5346_vm14 = vcmp.ge.f32.partialorder %v8576_v9, 0.0 }
0x1623   :  { %v5275_v40 = vadd.f32 1.0, %v5271_v36  ;;  %v5272_v52 = vmul.f32 0.3275911, %v5268_v62  ;;  %v5327_v15 = vmul.f32 %v5323_v43, %v5267_v56  ;;  %v5324_v59 = vsub.f32 0.0, %v5268_v62 }
0x1624   :  { %v5273_v57 = vadd.f32 1.0, %v5269_v18  ;;  %v5270_v45 = vmul.f32 0.3275911, %v5266_v16  ;;  %v5325_v4 = vmul.f32 %v5321_v44, %v5265_v34  ;;  %v5322_v39 = vsub.f32 0.0, %v5266_v16 }
0x1625   :  { %6669 = vrcp.f32 %v5275_v40  ;;  %v5276_v25 = vadd.f32 1.0, %v5272_v52  ;;  %v5333_v7 = vmul.f32 1.442695, %v5327_v15  ;;  %v5328_v30 = vmul.f32 %v5324_v59, %v5268_v62 }
0x1626   :  { %6671 = vrcp.f32 %v5273_v57  ;;  %v5274_v13 = vadd.f32 1.0, %v5270_v45  ;;  %v5329_v22 = vmul.f32 1.442695, %v5325_v4  ;;  %v5326_v1 = vmul.f32 %v5322_v39, %v5266_v16 }
0x1627   :  { %6673 = vrcp.f32 %v5276_v25  ;;  %v5335_v24 = vmul.f32 1.442695, %v5328_v30 }
0x1628   :  { %6675 = vrcp.f32 %v5274_v13  ;;  %v5331_v61 = vmul.f32 1.442695, %v5326_v1 }
0x1629   :  { %6677 = vpow2.f32 %v5333_v7 }
0x162a   :  { %6679 = vpow2.f32 %v5329_v22 }
0x162b   :  { %6681 = vpow2.f32 %v5335_v24 }
0x162c   :  { %6683 = vpow2.f32 %v5331_v61 }
0x162f   :  { %v6670_v5 = vpop.eup %6669 }
0x1630   :  { %v6672_v33 = vpop.eup %6671  ;;  %v5287_v58 = vmul.f32 1.0614054, %v6670_v5 }
0x1631   :  { %v5285_v35 = vmul.f32 1.0614054, %v6672_v33  ;;  %v6674_v29 = vpop.eup %6673 }
0x1632   :  { %v5291_v50 = vadd.f32 -1.4531521, %v5287_v58  ;;  %v5288_v21 = vmul.f32 1.0614054, %v6674_v29  ;;  %v6676_v31 = vpop.eup %6675 }
0x1633   :  { %v5289_v38 = vadd.f32 -1.4531521, %v5285_v35  ;;  %v5286_v37 = vmul.f32 1.0614054, %v6676_v31  ;;  %v6678_v52 = vpop.eup %6677 }
0x1634   :  { %v5295_v23 = vmul.f32 %v6670_v5, %v5291_v50  ;;  %v5292_v54 = vadd.f32 -1.4531521, %v5288_v21  ;;  %v6680_v16 = vpop.eup %6679 }
0x1635   :  { %v5293_v10 = vmul.f32 %v6672_v33, %v5289_v38  ;;  %v5290_v2 = vadd.f32 -1.4531521, %v5286_v37  ;;  %v6682_v58 = vpop.eup %6681  ;;  %v5257_v37 = vmul.f32 0.5, %v8560_v41 }
0x1636   :  { %v5299_v26 = vadd.f32 1.4214138, %v5295_v23  ;;  %v5296_v28 = vmul.f32 %v6674_v29, %v5292_v54  ;;  %v6684_v7 = vpop.eup %6683  ;;  %v5260_v54 = vmul.f32 0.5, %v8565_v48 }
0x1637   :  { %v5297_v49 = vadd.f32 1.4214138, %v5293_v10  ;;  %v5294_v3 = vmul.f32 %v6676_v31, %v5290_v2 }
0x1638   :  { %v5303_v63 = vmul.f32 %v6670_v5, %v5299_v26  ;;  %v5300_v46 = vadd.f32 1.4214138, %v5296_v28 }
0x1639   :  { %v5301_v0 = vmul.f32 %v6672_v33, %v5297_v49  ;;  %v5298_v42 = vadd.f32 1.4214138, %v5294_v3 }
0x163a   :  { %v5307_v32 = vadd.f32 -0.28449672, %v5303_v63  ;;  %v5304_v55 = vmul.f32 %v6674_v29, %v5300_v46  ;;  %v5258_v63 = vmul.f32 0.5, %v8572_v53 }
0x163b   :  { %v5305_v19 = vadd.f32 -0.28449672, %v5301_v0  ;;  %v5302_v34 = vmul.f32 %v6676_v31, %v5298_v42 }
0x163c   :  { %v5311_v27 = vmul.f32 %v6670_v5, %v5307_v32  ;;  %v5308_v56 = vadd.f32 -0.28449672, %v5304_v55 }
0x163d   :  { %v5309_v51 = vmul.f32 %v6672_v33, %v5305_v19  ;;  %v5306_v40 = vadd.f32 -0.28449672, %v5302_v34 }
0x163e   :  { %v5315_v17 = vadd.f32 0.2548296, %v5311_v27  ;;  %v5312_v18 = vmul.f32 %v6674_v29, %v5308_v56 }
0x163f   :  { %v5313_v36 = vadd.f32 0.2548296, %v5309_v51  ;;  %v5310_v13 = vmul.f32 %v6676_v31, %v5306_v40 }
0x1640   :  { %v5319_v62 = vmul.f32 %v6670_v5, %v5315_v17  ;;  %v5316_v45 = vadd.f32 0.2548296, %v5312_v18 }
0x1641   :  { %v5317_v57 = vmul.f32 %v6672_v33, %v5313_v36  ;;  %v5314_v59 = vadd.f32 0.2548296, %v5310_v13 }
0x1642   :  { %v5339_v25 = vmul.f32 %v6678_v52, %v5319_v62  ;;  %v5320_v15 = vmul.f32 %v6674_v29, %v5316_v45  ;;  %v5259_v29 = vmul.f32 0.5, %v8555_v12 }
0x1643   :  { %v5337_v43 = vmul.f32 %v6680_v16, %v5317_v57  ;;  %v5318_v50 = vmul.f32 %v6676_v31, %v5314_v59 }
0x1644   :  { %v5343_v44 = vsub.f32 1.0, %v5339_v25  ;;  %v5340_v39 = vmul.f32 %v6682_v58, %v5320_v15 }
0x1645   :  { %v5341_v4 = vsub.f32 1.0, %v5337_v43  ;;  %v5338_v33 = vmul.f32 %v6684_v7, %v5318_v50 }
0x1646   :  { %v5351_v35 = vsub.f32 0.0, %v5343_v44  ;;  %v5344_v30 = vsub.f32 1.0, %v5340_v39 }
0x1647   :  { %v5349_v5 = vsub.f32 0.0, %v5341_v4  ;;  %v5342_v21 = vsub.f32 1.0, %v5338_v33 }
0x1648   :  { %v5355_v38 = vsel %vm5347_vm11, %v5343_v44, %v5351_v35  ;;  %v5352_v22 = vsub.f32 0.0, %v5344_v30 }
0x1649   :  { %v5353_v23 = vsel %vm5345_vm12, %v5341_v4, %v5349_v5  ;;  %v5359_v10 = vadd.f32 1.0, %v5355_v38  ;;  %v5350_v26 = vsub.f32 0.0, %v5342_v21 }
0x164a   :  { %v5356_v1 = vsel %vm5348_vm13, %v5344_v30, %v5352_v22  ;;  %v5357_v31 = vadd.f32 1.0, %v5353_v23  ;;  %v5725_v22 = vld [vmem:[#allocation27] ss:$0 sm:$0xff] }
0x164b   :  { %v5360_v14 = vadd.f32 1.0, %v5356_v1  ;;  %v5354_v49 = vsel %vm5346_vm14, %v5342_v21, %v5350_v26  ;;  %v5363_v20 = vmul.f32 %v5359_v10, %v5259_v29  ;;  %v5726_v29 = vld [vmem:[#allocation29] ss:$0 sm:$0xff] }
0x164c   :  { %v5358_v28 = vadd.f32 1.0, %v5354_v49  ;;  %v5361_v2 = vmul.f32 %v5357_v31, %v5257_v37 }
0x164d   :  { %v5364_v24 = vmul.f32 %v5360_v14, %v5260_v54 }
0x164e   :  { %v5362_v0 = vmul.f32 %v5358_v28, %v5258_v63 }
0x164f   :  { %v5366_v47 = vpack.c.bf16 %v5364_v24, %v5363_v20 }
0x1650   :  { %v5365_v12 = vpack.c.bf16 %v5362_v0, %v5361_v2 }
0x1652   :  { %6412 = vmatprep.mubr.bf16.mxu1 %v5365_v12 }
0x1653   :  { %6413 = vmatmul.mubr.bf16.vlgmr.msra.gmra.mrb[148].mxu1 %v5366_v47 }
0x1726   :  { %v6414_v61 = vpop.f32.mrb[148].mxu1 }
0x1727   :  { %v5466_v32 = vpop.f32.mrb[149].mxu1  ;;  %v5483_v41 = vadd.f32 %v6414_v61, %v8529_v60 }
0x1728   :  { %v5481_v48 = vadd.f32 %v5466_v32, %v8526_v8  ;;  %v6415_v46 = vpop.f32.mrb[150].mxu1 }
0x1729   :  { %v5469_v9 = vpop.f32.mrb[151].mxu1  ;;  %v5484_v53 = vadd.f32 %v6415_v46, %v8539_v11  ;;  %v5493_v55 = vsel %vm394_vm1, %v5483_v41, 0.0 }
0x172a   :  { %v5482_v3 = vadd.f32 %v5469_v9, %v8532_v6  ;;  %v5487_v19 = vsel %vm394_vm1, %v5481_v48, 0.0 }
0x172b   :  { %5488 = vadd.xlane.f32.xlu0 %v5487_v19  ;;  %v5496_v42 = vsel %vm394_vm1, %v5484_v53, 0.0 }
0x172c   :  { %v5490_v27 = vsel %vm394_vm1, %v5482_v3, 0.0 }
0x172d   :  { %5491 = vadd.xlane.f32.xlu1 %v5490_v27 }
0x172f   :  { %5494 = vadd.xlane.f32.xlu0 %v5493_v55 }
0x1731   :  { %5497 = vadd.xlane.f32.xlu1 %v5496_v42 }
0x17b8   :  { %v5489_v8 = vpop.xlane.xlu0 %5488 }
0x17b9   :  { %v5499_v51 = vmul.f32 0.03125, %v5489_v8 }
0x17ba   :  { %v5492_v17 = vpop.xlane.xlu1 %5491 }
0x17bb   :  { %v5503_v60 = vsub.f32 %v5481_v48, %v5499_v51  ;;  %v5500_v56 = vmul.f32 0.03125, %v5492_v17 }
0x17bc   :  { %v5495_v6 = vpop.xlane.xlu0 %5494 }
0x17bd   :  { %v5504_v34 = vsub.f32 %v5482_v3, %v5500_v56  ;;  %v5501_v36 = vmul.f32 0.03125, %v5495_v6  ;;  %v5507_v62 = vmul.f32 %v5503_v60, %v5503_v60 }
0x17be   :  { %v5498_v18 = vpop.xlane.xlu1 %5497 }
0x17bf   :  { %v5505_v11 = vsub.f32 %v5483_v41, %v5501_v36  ;;  %v5502_v40 = vmul.f32 0.03125, %v5498_v18  ;;  %v5511_v52 = vsel %vm394_vm1, %v5507_v62, 0.0  ;;  %v5508_v57 = vmul.f32 %v5504_v34, %v5504_v34 }
0x17c0   :  { %5512 = vadd.xlane.f32.xlu0 %v5511_v52 }
0x17c1   :  { %v5506_v16 = vsub.f32 %v5484_v53, %v5502_v40  ;;  %v5514_v25 = vsel %vm394_vm1, %v5508_v57, 0.0  ;;  %v5509_v45 = vmul.f32 %v5505_v11, %v5505_v11 }
0x17c2   :  { %5515 = vadd.xlane.f32.xlu1 %v5514_v25 }
0x17c3   :  { %v5517_v13 = vsel %vm394_vm1, %v5509_v45, 0.0  ;;  %v5510_v43 = vmul.f32 %v5506_v16, %v5506_v16 }
0x17c4   :  { %5518 = vadd.xlane.f32.xlu0 %v5517_v13 }
0x17c5   :  { %v5520_v44 = vsel %vm394_vm1, %v5510_v43, 0.0 }
0x17c6   :  { %5521 = vadd.xlane.f32.xlu1 %v5520_v44 }
0x184d   :  { %v5513_v15 = vpop.xlane.xlu0 %5512 }
0x184e   :  { %v5523_v59 = vmul.f32 0.03125, %v5513_v15 }
0x184f   :  { %v5516_v58 = vpop.xlane.xlu1 %5515 }
0x1850   :  { %v5527_v4 = vadd.f32 1e-05, %v5523_v59  ;;  %v5524_v35 = vmul.f32 0.03125, %v5516_v58 }
0x1851   :  { %v5519_v39 = vpop.xlane.xlu0 %5518 }
0x1852   :  { %6685 = vrsqrt.f32 %v5527_v4  ;;  %v5528_v50 = vadd.f32 1e-05, %v5524_v35  ;;  %v5525_v7 = vmul.f32 0.03125, %v5519_v39 }
0x1853   :  { %v5522_v5 = vpop.xlane.xlu1 %5521 }
0x1854   :  { %6687 = vrsqrt.f32 %v5528_v50  ;;  %v5529_v38 = vadd.f32 1e-05, %v5525_v7  ;;  %v5526_v30 = vmul.f32 0.03125, %v5522_v5 }
0x1856   :  { %6689 = vrsqrt.f32 %v5529_v38  ;;  %v5530_v33 = vadd.f32 1e-05, %v5526_v30 }
0x1858   :  { %6691 = vrsqrt.f32 %v5530_v33 }
0x185c   :  { %v6686_v23 = vpop.eup %6685 }
0x185d   :  { %v5535_v21 = vmul.f32 %v6686_v23, %v5503_v60 }
0x185e   :  { %v6688_v10 = vpop.eup %6687 }
0x185f   :  { %v5545_v1 = vmul.f32 %v5725_v22, %v5535_v21  ;;  %v5536_v26 = vmul.f32 %v6688_v10, %v5504_v34 }
0x1860   :  { %v6690_v31 = vpop.eup %6689 }
0x1861   :  { %v5546_v54 = vmul.f32 %v5725_v22, %v5536_v26  ;;  %v5537_v14 = vmul.f32 %v6690_v31, %v5505_v11  ;;  %v5555_v37 = vadd.f32 %v5726_v29, %v5545_v1 }
0x1862   :  { %v6692_v49 = vpop.eup %6691 }
0x1863   :  { %v5547_v20 = vmul.f32 %v5725_v22, %v5537_v14  ;;  %v5538_v24 = vmul.f32 %v6692_v49, %v5506_v16  ;;  %v5556_v63 = vadd.f32 %v5726_v29, %v5546_v54  ;;  %5559 = vst.msk [vmem:[#allocation30] sm:$0xff] %vm394_vm1, %v5555_v37 }
0x1865   :  { %v5548_v28 = vmul.f32 %v5725_v22, %v5538_v24  ;;  %v5557_v2 = vadd.f32 %v5726_v29, %v5547_v20  ;;  %5560 = vst.msk [vmem:[#allocation30 + $0x8] sm:$0xff] %vm394_vm1, %v5556_v63 }
0x1867   :  { %v5558_v47 = vadd.f32 %v5726_v29, %v5548_v28  ;;  %5561 = vst.msk [vmem:[#allocation30 + $0x10] sm:$0xff] %vm394_vm1, %v5557_v2 }
0x1869   :  { %5562 = vst.msk [vmem:[#allocation30 + $0x18] sm:$0xff] %vm394_vm1, %v5558_v47 }
0x186a   :  { %7082 = shalt.err (!%p7079_p0)
}
0x186b   :  { %s8647_s12 = sld [smem:[#allocation44_spill]] }
0x1871   :  { %s7083_s21 = scalar_lea.hbm %s8647_s12, 512 }
0x1872   :  { %p7084_p1 = scmp.ne.s32.totalorder %s8647_s12, %s7083_s21  ;;  %p7087_p2 = scmp.lt.u32.totalorder %s7083_s21, %s8647_s12 }
0x1874   :  { %p7089_p3 = pnand %p7087_p2, %p7084_p1 }
0x1876   :  { %7092 = shalt.err (!%p7089_p3)
}
0x1877   :  { %5574 = dma.vmem_to_hbm [thread:$0]  %s5569_s4, 512, %s8647_s12, [#allocation5], %s7127_s0, %s7127_s0, %s7128_s11  }
0x1878   :  { %7111 = dma.done.wait [#allocation5], 512  }
0x1879   :  { %7112 = vsyncadd [#allocation5], 4294966784 }
0x187a   :  { %5578 = vsyncpa [#allocation4], 1 }
0x187b   :  { %5579 = vsyncpa [#allocation7], 1 }
0x187c   :  { %5580 = vsyncpa [#allocation10], 1 }
0x187d   :  { %5581 = vsyncpa [#allocation13], 1 }
0x187e   :  { %5582 = vsyncpa [#allocation16], 1 }
0x187f   :  { %5583 = vsyncpa [#allocation19], 1 }
0x1880   :  { %5584 = vsyncpa [#allocation22], 1 }
0x1881   :  { %5585 = vsyncpa [#allocation25], 1 }
0x1882   :  { %5586 = vsyncpa [#allocation28], 1 }
0x1883   :  { %5587 = vsyncpa [#allocation5], 1 }

</bundles_post_ra>
